<compile_context>
chip_gen: v6e
topology: v6e:2x2x1
jax: 0.10.0
libtpu: 0.0.40
codegen_flags: <defaults>
</compile_context>

<pallas_src>
import functools

import jax
import jax.numpy as jnp
from jax.experimental import pallas as pl
from jax.experimental.pallas import tpu as pltpu


def _round_up(x, m):
    return ((x + m - 1) // m) * m


# ----------------------------------------------------------------------------
# Fused DataGen kernel.  Gate order follows PyTorch nn.GRU: (r, z, n); weights
# are pre-transposed to (in_features, 3*Gp) with each gate padded to Gp lanes.
# ----------------------------------------------------------------------------
def _datagen_kernel(
    z_ref,                                   # (T*Bp, Zp) f32  noise, lane-padded
    g_wih, g_whh, g_bproj, g_bhn,            # generator GRU        (Zp -> Gp)
    s_wih, s_whh, s_bproj, s_bhn,            # fused supervisor f/b (Gp -> 2x Gp)
    r_wih, r_whh, r_bproj, r_bhn,            # recovery GRU         (Gp -> Gp)
    lw_ref, lb_ref,                          # recovery Linear      (Gp -> x_dim)
    x_ref,                                   # output (T*Bp, x_dim)
    gi_scr, seq_a, seq_b, seq_c,             # VMEM scratch
    *, T, Bp, Gp, unroll):
    G3 = 3 * Gp

    def input_proj(x2d, wih_ref, bias_ref, width):
        # Hoisted, time-independent input projection: one big MXU matmul per
        # stage.  bias_ref already contains b_ih + b_hh(r,z) (folded host-side)
        # so the serial loop only adds b_hn.
        gi_scr[:, :width] = (
            jnp.dot(x2d.astype(jnp.bfloat16), wih_ref[...],
                    preferred_element_type=jnp.float32)
            + bias_ref[...])

    def gru_scan(whh_ref, bhn_ref, out_ref):
        whh = whh_ref[...]          # (Gp, 3Gp) bf16, loaded once
        bhn = bhn_ref[...]          # (Bp, Gp) f32, pre-broadcast host-side

        def body(i, h):
            row = pl.multiple_of(i * Bp, Bp)
            gi = gi_scr[pl.ds(row, Bp), :G3]                      # (Bp, 3Gp)
            gh = jnp.dot(h.astype(jnp.bfloat16), whh,
                         preferred_element_type=jnp.float32)      # (Bp, 3Gp)
            r = jax.nn.sigmoid(gi[:, :Gp] + gh[:, :Gp])           # 128-aligned
            z = jax.nn.sigmoid(gi[:, Gp:2 * Gp] + gh[:, Gp:2 * Gp])
            n = jnp.tanh(gi[:, 2 * Gp:] + r * (gh[:, 2 * Gp:] + bhn))
            h_new = (1.0 - z) * n + z * h
            out_ref[pl.ds(row, Bp), :] = h_new
            return h_new

        jax.lax.fori_loop(0, T, body, jnp.zeros((Bp, Gp), jnp.float32),
                          unroll=unroll)

    def sup_scan():
        # Merged supervisor fwd/bwd scan: ONE (2Bp,Gp)@(Gp,6Gp) MXU push per
        # step (fwd gates in the top rows / left half, bwd gates in the bottom
        # rows / right half; cross blocks are discarded).
        whh = s_whh[...]            # (Gp, 6Gp) bf16 = [sf_whh | sb_whh]
        bhn = s_bhn[...]            # (2Bp, Gp) f32  = [b_hn_fwd ; b_hn_bwd]

        def body(i, h):             # h: (2Bp, Gp); rows [:Bp]=fwd, [Bp:]=bwd
            rf = pl.multiple_of(i * Bp, Bp)                # fwd time t = i
            rb = pl.multiple_of((T - 1 - i) * Bp, Bp)      # bwd time t = T-1-i
            gi = jnp.concatenate(
                [gi_scr[pl.ds(rf, Bp), :G3],
                 gi_scr[pl.ds(rb, Bp), G3:]], axis=0)             # (2Bp, 3Gp)
            gh_all = jnp.dot(h.astype(jnp.bfloat16), whh,
                             preferred_element_type=jnp.float32)  # (2Bp, 6Gp)
            gh = jnp.concatenate(
                [gh_all[:Bp, :G3], gh_all[Bp:, G3:]], axis=0)     # (2Bp, 3Gp)
            r = jax.nn.sigmoid(gi[:, :Gp] + gh[:, :Gp])
            z = jax.nn.sigmoid(gi[:, Gp:2 * Gp] + gh[:, Gp:2 * Gp])
            n = jnp.tanh(gi[:, 2 * Gp:] + r * (gh[:, 2 * Gp:] + bhn))
            h_new = (1.0 - z) * n + z * h
            seq_b[pl.ds(rf, Bp), :] = h_new[:Bp]                  # h_fwd[t]
            seq_c[pl.ds(rb, Bp), :] = h_new[Bp:]                  # h_bwd[t]
            return h_new

        jax.lax.fori_loop(0, T, body, jnp.zeros((2 * Bp, Gp), jnp.float32),
                          unroll=unroll)

    # 1) generator GRU: z -> e_hat  (seq_a)
    input_proj(z_ref[...], g_wih, g_bproj, G3)
    gru_scan(g_whh, g_bhn, seq_a)

    # 2+3) supervisor fwd+bwd: fused input projection, merged scan.
    input_proj(seq_a[...], s_wih, s_bproj, 2 * G3)
    sup_scan()

    # H_hat = mean(stack([fwd, bwd]), 0): one whole-slab VPU op after the loop.
    seq_b[...] = 0.5 * (seq_b[...] + seq_c[...])

    # 4) recovery GRU: h_hat -> rec_h  (seq_a reused)
    input_proj(seq_b[...], r_wih, r_bproj, G3)
    gru_scan(r_whh, r_bhn, seq_a)

    # 5) fused output projection + sigmoid; single write-back of the output.
    y = jnp.dot(seq_a[...].astype(jnp.bfloat16), lw_ref[...],
                preferred_element_type=jnp.float32) + lb_ref[...]
    x_ref[...] = jax.nn.sigmoid(y).astype(x_ref.dtype)


# ----------------------------------------------------------------------------
# Parameter construction (PyTorch-style uniform(-k, k) init, raw fp32 layout).
# ----------------------------------------------------------------------------
def _gru_params(key, in_dim, hidden):
    k = 1.0 / jnp.sqrt(jnp.float32(hidden))
    k1, k2, k3, k4 = jax.random.split(key, 4)
    u = lambda kk, shape: jax.random.uniform(kk, shape, jnp.float32, -k, k)
    return dict(
        w_ih=u(k1, (in_dim, 3 * hidden)),
        w_hh=u(k2, (hidden, 3 * hidden)),
        b_ih=u(k3, (1, 3 * hidden)),
        b_hh=u(k4, (1, 3 * hidden)),
    )


def make_datagen_params(key, z_dim, hidden, x_dim):
    kg, ksf, ksb, kr, kl1, kl2 = jax.random.split(key, 6)
    k = 1.0 / jnp.sqrt(jnp.float32(hidden))
    return dict(
        generator=_gru_params(kg, z_dim, hidden),
        supervisor_fwd=_gru_params(ksf, hidden, hidden),
        supervisor_bwd=_gru_params(ksb, hidden, hidden),
        recovery_gru=_gru_params(kr, hidden, hidden),
        recovery_w=jax.random.uniform(kl1, (hidden, x_dim), jnp.float32, -k, k),
        recovery_b=jax.random.uniform(kl2, (1, x_dim), jnp.float32, -k, k),
    )


# ----------------------------------------------------------------------------
# Kernel-layout prep: gate-major 128-lane padding + bias folding.
# ----------------------------------------------------------------------------
def _pad_gates(a, H, Gp):
    """(In, k*H) -> (In, k*Gp): zero-pad each H-wide gate block to Gp lanes so
    every r/z/n slice inside the kernel is a 128-lane-aligned whole vreg."""
    rows, cols = a.shape
    k = cols // H
    a = a.reshape(rows, k, H)
    a = jnp.pad(a, ((0, 0), (0, 0), (0, Gp - H)))
    return a.reshape(rows, k * Gp)


def _prep_gru(p, in_pad, H, Gp):
    w_ih = jnp.pad(_pad_gates(p["w_ih"], H, Gp),
                   ((0, in_pad - p["w_ih"].shape[0]), (0, 0))).astype(jnp.bfloat16)
    w_hh = jnp.pad(_pad_gates(p["w_hh"], H, Gp),
                   ((0, Gp - H), (0, 0))).astype(jnp.bfloat16)
    b_ih = _pad_gates(p["b_ih"], H, Gp)                     # (1, 3Gp) f32
    b_hh = _pad_gates(p["b_hh"], H, Gp)                     # (1, 3Gp) f32
    # Fold b_hh of the r/z gates into the hoisted projection bias; b_hn stays
    # separate (must remain inside r * (W_hn h + b_hn) per PyTorch GRU).
    b_proj = b_ih.at[:, :2 * Gp].add(b_hh[:, :2 * Gp])
    b_hn = b_hh[:, 2 * Gp:]                                 # (1, Gp) f32
    return w_ih, w_hh, b_proj, b_hn


# ----------------------------------------------------------------------------
# DataGen.forward
# ----------------------------------------------------------------------------
@jax.jit
def datagen_forward(Z, params):
    """Z: (B, T, z_dim) float32 -> X_hat: (B, T, x_dim) float32."""
    B, T, z_dim = Z.shape
    H = params["generator"]["w_hh"].shape[0]
    x_dim = params["recovery_w"].shape[1]
    Bp = _round_up(B, 8)          # sublane-aligned batch
    Gp = _round_up(H, 128)        # 128-lane-aligned gate / hidden width
    Zp = _round_up(z_dim, 128)    # lane-dense noise input

    # Time-major, batch- and lane-padded noise, flat (T*Bp, Zp): every per-step
    # slice in the kernel is an aligned (Bp, .) tile.
    z_tm = jnp.transpose(Z, (1, 0, 2)).astype(jnp.float32)       # (T, B, z)
    z_tm = jnp.pad(z_tm, ((0, 0), (0, Bp - B), (0, Zp - z_dim)))
    z2d = z_tm.reshape(T * Bp, Zp)

    g_wih, g_whh, g_bproj, g_bhn1 = _prep_gru(params["generator"], Zp, H, Gp)
    sf = _prep_gru(params["supervisor_fwd"], Gp, H, Gp)
    sb = _prep_gru(params["supervisor_bwd"], Gp, H, Gp)
    r_wih, r_whh, r_bproj, r_bhn1 = _prep_gru(params["recovery_gru"], Gp, H, Gp)

    # Fuse supervisor fwd/bwd: one input projection (Gp -> 6Gp) and one per-step
    # hidden matmul against [sf_whh | sb_whh].
    s_wih = jnp.concatenate([sf[0], sb[0]], axis=1)              # (Gp, 6Gp)
    s_whh = jnp.concatenate([sf[1], sb[1]], axis=1)              # (Gp, 6Gp)
    s_bproj = jnp.concatenate([sf[2], sb[2]], axis=1)            # (1, 6Gp)
    s_bhn = jnp.concatenate([jnp.broadcast_to(sf[3], (Bp, Gp)),
                             jnp.broadcast_to(sb[3], (Bp, Gp))], axis=0)
    g_bhn = jnp.broadcast_to(g_bhn1, (Bp, Gp))
    r_bhn = jnp.broadcast_to(r_bhn1, (Bp, Gp))

    lw = jnp.pad(params["recovery_w"], ((0, Gp - H), (0, 0))).astype(jnp.bfloat16)
    lb = params["recovery_b"].astype(jnp.float32)                # (1, x_dim)

    # Explicit VMEM budget (scratch + I/O + weights, x2 headroom), kept inside
    # the smallest physical VMEM (v7x: 64 MiB).
    est = (4 * T * Bp * (9 * Gp + Zp + x_dim)                    # scratch + z + out
           + 2 * (Zp * 3 * Gp + 21 * Gp * Gp + Gp * x_dim)       # bf16 weights
           + 4 * (12 * Gp + 4 * Bp * Gp + x_dim))                # f32 biases
    vmem_limit = int(min(60 * 2 ** 20, max(4 * 2 ** 20, 2 * est)))

    kernel = functools.partial(
        _datagen_kernel, T=T, Bp=Bp, Gp=Gp,
        unroll=(T if T <= 8 else 8))   # cap unroll at realistic T (vreg pressure)

    x2d = pl.pallas_call(
        kernel,
        out_shape=jax.ShapeDtypeStruct((T * Bp, x_dim), jnp.float32),
        scratch_shapes=[
            pltpu.VMEM((T * Bp, 6 * Gp), jnp.float32),  # hoisted input projections
            pltpu.VMEM((T * Bp, Gp), jnp.float32),      # seq A: e_hat / rec_h
            pltpu.VMEM((T * Bp, Gp), jnp.float32),      # seq B: h_fwd / h_hat
            pltpu.VMEM((T * Bp, Gp), jnp.float32),      # seq C: h_bwd
        ],
        compiler_params=pltpu.CompilerParams(vmem_limit_bytes=vmem_limit),
    )(z2d,
      g_wih, g_whh, g_bproj, g_bhn,
      s_wih, s_whh, s_bproj, s_bhn,
      r_wih, r_whh, r_bproj, r_bhn,
      lw, lb)

    x = x2d.reshape(T, Bp, x_dim)[:, :B, :]                      # drop batch pad
    return jnp.transpose(x, (1, 0, 2))                           # (B, T, x_dim)


if __name__ == "__main__":
    key = jax.random.PRNGKey(0)
    k_param, k_z = jax.random.split(key)

    # Small shapes consistent with the module (hidden scaled down from 200).
    B, T, z_dim, hidden, x_dim = 2, 8, 4, 32, 6

    params = make_datagen_params(k_param, z_dim, hidden, x_dim)
    Z = jax.random.normal(k_z, (B, T, z_dim), jnp.float32)

    X_hat = datagen_forward(Z, params)
    X_hat = jax.block_until_ready(X_hat)

    assert X_hat.shape == (B, T, x_dim), X_hat.shape
    assert bool(jnp.all(jnp.isfinite(X_hat)))
    assert bool(jnp.all((X_hat >= 0.0) & (X_hat <= 1.0)))   # sigmoid output
    print("KERNEL_OK")
</pallas_src>

<mosaic_0001>
module attributes {stable_mosaic.version = 11 : i64} {
  func.func @_datagen_kernel(%arg0: memref<64x128xf32, #tpu.memory_space<vmem>>, %arg1: memref<128x384xbf16, #tpu.memory_space<vmem>>, %arg2: memref<128x384xbf16, #tpu.memory_space<vmem>>, %arg3: memref<1x384xf32, #tpu.memory_space<vmem>>, %arg4: memref<8x128xf32, #tpu.memory_space<vmem>>, %arg5: memref<128x768xbf16, #tpu.memory_space<vmem>>, %arg6: memref<128x768xbf16, #tpu.memory_space<vmem>>, %arg7: memref<1x768xf32, #tpu.memory_space<vmem>>, %arg8: memref<16x128xf32, #tpu.memory_space<vmem>>, %arg9: memref<128x384xbf16, #tpu.memory_space<vmem>>, %arg10: memref<128x384xbf16, #tpu.memory_space<vmem>>, %arg11: memref<1x384xf32, #tpu.memory_space<vmem>>, %arg12: memref<8x128xf32, #tpu.memory_space<vmem>>, %arg13: memref<128x6xbf16, #tpu.memory_space<vmem>>, %arg14: memref<1x6xf32, #tpu.memory_space<vmem>>, %arg15: memref<64x6xf32, #tpu.memory_space<vmem>>, %arg16: memref<64x768xf32, #tpu.memory_space<vmem>>, %arg17: memref<64x128xf32, #tpu.memory_space<vmem>>, %arg18: memref<64x128xf32, #tpu.memory_space<vmem>>, %arg19: memref<64x128xf32, #tpu.memory_space<vmem>>) attributes {dimension_semantics = [], scalar_prefetch = 0 : i64, scratch_operands = 4 : i64, tpu.core_type = #tpu.core_type<tc>} {
    %c0 = arith.constant 0 : index
    %c0_0 = arith.constant 0 : index
    %0 = vector.load %arg0[%c0, %c0_0] : memref<64x128xf32, #tpu.memory_space<vmem>>, vector<64x128xf32>
    %1 = arith.truncf %0 : vector<64x128xf32> to vector<64x128xbf16>
    %c0_1 = arith.constant 0 : index
    %c0_2 = arith.constant 0 : index
    %2 = vector.load %arg1[%c0_1, %c0_2] : memref<128x384xbf16, #tpu.memory_space<vmem>>, vector<128x384xbf16>
    %cst = arith.constant dense<0.000000e+00> : vector<64x384xf32>
    %3 = tpu.matmul %1, %2, %cst {dimension_numbers = #tpu.dot_dimension_numbers<[1], [0], [0], [1], [0, 0, 1, 1], [], []>} : vector<64x128xbf16>, vector<128x384xbf16>, vector<64x384xf32> -> vector<64x384xf32>
    %c0_3 = arith.constant 0 : index
    %c0_4 = arith.constant 0 : index
    %4 = vector.load %arg3[%c0_3, %c0_4] : memref<1x384xf32, #tpu.memory_space<vmem>>, vector<1x384xf32>
    %5 = vector.broadcast %4 : vector<1x384xf32> to vector<64x384xf32>
    %6 = arith.addf %3, %5 : vector<64x384xf32>
    %c0_5 = arith.constant 0 : index
    %c0_6 = arith.constant 0 : index
    %7 = vector.load %arg16[%c0_5, %c0_6] : memref<64x768xf32, #tpu.memory_space<vmem>>, vector<64x384xf32>
    tpu.vector_store %arg16[%c0_5, %c0_6], %6 {strides = array<i32>} : memref<64x768xf32, #tpu.memory_space<vmem>>, vector<64x384xf32>,
    %c0_7 = arith.constant 0 : index
    %c0_8 = arith.constant 0 : index
    %8 = vector.load %arg2[%c0_7, %c0_8] : memref<128x384xbf16, #tpu.memory_space<vmem>>, vector<128x384xbf16>
    %c0_9 = arith.constant 0 : index
    %c0_10 = arith.constant 0 : index
    %9 = vector.load %arg4[%c0_9, %c0_10] : memref<8x128xf32, #tpu.memory_space<vmem>>, vector<8x128xf32>
    %cst_11 = arith.constant 0.000000e+00 : f32
    %10 = vector.broadcast %cst_11 : f32 to vector<8x128xf32>
    %c0_i32 = arith.constant 0 : i32
    %c8_i32 = arith.constant 8 : i32
    %11 = arith.muli %c0_i32, %c8_i32 : i32
    %12 = tpu.assume_multiple %11, 8 : i32
    %13 = arith.index_cast %12 : i32 to index
    %c0_12 = arith.constant 0 : index
    %14 = vector.load %arg16[%13, %c0_12] : memref<64x768xf32, #tpu.memory_space<vmem>>, vector<8x384xf32>
    %15 = arith.truncf %10 : vector<8x128xf32> to vector<8x128xbf16>
    %cst_13 = arith.constant dense<0.000000e+00> : vector<8x384xf32>
    %16 = tpu.matmul %15, %8, %cst_13 {dimension_numbers = #tpu.dot_dimension_numbers<[1], [0], [0], [1], [0, 0, 1, 1], [], []>} : vector<8x128xbf16>, vector<128x384xbf16>, vector<8x384xf32> -> vector<8x384xf32>
    %17 = vector.extract_strided_slice %14 {offsets = [0, 0], sizes = [8, 128], strides = [1, 1]} : vector<8x384xf32> to vector<8x128xf32>
    %18 = vector.extract_strided_slice %16 {offsets = [0, 0], sizes = [8, 128], strides = [1, 1]} : vector<8x384xf32> to vector<8x128xf32>
    %19 = arith.addf %17, %18 : vector<8x128xf32>
    %20 = arith.negf %19 : vector<8x128xf32>
    %21 = math.exp %20 : vector<8x128xf32>
    %cst_14 = arith.constant 1.000000e+00 : f32
    %22 = vector.broadcast %cst_14 : f32 to vector<8x128xf32>
    %23 = arith.addf %22, %21 : vector<8x128xf32>
    %24 = arith.divf %22, %23 : vector<8x128xf32>
    %25 = vector.extract_strided_slice %14 {offsets = [0, 128], sizes = [8, 128], strides = [1, 1]} : vector<8x384xf32> to vector<8x128xf32>
    %26 = vector.extract_strided_slice %16 {offsets = [0, 128], sizes = [8, 128], strides = [1, 1]} : vector<8x384xf32> to vector<8x128xf32>
    %27 = arith.addf %25, %26 : vector<8x128xf32>
    %28 = arith.negf %27 : vector<8x128xf32>
    %29 = math.exp %28 : vector<8x128xf32>
    %cst_15 = arith.constant 1.000000e+00 : f32
    %30 = vector.broadcast %cst_15 : f32 to vector<8x128xf32>
    %31 = arith.addf %30, %29 : vector<8x128xf32>
    %32 = arith.divf %30, %31 : vector<8x128xf32>
    %33 = vector.extract_strided_slice %14 {offsets = [0, 256], sizes = [8, 128], strides = [1, 1]} : vector<8x384xf32> to vector<8x128xf32>
    %34 = vector.extract_strided_slice %16 {offsets = [0, 256], sizes = [8, 128], strides = [1, 1]} : vector<8x384xf32> to vector<8x128xf32>
    %35 = arith.addf %34, %9 : vector<8x128xf32>
    %36 = arith.mulf %24, %35 : vector<8x128xf32>
    %37 = arith.addf %33, %36 : vector<8x128xf32>
    %38 = math.tanh %37 : vector<8x128xf32>
    %cst_16 = arith.constant 1.000000e+00 : f32
    %39 = vector.broadcast %cst_16 : f32 to vector<8x128xf32>
    %40 = arith.subf %39, %32 : vector<8x128xf32>
    %41 = arith.mulf %40, %38 : vector<8x128xf32>
    %42 = arith.mulf %32, %10 : vector<8x128xf32>
    %43 = arith.addf %41, %42 : vector<8x128xf32>
    %44 = arith.index_cast %12 : i32 to index
    %c0_17 = arith.constant 0 : index
    %45 = vector.load %arg17[%44, %c0_17] : memref<64x128xf32, #tpu.memory_space<vmem>>, vector<8x128xf32>
    tpu.vector_store %arg17[%44, %c0_17], %43 {strides = array<i32>} : memref<64x128xf32, #tpu.memory_space<vmem>>, vector<8x128xf32>,
    %c1_i32 = arith.constant 1 : i32
    %c8_i32_18 = arith.constant 8 : i32
    %46 = arith.muli %c1_i32, %c8_i32_18 : i32
    %47 = tpu.assume_multiple %46, 8 : i32
    %48 = arith.index_cast %47 : i32 to index
    %c0_19 = arith.constant 0 : index
    %49 = vector.load %arg16[%48, %c0_19] : memref<64x768xf32, #tpu.memory_space<vmem>>, vector<8x384xf32>
    %50 = arith.truncf %43 : vector<8x128xf32> to vector<8x128xbf16>
    %cst_20 = arith.constant dense<0.000000e+00> : vector<8x384xf32>
    %51 = tpu.matmul %50, %8, %cst_20 {dimension_numbers = #tpu.dot_dimension_numbers<[1], [0], [0], [1], [0, 0, 1, 1], [], []>} : vector<8x128xbf16>, vector<128x384xbf16>, vector<8x384xf32> -> vector<8x384xf32>
    %52 = vector.extract_strided_slice %49 {offsets = [0, 0], sizes = [8, 128], strides = [1, 1]} : vector<8x384xf32> to vector<8x128xf32>
    %53 = vector.extract_strided_slice %51 {offsets = [0, 0], sizes = [8, 128], strides = [1, 1]} : vector<8x384xf32> to vector<8x128xf32>
    %54 = arith.addf %52, %53 : vector<8x128xf32>
    %55 = arith.negf %54 : vector<8x128xf32>
    %56 = math.exp %55 : vector<8x128xf32>
    %cst_21 = arith.constant 1.000000e+00 : f32
    %57 = vector.broadcast %cst_21 : f32 to vector<8x128xf32>
    %58 = arith.addf %57, %56 : vector<8x128xf32>
    %59 = arith.divf %57, %58 : vector<8x128xf32>
    %60 = vector.extract_strided_slice %49 {offsets = [0, 128], sizes = [8, 128], strides = [1, 1]} : vector<8x384xf32> to vector<8x128xf32>
    %61 = vector.extract_strided_slice %51 {offsets = [0, 128], sizes = [8, 128], strides = [1, 1]} : vector<8x384xf32> to vector<8x128xf32>
    %62 = arith.addf %60, %61 : vector<8x128xf32>
    %63 = arith.negf %62 : vector<8x128xf32>
    %64 = math.exp %63 : vector<8x128xf32>
    %cst_22 = arith.constant 1.000000e+00 : f32
    %65 = vector.broadcast %cst_22 : f32 to vector<8x128xf32>
    %66 = arith.addf %65, %64 : vector<8x128xf32>
    %67 = arith.divf %65, %66 : vector<8x128xf32>
    %68 = vector.extract_strided_slice %49 {offsets = [0, 256], sizes = [8, 128], strides = [1, 1]} : vector<8x384xf32> to vector<8x128xf32>
    %69 = vector.extract_strided_slice %51 {offsets = [0, 256], sizes = [8, 128], strides = [1, 1]} : vector<8x384xf32> to vector<8x128xf32>
    %70 = arith.addf %69, %9 : vector<8x128xf32>
    %71 = arith.mulf %59, %70 : vector<8x128xf32>
    %72 = arith.addf %68, %71 : vector<8x128xf32>
    %73 = math.tanh %72 : vector<8x128xf32>
    %cst_23 = arith.constant 1.000000e+00 : f32
    %74 = vector.broadcast %cst_23 : f32 to vector<8x128xf32>
    %75 = arith.subf %74, %67 : vector<8x128xf32>
    %76 = arith.mulf %75, %73 : vector<8x128xf32>
    %77 = arith.mulf %67, %43 : vector<8x128xf32>
    %78 = arith.addf %76, %77 : vector<8x128xf32>
    %79 = arith.index_cast %47 : i32 to index
    %c0_24 = arith.constant 0 : index
    %80 = vector.load %arg17[%79, %c0_24] : memref<64x128xf32, #tpu.memory_space<vmem>>, vector<8x128xf32>
    tpu.vector_store %arg17[%79, %c0_24], %78 {strides = array<i32>} : memref<64x128xf32, #tpu.memory_space<vmem>>, vector<8x128xf32>,
    %c2_i32 = arith.constant 2 : i32
    %c8_i32_25 = arith.constant 8 : i32
    %81 = arith.muli %c2_i32, %c8_i32_25 : i32
    %82 = tpu.assume_multiple %81, 8 : i32
    %83 = arith.index_cast %82 : i32 to index
    %c0_26 = arith.constant 0 : index
    %84 = vector.load %arg16[%83, %c0_26] : memref<64x768xf32, #tpu.memory_space<vmem>>, vector<8x384xf32>
    %85 = arith.truncf %78 : vector<8x128xf32> to vector<8x128xbf16>
    %cst_27 = arith.constant dense<0.000000e+00> : vector<8x384xf32>
    %86 = tpu.matmul %85, %8, %cst_27 {dimension_numbers = #tpu.dot_dimension_numbers<[1], [0], [0], [1], [0, 0, 1, 1], [], []>} : vector<8x128xbf16>, vector<128x384xbf16>, vector<8x384xf32> -> vector<8x384xf32>
    %87 = vector.extract_strided_slice %84 {offsets = [0, 0], sizes = [8, 128], strides = [1, 1]} : vector<8x384xf32> to vector<8x128xf32>
    %88 = vector.extract_strided_slice %86 {offsets = [0, 0], sizes = [8, 128], strides = [1, 1]} : vector<8x384xf32> to vector<8x128xf32>
    %89 = arith.addf %87, %88 : vector<8x128xf32>
    %90 = arith.negf %89 : vector<8x128xf32>
    %91 = math.exp %90 : vector<8x128xf32>
    %cst_28 = arith.constant 1.000000e+00 : f32
    %92 = vector.broadcast %cst_28 : f32 to vector<8x128xf32>
    %93 = arith.addf %92, %91 : vector<8x128xf32>
    %94 = arith.divf %92, %93 : vector<8x128xf32>
    %95 = vector.extract_strided_slice %84 {offsets = [0, 128], sizes = [8, 128], strides = [1, 1]} : vector<8x384xf32> to vector<8x128xf32>
    %96 = vector.extract_strided_slice %86 {offsets = [0, 128], sizes = [8, 128], strides = [1, 1]} : vector<8x384xf32> to vector<8x128xf32>
    %97 = arith.addf %95, %96 : vector<8x128xf32>
    %98 = arith.negf %97 : vector<8x128xf32>
    %99 = math.exp %98 : vector<8x128xf32>
    %cst_29 = arith.constant 1.000000e+00 : f32
    %100 = vector.broadcast %cst_29 : f32 to vector<8x128xf32>
    %101 = arith.addf %100, %99 : vector<8x128xf32>
    %102 = arith.divf %100, %101 : vector<8x128xf32>
    %103 = vector.extract_strided_slice %84 {offsets = [0, 256], sizes = [8, 128], strides = [1, 1]} : vector<8x384xf32> to vector<8x128xf32>
    %104 = vector.extract_strided_slice %86 {offsets = [0, 256], sizes = [8, 128], strides = [1, 1]} : vector<8x384xf32> to vector<8x128xf32>
    %105 = arith.addf %104, %9 : vector<8x128xf32>
    %106 = arith.mulf %94, %105 : vector<8x128xf32>
    %107 = arith.addf %103, %106 : vector<8x128xf32>
    %108 = math.tanh %107 : vector<8x128xf32>
    %cst_30 = arith.constant 1.000000e+00 : f32
    %109 = vector.broadcast %cst_30 : f32 to vector<8x128xf32>
    %110 = arith.subf %109, %102 : vector<8x128xf32>
    %111 = arith.mulf %110, %108 : vector<8x128xf32>
    %112 = arith.mulf %102, %78 : vector<8x128xf32>
    %113 = arith.addf %111, %112 : vector<8x128xf32>
    %114 = arith.index_cast %82 : i32 to index
    %c0_31 = arith.constant 0 : index
    %115 = vector.load %arg17[%114, %c0_31] : memref<64x128xf32, #tpu.memory_space<vmem>>, vector<8x128xf32>
    tpu.vector_store %arg17[%114, %c0_31], %113 {strides = array<i32>} : memref<64x128xf32, #tpu.memory_space<vmem>>, vector<8x128xf32>,
    %c3_i32 = arith.constant 3 : i32
    %c8_i32_32 = arith.constant 8 : i32
    %116 = arith.muli %c3_i32, %c8_i32_32 : i32
    %117 = tpu.assume_multiple %116, 8 : i32
    %118 = arith.index_cast %117 : i32 to index
    %c0_33 = arith.constant 0 : index
    %119 = vector.load %arg16[%118, %c0_33] : memref<64x768xf32, #tpu.memory_space<vmem>>, vector<8x384xf32>
    %120 = arith.truncf %113 : vector<8x128xf32> to vector<8x128xbf16>
    %cst_34 = arith.constant dense<0.000000e+00> : vector<8x384xf32>
    %121 = tpu.matmul %120, %8, %cst_34 {dimension_numbers = #tpu.dot_dimension_numbers<[1], [0], [0], [1], [0, 0, 1, 1], [], []>} : vector<8x128xbf16>, vector<128x384xbf16>, vector<8x384xf32> -> vector<8x384xf32>
    %122 = vector.extract_strided_slice %119 {offsets = [0, 0], sizes = [8, 128], strides = [1, 1]} : vector<8x384xf32> to vector<8x128xf32>
    %123 = vector.extract_strided_slice %121 {offsets = [0, 0], sizes = [8, 128], strides = [1, 1]} : vector<8x384xf32> to vector<8x128xf32>
    %124 = arith.addf %122, %123 : vector<8x128xf32>
    %125 = arith.negf %124 : vector<8x128xf32>
    %126 = math.exp %125 : vector<8x128xf32>
    %cst_35 = arith.constant 1.000000e+00 : f32
    %127 = vector.broadcast %cst_35 : f32 to vector<8x128xf32>
    %128 = arith.addf %127, %126 : vector<8x128xf32>
    %129 = arith.divf %127, %128 : vector<8x128xf32>
    %130 = vector.extract_strided_slice %119 {offsets = [0, 128], sizes = [8, 128], strides = [1, 1]} : vector<8x384xf32> to vector<8x128xf32>
    %131 = vector.extract_strided_slice %121 {offsets = [0, 128], sizes = [8, 128], strides = [1, 1]} : vector<8x384xf32> to vector<8x128xf32>
    %132 = arith.addf %130, %131 : vector<8x128xf32>
    %133 = arith.negf %132 : vector<8x128xf32>
    %134 = math.exp %133 : vector<8x128xf32>
    %cst_36 = arith.constant 1.000000e+00 : f32
    %135 = vector.broadcast %cst_36 : f32 to vector<8x128xf32>
    %136 = arith.addf %135, %134 : vector<8x128xf32>
    %137 = arith.divf %135, %136 : vector<8x128xf32>
    %138 = vector.extract_strided_slice %119 {offsets = [0, 256], sizes = [8, 128], strides = [1, 1]} : vector<8x384xf32> to vector<8x128xf32>
    %139 = vector.extract_strided_slice %121 {offsets = [0, 256], sizes = [8, 128], strides = [1, 1]} : vector<8x384xf32> to vector<8x128xf32>
    %140 = arith.addf %139, %9 : vector<8x128xf32>
    %141 = arith.mulf %129, %140 : vector<8x128xf32>
    %142 = arith.addf %138, %141 : vector<8x128xf32>
    %143 = math.tanh %142 : vector<8x128xf32>
    %cst_37 = arith.constant 1.000000e+00 : f32
    %144 = vector.broadcast %cst_37 : f32 to vector<8x128xf32>
    %145 = arith.subf %144, %137 : vector<8x128xf32>
    %146 = arith.mulf %145, %143 : vector<8x128xf32>
    %147 = arith.mulf %137, %113 : vector<8x128xf32>
    %148 = arith.addf %146, %147 : vector<8x128xf32>
    %149 = arith.index_cast %117 : i32 to index
    %c0_38 = arith.constant 0 : index
    %150 = vector.load %arg17[%149, %c0_38] : memref<64x128xf32, #tpu.memory_space<vmem>>, vector<8x128xf32>
    tpu.vector_store %arg17[%149, %c0_38], %148 {strides = array<i32>} : memref<64x128xf32, #tpu.memory_space<vmem>>, vector<8x128xf32>,
    %c4_i32 = arith.constant 4 : i32
    %c8_i32_39 = arith.constant 8 : i32
    %151 = arith.muli %c4_i32, %c8_i32_39 : i32
    %152 = tpu.assume_multiple %151, 8 : i32
    %153 = arith.index_cast %152 : i32 to index
    %c0_40 = arith.constant 0 : index
    %154 = vector.load %arg16[%153, %c0_40] : memref<64x768xf32, #tpu.memory_space<vmem>>, vector<8x384xf32>
    %155 = arith.truncf %148 : vector<8x128xf32> to vector<8x128xbf16>
    %cst_41 = arith.constant dense<0.000000e+00> : vector<8x384xf32>
    %156 = tpu.matmul %155, %8, %cst_41 {dimension_numbers = #tpu.dot_dimension_numbers<[1], [0], [0], [1], [0, 0, 1, 1], [], []>} : vector<8x128xbf16>, vector<128x384xbf16>, vector<8x384xf32> -> vector<8x384xf32>
    %157 = vector.extract_strided_slice %154 {offsets = [0, 0], sizes = [8, 128], strides = [1, 1]} : vector<8x384xf32> to vector<8x128xf32>
    %158 = vector.extract_strided_slice %156 {offsets = [0, 0], sizes = [8, 128], strides = [1, 1]} : vector<8x384xf32> to vector<8x128xf32>
    %159 = arith.addf %157, %158 : vector<8x128xf32>
    %160 = arith.negf %159 : vector<8x128xf32>
    %161 = math.exp %160 : vector<8x128xf32>
    %cst_42 = arith.constant 1.000000e+00 : f32
    %162 = vector.broadcast %cst_42 : f32 to vector<8x128xf32>
    %163 = arith.addf %162, %161 : vector<8x128xf32>
    %164 = arith.divf %162, %163 : vector<8x128xf32>
    %165 = vector.extract_strided_slice %154 {offsets = [0, 128], sizes = [8, 128], strides = [1, 1]} : vector<8x384xf32> to vector<8x128xf32>
    %166 = vector.extract_strided_slice %156 {offsets = [0, 128], sizes = [8, 128], strides = [1, 1]} : vector<8x384xf32> to vector<8x128xf32>
    %167 = arith.addf %165, %166 : vector<8x128xf32>
    %168 = arith.negf %167 : vector<8x128xf32>
    %169 = math.exp %168 : vector<8x128xf32>
    %cst_43 = arith.constant 1.000000e+00 : f32
    %170 = vector.broadcast %cst_43 : f32 to vector<8x128xf32>
    %171 = arith.addf %170, %169 : vector<8x128xf32>
    %172 = arith.divf %170, %171 : vector<8x128xf32>
    %173 = vector.extract_strided_slice %154 {offsets = [0, 256], sizes = [8, 128], strides = [1, 1]} : vector<8x384xf32> to vector<8x128xf32>
    %174 = vector.extract_strided_slice %156 {offsets = [0, 256], sizes = [8, 128], strides = [1, 1]} : vector<8x384xf32> to vector<8x128xf32>
    %175 = arith.addf %174, %9 : vector<8x128xf32>
    %176 = arith.mulf %164, %175 : vector<8x128xf32>
    %177 = arith.addf %173, %176 : vector<8x128xf32>
    %178 = math.tanh %177 : vector<8x128xf32>
    %cst_44 = arith.constant 1.000000e+00 : f32
    %179 = vector.broadcast %cst_44 : f32 to vector<8x128xf32>
    %180 = arith.subf %179, %172 : vector<8x128xf32>
    %181 = arith.mulf %180, %178 : vector<8x128xf32>
    %182 = arith.mulf %172, %148 : vector<8x128xf32>
    %183 = arith.addf %181, %182 : vector<8x128xf32>
    %184 = arith.index_cast %152 : i32 to index
    %c0_45 = arith.constant 0 : index
    %185 = vector.load %arg17[%184, %c0_45] : memref<64x128xf32, #tpu.memory_space<vmem>>, vector<8x128xf32>
    tpu.vector_store %arg17[%184, %c0_45], %183 {strides = array<i32>} : memref<64x128xf32, #tpu.memory_space<vmem>>, vector<8x128xf32>,
    %c5_i32 = arith.constant 5 : i32
    %c8_i32_46 = arith.constant 8 : i32
    %186 = arith.muli %c5_i32, %c8_i32_46 : i32
    %187 = tpu.assume_multiple %186, 8 : i32
    %188 = arith.index_cast %187 : i32 to index
    %c0_47 = arith.constant 0 : index
    %189 = vector.load %arg16[%188, %c0_47] : memref<64x768xf32, #tpu.memory_space<vmem>>, vector<8x384xf32>
    %190 = arith.truncf %183 : vector<8x128xf32> to vector<8x128xbf16>
    %cst_48 = arith.constant dense<0.000000e+00> : vector<8x384xf32>
    %191 = tpu.matmul %190, %8, %cst_48 {dimension_numbers = #tpu.dot_dimension_numbers<[1], [0], [0], [1], [0, 0, 1, 1], [], []>} : vector<8x128xbf16>, vector<128x384xbf16>, vector<8x384xf32> -> vector<8x384xf32>
    %192 = vector.extract_strided_slice %189 {offsets = [0, 0], sizes = [8, 128], strides = [1, 1]} : vector<8x384xf32> to vector<8x128xf32>
    %193 = vector.extract_strided_slice %191 {offsets = [0, 0], sizes = [8, 128], strides = [1, 1]} : vector<8x384xf32> to vector<8x128xf32>
    %194 = arith.addf %192, %193 : vector<8x128xf32>
    %195 = arith.negf %194 : vector<8x128xf32>
    %196 = math.exp %195 : vector<8x128xf32>
    %cst_49 = arith.constant 1.000000e+00 : f32
    %197 = vector.broadcast %cst_49 : f32 to vector<8x128xf32>
    %198 = arith.addf %197, %196 : vector<8x128xf32>
    %199 = arith.divf %197, %198 : vector<8x128xf32>
    %200 = vector.extract_strided_slice %189 {offsets = [0, 128], sizes = [8, 128], strides = [1, 1]} : vector<8x384xf32> to vector<8x128xf32>
    %201 = vector.extract_strided_slice %191 {offsets = [0, 128], sizes = [8, 128], strides = [1, 1]} : vector<8x384xf32> to vector<8x128xf32>
    %202 = arith.addf %200, %201 : vector<8x128xf32>
    %203 = arith.negf %202 : vector<8x128xf32>
    %204 = math.exp %203 : vector<8x128xf32>
    %cst_50 = arith.constant 1.000000e+00 : f32
    %205 = vector.broadcast %cst_50 : f32 to vector<8x128xf32>
    %206 = arith.addf %205, %204 : vector<8x128xf32>
    %207 = arith.divf %205, %206 : vector<8x128xf32>
    %208 = vector.extract_strided_slice %189 {offsets = [0, 256], sizes = [8, 128], strides = [1, 1]} : vector<8x384xf32> to vector<8x128xf32>
    %209 = vector.extract_strided_slice %191 {offsets = [0, 256], sizes = [8, 128], strides = [1, 1]} : vector<8x384xf32> to vector<8x128xf32>
    %210 = arith.addf %209, %9 : vector<8x128xf32>
    %211 = arith.mulf %199, %210 : vector<8x128xf32>
    %212 = arith.addf %208, %211 : vector<8x128xf32>
    %213 = math.tanh %212 : vector<8x128xf32>
    %cst_51 = arith.constant 1.000000e+00 : f32
    %214 = vector.broadcast %cst_51 : f32 to vector<8x128xf32>
    %215 = arith.subf %214, %207 : vector<8x128xf32>
    %216 = arith.mulf %215, %213 : vector<8x128xf32>
    %217 = arith.mulf %207, %183 : vector<8x128xf32>
    %218 = arith.addf %216, %217 : vector<8x128xf32>
    %219 = arith.index_cast %187 : i32 to index
    %c0_52 = arith.constant 0 : index
    %220 = vector.load %arg17[%219, %c0_52] : memref<64x128xf32, #tpu.memory_space<vmem>>, vector<8x128xf32>
    tpu.vector_store %arg17[%219, %c0_52], %218 {strides = array<i32>} : memref<64x128xf32, #tpu.memory_space<vmem>>, vector<8x128xf32>,
    %c6_i32 = arith.constant 6 : i32
    %c8_i32_53 = arith.constant 8 : i32
    %221 = arith.muli %c6_i32, %c8_i32_53 : i32
    %222 = tpu.assume_multiple %221, 8 : i32
    %223 = arith.index_cast %222 : i32 to index
    %c0_54 = arith.constant 0 : index
    %224 = vector.load %arg16[%223, %c0_54] : memref<64x768xf32, #tpu.memory_space<vmem>>, vector<8x384xf32>
    %225 = arith.truncf %218 : vector<8x128xf32> to vector<8x128xbf16>
    %cst_55 = arith.constant dense<0.000000e+00> : vector<8x384xf32>
    %226 = tpu.matmul %225, %8, %cst_55 {dimension_numbers = #tpu.dot_dimension_numbers<[1], [0], [0], [1], [0, 0, 1, 1], [], []>} : vector<8x128xbf16>, vector<128x384xbf16>, vector<8x384xf32> -> vector<8x384xf32>
    %227 = vector.extract_strided_slice %224 {offsets = [0, 0], sizes = [8, 128], strides = [1, 1]} : vector<8x384xf32> to vector<8x128xf32>
    %228 = vector.extract_strided_slice %226 {offsets = [0, 0], sizes = [8, 128], strides = [1, 1]} : vector<8x384xf32> to vector<8x128xf32>
    %229 = arith.addf %227, %228 : vector<8x128xf32>
    %230 = arith.negf %229 : vector<8x128xf32>
    %231 = math.exp %230 : vector<8x128xf32>
    %cst_56 = arith.constant 1.000000e+00 : f32
    %232 = vector.broadcast %cst_56 : f32 to vector<8x128xf32>
    %233 = arith.addf %232, %231 : vector<8x128xf32>
    %234 = arith.divf %232, %233 : vector<8x128xf32>
    %235 = vector.extract_strided_slice %224 {offsets = [0, 128], sizes = [8, 128], strides = [1, 1]} : vector<8x384xf32> to vector<8x128xf32>
    %236 = vector.extract_strided_slice %226 {offsets = [0, 128], sizes = [8, 128], strides = [1, 1]} : vector<8x384xf32> to vector<8x128xf32>
    %237 = arith.addf %235, %236 : vector<8x128xf32>
    %238 = arith.negf %237 : vector<8x128xf32>
    %239 = math.exp %238 : vector<8x128xf32>
    %cst_57 = arith.constant 1.000000e+00 : f32
    %240 = vector.broadcast %cst_57 : f32 to vector<8x128xf32>
    %241 = arith.addf %240, %239 : vector<8x128xf32>
    %242 = arith.divf %240, %241 : vector<8x128xf32>
    %243 = vector.extract_strided_slice %224 {offsets = [0, 256], sizes = [8, 128], strides = [1, 1]} : vector<8x384xf32> to vector<8x128xf32>
    %244 = vector.extract_strided_slice %226 {offsets = [0, 256], sizes = [8, 128], strides = [1, 1]} : vector<8x384xf32> to vector<8x128xf32>
    %245 = arith.addf %244, %9 : vector<8x128xf32>
    %246 = arith.mulf %234, %245 : vector<8x128xf32>
    %247 = arith.addf %243, %246 : vector<8x128xf32>
    %248 = math.tanh %247 : vector<8x128xf32>
    %cst_58 = arith.constant 1.000000e+00 : f32
    %249 = vector.broadcast %cst_58 : f32 to vector<8x128xf32>
    %250 = arith.subf %249, %242 : vector<8x128xf32>
    %251 = arith.mulf %250, %248 : vector<8x128xf32>
    %252 = arith.mulf %242, %218 : vector<8x128xf32>
    %253 = arith.addf %251, %252 : vector<8x128xf32>
    %254 = arith.index_cast %222 : i32 to index
    %c0_59 = arith.constant 0 : index
    %255 = vector.load %arg17[%254, %c0_59] : memref<64x128xf32, #tpu.memory_space<vmem>>, vector<8x128xf32>
    tpu.vector_store %arg17[%254, %c0_59], %253 {strides = array<i32>} : memref<64x128xf32, #tpu.memory_space<vmem>>, vector<8x128xf32>,
    %c7_i32 = arith.constant 7 : i32
    %c8_i32_60 = arith.constant 8 : i32
    %256 = arith.muli %c7_i32, %c8_i32_60 : i32
    %257 = tpu.assume_multiple %256, 8 : i32
    %258 = arith.index_cast %257 : i32 to index
    %c0_61 = arith.constant 0 : index
    %259 = vector.load %arg16[%258, %c0_61] : memref<64x768xf32, #tpu.memory_space<vmem>>, vector<8x384xf32>
    %260 = arith.truncf %253 : vector<8x128xf32> to vector<8x128xbf16>
    %cst_62 = arith.constant dense<0.000000e+00> : vector<8x384xf32>
    %261 = tpu.matmul %260, %8, %cst_62 {dimension_numbers = #tpu.dot_dimension_numbers<[1], [0], [0], [1], [0, 0, 1, 1], [], []>} : vector<8x128xbf16>, vector<128x384xbf16>, vector<8x384xf32> -> vector<8x384xf32>
    %262 = vector.extract_strided_slice %259 {offsets = [0, 0], sizes = [8, 128], strides = [1, 1]} : vector<8x384xf32> to vector<8x128xf32>
    %263 = vector.extract_strided_slice %261 {offsets = [0, 0], sizes = [8, 128], strides = [1, 1]} : vector<8x384xf32> to vector<8x128xf32>
    %264 = arith.addf %262, %263 : vector<8x128xf32>
    %265 = arith.negf %264 : vector<8x128xf32>
    %266 = math.exp %265 : vector<8x128xf32>
    %cst_63 = arith.constant 1.000000e+00 : f32
    %267 = vector.broadcast %cst_63 : f32 to vector<8x128xf32>
    %268 = arith.addf %267, %266 : vector<8x128xf32>
    %269 = arith.divf %267, %268 : vector<8x128xf32>
    %270 = vector.extract_strided_slice %259 {offsets = [0, 128], sizes = [8, 128], strides = [1, 1]} : vector<8x384xf32> to vector<8x128xf32>
    %271 = vector.extract_strided_slice %261 {offsets = [0, 128], sizes = [8, 128], strides = [1, 1]} : vector<8x384xf32> to vector<8x128xf32>
    %272 = arith.addf %270, %271 : vector<8x128xf32>
    %273 = arith.negf %272 : vector<8x128xf32>
    %274 = math.exp %273 : vector<8x128xf32>
    %cst_64 = arith.constant 1.000000e+00 : f32
    %275 = vector.broadcast %cst_64 : f32 to vector<8x128xf32>
    %276 = arith.addf %275, %274 : vector<8x128xf32>
    %277 = arith.divf %275, %276 : vector<8x128xf32>
    %278 = vector.extract_strided_slice %259 {offsets = [0, 256], sizes = [8, 128], strides = [1, 1]} : vector<8x384xf32> to vector<8x128xf32>
    %279 = vector.extract_strided_slice %261 {offsets = [0, 256], sizes = [8, 128], strides = [1, 1]} : vector<8x384xf32> to vector<8x128xf32>
    %280 = arith.addf %279, %9 : vector<8x128xf32>
    %281 = arith.mulf %269, %280 : vector<8x128xf32>
    %282 = arith.addf %278, %281 : vector<8x128xf32>
    %283 = math.tanh %282 : vector<8x128xf32>
    %cst_65 = arith.constant 1.000000e+00 : f32
    %284 = vector.broadcast %cst_65 : f32 to vector<8x128xf32>
    %285 = arith.subf %284, %277 : vector<8x128xf32>
    %286 = arith.mulf %285, %283 : vector<8x128xf32>
    %287 = arith.mulf %277, %253 : vector<8x128xf32>
    %288 = arith.addf %286, %287 : vector<8x128xf32>
    %289 = arith.index_cast %257 : i32 to index
    %c0_66 = arith.constant 0 : index
    %290 = vector.load %arg17[%289, %c0_66] : memref<64x128xf32, #tpu.memory_space<vmem>>, vector<8x128xf32>
    tpu.vector_store %arg17[%289, %c0_66], %288 {strides = array<i32>} : memref<64x128xf32, #tpu.memory_space<vmem>>, vector<8x128xf32>,
    %c8_i32_67 = arith.constant 8 : i32
    %c0_68 = arith.constant 0 : index
    %c0_69 = arith.constant 0 : index
    %291 = vector.load %arg17[%c0_68, %c0_69] : memref<64x128xf32, #tpu.memory_space<vmem>>, vector<64x128xf32>
    %292 = arith.truncf %291 : vector<64x128xf32> to vector<64x128xbf16>
    %c0_70 = arith.constant 0 : index
    %c0_71 = arith.constant 0 : index
    %293 = vector.load %arg5[%c0_70, %c0_71] : memref<128x768xbf16, #tpu.memory_space<vmem>>, vector<128x768xbf16>
    %cst_72 = arith.constant dense<0.000000e+00> : vector<64x768xf32>
    %294 = tpu.matmul %292, %293, %cst_72 {dimension_numbers = #tpu.dot_dimension_numbers<[1], [0], [0], [1], [0, 0, 1, 1], [], []>} : vector<64x128xbf16>, vector<128x768xbf16>, vector<64x768xf32> -> vector<64x768xf32>
    %c0_73 = arith.constant 0 : index
    %c0_74 = arith.constant 0 : index
    %295 = vector.load %arg7[%c0_73, %c0_74] : memref<1x768xf32, #tpu.memory_space<vmem>>, vector<1x768xf32>
    %296 = vector.broadcast %295 : vector<1x768xf32> to vector<64x768xf32>
    %297 = arith.addf %294, %296 : vector<64x768xf32>
    %c0_75 = arith.constant 0 : index
    %c0_76 = arith.constant 0 : index
    %298 = vector.load %arg16[%c0_75, %c0_76] : memref<64x768xf32, #tpu.memory_space<vmem>>, vector<64x768xf32>
    tpu.vector_store %arg16[%c0_75, %c0_76], %297 {strides = array<i32>} : memref<64x768xf32, #tpu.memory_space<vmem>>, vector<64x768xf32>,
    %c0_77 = arith.constant 0 : index
    %c0_78 = arith.constant 0 : index
    %299 = vector.load %arg6[%c0_77, %c0_78] : memref<128x768xbf16, #tpu.memory_space<vmem>>, vector<128x768xbf16>
    %c0_79 = arith.constant 0 : index
    %c0_80 = arith.constant 0 : index
    %300 = vector.load %arg8[%c0_79, %c0_80] : memref<16x128xf32, #tpu.memory_space<vmem>>, vector<16x128xf32>
    %cst_81 = arith.constant 0.000000e+00 : f32
    %301 = vector.broadcast %cst_81 : f32 to vector<16x128xf32>
    %c0_i32_82 = arith.constant 0 : i32
    %c8_i32_83 = arith.constant 8 : i32
    %302 = arith.muli %c0_i32_82, %c8_i32_83 : i32
    %303 = tpu.assume_multiple %302, 8 : i32
    %c7_i32_84 = arith.constant 7 : i32
    %304 = arith.subi %c7_i32_84, %c0_i32_82 : i32
    %c8_i32_85 = arith.constant 8 : i32
    %305 = arith.muli %304, %c8_i32_85 : i32
    %306 = tpu.assume_multiple %305, 8 : i32
    %307 = arith.index_cast %303 : i32 to index
    %c0_86 = arith.constant 0 : index
    %308 = vector.load %arg16[%307, %c0_86] : memref<64x768xf32, #tpu.memory_space<vmem>>, vector<8x384xf32>
    %309 = arith.index_cast %306 : i32 to index
    %c384 = arith.constant 384 : index
    %310 = vector.load %arg16[%309, %c384] : memref<64x768xf32, #tpu.memory_space<vmem>>, vector<8x384xf32>
    %311 = tpu.concatenate %308, %310 in 0 : vector<8x384xf32>, vector<8x384xf32> -> vector<16x384xf32>
    %312 = arith.truncf %301 : vector<16x128xf32> to vector<16x128xbf16>
    %cst_87 = arith.constant dense<0.000000e+00> : vector<16x768xf32>
    %313 = tpu.matmul %312, %299, %cst_87 {dimension_numbers = #tpu.dot_dimension_numbers<[1], [0], [0], [1], [0, 0, 1, 1], [], []>} : vector<16x128xbf16>, vector<128x768xbf16>, vector<16x768xf32> -> vector<16x768xf32>
    %314 = vector.extract_strided_slice %313 {offsets = [0, 0], sizes = [8, 384], strides = [1, 1]} : vector<16x768xf32> to vector<8x384xf32>
    %315 = vector.extract_strided_slice %313 {offsets = [8, 384], sizes = [8, 384], strides = [1, 1]} : vector<16x768xf32> to vector<8x384xf32>
    %316 = tpu.concatenate %314, %315 in 0 : vector<8x384xf32>, vector<8x384xf32> -> vector<16x384xf32>
    %317 = vector.extract_strided_slice %311 {offsets = [0, 0], sizes = [16, 128], strides = [1, 1]} : vector<16x384xf32> to vector<16x128xf32>
    %318 = vector.extract_strided_slice %316 {offsets = [0, 0], sizes = [16, 128], strides = [1, 1]} : vector<16x384xf32> to vector<16x128xf32>
    %319 = arith.addf %317, %318 : vector<16x128xf32>
    %320 = arith.negf %319 : vector<16x128xf32>
    %321 = math.exp %320 : vector<16x128xf32>
    %cst_88 = arith.constant 1.000000e+00 : f32
    %322 = vector.broadcast %cst_88 : f32 to vector<16x128xf32>
    %323 = arith.addf %322, %321 : vector<16x128xf32>
    %324 = arith.divf %322, %323 : vector<16x128xf32>
    %325 = vector.extract_strided_slice %311 {offsets = [0, 128], sizes = [16, 128], strides = [1, 1]} : vector<16x384xf32> to vector<16x128xf32>
    %326 = vector.extract_strided_slice %316 {offsets = [0, 128], sizes = [16, 128], strides = [1, 1]} : vector<16x384xf32> to vector<16x128xf32>
    %327 = arith.addf %325, %326 : vector<16x128xf32>
    %328 = arith.negf %327 : vector<16x128xf32>
    %329 = math.exp %328 : vector<16x128xf32>
    %cst_89 = arith.constant 1.000000e+00 : f32
    %330 = vector.broadcast %cst_89 : f32 to vector<16x128xf32>
    %331 = arith.addf %330, %329 : vector<16x128xf32>
    %332 = arith.divf %330, %331 : vector<16x128xf32>
    %333 = vector.extract_strided_slice %311 {offsets = [0, 256], sizes = [16, 128], strides = [1, 1]} : vector<16x384xf32> to vector<16x128xf32>
    %334 = vector.extract_strided_slice %316 {offsets = [0, 256], sizes = [16, 128], strides = [1, 1]} : vector<16x384xf32> to vector<16x128xf32>
    %335 = arith.addf %334, %300 : vector<16x128xf32>
    %336 = arith.mulf %324, %335 : vector<16x128xf32>
    %337 = arith.addf %333, %336 : vector<16x128xf32>
    %338 = math.tanh %337 : vector<16x128xf32>
    %cst_90 = arith.constant 1.000000e+00 : f32
    %339 = vector.broadcast %cst_90 : f32 to vector<16x128xf32>
    %340 = arith.subf %339, %332 : vector<16x128xf32>
    %341 = arith.mulf %340, %338 : vector<16x128xf32>
    %342 = arith.mulf %332, %301 : vector<16x128xf32>
    %343 = arith.addf %341, %342 : vector<16x128xf32>
    %344 = vector.extract_strided_slice %343 {offsets = [0, 0], sizes = [8, 128], strides = [1, 1]} : vector<16x128xf32> to vector<8x128xf32>
    %345 = arith.index_cast %303 : i32 to index
    %c0_91 = arith.constant 0 : index
    %346 = vector.load %arg18[%345, %c0_91] : memref<64x128xf32, #tpu.memory_space<vmem>>, vector<8x128xf32>
    tpu.vector_store %arg18[%345, %c0_91], %344 {strides = array<i32>} : memref<64x128xf32, #tpu.memory_space<vmem>>, vector<8x128xf32>,
    %347 = vector.extract_strided_slice %343 {offsets = [8, 0], sizes = [8, 128], strides = [1, 1]} : vector<16x128xf32> to vector<8x128xf32>
    %348 = arith.index_cast %306 : i32 to index
    %c0_92 = arith.constant 0 : index
    %349 = vector.load %arg19[%348, %c0_92] : memref<64x128xf32, #tpu.memory_space<vmem>>, vector<8x128xf32>
    tpu.vector_store %arg19[%348, %c0_92], %347 {strides = array<i32>} : memref<64x128xf32, #tpu.memory_space<vmem>>, vector<8x128xf32>,
    %c1_i32_93 = arith.constant 1 : i32
    %c8_i32_94 = arith.constant 8 : i32
    %350 = arith.muli %c1_i32_93, %c8_i32_94 : i32
    %351 = tpu.assume_multiple %350, 8 : i32
    %c7_i32_95 = arith.constant 7 : i32
    %352 = arith.subi %c7_i32_95, %c1_i32_93 : i32
    %c8_i32_96 = arith.constant 8 : i32
    %353 = arith.muli %352, %c8_i32_96 : i32
    %354 = tpu.assume_multiple %353, 8 : i32
    %355 = arith.index_cast %351 : i32 to index
    %c0_97 = arith.constant 0 : index
    %356 = vector.load %arg16[%355, %c0_97] : memref<64x768xf32, #tpu.memory_space<vmem>>, vector<8x384xf32>
    %357 = arith.index_cast %354 : i32 to index
    %c384_98 = arith.constant 384 : index
    %358 = vector.load %arg16[%357, %c384_98] : memref<64x768xf32, #tpu.memory_space<vmem>>, vector<8x384xf32>
    %359 = tpu.concatenate %356, %358 in 0 : vector<8x384xf32>, vector<8x384xf32> -> vector<16x384xf32>
    %360 = arith.truncf %343 : vector<16x128xf32> to vector<16x128xbf16>
    %cst_99 = arith.constant dense<0.000000e+00> : vector<16x768xf32>
    %361 = tpu.matmul %360, %299, %cst_99 {dimension_numbers = #tpu.dot_dimension_numbers<[1], [0], [0], [1], [0, 0, 1, 1], [], []>} : vector<16x128xbf16>, vector<128x768xbf16>, vector<16x768xf32> -> vector<16x768xf32>
    %362 = vector.extract_strided_slice %361 {offsets = [0, 0], sizes = [8, 384], strides = [1, 1]} : vector<16x768xf32> to vector<8x384xf32>
    %363 = vector.extract_strided_slice %361 {offsets = [8, 384], sizes = [8, 384], strides = [1, 1]} : vector<16x768xf32> to vector<8x384xf32>
    %364 = tpu.concatenate %362, %363 in 0 : vector<8x384xf32>, vector<8x384xf32> -> vector<16x384xf32>
    %365 = vector.extract_strided_slice %359 {offsets = [0, 0], sizes = [16, 128], strides = [1, 1]} : vector<16x384xf32> to vector<16x128xf32>
    %366 = vector.extract_strided_slice %364 {offsets = [0, 0], sizes = [16, 128], strides = [1, 1]} : vector<16x384xf32> to vector<16x128xf32>
    %367 = arith.addf %365, %366 : vector<16x128xf32>
    %368 = arith.negf %367 : vector<16x128xf32>
    %369 = math.exp %368 : vector<16x128xf32>
    %cst_100 = arith.constant 1.000000e+00 : f32
    %370 = vector.broadcast %cst_100 : f32 to vector<16x128xf32>
    %371 = arith.addf %370, %369 : vector<16x128xf32>
    %372 = arith.divf %370, %371 : vector<16x128xf32>
    %373 = vector.extract_strided_slice %359 {offsets = [0, 128], sizes = [16, 128], strides = [1, 1]} : vector<16x384xf32> to vector<16x128xf32>
    %374 = vector.extract_strided_slice %364 {offsets = [0, 128], sizes = [16, 128], strides = [1, 1]} : vector<16x384xf32> to vector<16x128xf32>
    %375 = arith.addf %373, %374 : vector<16x128xf32>
    %376 = arith.negf %375 : vector<16x128xf32>
    %377 = math.exp %376 : vector<16x128xf32>
    %cst_101 = arith.constant 1.000000e+00 : f32
    %378 = vector.broadcast %cst_101 : f32 to vector<16x128xf32>
    %379 = arith.addf %378, %377 : vector<16x128xf32>
    %380 = arith.divf %378, %379 : vector<16x128xf32>
    %381 = vector.extract_strided_slice %359 {offsets = [0, 256], sizes = [16, 128], strides = [1, 1]} : vector<16x384xf32> to vector<16x128xf32>
    %382 = vector.extract_strided_slice %364 {offsets = [0, 256], sizes = [16, 128], strides = [1, 1]} : vector<16x384xf32> to vector<16x128xf32>
    %383 = arith.addf %382, %300 : vector<16x128xf32>
    %384 = arith.mulf %372, %383 : vector<16x128xf32>
    %385 = arith.addf %381, %384 : vector<16x128xf32>
    %386 = math.tanh %385 : vector<16x128xf32>
    %cst_102 = arith.constant 1.000000e+00 : f32
    %387 = vector.broadcast %cst_102 : f32 to vector<16x128xf32>
    %388 = arith.subf %387, %380 : vector<16x128xf32>
    %389 = arith.mulf %388, %386 : vector<16x128xf32>
    %390 = arith.mulf %380, %343 : vector<16x128xf32>
    %391 = arith.addf %389, %390 : vector<16x128xf32>
    %392 = vector.extract_strided_slice %391 {offsets = [0, 0], sizes = [8, 128], strides = [1, 1]} : vector<16x128xf32> to vector<8x128xf32>
    %393 = arith.index_cast %351 : i32 to index
    %c0_103 = arith.constant 0 : index
    %394 = vector.load %arg18[%393, %c0_103] : memref<64x128xf32, #tpu.memory_space<vmem>>, vector<8x128xf32>
    tpu.vector_store %arg18[%393, %c0_103], %392 {strides = array<i32>} : memref<64x128xf32, #tpu.memory_space<vmem>>, vector<8x128xf32>,
    %395 = vector.extract_strided_slice %391 {offsets = [8, 0], sizes = [8, 128], strides = [1, 1]} : vector<16x128xf32> to vector<8x128xf32>
    %396 = arith.index_cast %354 : i32 to index
    %c0_104 = arith.constant 0 : index
    %397 = vector.load %arg19[%396, %c0_104] : memref<64x128xf32, #tpu.memory_space<vmem>>, vector<8x128xf32>
    tpu.vector_store %arg19[%396, %c0_104], %395 {strides = array<i32>} : memref<64x128xf32, #tpu.memory_space<vmem>>, vector<8x128xf32>,
    %c2_i32_105 = arith.constant 2 : i32
    %c8_i32_106 = arith.constant 8 : i32
    %398 = arith.muli %c2_i32_105, %c8_i32_106 : i32
    %399 = tpu.assume_multiple %398, 8 : i32
    %c7_i32_107 = arith.constant 7 : i32
    %400 = arith.subi %c7_i32_107, %c2_i32_105 : i32
    %c8_i32_108 = arith.constant 8 : i32
    %401 = arith.muli %400, %c8_i32_108 : i32
    %402 = tpu.assume_multiple %401, 8 : i32
    %403 = arith.index_cast %399 : i32 to index
    %c0_109 = arith.constant 0 : index
    %404 = vector.load %arg16[%403, %c0_109] : memref<64x768xf32, #tpu.memory_space<vmem>>, vector<8x384xf32>
    %405 = arith.index_cast %402 : i32 to index
    %c384_110 = arith.constant 384 : index
    %406 = vector.load %arg16[%405, %c384_110] : memref<64x768xf32, #tpu.memory_space<vmem>>, vector<8x384xf32>
    %407 = tpu.concatenate %404, %406 in 0 : vector<8x384xf32>, vector<8x384xf32> -> vector<16x384xf32>
    %408 = arith.truncf %391 : vector<16x128xf32> to vector<16x128xbf16>
    %cst_111 = arith.constant dense<0.000000e+00> : vector<16x768xf32>
    %409 = tpu.matmul %408, %299, %cst_111 {dimension_numbers = #tpu.dot_dimension_numbers<[1], [0], [0], [1], [0, 0, 1, 1], [], []>} : vector<16x128xbf16>, vector<128x768xbf16>, vector<16x768xf32> -> vector<16x768xf32>
    %410 = vector.extract_strided_slice %409 {offsets = [0, 0], sizes = [8, 384], strides = [1, 1]} : vector<16x768xf32> to vector<8x384xf32>
    %411 = vector.extract_strided_slice %409 {offsets = [8, 384], sizes = [8, 384], strides = [1, 1]} : vector<16x768xf32> to vector<8x384xf32>
    %412 = tpu.concatenate %410, %411 in 0 : vector<8x384xf32>, vector<8x384xf32> -> vector<16x384xf32>
    %413 = vector.extract_strided_slice %407 {offsets = [0, 0], sizes = [16, 128], strides = [1, 1]} : vector<16x384xf32> to vector<16x128xf32>
    %414 = vector.extract_strided_slice %412 {offsets = [0, 0], sizes = [16, 128], strides = [1, 1]} : vector<16x384xf32> to vector<16x128xf32>
    %415 = arith.addf %413, %414 : vector<16x128xf32>
    %416 = arith.negf %415 : vector<16x128xf32>
    %417 = math.exp %416 : vector<16x128xf32>
    %cst_112 = arith.constant 1.000000e+00 : f32
    %418 = vector.broadcast %cst_112 : f32 to vector<16x128xf32>
    %419 = arith.addf %418, %417 : vector<16x128xf32>
    %420 = arith.divf %418, %419 : vector<16x128xf32>
    %421 = vector.extract_strided_slice %407 {offsets = [0, 128], sizes = [16, 128], strides = [1, 1]} : vector<16x384xf32> to vector<16x128xf32>
    %422 = vector.extract_strided_slice %412 {offsets = [0, 128], sizes = [16, 128], strides = [1, 1]} : vector<16x384xf32> to vector<16x128xf32>
    %423 = arith.addf %421, %422 : vector<16x128xf32>
    %424 = arith.negf %423 : vector<16x128xf32>
    %425 = math.exp %424 : vector<16x128xf32>
    %cst_113 = arith.constant 1.000000e+00 : f32
    %426 = vector.broadcast %cst_113 : f32 to vector<16x128xf32>
    %427 = arith.addf %426, %425 : vector<16x128xf32>
    %428 = arith.divf %426, %427 : vector<16x128xf32>
    %429 = vector.extract_strided_slice %407 {offsets = [0, 256], sizes = [16, 128], strides = [1, 1]} : vector<16x384xf32> to vector<16x128xf32>
    %430 = vector.extract_strided_slice %412 {offsets = [0, 256], sizes = [16, 128], strides = [1, 1]} : vector<16x384xf32> to vector<16x128xf32>
    %431 = arith.addf %430, %300 : vector<16x128xf32>
    %432 = arith.mulf %420, %431 : vector<16x128xf32>
    %433 = arith.addf %429, %432 : vector<16x128xf32>
    %434 = math.tanh %433 : vector<16x128xf32>
    %cst_114 = arith.constant 1.000000e+00 : f32
    %435 = vector.broadcast %cst_114 : f32 to vector<16x128xf32>
    %436 = arith.subf %435, %428 : vector<16x128xf32>
    %437 = arith.mulf %436, %434 : vector<16x128xf32>
    %438 = arith.mulf %428, %391 : vector<16x128xf32>
    %439 = arith.addf %437, %438 : vector<16x128xf32>
    %440 = vector.extract_strided_slice %439 {offsets = [0, 0], sizes = [8, 128], strides = [1, 1]} : vector<16x128xf32> to vector<8x128xf32>
    %441 = arith.index_cast %399 : i32 to index
    %c0_115 = arith.constant 0 : index
    %442 = vector.load %arg18[%441, %c0_115] : memref<64x128xf32, #tpu.memory_space<vmem>>, vector<8x128xf32>
    tpu.vector_store %arg18[%441, %c0_115], %440 {strides = array<i32>} : memref<64x128xf32, #tpu.memory_space<vmem>>, vector<8x128xf32>,
    %443 = vector.extract_strided_slice %439 {offsets = [8, 0], sizes = [8, 128], strides = [1, 1]} : vector<16x128xf32> to vector<8x128xf32>
    %444 = arith.index_cast %402 : i32 to index
    %c0_116 = arith.constant 0 : index
    %445 = vector.load %arg19[%444, %c0_116] : memref<64x128xf32, #tpu.memory_space<vmem>>, vector<8x128xf32>
    tpu.vector_store %arg19[%444, %c0_116], %443 {strides = array<i32>} : memref<64x128xf32, #tpu.memory_space<vmem>>, vector<8x128xf32>,
    %c3_i32_117 = arith.constant 3 : i32
    %c8_i32_118 = arith.constant 8 : i32
    %446 = arith.muli %c3_i32_117, %c8_i32_118 : i32
    %447 = tpu.assume_multiple %446, 8 : i32
    %c7_i32_119 = arith.constant 7 : i32
    %448 = arith.subi %c7_i32_119, %c3_i32_117 : i32
    %c8_i32_120 = arith.constant 8 : i32
    %449 = arith.muli %448, %c8_i32_120 : i32
    %450 = tpu.assume_multiple %449, 8 : i32
    %451 = arith.index_cast %447 : i32 to index
    %c0_121 = arith.constant 0 : index
    %452 = vector.load %arg16[%451, %c0_121] : memref<64x768xf32, #tpu.memory_space<vmem>>, vector<8x384xf32>
    %453 = arith.index_cast %450 : i32 to index
    %c384_122 = arith.constant 384 : index
    %454 = vector.load %arg16[%453, %c384_122] : memref<64x768xf32, #tpu.memory_space<vmem>>, vector<8x384xf32>
    %455 = tpu.concatenate %452, %454 in 0 : vector<8x384xf32>, vector<8x384xf32> -> vector<16x384xf32>
    %456 = arith.truncf %439 : vector<16x128xf32> to vector<16x128xbf16>
    %cst_123 = arith.constant dense<0.000000e+00> : vector<16x768xf32>
    %457 = tpu.matmul %456, %299, %cst_123 {dimension_numbers = #tpu.dot_dimension_numbers<[1], [0], [0], [1], [0, 0, 1, 1], [], []>} : vector<16x128xbf16>, vector<128x768xbf16>, vector<16x768xf32> -> vector<16x768xf32>
    %458 = vector.extract_strided_slice %457 {offsets = [0, 0], sizes = [8, 384], strides = [1, 1]} : vector<16x768xf32> to vector<8x384xf32>
    %459 = vector.extract_strided_slice %457 {offsets = [8, 384], sizes = [8, 384], strides = [1, 1]} : vector<16x768xf32> to vector<8x384xf32>
    %460 = tpu.concatenate %458, %459 in 0 : vector<8x384xf32>, vector<8x384xf32> -> vector<16x384xf32>
    %461 = vector.extract_strided_slice %455 {offsets = [0, 0], sizes = [16, 128], strides = [1, 1]} : vector<16x384xf32> to vector<16x128xf32>
    %462 = vector.extract_strided_slice %460 {offsets = [0, 0], sizes = [16, 128], strides = [1, 1]} : vector<16x384xf32> to vector<16x128xf32>
    %463 = arith.addf %461, %462 : vector<16x128xf32>
    %464 = arith.negf %463 : vector<16x128xf32>
    %465 = math.exp %464 : vector<16x128xf32>
    %cst_124 = arith.constant 1.000000e+00 : f32
    %466 = vector.broadcast %cst_124 : f32 to vector<16x128xf32>
    %467 = arith.addf %466, %465 : vector<16x128xf32>
    %468 = arith.divf %466, %467 : vector<16x128xf32>
    %469 = vector.extract_strided_slice %455 {offsets = [0, 128], sizes = [16, 128], strides = [1, 1]} : vector<16x384xf32> to vector<16x128xf32>
    %470 = vector.extract_strided_slice %460 {offsets = [0, 128], sizes = [16, 128], strides = [1, 1]} : vector<16x384xf32> to vector<16x128xf32>
    %471 = arith.addf %469, %470 : vector<16x128xf32>
    %472 = arith.negf %471 : vector<16x128xf32>
    %473 = math.exp %472 : vector<16x128xf32>
    %cst_125 = arith.constant 1.000000e+00 : f32
    %474 = vector.broadcast %cst_125 : f32 to vector<16x128xf32>
    %475 = arith.addf %474, %473 : vector<16x128xf32>
    %476 = arith.divf %474, %475 : vector<16x128xf32>
    %477 = vector.extract_strided_slice %455 {offsets = [0, 256], sizes = [16, 128], strides = [1, 1]} : vector<16x384xf32> to vector<16x128xf32>
    %478 = vector.extract_strided_slice %460 {offsets = [0, 256], sizes = [16, 128], strides = [1, 1]} : vector<16x384xf32> to vector<16x128xf32>
    %479 = arith.addf %478, %300 : vector<16x128xf32>
    %480 = arith.mulf %468, %479 : vector<16x128xf32>
    %481 = arith.addf %477, %480 : vector<16x128xf32>
    %482 = math.tanh %481 : vector<16x128xf32>
    %cst_126 = arith.constant 1.000000e+00 : f32
    %483 = vector.broadcast %cst_126 : f32 to vector<16x128xf32>
    %484 = arith.subf %483, %476 : vector<16x128xf32>
    %485 = arith.mulf %484, %482 : vector<16x128xf32>
    %486 = arith.mulf %476, %439 : vector<16x128xf32>
    %487 = arith.addf %485, %486 : vector<16x128xf32>
    %488 = vector.extract_strided_slice %487 {offsets = [0, 0], sizes = [8, 128], strides = [1, 1]} : vector<16x128xf32> to vector<8x128xf32>
    %489 = arith.index_cast %447 : i32 to index
    %c0_127 = arith.constant 0 : index
    %490 = vector.load %arg18[%489, %c0_127] : memref<64x128xf32, #tpu.memory_space<vmem>>, vector<8x128xf32>
    tpu.vector_store %arg18[%489, %c0_127], %488 {strides = array<i32>} : memref<64x128xf32, #tpu.memory_space<vmem>>, vector<8x128xf32>,
    %491 = vector.extract_strided_slice %487 {offsets = [8, 0], sizes = [8, 128], strides = [1, 1]} : vector<16x128xf32> to vector<8x128xf32>
    %492 = arith.index_cast %450 : i32 to index
    %c0_128 = arith.constant 0 : index
    %493 = vector.load %arg19[%492, %c0_128] : memref<64x128xf32, #tpu.memory_space<vmem>>, vector<8x128xf32>
    tpu.vector_store %arg19[%492, %c0_128], %491 {strides = array<i32>} : memref<64x128xf32, #tpu.memory_space<vmem>>, vector<8x128xf32>,
    %c4_i32_129 = arith.constant 4 : i32
    %c8_i32_130 = arith.constant 8 : i32
    %494 = arith.muli %c4_i32_129, %c8_i32_130 : i32
    %495 = tpu.assume_multiple %494, 8 : i32
    %c7_i32_131 = arith.constant 7 : i32
    %496 = arith.subi %c7_i32_131, %c4_i32_129 : i32
    %c8_i32_132 = arith.constant 8 : i32
    %497 = arith.muli %496, %c8_i32_132 : i32
    %498 = tpu.assume_multiple %497, 8 : i32
    %499 = arith.index_cast %495 : i32 to index
    %c0_133 = arith.constant 0 : index
    %500 = vector.load %arg16[%499, %c0_133] : memref<64x768xf32, #tpu.memory_space<vmem>>, vector<8x384xf32>
    %501 = arith.index_cast %498 : i32 to index
    %c384_134 = arith.constant 384 : index
    %502 = vector.load %arg16[%501, %c384_134] : memref<64x768xf32, #tpu.memory_space<vmem>>, vector<8x384xf32>
    %503 = tpu.concatenate %500, %502 in 0 : vector<8x384xf32>, vector<8x384xf32> -> vector<16x384xf32>
    %504 = arith.truncf %487 : vector<16x128xf32> to vector<16x128xbf16>
    %cst_135 = arith.constant dense<0.000000e+00> : vector<16x768xf32>
    %505 = tpu.matmul %504, %299, %cst_135 {dimension_numbers = #tpu.dot_dimension_numbers<[1], [0], [0], [1], [0, 0, 1, 1], [], []>} : vector<16x128xbf16>, vector<128x768xbf16>, vector<16x768xf32> -> vector<16x768xf32>
    %506 = vector.extract_strided_slice %505 {offsets = [0, 0], sizes = [8, 384], strides = [1, 1]} : vector<16x768xf32> to vector<8x384xf32>
    %507 = vector.extract_strided_slice %505 {offsets = [8, 384], sizes = [8, 384], strides = [1, 1]} : vector<16x768xf32> to vector<8x384xf32>
    %508 = tpu.concatenate %506, %507 in 0 : vector<8x384xf32>, vector<8x384xf32> -> vector<16x384xf32>
    %509 = vector.extract_strided_slice %503 {offsets = [0, 0], sizes = [16, 128], strides = [1, 1]} : vector<16x384xf32> to vector<16x128xf32>
    %510 = vector.extract_strided_slice %508 {offsets = [0, 0], sizes = [16, 128], strides = [1, 1]} : vector<16x384xf32> to vector<16x128xf32>
    %511 = arith.addf %509, %510 : vector<16x128xf32>
    %512 = arith.negf %511 : vector<16x128xf32>
    %513 = math.exp %512 : vector<16x128xf32>
    %cst_136 = arith.constant 1.000000e+00 : f32
    %514 = vector.broadcast %cst_136 : f32 to vector<16x128xf32>
    %515 = arith.addf %514, %513 : vector<16x128xf32>
    %516 = arith.divf %514, %515 : vector<16x128xf32>
    %517 = vector.extract_strided_slice %503 {offsets = [0, 128], sizes = [16, 128], strides = [1, 1]} : vector<16x384xf32> to vector<16x128xf32>
    %518 = vector.extract_strided_slice %508 {offsets = [0, 128], sizes = [16, 128], strides = [1, 1]} : vector<16x384xf32> to vector<16x128xf32>
    %519 = arith.addf %517, %518 : vector<16x128xf32>
    %520 = arith.negf %519 : vector<16x128xf32>
    %521 = math.exp %520 : vector<16x128xf32>
    %cst_137 = arith.constant 1.000000e+00 : f32
    %522 = vector.broadcast %cst_137 : f32 to vector<16x128xf32>
    %523 = arith.addf %522, %521 : vector<16x128xf32>
    %524 = arith.divf %522, %523 : vector<16x128xf32>
    %525 = vector.extract_strided_slice %503 {offsets = [0, 256], sizes = [16, 128], strides = [1, 1]} : vector<16x384xf32> to vector<16x128xf32>
    %526 = vector.extract_strided_slice %508 {offsets = [0, 256], sizes = [16, 128], strides = [1, 1]} : vector<16x384xf32> to vector<16x128xf32>
    %527 = arith.addf %526, %300 : vector<16x128xf32>
    %528 = arith.mulf %516, %527 : vector<16x128xf32>
    %529 = arith.addf %525, %528 : vector<16x128xf32>
    %530 = math.tanh %529 : vector<16x128xf32>
    %cst_138 = arith.constant 1.000000e+00 : f32
    %531 = vector.broadcast %cst_138 : f32 to vector<16x128xf32>
    %532 = arith.subf %531, %524 : vector<16x128xf32>
    %533 = arith.mulf %532, %530 : vector<16x128xf32>
    %534 = arith.mulf %524, %487 : vector<16x128xf32>
    %535 = arith.addf %533, %534 : vector<16x128xf32>
    %536 = vector.extract_strided_slice %535 {offsets = [0, 0], sizes = [8, 128], strides = [1, 1]} : vector<16x128xf32> to vector<8x128xf32>
    %537 = arith.index_cast %495 : i32 to index
    %c0_139 = arith.constant 0 : index
    %538 = vector.load %arg18[%537, %c0_139] : memref<64x128xf32, #tpu.memory_space<vmem>>, vector<8x128xf32>
    tpu.vector_store %arg18[%537, %c0_139], %536 {strides = array<i32>} : memref<64x128xf32, #tpu.memory_space<vmem>>, vector<8x128xf32>,
    %539 = vector.extract_strided_slice %535 {offsets = [8, 0], sizes = [8, 128], strides = [1, 1]} : vector<16x128xf32> to vector<8x128xf32>
    %540 = arith.index_cast %498 : i32 to index
    %c0_140 = arith.constant 0 : index
    %541 = vector.load %arg19[%540, %c0_140] : memref<64x128xf32, #tpu.memory_space<vmem>>, vector<8x128xf32>
    tpu.vector_store %arg19[%540, %c0_140], %539 {strides = array<i32>} : memref<64x128xf32, #tpu.memory_space<vmem>>, vector<8x128xf32>,
    %c5_i32_141 = arith.constant 5 : i32
    %c8_i32_142 = arith.constant 8 : i32
    %542 = arith.muli %c5_i32_141, %c8_i32_142 : i32
    %543 = tpu.assume_multiple %542, 8 : i32
    %c7_i32_143 = arith.constant 7 : i32
    %544 = arith.subi %c7_i32_143, %c5_i32_141 : i32
    %c8_i32_144 = arith.constant 8 : i32
    %545 = arith.muli %544, %c8_i32_144 : i32
    %546 = tpu.assume_multiple %545, 8 : i32
    %547 = arith.index_cast %543 : i32 to index
    %c0_145 = arith.constant 0 : index
    %548 = vector.load %arg16[%547, %c0_145] : memref<64x768xf32, #tpu.memory_space<vmem>>, vector<8x384xf32>
    %549 = arith.index_cast %546 : i32 to index
    %c384_146 = arith.constant 384 : index
    %550 = vector.load %arg16[%549, %c384_146] : memref<64x768xf32, #tpu.memory_space<vmem>>, vector<8x384xf32>
    %551 = tpu.concatenate %548, %550 in 0 : vector<8x384xf32>, vector<8x384xf32> -> vector<16x384xf32>
    %552 = arith.truncf %535 : vector<16x128xf32> to vector<16x128xbf16>
    %cst_147 = arith.constant dense<0.000000e+00> : vector<16x768xf32>
    %553 = tpu.matmul %552, %299, %cst_147 {dimension_numbers = #tpu.dot_dimension_numbers<[1], [0], [0], [1], [0, 0, 1, 1], [], []>} : vector<16x128xbf16>, vector<128x768xbf16>, vector<16x768xf32> -> vector<16x768xf32>
    %554 = vector.extract_strided_slice %553 {offsets = [0, 0], sizes = [8, 384], strides = [1, 1]} : vector<16x768xf32> to vector<8x384xf32>
    %555 = vector.extract_strided_slice %553 {offsets = [8, 384], sizes = [8, 384], strides = [1, 1]} : vector<16x768xf32> to vector<8x384xf32>
    %556 = tpu.concatenate %554, %555 in 0 : vector<8x384xf32>, vector<8x384xf32> -> vector<16x384xf32>
    %557 = vector.extract_strided_slice %551 {offsets = [0, 0], sizes = [16, 128], strides = [1, 1]} : vector<16x384xf32> to vector<16x128xf32>
    %558 = vector.extract_strided_slice %556 {offsets = [0, 0], sizes = [16, 128], strides = [1, 1]} : vector<16x384xf32> to vector<16x128xf32>
    %559 = arith.addf %557, %558 : vector<16x128xf32>
    %560 = arith.negf %559 : vector<16x128xf32>
    %561 = math.exp %560 : vector<16x128xf32>
    %cst_148 = arith.constant 1.000000e+00 : f32
    %562 = vector.broadcast %cst_148 : f32 to vector<16x128xf32>
    %563 = arith.addf %562, %561 : vector<16x128xf32>
    %564 = arith.divf %562, %563 : vector<16x128xf32>
    %565 = vector.extract_strided_slice %551 {offsets = [0, 128], sizes = [16, 128], strides = [1, 1]} : vector<16x384xf32> to vector<16x128xf32>
    %566 = vector.extract_strided_slice %556 {offsets = [0, 128], sizes = [16, 128], strides = [1, 1]} : vector<16x384xf32> to vector<16x128xf32>
    %567 = arith.addf %565, %566 : vector<16x128xf32>
    %568 = arith.negf %567 : vector<16x128xf32>
    %569 = math.exp %568 : vector<16x128xf32>
    %cst_149 = arith.constant 1.000000e+00 : f32
    %570 = vector.broadcast %cst_149 : f32 to vector<16x128xf32>
    %571 = arith.addf %570, %569 : vector<16x128xf32>
    %572 = arith.divf %570, %571 : vector<16x128xf32>
    %573 = vector.extract_strided_slice %551 {offsets = [0, 256], sizes = [16, 128], strides = [1, 1]} : vector<16x384xf32> to vector<16x128xf32>
    %574 = vector.extract_strided_slice %556 {offsets = [0, 256], sizes = [16, 128], strides = [1, 1]} : vector<16x384xf32> to vector<16x128xf32>
    %575 = arith.addf %574, %300 : vector<16x128xf32>
    %576 = arith.mulf %564, %575 : vector<16x128xf32>
    %577 = arith.addf %573, %576 : vector<16x128xf32>
    %578 = math.tanh %577 : vector<16x128xf32>
    %cst_150 = arith.constant 1.000000e+00 : f32
    %579 = vector.broadcast %cst_150 : f32 to vector<16x128xf32>
    %580 = arith.subf %579, %572 : vector<16x128xf32>
    %581 = arith.mulf %580, %578 : vector<16x128xf32>
    %582 = arith.mulf %572, %535 : vector<16x128xf32>
    %583 = arith.addf %581, %582 : vector<16x128xf32>
    %584 = vector.extract_strided_slice %583 {offsets = [0, 0], sizes = [8, 128], strides = [1, 1]} : vector<16x128xf32> to vector<8x128xf32>
    %585 = arith.index_cast %543 : i32 to index
    %c0_151 = arith.constant 0 : index
    %586 = vector.load %arg18[%585, %c0_151] : memref<64x128xf32, #tpu.memory_space<vmem>>, vector<8x128xf32>
    tpu.vector_store %arg18[%585, %c0_151], %584 {strides = array<i32>} : memref<64x128xf32, #tpu.memory_space<vmem>>, vector<8x128xf32>,
    %587 = vector.extract_strided_slice %583 {offsets = [8, 0], sizes = [8, 128], strides = [1, 1]} : vector<16x128xf32> to vector<8x128xf32>
    %588 = arith.index_cast %546 : i32 to index
    %c0_152 = arith.constant 0 : index
    %589 = vector.load %arg19[%588, %c0_152] : memref<64x128xf32, #tpu.memory_space<vmem>>, vector<8x128xf32>
    tpu.vector_store %arg19[%588, %c0_152], %587 {strides = array<i32>} : memref<64x128xf32, #tpu.memory_space<vmem>>, vector<8x128xf32>,
    %c6_i32_153 = arith.constant 6 : i32
    %c8_i32_154 = arith.constant 8 : i32
    %590 = arith.muli %c6_i32_153, %c8_i32_154 : i32
    %591 = tpu.assume_multiple %590, 8 : i32
    %c7_i32_155 = arith.constant 7 : i32
    %592 = arith.subi %c7_i32_155, %c6_i32_153 : i32
    %c8_i32_156 = arith.constant 8 : i32
    %593 = arith.muli %592, %c8_i32_156 : i32
    %594 = tpu.assume_multiple %593, 8 : i32
    %595 = arith.index_cast %591 : i32 to index
    %c0_157 = arith.constant 0 : index
    %596 = vector.load %arg16[%595, %c0_157] : memref<64x768xf32, #tpu.memory_space<vmem>>, vector<8x384xf32>
    %597 = arith.index_cast %594 : i32 to index
    %c384_158 = arith.constant 384 : index
    %598 = vector.load %arg16[%597, %c384_158] : memref<64x768xf32, #tpu.memory_space<vmem>>, vector<8x384xf32>
    %599 = tpu.concatenate %596, %598 in 0 : vector<8x384xf32>, vector<8x384xf32> -> vector<16x384xf32>
    %600 = arith.truncf %583 : vector<16x128xf32> to vector<16x128xbf16>
    %cst_159 = arith.constant dense<0.000000e+00> : vector<16x768xf32>
    %601 = tpu.matmul %600, %299, %cst_159 {dimension_numbers = #tpu.dot_dimension_numbers<[1], [0], [0], [1], [0, 0, 1, 1], [], []>} : vector<16x128xbf16>, vector<128x768xbf16>, vector<16x768xf32> -> vector<16x768xf32>
    %602 = vector.extract_strided_slice %601 {offsets = [0, 0], sizes = [8, 384], strides = [1, 1]} : vector<16x768xf32> to vector<8x384xf32>
    %603 = vector.extract_strided_slice %601 {offsets = [8, 384], sizes = [8, 384], strides = [1, 1]} : vector<16x768xf32> to vector<8x384xf32>
    %604 = tpu.concatenate %602, %603 in 0 : vector<8x384xf32>, vector<8x384xf32> -> vector<16x384xf32>
    %605 = vector.extract_strided_slice %599 {offsets = [0, 0], sizes = [16, 128], strides = [1, 1]} : vector<16x384xf32> to vector<16x128xf32>
    %606 = vector.extract_strided_slice %604 {offsets = [0, 0], sizes = [16, 128], strides = [1, 1]} : vector<16x384xf32> to vector<16x128xf32>
    %607 = arith.addf %605, %606 : vector<16x128xf32>
    %608 = arith.negf %607 : vector<16x128xf32>
    %609 = math.exp %608 : vector<16x128xf32>
    %cst_160 = arith.constant 1.000000e+00 : f32
    %610 = vector.broadcast %cst_160 : f32 to vector<16x128xf32>
    %611 = arith.addf %610, %609 : vector<16x128xf32>
    %612 = arith.divf %610, %611 : vector<16x128xf32>
    %613 = vector.extract_strided_slice %599 {offsets = [0, 128], sizes = [16, 128], strides = [1, 1]} : vector<16x384xf32> to vector<16x128xf32>
    %614 = vector.extract_strided_slice %604 {offsets = [0, 128], sizes = [16, 128], strides = [1, 1]} : vector<16x384xf32> to vector<16x128xf32>
    %615 = arith.addf %613, %614 : vector<16x128xf32>
    %616 = arith.negf %615 : vector<16x128xf32>
    %617 = math.exp %616 : vector<16x128xf32>
    %cst_161 = arith.constant 1.000000e+00 : f32
    %618 = vector.broadcast %cst_161 : f32 to vector<16x128xf32>
    %619 = arith.addf %618, %617 : vector<16x128xf32>
    %620 = arith.divf %618, %619 : vector<16x128xf32>
    %621 = vector.extract_strided_slice %599 {offsets = [0, 256], sizes = [16, 128], strides = [1, 1]} : vector<16x384xf32> to vector<16x128xf32>
    %622 = vector.extract_strided_slice %604 {offsets = [0, 256], sizes = [16, 128], strides = [1, 1]} : vector<16x384xf32> to vector<16x128xf32>
    %623 = arith.addf %622, %300 : vector<16x128xf32>
    %624 = arith.mulf %612, %623 : vector<16x128xf32>
    %625 = arith.addf %621, %624 : vector<16x128xf32>
    %626 = math.tanh %625 : vector<16x128xf32>
    %cst_162 = arith.constant 1.000000e+00 : f32
    %627 = vector.broadcast %cst_162 : f32 to vector<16x128xf32>
    %628 = arith.subf %627, %620 : vector<16x128xf32>
    %629 = arith.mulf %628, %626 : vector<16x128xf32>
    %630 = arith.mulf %620, %583 : vector<16x128xf32>
    %631 = arith.addf %629, %630 : vector<16x128xf32>
    %632 = vector.extract_strided_slice %631 {offsets = [0, 0], sizes = [8, 128], strides = [1, 1]} : vector<16x128xf32> to vector<8x128xf32>
    %633 = arith.index_cast %591 : i32 to index
    %c0_163 = arith.constant 0 : index
    %634 = vector.load %arg18[%633, %c0_163] : memref<64x128xf32, #tpu.memory_space<vmem>>, vector<8x128xf32>
    tpu.vector_store %arg18[%633, %c0_163], %632 {strides = array<i32>} : memref<64x128xf32, #tpu.memory_space<vmem>>, vector<8x128xf32>,
    %635 = vector.extract_strided_slice %631 {offsets = [8, 0], sizes = [8, 128], strides = [1, 1]} : vector<16x128xf32> to vector<8x128xf32>
    %636 = arith.index_cast %594 : i32 to index
    %c0_164 = arith.constant 0 : index
    %637 = vector.load %arg19[%636, %c0_164] : memref<64x128xf32, #tpu.memory_space<vmem>>, vector<8x128xf32>
    tpu.vector_store %arg19[%636, %c0_164], %635 {strides = array<i32>} : memref<64x128xf32, #tpu.memory_space<vmem>>, vector<8x128xf32>,
    %c7_i32_165 = arith.constant 7 : i32
    %c8_i32_166 = arith.constant 8 : i32
    %638 = arith.muli %c7_i32_165, %c8_i32_166 : i32
    %639 = tpu.assume_multiple %638, 8 : i32
    %c7_i32_167 = arith.constant 7 : i32
    %640 = arith.subi %c7_i32_167, %c7_i32_165 : i32
    %c8_i32_168 = arith.constant 8 : i32
    %641 = arith.muli %640, %c8_i32_168 : i32
    %642 = tpu.assume_multiple %641, 8 : i32
    %643 = arith.index_cast %639 : i32 to index
    %c0_169 = arith.constant 0 : index
    %644 = vector.load %arg16[%643, %c0_169] : memref<64x768xf32, #tpu.memory_space<vmem>>, vector<8x384xf32>
    %645 = arith.index_cast %642 : i32 to index
    %c384_170 = arith.constant 384 : index
    %646 = vector.load %arg16[%645, %c384_170] : memref<64x768xf32, #tpu.memory_space<vmem>>, vector<8x384xf32>
    %647 = tpu.concatenate %644, %646 in 0 : vector<8x384xf32>, vector<8x384xf32> -> vector<16x384xf32>
    %648 = arith.truncf %631 : vector<16x128xf32> to vector<16x128xbf16>
    %cst_171 = arith.constant dense<0.000000e+00> : vector<16x768xf32>
    %649 = tpu.matmul %648, %299, %cst_171 {dimension_numbers = #tpu.dot_dimension_numbers<[1], [0], [0], [1], [0, 0, 1, 1], [], []>} : vector<16x128xbf16>, vector<128x768xbf16>, vector<16x768xf32> -> vector<16x768xf32>
    %650 = vector.extract_strided_slice %649 {offsets = [0, 0], sizes = [8, 384], strides = [1, 1]} : vector<16x768xf32> to vector<8x384xf32>
    %651 = vector.extract_strided_slice %649 {offsets = [8, 384], sizes = [8, 384], strides = [1, 1]} : vector<16x768xf32> to vector<8x384xf32>
    %652 = tpu.concatenate %650, %651 in 0 : vector<8x384xf32>, vector<8x384xf32> -> vector<16x384xf32>
    %653 = vector.extract_strided_slice %647 {offsets = [0, 0], sizes = [16, 128], strides = [1, 1]} : vector<16x384xf32> to vector<16x128xf32>
    %654 = vector.extract_strided_slice %652 {offsets = [0, 0], sizes = [16, 128], strides = [1, 1]} : vector<16x384xf32> to vector<16x128xf32>
    %655 = arith.addf %653, %654 : vector<16x128xf32>
    %656 = arith.negf %655 : vector<16x128xf32>
    %657 = math.exp %656 : vector<16x128xf32>
    %cst_172 = arith.constant 1.000000e+00 : f32
    %658 = vector.broadcast %cst_172 : f32 to vector<16x128xf32>
    %659 = arith.addf %658, %657 : vector<16x128xf32>
    %660 = arith.divf %658, %659 : vector<16x128xf32>
    %661 = vector.extract_strided_slice %647 {offsets = [0, 128], sizes = [16, 128], strides = [1, 1]} : vector<16x384xf32> to vector<16x128xf32>
    %662 = vector.extract_strided_slice %652 {offsets = [0, 128], sizes = [16, 128], strides = [1, 1]} : vector<16x384xf32> to vector<16x128xf32>
    %663 = arith.addf %661, %662 : vector<16x128xf32>
    %664 = arith.negf %663 : vector<16x128xf32>
    %665 = math.exp %664 : vector<16x128xf32>
    %cst_173 = arith.constant 1.000000e+00 : f32
    %666 = vector.broadcast %cst_173 : f32 to vector<16x128xf32>
    %667 = arith.addf %666, %665 : vector<16x128xf32>
    %668 = arith.divf %666, %667 : vector<16x128xf32>
    %669 = vector.extract_strided_slice %647 {offsets = [0, 256], sizes = [16, 128], strides = [1, 1]} : vector<16x384xf32> to vector<16x128xf32>
    %670 = vector.extract_strided_slice %652 {offsets = [0, 256], sizes = [16, 128], strides = [1, 1]} : vector<16x384xf32> to vector<16x128xf32>
    %671 = arith.addf %670, %300 : vector<16x128xf32>
    %672 = arith.mulf %660, %671 : vector<16x128xf32>
    %673 = arith.addf %669, %672 : vector<16x128xf32>
    %674 = math.tanh %673 : vector<16x128xf32>
    %cst_174 = arith.constant 1.000000e+00 : f32
    %675 = vector.broadcast %cst_174 : f32 to vector<16x128xf32>
    %676 = arith.subf %675, %668 : vector<16x128xf32>
    %677 = arith.mulf %676, %674 : vector<16x128xf32>
    %678 = arith.mulf %668, %631 : vector<16x128xf32>
    %679 = arith.addf %677, %678 : vector<16x128xf32>
    %680 = vector.extract_strided_slice %679 {offsets = [0, 0], sizes = [8, 128], strides = [1, 1]} : vector<16x128xf32> to vector<8x128xf32>
    %681 = arith.index_cast %639 : i32 to index
    %c0_175 = arith.constant 0 : index
    %682 = vector.load %arg18[%681, %c0_175] : memref<64x128xf32, #tpu.memory_space<vmem>>, vector<8x128xf32>
    tpu.vector_store %arg18[%681, %c0_175], %680 {strides = array<i32>} : memref<64x128xf32, #tpu.memory_space<vmem>>, vector<8x128xf32>,
    %683 = vector.extract_strided_slice %679 {offsets = [8, 0], sizes = [8, 128], strides = [1, 1]} : vector<16x128xf32> to vector<8x128xf32>
    %684 = arith.index_cast %642 : i32 to index
    %c0_176 = arith.constant 0 : index
    %685 = vector.load %arg19[%684, %c0_176] : memref<64x128xf32, #tpu.memory_space<vmem>>, vector<8x128xf32>
    tpu.vector_store %arg19[%684, %c0_176], %683 {strides = array<i32>} : memref<64x128xf32, #tpu.memory_space<vmem>>, vector<8x128xf32>,
    %c8_i32_177 = arith.constant 8 : i32
    %c0_178 = arith.constant 0 : index
    %c0_179 = arith.constant 0 : index
    %686 = vector.load %arg18[%c0_178, %c0_179] : memref<64x128xf32, #tpu.memory_space<vmem>>, vector<64x128xf32>
    %c0_180 = arith.constant 0 : index
    %c0_181 = arith.constant 0 : index
    %687 = vector.load %arg19[%c0_180, %c0_181] : memref<64x128xf32, #tpu.memory_space<vmem>>, vector<64x128xf32>
    %688 = arith.addf %686, %687 : vector<64x128xf32>
    %cst_182 = arith.constant 5.000000e-01 : f32
    %689 = vector.broadcast %cst_182 : f32 to vector<64x128xf32>
    %690 = arith.mulf %689, %688 : vector<64x128xf32>
    %c0_183 = arith.constant 0 : index
    %c0_184 = arith.constant 0 : index
    %691 = vector.load %arg18[%c0_183, %c0_184] : memref<64x128xf32, #tpu.memory_space<vmem>>, vector<64x128xf32>
    tpu.vector_store %arg18[%c0_183, %c0_184], %690 {strides = array<i32>} : memref<64x128xf32, #tpu.memory_space<vmem>>, vector<64x128xf32>,
    %c0_185 = arith.constant 0 : index
    %c0_186 = arith.constant 0 : index
    %692 = vector.load %arg18[%c0_185, %c0_186] : memref<64x128xf32, #tpu.memory_space<vmem>>, vector<64x128xf32>
    %693 = arith.truncf %692 : vector<64x128xf32> to vector<64x128xbf16>
    %c0_187 = arith.constant 0 : index
    %c0_188 = arith.constant 0 : index
    %694 = vector.load %arg9[%c0_187, %c0_188] : memref<128x384xbf16, #tpu.memory_space<vmem>>, vector<128x384xbf16>
    %cst_189 = arith.constant dense<0.000000e+00> : vector<64x384xf32>
    %695 = tpu.matmul %693, %694, %cst_189 {dimension_numbers = #tpu.dot_dimension_numbers<[1], [0], [0], [1], [0, 0, 1, 1], [], []>} : vector<64x128xbf16>, vector<128x384xbf16>, vector<64x384xf32> -> vector<64x384xf32>
    %c0_190 = arith.constant 0 : index
    %c0_191 = arith.constant 0 : index
    %696 = vector.load %arg11[%c0_190, %c0_191] : memref<1x384xf32, #tpu.memory_space<vmem>>, vector<1x384xf32>
    %697 = vector.broadcast %696 : vector<1x384xf32> to vector<64x384xf32>
    %698 = arith.addf %695, %697 : vector<64x384xf32>
    %c0_192 = arith.constant 0 : index
    %c0_193 = arith.constant 0 : index
    %699 = vector.load %arg16[%c0_192, %c0_193] : memref<64x768xf32, #tpu.memory_space<vmem>>, vector<64x384xf32>
    tpu.vector_store %arg16[%c0_192, %c0_193], %698 {strides = array<i32>} : memref<64x768xf32, #tpu.memory_space<vmem>>, vector<64x384xf32>,
    %c0_194 = arith.constant 0 : index
    %c0_195 = arith.constant 0 : index
    %700 = vector.load %arg10[%c0_194, %c0_195] : memref<128x384xbf16, #tpu.memory_space<vmem>>, vector<128x384xbf16>
    %c0_196 = arith.constant 0 : index
    %c0_197 = arith.constant 0 : index
    %701 = vector.load %arg12[%c0_196, %c0_197] : memref<8x128xf32, #tpu.memory_space<vmem>>, vector<8x128xf32>
    %cst_198 = arith.constant 0.000000e+00 : f32
    %702 = vector.broadcast %cst_198 : f32 to vector<8x128xf32>
    %c0_i32_199 = arith.constant 0 : i32
    %c8_i32_200 = arith.constant 8 : i32
    %703 = arith.muli %c0_i32_199, %c8_i32_200 : i32
    %704 = tpu.assume_multiple %703, 8 : i32
    %705 = arith.index_cast %704 : i32 to index
    %c0_201 = arith.constant 0 : index
    %706 = vector.load %arg16[%705, %c0_201] : memref<64x768xf32, #tpu.memory_space<vmem>>, vector<8x384xf32>
    %707 = arith.truncf %702 : vector<8x128xf32> to vector<8x128xbf16>
    %cst_202 = arith.constant dense<0.000000e+00> : vector<8x384xf32>
    %708 = tpu.matmul %707, %700, %cst_202 {dimension_numbers = #tpu.dot_dimension_numbers<[1], [0], [0], [1], [0, 0, 1, 1], [], []>} : vector<8x128xbf16>, vector<128x384xbf16>, vector<8x384xf32> -> vector<8x384xf32>
    %709 = vector.extract_strided_slice %706 {offsets = [0, 0], sizes = [8, 128], strides = [1, 1]} : vector<8x384xf32> to vector<8x128xf32>
    %710 = vector.extract_strided_slice %708 {offsets = [0, 0], sizes = [8, 128], strides = [1, 1]} : vector<8x384xf32> to vector<8x128xf32>
    %711 = arith.addf %709, %710 : vector<8x128xf32>
    %712 = arith.negf %711 : vector<8x128xf32>
    %713 = math.exp %712 : vector<8x128xf32>
    %cst_203 = arith.constant 1.000000e+00 : f32
    %714 = vector.broadcast %cst_203 : f32 to vector<8x128xf32>
    %715 = arith.addf %714, %713 : vector<8x128xf32>
    %716 = arith.divf %714, %715 : vector<8x128xf32>
    %717 = vector.extract_strided_slice %706 {offsets = [0, 128], sizes = [8, 128], strides = [1, 1]} : vector<8x384xf32> to vector<8x128xf32>
    %718 = vector.extract_strided_slice %708 {offsets = [0, 128], sizes = [8, 128], strides = [1, 1]} : vector<8x384xf32> to vector<8x128xf32>
    %719 = arith.addf %717, %718 : vector<8x128xf32>
    %720 = arith.negf %719 : vector<8x128xf32>
    %721 = math.exp %720 : vector<8x128xf32>
    %cst_204 = arith.constant 1.000000e+00 : f32
    %722 = vector.broadcast %cst_204 : f32 to vector<8x128xf32>
    %723 = arith.addf %722, %721 : vector<8x128xf32>
    %724 = arith.divf %722, %723 : vector<8x128xf32>
    %725 = vector.extract_strided_slice %706 {offsets = [0, 256], sizes = [8, 128], strides = [1, 1]} : vector<8x384xf32> to vector<8x128xf32>
    %726 = vector.extract_strided_slice %708 {offsets = [0, 256], sizes = [8, 128], strides = [1, 1]} : vector<8x384xf32> to vector<8x128xf32>
    %727 = arith.addf %726, %701 : vector<8x128xf32>
    %728 = arith.mulf %716, %727 : vector<8x128xf32>
    %729 = arith.addf %725, %728 : vector<8x128xf32>
    %730 = math.tanh %729 : vector<8x128xf32>
    %cst_205 = arith.constant 1.000000e+00 : f32
    %731 = vector.broadcast %cst_205 : f32 to vector<8x128xf32>
    %732 = arith.subf %731, %724 : vector<8x128xf32>
    %733 = arith.mulf %732, %730 : vector<8x128xf32>
    %734 = arith.mulf %724, %702 : vector<8x128xf32>
    %735 = arith.addf %733, %734 : vector<8x128xf32>
    %736 = arith.index_cast %704 : i32 to index
    %c0_206 = arith.constant 0 : index
    %737 = vector.load %arg17[%736, %c0_206] : memref<64x128xf32, #tpu.memory_space<vmem>>, vector<8x128xf32>
    tpu.vector_store %arg17[%736, %c0_206], %735 {strides = array<i32>} : memref<64x128xf32, #tpu.memory_space<vmem>>, vector<8x128xf32>,
    %c1_i32_207 = arith.constant 1 : i32
    %c8_i32_208 = arith.constant 8 : i32
    %738 = arith.muli %c1_i32_207, %c8_i32_208 : i32
    %739 = tpu.assume_multiple %738, 8 : i32
    %740 = arith.index_cast %739 : i32 to index
    %c0_209 = arith.constant 0 : index
    %741 = vector.load %arg16[%740, %c0_209] : memref<64x768xf32, #tpu.memory_space<vmem>>, vector<8x384xf32>
    %742 = arith.truncf %735 : vector<8x128xf32> to vector<8x128xbf16>
    %cst_210 = arith.constant dense<0.000000e+00> : vector<8x384xf32>
    %743 = tpu.matmul %742, %700, %cst_210 {dimension_numbers = #tpu.dot_dimension_numbers<[1], [0], [0], [1], [0, 0, 1, 1], [], []>} : vector<8x128xbf16>, vector<128x384xbf16>, vector<8x384xf32> -> vector<8x384xf32>
    %744 = vector.extract_strided_slice %741 {offsets = [0, 0], sizes = [8, 128], strides = [1, 1]} : vector<8x384xf32> to vector<8x128xf32>
    %745 = vector.extract_strided_slice %743 {offsets = [0, 0], sizes = [8, 128], strides = [1, 1]} : vector<8x384xf32> to vector<8x128xf32>
    %746 = arith.addf %744, %745 : vector<8x128xf32>
    %747 = arith.negf %746 : vector<8x128xf32>
    %748 = math.exp %747 : vector<8x128xf32>
    %cst_211 = arith.constant 1.000000e+00 : f32
    %749 = vector.broadcast %cst_211 : f32 to vector<8x128xf32>
    %750 = arith.addf %749, %748 : vector<8x128xf32>
    %751 = arith.divf %749, %750 : vector<8x128xf32>
    %752 = vector.extract_strided_slice %741 {offsets = [0, 128], sizes = [8, 128], strides = [1, 1]} : vector<8x384xf32> to vector<8x128xf32>
    %753 = vector.extract_strided_slice %743 {offsets = [0, 128], sizes = [8, 128], strides = [1, 1]} : vector<8x384xf32> to vector<8x128xf32>
    %754 = arith.addf %752, %753 : vector<8x128xf32>
    %755 = arith.negf %754 : vector<8x128xf32>
    %756 = math.exp %755 : vector<8x128xf32>
    %cst_212 = arith.constant 1.000000e+00 : f32
    %757 = vector.broadcast %cst_212 : f32 to vector<8x128xf32>
    %758 = arith.addf %757, %756 : vector<8x128xf32>
    %759 = arith.divf %757, %758 : vector<8x128xf32>
    %760 = vector.extract_strided_slice %741 {offsets = [0, 256], sizes = [8, 128], strides = [1, 1]} : vector<8x384xf32> to vector<8x128xf32>
    %761 = vector.extract_strided_slice %743 {offsets = [0, 256], sizes = [8, 128], strides = [1, 1]} : vector<8x384xf32> to vector<8x128xf32>
    %762 = arith.addf %761, %701 : vector<8x128xf32>
    %763 = arith.mulf %751, %762 : vector<8x128xf32>
    %764 = arith.addf %760, %763 : vector<8x128xf32>
    %765 = math.tanh %764 : vector<8x128xf32>
    %cst_213 = arith.constant 1.000000e+00 : f32
    %766 = vector.broadcast %cst_213 : f32 to vector<8x128xf32>
    %767 = arith.subf %766, %759 : vector<8x128xf32>
    %768 = arith.mulf %767, %765 : vector<8x128xf32>
    %769 = arith.mulf %759, %735 : vector<8x128xf32>
    %770 = arith.addf %768, %769 : vector<8x128xf32>
    %771 = arith.index_cast %739 : i32 to index
    %c0_214 = arith.constant 0 : index
    %772 = vector.load %arg17[%771, %c0_214] : memref<64x128xf32, #tpu.memory_space<vmem>>, vector<8x128xf32>
    tpu.vector_store %arg17[%771, %c0_214], %770 {strides = array<i32>} : memref<64x128xf32, #tpu.memory_space<vmem>>, vector<8x128xf32>,
    %c2_i32_215 = arith.constant 2 : i32
    %c8_i32_216 = arith.constant 8 : i32
    %773 = arith.muli %c2_i32_215, %c8_i32_216 : i32
    %774 = tpu.assume_multiple %773, 8 : i32
    %775 = arith.index_cast %774 : i32 to index
    %c0_217 = arith.constant 0 : index
    %776 = vector.load %arg16[%775, %c0_217] : memref<64x768xf32, #tpu.memory_space<vmem>>, vector<8x384xf32>
    %777 = arith.truncf %770 : vector<8x128xf32> to vector<8x128xbf16>
    %cst_218 = arith.constant dense<0.000000e+00> : vector<8x384xf32>
    %778 = tpu.matmul %777, %700, %cst_218 {dimension_numbers = #tpu.dot_dimension_numbers<[1], [0], [0], [1], [0, 0, 1, 1], [], []>} : vector<8x128xbf16>, vector<128x384xbf16>, vector<8x384xf32> -> vector<8x384xf32>
    %779 = vector.extract_strided_slice %776 {offsets = [0, 0], sizes = [8, 128], strides = [1, 1]} : vector<8x384xf32> to vector<8x128xf32>
    %780 = vector.extract_strided_slice %778 {offsets = [0, 0], sizes = [8, 128], strides = [1, 1]} : vector<8x384xf32> to vector<8x128xf32>
    %781 = arith.addf %779, %780 : vector<8x128xf32>
    %782 = arith.negf %781 : vector<8x128xf32>
    %783 = math.exp %782 : vector<8x128xf32>
    %cst_219 = arith.constant 1.000000e+00 : f32
    %784 = vector.broadcast %cst_219 : f32 to vector<8x128xf32>
    %785 = arith.addf %784, %783 : vector<8x128xf32>
    %786 = arith.divf %784, %785 : vector<8x128xf32>
    %787 = vector.extract_strided_slice %776 {offsets = [0, 128], sizes = [8, 128], strides = [1, 1]} : vector<8x384xf32> to vector<8x128xf32>
    %788 = vector.extract_strided_slice %778 {offsets = [0, 128], sizes = [8, 128], strides = [1, 1]} : vector<8x384xf32> to vector<8x128xf32>
    %789 = arith.addf %787, %788 : vector<8x128xf32>
    %790 = arith.negf %789 : vector<8x128xf32>
    %791 = math.exp %790 : vector<8x128xf32>
    %cst_220 = arith.constant 1.000000e+00 : f32
    %792 = vector.broadcast %cst_220 : f32 to vector<8x128xf32>
    %793 = arith.addf %792, %791 : vector<8x128xf32>
    %794 = arith.divf %792, %793 : vector<8x128xf32>
    %795 = vector.extract_strided_slice %776 {offsets = [0, 256], sizes = [8, 128], strides = [1, 1]} : vector<8x384xf32> to vector<8x128xf32>
    %796 = vector.extract_strided_slice %778 {offsets = [0, 256], sizes = [8, 128], strides = [1, 1]} : vector<8x384xf32> to vector<8x128xf32>
    %797 = arith.addf %796, %701 : vector<8x128xf32>
    %798 = arith.mulf %786, %797 : vector<8x128xf32>
    %799 = arith.addf %795, %798 : vector<8x128xf32>
    %800 = math.tanh %799 : vector<8x128xf32>
    %cst_221 = arith.constant 1.000000e+00 : f32
    %801 = vector.broadcast %cst_221 : f32 to vector<8x128xf32>
    %802 = arith.subf %801, %794 : vector<8x128xf32>
    %803 = arith.mulf %802, %800 : vector<8x128xf32>
    %804 = arith.mulf %794, %770 : vector<8x128xf32>
    %805 = arith.addf %803, %804 : vector<8x128xf32>
    %806 = arith.index_cast %774 : i32 to index
    %c0_222 = arith.constant 0 : index
    %807 = vector.load %arg17[%806, %c0_222] : memref<64x128xf32, #tpu.memory_space<vmem>>, vector<8x128xf32>
    tpu.vector_store %arg17[%806, %c0_222], %805 {strides = array<i32>} : memref<64x128xf32, #tpu.memory_space<vmem>>, vector<8x128xf32>,
    %c3_i32_223 = arith.constant 3 : i32
    %c8_i32_224 = arith.constant 8 : i32
    %808 = arith.muli %c3_i32_223, %c8_i32_224 : i32
    %809 = tpu.assume_multiple %808, 8 : i32
    %810 = arith.index_cast %809 : i32 to index
    %c0_225 = arith.constant 0 : index
    %811 = vector.load %arg16[%810, %c0_225] : memref<64x768xf32, #tpu.memory_space<vmem>>, vector<8x384xf32>
    %812 = arith.truncf %805 : vector<8x128xf32> to vector<8x128xbf16>
    %cst_226 = arith.constant dense<0.000000e+00> : vector<8x384xf32>
    %813 = tpu.matmul %812, %700, %cst_226 {dimension_numbers = #tpu.dot_dimension_numbers<[1], [0], [0], [1], [0, 0, 1, 1], [], []>} : vector<8x128xbf16>, vector<128x384xbf16>, vector<8x384xf32> -> vector<8x384xf32>
    %814 = vector.extract_strided_slice %811 {offsets = [0, 0], sizes = [8, 128], strides = [1, 1]} : vector<8x384xf32> to vector<8x128xf32>
    %815 = vector.extract_strided_slice %813 {offsets = [0, 0], sizes = [8, 128], strides = [1, 1]} : vector<8x384xf32> to vector<8x128xf32>
    %816 = arith.addf %814, %815 : vector<8x128xf32>
    %817 = arith.negf %816 : vector<8x128xf32>
    %818 = math.exp %817 : vector<8x128xf32>
    %cst_227 = arith.constant 1.000000e+00 : f32
    %819 = vector.broadcast %cst_227 : f32 to vector<8x128xf32>
    %820 = arith.addf %819, %818 : vector<8x128xf32>
    %821 = arith.divf %819, %820 : vector<8x128xf32>
    %822 = vector.extract_strided_slice %811 {offsets = [0, 128], sizes = [8, 128], strides = [1, 1]} : vector<8x384xf32> to vector<8x128xf32>
    %823 = vector.extract_strided_slice %813 {offsets = [0, 128], sizes = [8, 128], strides = [1, 1]} : vector<8x384xf32> to vector<8x128xf32>
    %824 = arith.addf %822, %823 : vector<8x128xf32>
    %825 = arith.negf %824 : vector<8x128xf32>
    %826 = math.exp %825 : vector<8x128xf32>
    %cst_228 = arith.constant 1.000000e+00 : f32
    %827 = vector.broadcast %cst_228 : f32 to vector<8x128xf32>
    %828 = arith.addf %827, %826 : vector<8x128xf32>
    %829 = arith.divf %827, %828 : vector<8x128xf32>
    %830 = vector.extract_strided_slice %811 {offsets = [0, 256], sizes = [8, 128], strides = [1, 1]} : vector<8x384xf32> to vector<8x128xf32>
    %831 = vector.extract_strided_slice %813 {offsets = [0, 256], sizes = [8, 128], strides = [1, 1]} : vector<8x384xf32> to vector<8x128xf32>
    %832 = arith.addf %831, %701 : vector<8x128xf32>
    %833 = arith.mulf %821, %832 : vector<8x128xf32>
    %834 = arith.addf %830, %833 : vector<8x128xf32>
    %835 = math.tanh %834 : vector<8x128xf32>
    %cst_229 = arith.constant 1.000000e+00 : f32
    %836 = vector.broadcast %cst_229 : f32 to vector<8x128xf32>
    %837 = arith.subf %836, %829 : vector<8x128xf32>
    %838 = arith.mulf %837, %835 : vector<8x128xf32>
    %839 = arith.mulf %829, %805 : vector<8x128xf32>
    %840 = arith.addf %838, %839 : vector<8x128xf32>
    %841 = arith.index_cast %809 : i32 to index
    %c0_230 = arith.constant 0 : index
    %842 = vector.load %arg17[%841, %c0_230] : memref<64x128xf32, #tpu.memory_space<vmem>>, vector<8x128xf32>
    tpu.vector_store %arg17[%841, %c0_230], %840 {strides = array<i32>} : memref<64x128xf32, #tpu.memory_space<vmem>>, vector<8x128xf32>,
    %c4_i32_231 = arith.constant 4 : i32
    %c8_i32_232 = arith.constant 8 : i32
    %843 = arith.muli %c4_i32_231, %c8_i32_232 : i32
    %844 = tpu.assume_multiple %843, 8 : i32
    %845 = arith.index_cast %844 : i32 to index
    %c0_233 = arith.constant 0 : index
    %846 = vector.load %arg16[%845, %c0_233] : memref<64x768xf32, #tpu.memory_space<vmem>>, vector<8x384xf32>
    %847 = arith.truncf %840 : vector<8x128xf32> to vector<8x128xbf16>
    %cst_234 = arith.constant dense<0.000000e+00> : vector<8x384xf32>
    %848 = tpu.matmul %847, %700, %cst_234 {dimension_numbers = #tpu.dot_dimension_numbers<[1], [0], [0], [1], [0, 0, 1, 1], [], []>} : vector<8x128xbf16>, vector<128x384xbf16>, vector<8x384xf32> -> vector<8x384xf32>
    %849 = vector.extract_strided_slice %846 {offsets = [0, 0], sizes = [8, 128], strides = [1, 1]} : vector<8x384xf32> to vector<8x128xf32>
    %850 = vector.extract_strided_slice %848 {offsets = [0, 0], sizes = [8, 128], strides = [1, 1]} : vector<8x384xf32> to vector<8x128xf32>
    %851 = arith.addf %849, %850 : vector<8x128xf32>
    %852 = arith.negf %851 : vector<8x128xf32>
    %853 = math.exp %852 : vector<8x128xf32>
    %cst_235 = arith.constant 1.000000e+00 : f32
    %854 = vector.broadcast %cst_235 : f32 to vector<8x128xf32>
    %855 = arith.addf %854, %853 : vector<8x128xf32>
    %856 = arith.divf %854, %855 : vector<8x128xf32>
    %857 = vector.extract_strided_slice %846 {offsets = [0, 128], sizes = [8, 128], strides = [1, 1]} : vector<8x384xf32> to vector<8x128xf32>
    %858 = vector.extract_strided_slice %848 {offsets = [0, 128], sizes = [8, 128], strides = [1, 1]} : vector<8x384xf32> to vector<8x128xf32>
    %859 = arith.addf %857, %858 : vector<8x128xf32>
    %860 = arith.negf %859 : vector<8x128xf32>
    %861 = math.exp %860 : vector<8x128xf32>
    %cst_236 = arith.constant 1.000000e+00 : f32
    %862 = vector.broadcast %cst_236 : f32 to vector<8x128xf32>
    %863 = arith.addf %862, %861 : vector<8x128xf32>
    %864 = arith.divf %862, %863 : vector<8x128xf32>
    %865 = vector.extract_strided_slice %846 {offsets = [0, 256], sizes = [8, 128], strides = [1, 1]} : vector<8x384xf32> to vector<8x128xf32>
    %866 = vector.extract_strided_slice %848 {offsets = [0, 256], sizes = [8, 128], strides = [1, 1]} : vector<8x384xf32> to vector<8x128xf32>
    %867 = arith.addf %866, %701 : vector<8x128xf32>
    %868 = arith.mulf %856, %867 : vector<8x128xf32>
    %869 = arith.addf %865, %868 : vector<8x128xf32>
    %870 = math.tanh %869 : vector<8x128xf32>
    %cst_237 = arith.constant 1.000000e+00 : f32
    %871 = vector.broadcast %cst_237 : f32 to vector<8x128xf32>
    %872 = arith.subf %871, %864 : vector<8x128xf32>
    %873 = arith.mulf %872, %870 : vector<8x128xf32>
    %874 = arith.mulf %864, %840 : vector<8x128xf32>
    %875 = arith.addf %873, %874 : vector<8x128xf32>
    %876 = arith.index_cast %844 : i32 to index
    %c0_238 = arith.constant 0 : index
    %877 = vector.load %arg17[%876, %c0_238] : memref<64x128xf32, #tpu.memory_space<vmem>>, vector<8x128xf32>
    tpu.vector_store %arg17[%876, %c0_238], %875 {strides = array<i32>} : memref<64x128xf32, #tpu.memory_space<vmem>>, vector<8x128xf32>,
    %c5_i32_239 = arith.constant 5 : i32
    %c8_i32_240 = arith.constant 8 : i32
    %878 = arith.muli %c5_i32_239, %c8_i32_240 : i32
    %879 = tpu.assume_multiple %878, 8 : i32
    %880 = arith.index_cast %879 : i32 to index
    %c0_241 = arith.constant 0 : index
    %881 = vector.load %arg16[%880, %c0_241] : memref<64x768xf32, #tpu.memory_space<vmem>>, vector<8x384xf32>
    %882 = arith.truncf %875 : vector<8x128xf32> to vector<8x128xbf16>
    %cst_242 = arith.constant dense<0.000000e+00> : vector<8x384xf32>
    %883 = tpu.matmul %882, %700, %cst_242 {dimension_numbers = #tpu.dot_dimension_numbers<[1], [0], [0], [1], [0, 0, 1, 1], [], []>} : vector<8x128xbf16>, vector<128x384xbf16>, vector<8x384xf32> -> vector<8x384xf32>
    %884 = vector.extract_strided_slice %881 {offsets = [0, 0], sizes = [8, 128], strides = [1, 1]} : vector<8x384xf32> to vector<8x128xf32>
    %885 = vector.extract_strided_slice %883 {offsets = [0, 0], sizes = [8, 128], strides = [1, 1]} : vector<8x384xf32> to vector<8x128xf32>
    %886 = arith.addf %884, %885 : vector<8x128xf32>
    %887 = arith.negf %886 : vector<8x128xf32>
    %888 = math.exp %887 : vector<8x128xf32>
    %cst_243 = arith.constant 1.000000e+00 : f32
    %889 = vector.broadcast %cst_243 : f32 to vector<8x128xf32>
    %890 = arith.addf %889, %888 : vector<8x128xf32>
    %891 = arith.divf %889, %890 : vector<8x128xf32>
    %892 = vector.extract_strided_slice %881 {offsets = [0, 128], sizes = [8, 128], strides = [1, 1]} : vector<8x384xf32> to vector<8x128xf32>
    %893 = vector.extract_strided_slice %883 {offsets = [0, 128], sizes = [8, 128], strides = [1, 1]} : vector<8x384xf32> to vector<8x128xf32>
    %894 = arith.addf %892, %893 : vector<8x128xf32>
    %895 = arith.negf %894 : vector<8x128xf32>
    %896 = math.exp %895 : vector<8x128xf32>
    %cst_244 = arith.constant 1.000000e+00 : f32
    %897 = vector.broadcast %cst_244 : f32 to vector<8x128xf32>
    %898 = arith.addf %897, %896 : vector<8x128xf32>
    %899 = arith.divf %897, %898 : vector<8x128xf32>
    %900 = vector.extract_strided_slice %881 {offsets = [0, 256], sizes = [8, 128], strides = [1, 1]} : vector<8x384xf32> to vector<8x128xf32>
    %901 = vector.extract_strided_slice %883 {offsets = [0, 256], sizes = [8, 128], strides = [1, 1]} : vector<8x384xf32> to vector<8x128xf32>
    %902 = arith.addf %901, %701 : vector<8x128xf32>
    %903 = arith.mulf %891, %902 : vector<8x128xf32>
    %904 = arith.addf %900, %903 : vector<8x128xf32>
    %905 = math.tanh %904 : vector<8x128xf32>
    %cst_245 = arith.constant 1.000000e+00 : f32
    %906 = vector.broadcast %cst_245 : f32 to vector<8x128xf32>
    %907 = arith.subf %906, %899 : vector<8x128xf32>
    %908 = arith.mulf %907, %905 : vector<8x128xf32>
    %909 = arith.mulf %899, %875 : vector<8x128xf32>
    %910 = arith.addf %908, %909 : vector<8x128xf32>
    %911 = arith.index_cast %879 : i32 to index
    %c0_246 = arith.constant 0 : index
    %912 = vector.load %arg17[%911, %c0_246] : memref<64x128xf32, #tpu.memory_space<vmem>>, vector<8x128xf32>
    tpu.vector_store %arg17[%911, %c0_246], %910 {strides = array<i32>} : memref<64x128xf32, #tpu.memory_space<vmem>>, vector<8x128xf32>,
    %c6_i32_247 = arith.constant 6 : i32
    %c8_i32_248 = arith.constant 8 : i32
    %913 = arith.muli %c6_i32_247, %c8_i32_248 : i32
    %914 = tpu.assume_multiple %913, 8 : i32
    %915 = arith.index_cast %914 : i32 to index
    %c0_249 = arith.constant 0 : index
    %916 = vector.load %arg16[%915, %c0_249] : memref<64x768xf32, #tpu.memory_space<vmem>>, vector<8x384xf32>
    %917 = arith.truncf %910 : vector<8x128xf32> to vector<8x128xbf16>
    %cst_250 = arith.constant dense<0.000000e+00> : vector<8x384xf32>
    %918 = tpu.matmul %917, %700, %cst_250 {dimension_numbers = #tpu.dot_dimension_numbers<[1], [0], [0], [1], [0, 0, 1, 1], [], []>} : vector<8x128xbf16>, vector<128x384xbf16>, vector<8x384xf32> -> vector<8x384xf32>
    %919 = vector.extract_strided_slice %916 {offsets = [0, 0], sizes = [8, 128], strides = [1, 1]} : vector<8x384xf32> to vector<8x128xf32>
    %920 = vector.extract_strided_slice %918 {offsets = [0, 0], sizes = [8, 128], strides = [1, 1]} : vector<8x384xf32> to vector<8x128xf32>
    %921 = arith.addf %919, %920 : vector<8x128xf32>
    %922 = arith.negf %921 : vector<8x128xf32>
    %923 = math.exp %922 : vector<8x128xf32>
    %cst_251 = arith.constant 1.000000e+00 : f32
    %924 = vector.broadcast %cst_251 : f32 to vector<8x128xf32>
    %925 = arith.addf %924, %923 : vector<8x128xf32>
    %926 = arith.divf %924, %925 : vector<8x128xf32>
    %927 = vector.extract_strided_slice %916 {offsets = [0, 128], sizes = [8, 128], strides = [1, 1]} : vector<8x384xf32> to vector<8x128xf32>
    %928 = vector.extract_strided_slice %918 {offsets = [0, 128], sizes = [8, 128], strides = [1, 1]} : vector<8x384xf32> to vector<8x128xf32>
    %929 = arith.addf %927, %928 : vector<8x128xf32>
    %930 = arith.negf %929 : vector<8x128xf32>
    %931 = math.exp %930 : vector<8x128xf32>
    %cst_252 = arith.constant 1.000000e+00 : f32
    %932 = vector.broadcast %cst_252 : f32 to vector<8x128xf32>
    %933 = arith.addf %932, %931 : vector<8x128xf32>
    %934 = arith.divf %932, %933 : vector<8x128xf32>
    %935 = vector.extract_strided_slice %916 {offsets = [0, 256], sizes = [8, 128], strides = [1, 1]} : vector<8x384xf32> to vector<8x128xf32>
    %936 = vector.extract_strided_slice %918 {offsets = [0, 256], sizes = [8, 128], strides = [1, 1]} : vector<8x384xf32> to vector<8x128xf32>
    %937 = arith.addf %936, %701 : vector<8x128xf32>
    %938 = arith.mulf %926, %937 : vector<8x128xf32>
    %939 = arith.addf %935, %938 : vector<8x128xf32>
    %940 = math.tanh %939 : vector<8x128xf32>
    %cst_253 = arith.constant 1.000000e+00 : f32
    %941 = vector.broadcast %cst_253 : f32 to vector<8x128xf32>
    %942 = arith.subf %941, %934 : vector<8x128xf32>
    %943 = arith.mulf %942, %940 : vector<8x128xf32>
    %944 = arith.mulf %934, %910 : vector<8x128xf32>
    %945 = arith.addf %943, %944 : vector<8x128xf32>
    %946 = arith.index_cast %914 : i32 to index
    %c0_254 = arith.constant 0 : index
    %947 = vector.load %arg17[%946, %c0_254] : memref<64x128xf32, #tpu.memory_space<vmem>>, vector<8x128xf32>
    tpu.vector_store %arg17[%946, %c0_254], %945 {strides = array<i32>} : memref<64x128xf32, #tpu.memory_space<vmem>>, vector<8x128xf32>,
    %c7_i32_255 = arith.constant 7 : i32
    %c8_i32_256 = arith.constant 8 : i32
    %948 = arith.muli %c7_i32_255, %c8_i32_256 : i32
    %949 = tpu.assume_multiple %948, 8 : i32
    %950 = arith.index_cast %949 : i32 to index
    %c0_257 = arith.constant 0 : index
    %951 = vector.load %arg16[%950, %c0_257] : memref<64x768xf32, #tpu.memory_space<vmem>>, vector<8x384xf32>
    %952 = arith.truncf %945 : vector<8x128xf32> to vector<8x128xbf16>
    %cst_258 = arith.constant dense<0.000000e+00> : vector<8x384xf32>
    %953 = tpu.matmul %952, %700, %cst_258 {dimension_numbers = #tpu.dot_dimension_numbers<[1], [0], [0], [1], [0, 0, 1, 1], [], []>} : vector<8x128xbf16>, vector<128x384xbf16>, vector<8x384xf32> -> vector<8x384xf32>
    %954 = vector.extract_strided_slice %951 {offsets = [0, 0], sizes = [8, 128], strides = [1, 1]} : vector<8x384xf32> to vector<8x128xf32>
    %955 = vector.extract_strided_slice %953 {offsets = [0, 0], sizes = [8, 128], strides = [1, 1]} : vector<8x384xf32> to vector<8x128xf32>
    %956 = arith.addf %954, %955 : vector<8x128xf32>
    %957 = arith.negf %956 : vector<8x128xf32>
    %958 = math.exp %957 : vector<8x128xf32>
    %cst_259 = arith.constant 1.000000e+00 : f32
    %959 = vector.broadcast %cst_259 : f32 to vector<8x128xf32>
    %960 = arith.addf %959, %958 : vector<8x128xf32>
    %961 = arith.divf %959, %960 : vector<8x128xf32>
    %962 = vector.extract_strided_slice %951 {offsets = [0, 128], sizes = [8, 128], strides = [1, 1]} : vector<8x384xf32> to vector<8x128xf32>
    %963 = vector.extract_strided_slice %953 {offsets = [0, 128], sizes = [8, 128], strides = [1, 1]} : vector<8x384xf32> to vector<8x128xf32>
    %964 = arith.addf %962, %963 : vector<8x128xf32>
    %965 = arith.negf %964 : vector<8x128xf32>
    %966 = math.exp %965 : vector<8x128xf32>
    %cst_260 = arith.constant 1.000000e+00 : f32
    %967 = vector.broadcast %cst_260 : f32 to vector<8x128xf32>
    %968 = arith.addf %967, %966 : vector<8x128xf32>
    %969 = arith.divf %967, %968 : vector<8x128xf32>
    %970 = vector.extract_strided_slice %951 {offsets = [0, 256], sizes = [8, 128], strides = [1, 1]} : vector<8x384xf32> to vector<8x128xf32>
    %971 = vector.extract_strided_slice %953 {offsets = [0, 256], sizes = [8, 128], strides = [1, 1]} : vector<8x384xf32> to vector<8x128xf32>
    %972 = arith.addf %971, %701 : vector<8x128xf32>
    %973 = arith.mulf %961, %972 : vector<8x128xf32>
    %974 = arith.addf %970, %973 : vector<8x128xf32>
    %975 = math.tanh %974 : vector<8x128xf32>
    %cst_261 = arith.constant 1.000000e+00 : f32
    %976 = vector.broadcast %cst_261 : f32 to vector<8x128xf32>
    %977 = arith.subf %976, %969 : vector<8x128xf32>
    %978 = arith.mulf %977, %975 : vector<8x128xf32>
    %979 = arith.mulf %969, %945 : vector<8x128xf32>
    %980 = arith.addf %978, %979 : vector<8x128xf32>
    %981 = arith.index_cast %949 : i32 to index
    %c0_262 = arith.constant 0 : index
    %982 = vector.load %arg17[%981, %c0_262] : memref<64x128xf32, #tpu.memory_space<vmem>>, vector<8x128xf32>
    tpu.vector_store %arg17[%981, %c0_262], %980 {strides = array<i32>} : memref<64x128xf32, #tpu.memory_space<vmem>>, vector<8x128xf32>,
    %c8_i32_263 = arith.constant 8 : i32
    %c0_264 = arith.constant 0 : index
    %c0_265 = arith.constant 0 : index
    %983 = vector.load %arg17[%c0_264, %c0_265] : memref<64x128xf32, #tpu.memory_space<vmem>>, vector<64x128xf32>
    %984 = arith.truncf %983 : vector<64x128xf32> to vector<64x128xbf16>
    %c0_266 = arith.constant 0 : index
    %c0_267 = arith.constant 0 : index
    %985 = vector.load %arg13[%c0_266, %c0_267] : memref<128x6xbf16, #tpu.memory_space<vmem>>, vector<128x6xbf16>
    %cst_268 = arith.constant dense<0.000000e+00> : vector<64x6xf32>
    %986 = tpu.matmul %984, %985, %cst_268 {dimension_numbers = #tpu.dot_dimension_numbers<[1], [0], [0], [1], [0, 0, 1, 1], [], []>} : vector<64x128xbf16>, vector<128x6xbf16>, vector<64x6xf32> -> vector<64x6xf32>
    %c0_269 = arith.constant 0 : index
    %c0_270 = arith.constant 0 : index
    %987 = vector.load %arg14[%c0_269, %c0_270] : memref<1x6xf32, #tpu.memory_space<vmem>>, vector<1x6xf32>
    %988 = vector.broadcast %987 : vector<1x6xf32> to vector<64x6xf32>
    %989 = arith.addf %986, %988 : vector<64x6xf32>
    %990 = arith.negf %989 : vector<64x6xf32>
    %991 = math.exp %990 : vector<64x6xf32>
    %cst_271 = arith.constant 1.000000e+00 : f32
    %992 = vector.broadcast %cst_271 : f32 to vector<64x6xf32>
    %993 = arith.addf %992, %991 : vector<64x6xf32>
    %994 = arith.divf %992, %993 : vector<64x6xf32>
    %c0_272 = arith.constant 0 : index
    %c0_273 = arith.constant 0 : index
    %995 = vector.load %arg15[%c0_272, %c0_273] : memref<64x6xf32, #tpu.memory_space<vmem>>, vector<64x6xf32>
    tpu.vector_store %arg15[%c0_272, %c0_273], %994 {strides = array<i32>} : memref<64x6xf32, #tpu.memory_space<vmem>>, vector<64x6xf32>,
    return
  }
}

</mosaic_0001>

<bundles_post_ra>
// kernel: datagen_forward.1
= control target key start
LH: loop header
LB: loop body
LE: loop exit
PB: predicated region body
PF: predicated region fallthrough
CT: control target
= control target key end

     0   :  { %v9870_v1 = vmov 0   ;;  %v9872_v41 = vmov 0.0   ;;  %vm6969_vm0 = vmmov 0   ;;  %v97_v62 = vlaneseq  ;;  %s9854_s1 = inlined_call_operand.vmem [shape: bf16[128,384], index: 1, kind: input, shape index: {}]   ;;  %s9855_s0 = inlined_call_operand.vmem [shape: f32[64,128], index: 0, kind: input, shape index: {}]   ;;  %s9856_s2 = inlined_call_operand.vmem [shape: bf16[128,384], index: 2, kind: input, shape index: {}]   ;;  %s9857_s3 = inlined_call_operand.vmem [shape: f32[1,384], index: 3, kind: input, shape index: {}]   ;;  %s9858_s4 = inlined_call_operand.vmem [shape: f32[8,128], index: 4, kind: input, shape index: {}]   ;;  %s9859_s5 = inlined_call_operand.vmem [shape: bf16[128,768], index: 5, kind: input, shape index: {}]   ;;  %s9860_s6 = inlined_call_operand.vmem [shape: bf16[128,768], index: 6, kind: input, shape index: {}]   ;;  %s9861_s7 = inlined_call_operand.vmem [shape: f32[1,768], index: 7, kind: input, shape index: {}]   ;;  %s9862_s8 = inlined_call_operand.vmem [shape: f32[16,128], index: 8, kind: input, shape index: {}]   ;;  %s9863_s9 = inlined_call_operand.vmem [shape: bf16[128,384], index: 9, kind: input, shape index: {}]   ;;  %s9864_s10 = inlined_call_operand.vmem [shape: bf16[128,384], index: 10, kind: input, shape index: {}]   ;;  %s9865_s11 = inlined_call_operand.vmem [shape: f32[1,384], index: 11, kind: input, shape index: {}]   ;;  %s9866_s12 = inlined_call_operand.vmem [shape: f32[8,128], index: 12, kind: input, shape index: {}]   ;;  %s9867_s13 = inlined_call_operand.vmem [shape: bf16[128,6], index: 13, kind: input, shape index: {}]   ;;  %s9868_s14 = inlined_call_operand.vmem [shape: f32[1,6], index: 14, kind: input, shape index: {}]   ;;  %s9869_s15 = inlined_call_operand.vmem [shape: f32[64,6], index: 15, kind: output, shape index: {}]  }
   0x1   :  { %v6246_v0 = vld [vmem:[%s9854_s1 + $0xac] ss:$12 sps:$4 sm:$0xff]   ;;  %272 = vmatprep.mubr.bf16.mxu0 %v9870_v1  ;;  %v6248_v2 = vld [vmem:[%s9854_s1 + $0xa8] ss:$12 sps:$4 sm:$0xff]   ;;  %v6251_v4 = vld [vmem:[%s9854_s1 + $0x90] ss:$12 sps:$4 sm:$0xff]  }
   0x2   :  { %240 = vmatprep.subr.bf16.mxu0 %v6246_v0  ;;  %v6249_v3 = vld [vmem:[%s9854_s1 + $0x94] ss:$12 sps:$4 sm:$0xff]   ;;  %v6252_v5 = vld [vmem:[%s9854_s1 + $0x7c] ss:$12 sps:$4 sm:$0xff]   ;;  %v6254_v6 = vld [vmem:[%s9854_s1 + $0x78] ss:$12 sps:$4 sm:$0xff]  }
   0x3   :  { %241 = vmatpush1.bf16.msra.mxu0 %v6248_v2  ;;  %v6255_v7 = vld [vmem:[%s9854_s1 + $0x64] ss:$12 sps:$4 sm:$0xff]   ;;  %v6257_v9 = vld [vmem:[%s9854_s1 + $0x60] ss:$12 sps:$4 sm:$0xff]   ;;  %v6260_v14 = vld [vmem:[%s9854_s1 + $0x48] ss:$12 sps:$4 sm:$0xff]  }
   0x4   :  { %242 = vmatprep.subr.bf16.mxu0 %v6249_v3  ;;  %v6267_v8 = vld [vmem:[%s9854_s1 + $0xb0] ss:$12 sps:$4 sm:$0xff]   ;;  %v6258_v10 = vld [vmem:[%s9854_s1 + $0x4c] ss:$12 sps:$4 sm:$0xff]   ;;  %v51_v12 = vld [vmem:[%s9855_s0] sm:$0xff]  ;;  %v7344_v63 = vshrl.u32 %v97_v62, 7 }
   0x5   :  { %5851 = vmatprep.subr.bf16.mxu1 %v6267_v8  ;;  %v6271_v11 = vld [vmem:[%s9854_s1 + $0x98] ss:$12 sps:$4 sm:$0xff]   ;;  %v52_v13 = vld [vmem:[%s9855_s0 + $0x8] sm:$0xff]  ;;  %v6261_v17 = vld [vmem:[%s9854_s1 + $0x34] ss:$12 sps:$4 sm:$0xff]   ;;  %vm5378_vm1 = vcmask 48128  }
   0x6   :  { %5852 = vmatpush3.bf16.msra.mxu1 %v6267_v8  ;;  %v59_v15 = vpack.c.bf16 %v52_v13, %v51_v12  ;;  %v6275_v16 = vld [vmem:[%s9854_s1 + $0x80] ss:$12 sps:$4 sm:$0xff]   ;;  %v6279_v18 = vld [vmem:[%s9854_s1 + $0x68] ss:$12 sps:$4 sm:$0xff]   ;;  %v6263_v19 = vld [vmem:[%s9854_s1 + $0x30] ss:$12 sps:$4 sm:$0xff]  }
   0x7   :  { %243 = vmatpush1.bf16.msra.mxu0 %v6251_v4  ;;  %5853 = vmatprep.subr.bf16.mxu1 %v6271_v11  ;;  %v6264_v20 = vld [vmem:[%s9854_s1 + $0x1c] ss:$12 sps:$4 sm:$0xff]   ;;  %v6266_v22 = vld [vmem:[%s9854_s1 + $0x18] ss:$12 sps:$4 sm:$0xff]   ;;  %v6270_v25 = vld [vmem:[%s9854_s1] ss:$12 sps:$4 sm:$0xff]  }
   0x8   :  { %244 = vmatprep.subr.bf16.mxu0 %v6252_v5  ;;  %5867 = vmatprep.mubr.bf16.mxu1 %v59_v15  ;;  %v6283_v21 = vld [vmem:[%s9854_s1 + $0x50] ss:$12 sps:$4 sm:$0xff]   ;;  %v6287_v24 = vld [vmem:[%s9854_s1 + $0x38] ss:$12 sps:$4 sm:$0xff]   ;;  %v6291_v27 = vld [vmem:[%s9854_s1 + $0x20] ss:$12 sps:$4 sm:$0xff]  }
   0x9   :  { %v6268_v23 = vld [vmem:[%s9854_s1 + $0x4] ss:$12 sps:$4 sm:$0xff]   ;;  %v7126_v26 = vld [vmem:[%s9856_s2 + $0xac] ss:$12 sps:$4 sm:$0xff]   ;;  %v7134_v28 = vld [vmem:[%s9856_s2 + $0xa8] ss:$12 sps:$4 sm:$0xff]  }
   0xa   :  { %5854 = vmatpush3.bf16.msra.mxu1 %v6271_v11  ;;  %v7140_v29 = vld [vmem:[%s9856_s2 + $0x94] ss:$12 sps:$4 sm:$0xff]   ;;  %v7145_v30 = vld [vmem:[%s9856_s2 + $0x90] ss:$12 sps:$4 sm:$0xff]   ;;  %v7168_v36 = vld [vmem:[%s9856_s2 + $0x78] ss:$12 sps:$4 sm:$0xff]  }
   0xb   :  { %245 = vmatpush1.bf16.msra.mxu0 %v6254_v6  ;;  %5855 = vmatprep.subr.bf16.mxu1 %v6275_v16  ;;  %v53_v31 = vld [vmem:[%s9855_s0 + $0x10] sm:$0xff]  ;;  %v54_v33 = vld [vmem:[%s9855_s0 + $0x18] sm:$0xff]  ;;  %v55_v38 = vld [vmem:[%s9855_s0 + $0x20] sm:$0xff]  ;;  %9946 = vst [vmem:[#allocation6_spill] sm:$0xff] %v7344_v63  ;;  %v7347_v0 = vsub.s32 0, %v7344_v63  ;;  %v7354_v6 = vsub.s32 2, %v7344_v63 }
   0xc   :  { %246 = vmatprep.subr.bf16.mxu0 %v6255_v7  ;;  %v6295_v32 = vld [vmem:[%s9854_s1 + $0x8] ss:$12 sps:$4 sm:$0xff]   ;;  %v60_v35 = vpack.c.bf16 %v54_v33, %v53_v31  ;;  %v7174_v37 = vld [vmem:[%s9856_s2 + $0x64] ss:$12 sps:$4 sm:$0xff]   ;;  %v7192_v42 = vld [vmem:[%s9856_s2 + $0x60] ss:$12 sps:$4 sm:$0xff]  }
   0xd   :  { %v7162_v34 = vld [vmem:[%s9856_s2 + $0x7c] ss:$12 sps:$4 sm:$0xff]   ;;  %v7199_v44 = vld [vmem:[%s9856_s2 + $0x4c] ss:$12 sps:$4 sm:$0xff]   ;;  %v57_v47 = vld [vmem:[%s9855_s0 + $0x30] sm:$0xff]  ;;  %9947 = vst [vmem:[#allocation7_spill] sm:$0xff] %v7347_v0 }
   0xe   :  { %5856 = vmatpush3.bf16.msra.mxu1 %v6275_v16  ;;  %v56_v39 = vld [vmem:[%s9855_s0 + $0x28] sm:$0xff]  ;;  %v7185_v40 = vld [vmem:[%s9856_s2 + $0xb0] ss:$12 sps:$4 sm:$0xff]   ;;  %v7205_v45 = vld [vmem:[%s9856_s2 + $0x98] ss:$12 sps:$4 sm:$0xff]   ;;  %9948 = vst [vmem:[#allocation8_spill] sm:$0xff] %v7354_v6 }
   0xf   :  { %247 = vmatpush1.bf16.msra.mxu0 %v6257_v9  ;;  %5857 = vmatprep.subr.bf16.mxu1 %v6279_v18  ;;  %v61_v43 = vpack.c.bf16 %v56_v39, %v55_v38  ;;  %v7212_v46 = vld [vmem:[%s9856_s2 + $0x48] ss:$12 sps:$4 sm:$0xff]   ;;  %v58_v48 = vld [vmem:[%s9855_s0 + $0x38] sm:$0xff]  ;;  %v7230_v50 = vld [vmem:[%s9856_s2 + $0x80] ss:$12 sps:$4 sm:$0xff]   ;;  %v7357_v8 = vsub.s32 1, %v7344_v63 }
  0x10   :  { %248 = vmatprep.subr.bf16.mxu0 %v6258_v10  ;;  %v7224_v49 = vld [vmem:[%s9856_s2 + $0x34] ss:$12 sps:$4 sm:$0xff]   ;;  %v62_v51 = vpack.c.bf16 %v58_v48, %v57_v47  ;;  %v7237_v52 = vld [vmem:[%s9856_s2 + $0x30] ss:$12 sps:$4 sm:$0xff]   ;;  %v7259_v55 = vld [vmem:[%s9856_s2 + $0x18] ss:$12 sps:$4 sm:$0xff]  }
  0x11   :  { %v7244_v53 = vld [vmem:[%s9856_s2 + $0x1c] ss:$12 sps:$4 sm:$0xff]   ;;  %v7265_v56 = vld [vmem:[%s9856_s2 + $0x4] ss:$12 sps:$4 sm:$0xff]   ;;  %v7278_v58 = vld [vmem:[%s9856_s2] ss:$12 sps:$4 sm:$0xff]  }
  0x12   :  { %5858 = vmatpush3.bf16.msra.mxu1 %v6279_v18  ;;  %v7250_v54 = vld [vmem:[%s9856_s2 + $0x68] ss:$12 sps:$4 sm:$0xff]   ;;  %v7271_v57 = vld [vmem:[%s9856_s2 + $0x50] ss:$12 sps:$4 sm:$0xff]   ;;  %v7286_v59 = vld [vmem:[%s9856_s2 + $0x38] ss:$12 sps:$4 sm:$0xff]  }
  0x13   :  { %249 = vmatpush1.bf16.msra.mxu0 %v6260_v14  ;;  %5859 = vmatprep.subr.bf16.mxu1 %v6283_v21  ;;  %v7295_v60 = vld [vmem:[%s9856_s2 + $0x20] ss:$12 sps:$4 sm:$0xff]   ;;  %v7306_v61 = vld [vmem:[%s9856_s2 + $0x8] ss:$12 sps:$4 sm:$0xff]   ;;  %9949 = vst [vmem:[#allocation9_spill] sm:$0xff] %v7357_v8 }
  0x14   :  { %250 = vmatprep.subr.bf16.mxu0 %v6261_v17  ;;  %v95_v2 = vld [vmem:[%s9857_s3] sm:$0x7] }
  0x15   :  { %v100_v5 = vrot.slane %v95_v2, %v7347_v0  ;;  %v7364_v11 = vrot.slane %v95_v2, %v7354_v6  ;;  %v7367_v13 = vrot.slane %v95_v2, %v7357_v8 }
  0x16   :  { %5860 = vmatpush3.bf16.msra.mxu1 %v6283_v21 }
  0x17   :  { %251 = vmatpush1.bf16.msra.mxu0 %v6263_v19  ;;  %5861 = vmatprep.subr.bf16.mxu1 %v6287_v24 }
  0x18   :  { %252 = vmatprep.subr.bf16.mxu0 %v6264_v20 }
  0x1a   :  { %5862 = vmatpush3.bf16.msra.mxu1 %v6287_v24 }
  0x1b   :  { %253 = vmatpush1.bf16.msra.mxu0 %v6266_v22  ;;  %5863 = vmatprep.subr.bf16.mxu1 %v6291_v27 }
  0x1c   :  { %254 = vmatprep.subr.bf16.mxu0 %v6268_v23 }
  0x1e   :  { %5864 = vmatpush3.bf16.msra.mxu1 %v6291_v27 }
  0x1f   :  { %255 = vmatpush1.bf16.msra.mxu0 %v6270_v25  ;;  %5865 = vmatprep.subr.bf16.mxu1 %v6295_v32 }
  0x20   :  { %569 = vmatprep.subr.bf16.mxu0 %v7126_v26 }
  0x22   :  { %273 = vmatmul.mubr.bf16.vlgmr.msra.gmra.mxu0 %v59_v15  ;;  %5866 = vmatpush3.bf16.msra.mxu1 %v6295_v32 }
  0x23   :  { %570 = vmatpush1.bf16.msra.mxu0 %v7134_v28  ;;  %282 = vmatprep.mubr.bf16.mxu0 %v9870_v1 }
  0x24   :  { %571 = vmatprep.subr.bf16.mxu0 %v7140_v29  ;;  %5875 = vmatprep.subr.bf16.mxu1 %v9872_v41 }
  0x25   :  { %5868 = vmatmul.mubr.bf16.vlgmr.msra.gmra.mxu1 %v60_v35 }
  0x26   :  { %5876 = vmatpush3.bf16.msra.mxu1 %v7185_v40  ;;  %5871 = vmatprep.mubr.bf16.mxu1 %v61_v43 }
  0x27   :  { %572 = vmatpush1.bf16.msra.mxu0 %v7145_v30  ;;  %5877 = vmatprep.subr.bf16.mxu1 %v9872_v41 }
  0x28   :  { %573 = vmatprep.subr.bf16.mxu0 %v7162_v34 }
  0x2a   :  { %283 = vmatmul.mubr.bf16.gmra.mxu0 %v60_v35  ;;  %5878 = vmatpush3.bf16.msra.mxu1 %v7205_v45 }
  0x2b   :  { %574 = vmatpush1.bf16.msra.mxu0 %v7168_v36  ;;  %292 = vmatprep.mubr.bf16.mxu0 %v9870_v1 }
  0x2c   :  { %575 = vmatprep.subr.bf16.mxu0 %v7174_v37  ;;  %5879 = vmatprep.subr.bf16.mxu1 %v9872_v41 }
  0x2d   :  { %5872 = vmatmul.mubr.bf16.gmra.mxu1 %v62_v51 }
  0x2e   :  { %5880 = vmatpush3.bf16.msra.mxu1 %v7230_v50  ;;  %5891 = vmatprep.mubr.msk.bf16.mxu1 %vm6969_vm0, %v9872_v41 }
  0x2f   :  { %576 = vmatpush1.bf16.msra.mxu0 %v7192_v42  ;;  %5881 = vmatprep.subr.bf16.mxu1 %v9872_v41 }
  0x30   :  { %577 = vmatprep.subr.bf16.mxu0 %v7199_v44 }
  0x32   :  { %293 = vmatmul.mubr.bf16.gmra.mxu0 %v61_v43  ;;  %5882 = vmatpush3.bf16.msra.mxu1 %v7250_v54 }
  0x33   :  { %578 = vmatpush1.bf16.msra.mxu0 %v7212_v46  ;;  %302 = vmatprep.mubr.bf16.mxu0 %v9870_v1 }
  0x34   :  { %579 = vmatprep.subr.bf16.mxu0 %v7224_v49  ;;  %5883 = vmatprep.subr.bf16.mxu1 %v9872_v41 }
  0x36   :  { %5884 = vmatpush3.bf16.msra.mxu1 %v7271_v57 }
  0x37   :  { %580 = vmatpush1.bf16.msra.mxu0 %v7237_v52  ;;  %5885 = vmatprep.subr.bf16.mxu1 %v9872_v41 }
  0x38   :  { %581 = vmatprep.subr.bf16.mxu0 %v7244_v53 }
  0x3a   :  { %303 = vmatmul.mubr.bf16.gmra.mxu0 %v62_v51  ;;  %5886 = vmatpush3.bf16.msra.mxu1 %v7286_v59 }
  0x3b   :  { %582 = vmatpush1.bf16.msra.mxu0 %v7259_v55  ;;  %601 = vmatprep.mubr.bf16.mxu0 %v9870_v1 }
  0x3c   :  { %583 = vmatprep.subr.bf16.mxu0 %v7265_v56  ;;  %5887 = vmatprep.subr.bf16.mxu1 %v9872_v41 }
  0x3e   :  { %5888 = vmatpush3.bf16.msra.mxu1 %v7295_v60 }
  0x3f   :  { %584 = vmatpush1.bf16.msra.mxu0 %v7278_v58  ;;  %5889 = vmatprep.subr.bf16.mxu1 %v9872_v41 }
  0x40   :  { %680 = vmatprep.subr.bf16.mxu0 %v7126_v26 }
  0x42   :  { %602 = vmatmul.mubr.bf16.vlgmr.msra.gmra.mxu0 %v9870_v1  ;;  %5890 = vmatpush3.bf16.msra.mxu1 %v7306_v61 }
  0x43   :  { %681 = vmatpush1.bf16.msra.mxu0 %v7134_v28  ;;  %712 = vmatprep.mubr.bf16.mxu0 %v9870_v1 }
  0x44   :  { %682 = vmatprep.subr.bf16.mxu0 %v7140_v29  ;;  %5895 = vmatprep.subr.bf16.mxu1 %v9872_v41 }
  0x45   :  { %5892 = vmatmul.mubr.bf16.vlgmr.msra.gmra.mxu1 %v9870_v1 }
  0x46   :  { %5896 = vmatpush3.bf16.msra.mxu1 %v7185_v40  ;;  %5911 = vmatprep.mubr.msk.bf16.mxu1 %vm6969_vm0, %v9872_v41 }
  0x47   :  { %683 = vmatpush1.bf16.msra.mxu0 %v7145_v30  ;;  %5897 = vmatprep.subr.bf16.mxu1 %v9872_v41 }
  0x48   :  { %684 = vmatprep.subr.bf16.mxu0 %v7162_v34 }
  0x4a   :  { %5898 = vmatpush3.bf16.msra.mxu1 %v7205_v45 }
  0x4b   :  { %685 = vmatpush1.bf16.msra.mxu0 %v7168_v36  ;;  %5899 = vmatprep.subr.bf16.mxu1 %v9872_v41 }
  0x4c   :  { %686 = vmatprep.subr.bf16.mxu0 %v7174_v37 }
  0x4e   :  { %5900 = vmatpush3.bf16.msra.mxu1 %v7230_v50 }
  0x4f   :  { %687 = vmatpush1.bf16.msra.mxu0 %v7192_v42  ;;  %5901 = vmatprep.subr.bf16.mxu1 %v9872_v41 }
  0x50   :  { %688 = vmatprep.subr.bf16.mxu0 %v7199_v44 }
  0x52   :  { %5902 = vmatpush3.bf16.msra.mxu1 %v7250_v54 }
  0x53   :  { %689 = vmatpush1.bf16.msra.mxu0 %v7212_v46  ;;  %5903 = vmatprep.subr.bf16.mxu1 %v9872_v41 }
  0x54   :  { %690 = vmatprep.subr.bf16.mxu0 %v7224_v49 }
  0x56   :  { %5904 = vmatpush3.bf16.msra.mxu1 %v7271_v57 }
  0x57   :  { %691 = vmatpush1.bf16.msra.mxu0 %v7237_v52  ;;  %5905 = vmatprep.subr.bf16.mxu1 %v9872_v41 }
  0x58   :  { %692 = vmatprep.subr.bf16.mxu0 %v7244_v53 }
  0x5a   :  { %5906 = vmatpush3.bf16.msra.mxu1 %v7286_v59 }
  0x5b   :  { %693 = vmatpush1.bf16.msra.mxu0 %v7259_v55  ;;  %5907 = vmatprep.subr.bf16.mxu1 %v9872_v41 }
  0x5c   :  { %694 = vmatprep.subr.bf16.mxu0 %v7265_v56 }
  0x5e   :  { %5908 = vmatpush3.bf16.msra.mxu1 %v7295_v60 }
  0x5f   :  { %695 = vmatpush1.bf16.msra.mxu0 %v7278_v58  ;;  %5909 = vmatprep.subr.bf16.mxu1 %v9872_v41 }
  0x60   :  { %792 = vmatprep.subr.bf16.mxu0 %v7126_v26 }
  0x62   :  { %5910 = vmatpush3.bf16.msra.mxu1 %v7306_v61 }
  0x63   :  { %5915 = vmatprep.subr.bf16.mxu1 %v9872_v41 }
  0xe2   :  { %v274_v3 = vpop.f32.mrf.mxu0 }
  0xe4   :  { %v276_v4 = vpop.f32.mrf.mxu0 }
  0xe5   :  { %v5869_v16 = vpop.f32.mrf.mxu1 }
  0xe6   :  { %v278_v7 = vpop.f32.mrf.mxu0  ;;  %v7375_v18 = vadd.f32 %v5869_v16, %v7364_v11 }
  0xe7   :  { %v7359_v9 = vadd.f32 %v278_v7, %v100_v5  ;;  %v347_v20 = vpop.f32.mrf.mxu1 }
  0xe8   :  { %v7361_v10 = vpop.f32.mrf.mxu0 }
  0xe9   :  { %v5870_v23 = vpop.f32.mrf.mxu1 }
  0xea   :  { %v284_v12 = vpop.f32.mrf.mxu0  ;;  %v7382_v24 = vadd.f32 %v5870_v23, %v7364_v11 }
  0xeb   :  { %v7369_v14 = vadd.f32 %v284_v12, %v100_v5  ;;  %v7384_v27 = vpop.f32.mrf.mxu1 }
  0xec   :  { %v286_v15 = vpop.f32.mrf.mxu0 }
  0xed   :  { %v7372_v17 = vadd.f32 %v286_v15, %v7367_v13  ;;  %v5873_v33 = vpop.f32.mrf.mxu1 }
  0xee   :  { %v288_v19 = vpop.f32.mrf.mxu0  ;;  %v7392_v38 = vadd.f32 %v5873_v33, %v7364_v11 }
  0xef   :  { %v7377_v21 = vadd.f32 %v288_v19, %v100_v5  ;;  %v363_v43 = vpop.f32.mrf.mxu1 }
  0xf0   :  { %v7379_v22 = vpop.f32.mrf.mxu0  ;;  %9950 = vst [vmem:[#allocation10_spill] sm:$0xff] %v7392_v38  ;;  %v7397_v48 = vadd.f32 %v363_v43, %v7364_v11 }
  0xf1   :  { %v5874_v62 = vpop.f32.mrf.mxu1 }
  0xf2   :  { %v294_v25 = vpop.f32.mrf.mxu0  ;;  %v7402_v2 = vadd.f32 %v5874_v62, %v7364_v11  ;;  %v277_v62 = vadd.f32 %v276_v4, %v7367_v13 }
  0xf3   :  { %v7386_v31 = vadd.f32 %v294_v25, %v100_v5  ;;  %v7414_v6 = vpop.f32.mrf.mxu1 }
  0xf4   :  { %v296_v32 = vpop.f32.mrf.mxu0  ;;  %9951 = vst [vmem:[#allocation11_spill] sm:$0xff] %v7402_v2 }
  0xf5   :  { %v7389_v35 = vadd.f32 %v296_v32, %v7367_v13  ;;  %v275_v32 = vadd.f32 %v274_v3, %v100_v5 }
  0xf6   :  { %v298_v39 = vpop.f32.mrf.mxu0 }
  0xf7   :  { %v7394_v47 = vadd.f32 %v298_v39, %v100_v5 }
  0xf8   :  { %v7399_v51 = vpop.f32.mrf.mxu0 }
  0xfa   :  { %v304_v7 = vpop.f32.mrf.mxu0 }
  0xfb   :  { %v7404_v12 = vadd.f32 %v304_v7, %v100_v5 }
  0xfc   :  { %v306_v15 = vpop.f32.mrf.mxu0 }
  0xfd   :  { %v7407_v16 = vadd.f32 %v306_v15, %v7367_v13 }
  0xfe   :  { %v308_v19 = vpop.f32.mrf.mxu0 }
  0xff   :  { %v7409_v23 = vadd.f32 %v308_v19, %v100_v5 }
 0x100   :  { %v7411_v25 = vpop.f32.mrf.mxu0 }
 0x101   :  { %9952 = vst [vmem:[#allocation12_spill] sm:$0xff] %v7409_v23  ;;  %9953 = vst [vmem:[#allocation13_spill] sm:$0xff] %v7411_v25 }
 0x102   :  { %v603_v33 = vpop.f32.mrf.mxu0 }
 0x103   :  { %v650_v39 = vadd.f32 %v603_v33, %v275_v32  ;;  %v348_v33 = vadd.f32 %v347_v20, %v7364_v11  ;;  %v9954_v20 = vmov 0.0  }
 0x104   :  { %v605_v43 = vpop.f32.mrf.mxu0 }
 0x105   :  { %v5446_v1 = vmul.f32 -1.442695, %v650_v39  ;;  %v657_v8 = vadd.f32 %v605_v43, %v277_v62  ;;  %v644_v15 = vpop.f32.mrf.mxu1 }
 0x106   :  { %v607_v41 = vpop.f32.mrf.mxu0 }
 0x107   :  { %6526 = vpow2.f32 %v5446_v1  ;;  %v5447_v0 = vmul.f32 -1.442695, %v657_v8  ;;  %v5893_v63 = vpop.f32.mrf.mxu1  ;;  %v7419_v41 = vld [vmem:[%s9858_s4] sm:$0xff] }
 0x108   :  { %v608_v7 = vpop.f32.mrf.mxu0  ;;  %v664_v4 = vadd.f32 %v644_v15, %v7419_v41  ;;  %v9955_v15 = vmov 0  }
 0x109   :  { %v647_v19 = vpop.f32.mrf.mxu1  ;;  %6528 = vpow2.f32 %v5447_v0 }
 0x10b   :  { %v5894_v2 = vpop.f32.mrf.mxu1 }
 0x114   :  { %v6527_v25 = vpop.eup %6526 }
 0x115   :  { %v654_v3 = vadd.f32 1.0, %v6527_v25 }
 0x116   :  { %v6529_v5 = vpop.eup %6528 }
 0x117   :  { %6530 = vrcp.f32 %v654_v3  ;;  %v661_v1 = vadd.f32 1.0, %v6529_v5 }
 0x119   :  { %6532 = vrcp.f32 %v661_v1 }
 0x124   :  { %v6531_v32 = vpop.eup %6530 }
 0x125   :  { %v665_v63 = vmul.f32 %v6531_v32, %v664_v4 }
 0x126   :  { %v6533_v0 = vpop.eup %6532 }
 0x127   :  { %v666_v8 = vadd.f32 %v665_v63, %v348_v33  ;;  %v668_v2 = vsub.f32 1.0, %v6533_v0  ;;  %v670_v43 = vmul.f32 0.0, %v6533_v0 }
 0x129   :  { %6534 = vtanh.f32 %v666_v8  ;;  %v281_v8 = vadd.f32 %v7361_v10, %v7367_v13 }
 0x136   :  { %v6535_v25 = vpop.eup %6534 }
 0x137   :  { %v669_v39 = vmul.f32 %v6535_v25, %v668_v2 }
 0x139   :  { %v7423_v62 = vadd.f32 %v670_v43, %v669_v39 }
 0x13b   :  { %v679_v7 = vpack.c.bf16 %v7423_v62, %v7423_v62 }
 0x13d   :  { %713 = vmatmul.mubr.bf16.vlgmr.msra.gmra.mxu0 %v679_v7  ;;  %5912 = vmatmul.mubr.bf16.vlgmr.msra.gmra.mxu1 %v679_v7 }
 0x13e   :  { %793 = vmatpush1.bf16.msra.mxu0 %v7134_v28  ;;  %5916 = vmatpush3.bf16.msra.mxu1 %v7185_v40 }
 0x13f   :  { %794 = vmatprep.subr.bf16.mxu0 %v7140_v29  ;;  %5917 = vmatprep.subr.bf16.mxu1 %v9954_v20 }
 0x140   :  { %824 = vmatprep.mubr.bf16.mxu0 %v9955_v15  ;;  %5931 = vmatprep.mubr.msk.bf16.mxu1 %vm6969_vm0, %v9954_v20 }
 0x142   :  { %795 = vmatpush1.bf16.msra.mxu0 %v7145_v30  ;;  %5918 = vmatpush3.bf16.msra.mxu1 %v7205_v45 }
 0x143   :  { %796 = vmatprep.subr.bf16.mxu0 %v7162_v34  ;;  %5919 = vmatprep.subr.bf16.mxu1 %v9954_v20 }
 0x146   :  { %797 = vmatpush1.bf16.msra.mxu0 %v7168_v36  ;;  %5920 = vmatpush3.bf16.msra.mxu1 %v7230_v50 }
 0x147   :  { %798 = vmatprep.subr.bf16.mxu0 %v7174_v37  ;;  %5921 = vmatprep.subr.bf16.mxu1 %v9954_v20 }
 0x14a   :  { %799 = vmatpush1.bf16.msra.mxu0 %v7192_v42  ;;  %5922 = vmatpush3.bf16.msra.mxu1 %v7250_v54 }
 0x14b   :  { %800 = vmatprep.subr.bf16.mxu0 %v7199_v44  ;;  %5923 = vmatprep.subr.bf16.mxu1 %v9954_v20 }
 0x14e   :  { %801 = vmatpush1.bf16.msra.mxu0 %v7212_v46  ;;  %5924 = vmatpush3.bf16.msra.mxu1 %v7271_v57 }
 0x14f   :  { %802 = vmatprep.subr.bf16.mxu0 %v7224_v49  ;;  %5925 = vmatprep.subr.bf16.mxu1 %v9954_v20 }
 0x152   :  { %803 = vmatpush1.bf16.msra.mxu0 %v7237_v52  ;;  %5926 = vmatpush3.bf16.msra.mxu1 %v7286_v59 }
 0x153   :  { %804 = vmatprep.subr.bf16.mxu0 %v7244_v53  ;;  %5927 = vmatprep.subr.bf16.mxu1 %v9954_v20 }
 0x156   :  { %805 = vmatpush1.bf16.msra.mxu0 %v7259_v55  ;;  %5928 = vmatpush3.bf16.msra.mxu1 %v7295_v60 }
 0x157   :  { %806 = vmatprep.subr.bf16.mxu0 %v7265_v56  ;;  %5929 = vmatprep.subr.bf16.mxu1 %v9954_v20 }
 0x15a   :  { %807 = vmatpush1.bf16.msra.mxu0 %v7278_v58  ;;  %5930 = vmatpush3.bf16.msra.mxu1 %v7306_v61 }
 0x15b   :  { %904 = vmatprep.subr.bf16.mxu0 %v7126_v26  ;;  %5935 = vmatprep.subr.bf16.mxu1 %v9954_v20 }
 0x1fd   :  { %v714_v19 = vpop.f32.mrf.mxu0  ;;  %v755_v3 = vpop.f32.mrf.mxu1 }
 0x1fe   :  { %v761_v5 = vadd.f32 %v714_v19, %v7359_v9  ;;  %v775_v9 = vadd.f32 %v755_v3, %v7419_v41 }
 0x1ff   :  { %v716_v1 = vpop.f32.mrf.mxu0  ;;  %v5913_v4 = vpop.f32.mrf.mxu1 }
 0x200   :  { %v5448_v32 = vmul.f32 -1.442695, %v761_v5  ;;  %v768_v25 = vadd.f32 %v716_v1, %v281_v8  ;;  %v351_v5 = vadd.f32 %v7384_v27, %v7364_v11 }
 0x201   :  { %v718_v33 = vpop.f32.mrf.mxu0  ;;  %v758_v63 = vpop.f32.mrf.mxu1 }
 0x202   :  { %6536 = vpow2.f32 %v5448_v32  ;;  %v5449_v39 = vmul.f32 -1.442695, %v768_v25 }
 0x203   :  { %v719_v0 = vpop.f32.mrf.mxu0  ;;  %v5914_v2 = vpop.f32.mrf.mxu1 }
 0x204   :  { %6538 = vpow2.f32 %v5449_v39 }
 0x20f   :  { %v6537_v43 = vpop.eup %6536 }
 0x210   :  { %v765_v7 = vadd.f32 1.0, %v6537_v43 }
 0x211   :  { %v6539_v23 = vpop.eup %6538 }
 0x212   :  { %6540 = vrcp.f32 %v765_v7  ;;  %v772_v38 = vadd.f32 1.0, %v6539_v23 }
 0x214   :  { %6542 = vrcp.f32 %v772_v38 }
 0x21f   :  { %v6541_v19 = vpop.eup %6540 }
 0x220   :  { %v776_v4 = vmul.f32 %v6541_v19, %v775_v9 }
 0x221   :  { %v6543_v32 = vpop.eup %6542 }
 0x222   :  { %v777_v10 = vadd.f32 %v776_v4, %v351_v5  ;;  %v779_v33 = vsub.f32 1.0, %v6543_v32  ;;  %v781_v8 = vmul.f32 %v6543_v32, %v7423_v62 }
 0x224   :  { %6544 = vtanh.f32 %v777_v10 }
 0x231   :  { %v6545_v1 = vpop.eup %6544 }
 0x232   :  { %v780_v63 = vmul.f32 %v6545_v1, %v779_v33 }
 0x234   :  { %v7469_v0 = vadd.f32 %v781_v8, %v780_v63 }
 0x236   :  { %v791_v23 = vpack.c.bf16 %v7469_v0, %v7469_v0 }
 0x238   :  { %825 = vmatmul.mubr.bf16.vlgmr.msra.gmra.mxu0 %v791_v23  ;;  %5932 = vmatmul.mubr.bf16.vlgmr.msra.gmra.mxu1 %v791_v23 }
 0x239   :  { %905 = vmatpush1.bf16.msra.mxu0 %v7134_v28  ;;  %5936 = vmatpush3.bf16.msra.mxu1 %v7185_v40 }
 0x23a   :  { %906 = vmatprep.subr.bf16.mxu0 %v7140_v29  ;;  %5937 = vmatprep.subr.bf16.mxu1 %v9954_v20 }
 0x23b   :  { %936 = vmatprep.mubr.bf16.mxu0 %v9955_v15  ;;  %5951 = vmatprep.mubr.msk.bf16.mxu1 %vm6969_vm0, %v9954_v20 }
 0x23d   :  { %907 = vmatpush1.bf16.msra.mxu0 %v7145_v30  ;;  %5938 = vmatpush3.bf16.msra.mxu1 %v7205_v45 }
 0x23e   :  { %908 = vmatprep.subr.bf16.mxu0 %v7162_v34  ;;  %5939 = vmatprep.subr.bf16.mxu1 %v9954_v20 }
 0x241   :  { %909 = vmatpush1.bf16.msra.mxu0 %v7168_v36  ;;  %5940 = vmatpush3.bf16.msra.mxu1 %v7230_v50 }
 0x242   :  { %910 = vmatprep.subr.bf16.mxu0 %v7174_v37  ;;  %5941 = vmatprep.subr.bf16.mxu1 %v9954_v20 }
 0x245   :  { %911 = vmatpush1.bf16.msra.mxu0 %v7192_v42  ;;  %5942 = vmatpush3.bf16.msra.mxu1 %v7250_v54 }
 0x246   :  { %912 = vmatprep.subr.bf16.mxu0 %v7199_v44  ;;  %5943 = vmatprep.subr.bf16.mxu1 %v9954_v20 }
 0x249   :  { %913 = vmatpush1.bf16.msra.mxu0 %v7212_v46  ;;  %5944 = vmatpush3.bf16.msra.mxu1 %v7271_v57 }
 0x24a   :  { %914 = vmatprep.subr.bf16.mxu0 %v7224_v49  ;;  %5945 = vmatprep.subr.bf16.mxu1 %v9954_v20 }
 0x24d   :  { %915 = vmatpush1.bf16.msra.mxu0 %v7237_v52  ;;  %5946 = vmatpush3.bf16.msra.mxu1 %v7286_v59 }
 0x24e   :  { %916 = vmatprep.subr.bf16.mxu0 %v7244_v53  ;;  %5947 = vmatprep.subr.bf16.mxu1 %v9954_v20 }
 0x251   :  { %917 = vmatpush1.bf16.msra.mxu0 %v7259_v55  ;;  %5948 = vmatpush3.bf16.msra.mxu1 %v7295_v60 }
 0x252   :  { %918 = vmatprep.subr.bf16.mxu0 %v7265_v56  ;;  %5949 = vmatprep.subr.bf16.mxu1 %v9954_v20 }
 0x255   :  { %919 = vmatpush1.bf16.msra.mxu0 %v7278_v58  ;;  %5950 = vmatpush3.bf16.msra.mxu1 %v7306_v61 }
 0x256   :  { %1016 = vmatprep.subr.bf16.mxu0 %v7126_v26  ;;  %5955 = vmatprep.subr.bf16.mxu1 %v9954_v20 }
 0x2f8   :  { %v826_v27 = vpop.f32.mrf.mxu0  ;;  %v867_v38 = vpop.f32.mrf.mxu1 }
 0x2f9   :  { %v873_v3 = vadd.f32 %v826_v27, %v7369_v14  ;;  %v887_v63 = vadd.f32 %v867_v38, %v7419_v41 }
 0x2fa   :  { %v828_v2 = vpop.f32.mrf.mxu0  ;;  %v5933_v25 = vpop.f32.mrf.mxu1 }
 0x2fb   :  { %v5450_v39 = vmul.f32 -1.442695, %v873_v3  ;;  %v880_v5 = vadd.f32 %v828_v2, %v7372_v17 }
 0x2fc   :  { %v830_v43 = vpop.f32.mrf.mxu0  ;;  %v870_v7 = vpop.f32.mrf.mxu1 }
 0x2fd   :  { %6546 = vpow2.f32 %v5450_v39  ;;  %v5451_v4 = vmul.f32 -1.442695, %v880_v5 }
 0x2fe   :  { %v831_v9 = vpop.f32.mrf.mxu0  ;;  %v5934_v19 = vpop.f32.mrf.mxu1 }
 0x2ff   :  { %6548 = vpow2.f32 %v5451_v4 }
 0x30a   :  { %v6547_v10 = vpop.eup %6546 }
 0x30b   :  { %v877_v32 = vadd.f32 1.0, %v6547_v10 }
 0x30c   :  { %v6549_v33 = vpop.eup %6548 }
 0x30d   :  { %6550 = vrcp.f32 %v877_v32  ;;  %v884_v1 = vadd.f32 1.0, %v6549_v33  ;;  %v291_v32 = vadd.f32 %v7379_v22, %v7367_v13 }
 0x30f   :  { %6552 = vrcp.f32 %v884_v1 }
 0x31a   :  { %v6551_v14 = vpop.eup %6550 }
 0x31b   :  { %v888_v8 = vmul.f32 %v6551_v14, %v887_v63 }
 0x31c   :  { %v6553_v27 = vpop.eup %6552 }
 0x31d   :  { %v889_v23 = vadd.f32 %v888_v8, %v7375_v18  ;;  %v891_v3 = vsub.f32 1.0, %v6553_v27  ;;  %v893_v17 = vmul.f32 %v6553_v27, %v7469_v0 }
 0x31f   :  { %6554 = vtanh.f32 %v889_v23 }
 0x32c   :  { %v6555_v25 = vpop.eup %6554 }
 0x32d   :  { %v892_v39 = vmul.f32 %v6555_v25, %v891_v3 }
 0x32f   :  { %v7513_v2 = vadd.f32 %v893_v17, %v892_v39 }
 0x331   :  { %v903_v43 = vpack.c.bf16 %v7513_v2, %v7513_v2 }
 0x333   :  { %937 = vmatmul.mubr.bf16.vlgmr.msra.gmra.mxu0 %v903_v43  ;;  %5952 = vmatmul.mubr.bf16.vlgmr.msra.gmra.mxu1 %v903_v43 }
 0x334   :  { %1017 = vmatpush1.bf16.msra.mxu0 %v7134_v28  ;;  %5956 = vmatpush3.bf16.msra.mxu1 %v7185_v40 }
 0x335   :  { %1018 = vmatprep.subr.bf16.mxu0 %v7140_v29  ;;  %5957 = vmatprep.subr.bf16.mxu1 %v9954_v20 }
 0x336   :  { %1048 = vmatprep.mubr.bf16.mxu0 %v9955_v15  ;;  %5971 = vmatprep.mubr.msk.bf16.mxu1 %vm6969_vm0, %v9954_v20 }
 0x338   :  { %1019 = vmatpush1.bf16.msra.mxu0 %v7145_v30  ;;  %5958 = vmatpush3.bf16.msra.mxu1 %v7205_v45 }
 0x339   :  { %1020 = vmatprep.subr.bf16.mxu0 %v7162_v34  ;;  %5959 = vmatprep.subr.bf16.mxu1 %v9954_v20 }
 0x33c   :  { %1021 = vmatpush1.bf16.msra.mxu0 %v7168_v36  ;;  %5960 = vmatpush3.bf16.msra.mxu1 %v7230_v50 }
 0x33d   :  { %1022 = vmatprep.subr.bf16.mxu0 %v7174_v37  ;;  %5961 = vmatprep.subr.bf16.mxu1 %v9954_v20 }
 0x340   :  { %1023 = vmatpush1.bf16.msra.mxu0 %v7192_v42  ;;  %5962 = vmatpush3.bf16.msra.mxu1 %v7250_v54 }
 0x341   :  { %1024 = vmatprep.subr.bf16.mxu0 %v7199_v44  ;;  %5963 = vmatprep.subr.bf16.mxu1 %v9954_v20 }
 0x344   :  { %1025 = vmatpush1.bf16.msra.mxu0 %v7212_v46  ;;  %5964 = vmatpush3.bf16.msra.mxu1 %v7271_v57 }
 0x345   :  { %1026 = vmatprep.subr.bf16.mxu0 %v7224_v49  ;;  %5965 = vmatprep.subr.bf16.mxu1 %v9954_v20 }
 0x348   :  { %1027 = vmatpush1.bf16.msra.mxu0 %v7237_v52  ;;  %5966 = vmatpush3.bf16.msra.mxu1 %v7286_v59 }
 0x349   :  { %1028 = vmatprep.subr.bf16.mxu0 %v7244_v53  ;;  %5967 = vmatprep.subr.bf16.mxu1 %v9954_v20 }
 0x34c   :  { %1029 = vmatpush1.bf16.msra.mxu0 %v7259_v55  ;;  %5968 = vmatpush3.bf16.msra.mxu1 %v7295_v60 }
 0x34d   :  { %1030 = vmatprep.subr.bf16.mxu0 %v7265_v56  ;;  %5969 = vmatprep.subr.bf16.mxu1 %v9954_v20 }
 0x350   :  { %1031 = vmatpush1.bf16.msra.mxu0 %v7278_v58  ;;  %5970 = vmatpush3.bf16.msra.mxu1 %v7306_v61 }
 0x351   :  { %1128 = vmatprep.subr.bf16.mxu0 %v7126_v26  ;;  %5975 = vmatprep.subr.bf16.mxu1 %v9954_v20 }
 0x3f3   :  { %v938_v18 = vpop.f32.mrf.mxu0  ;;  %v979_v38 = vpop.f32.mrf.mxu1 }
 0x3f4   :  { %v985_v7 = vadd.f32 %v938_v18, %v7377_v21  ;;  %v999_v21 = vadd.f32 %v979_v38, %v7419_v41 }
 0x3f5   :  { %v940_v9 = vpop.f32.mrf.mxu0  ;;  %v5953_v19 = vpop.f32.mrf.mxu1 }
 0x3f6   :  { %v5452_v5 = vmul.f32 -1.442695, %v985_v7  ;;  %v992_v63 = vadd.f32 %v940_v9, %v291_v32 }
 0x3f7   :  { %v942_v4 = vpop.f32.mrf.mxu0  ;;  %v982_v10 = vpop.f32.mrf.mxu1 }
 0x3f8   :  { %6556 = vpow2.f32 %v5452_v5  ;;  %v5453_v14 = vmul.f32 -1.442695, %v992_v63 }
 0x3f9   :  { %v943_v33 = vpop.f32.mrf.mxu0  ;;  %v5954_v1 = vpop.f32.mrf.mxu1 }
 0x3fa   :  { %6558 = vpow2.f32 %v5453_v14 }
 0x405   :  { %v6557_v8 = vpop.eup %6556 }
 0x406   :  { %v989_v23 = vadd.f32 1.0, %v6557_v8 }
 0x407   :  { %v6559_v27 = vpop.eup %6558 }
 0x408   :  { %6560 = vrcp.f32 %v989_v23  ;;  %v996_v3 = vadd.f32 1.0, %v6559_v27 }
 0x40a   :  { %6562 = vrcp.f32 %v996_v3 }
 0x415   :  { %v6561_v25 = vpop.eup %6560 }
 0x416   :  { %v1000_v39 = vmul.f32 %v6561_v25, %v999_v21 }
 0x417   :  { %v6563_v22 = vpop.eup %6562 }
 0x418   :  { %v1001_v17 = vadd.f32 %v1000_v39, %v7382_v24  ;;  %v1003_v43 = vsub.f32 1.0, %v6563_v22  ;;  %v1005_v9 = vmul.f32 %v6563_v22, %v7513_v2 }
 0x41a   :  { %6564 = vtanh.f32 %v1001_v17 }
 0x427   :  { %v6565_v18 = vpop.eup %6564 }
 0x428   :  { %v1004_v7 = vmul.f32 %v6565_v18, %v1003_v43 }
 0x42a   :  { %v7558_v19 = vadd.f32 %v1005_v9, %v1004_v7 }
 0x42c   :  { %v1015_v5 = vpack.c.bf16 %v7558_v19, %v7558_v19 }
 0x42e   :  { %1049 = vmatmul.mubr.bf16.vlgmr.msra.gmra.mxu0 %v1015_v5  ;;  %5972 = vmatmul.mubr.bf16.vlgmr.msra.gmra.mxu1 %v1015_v5 }
 0x42f   :  { %1129 = vmatpush1.bf16.msra.mxu0 %v7134_v28  ;;  %5976 = vmatpush3.bf16.msra.mxu1 %v7185_v40 }
 0x430   :  { %1130 = vmatprep.subr.bf16.mxu0 %v7140_v29  ;;  %5977 = vmatprep.subr.bf16.mxu1 %v9954_v20 }
 0x431   :  { %1160 = vmatprep.mubr.bf16.mxu0 %v9955_v15  ;;  %5991 = vmatprep.mubr.msk.bf16.mxu1 %vm6969_vm0, %v9954_v20 }
 0x433   :  { %1131 = vmatpush1.bf16.msra.mxu0 %v7145_v30  ;;  %5978 = vmatpush3.bf16.msra.mxu1 %v7205_v45 }
 0x434   :  { %1132 = vmatprep.subr.bf16.mxu0 %v7162_v34  ;;  %5979 = vmatprep.subr.bf16.mxu1 %v9954_v20 }
 0x437   :  { %1133 = vmatpush1.bf16.msra.mxu0 %v7168_v36  ;;  %5980 = vmatpush3.bf16.msra.mxu1 %v7230_v50 }
 0x438   :  { %1134 = vmatprep.subr.bf16.mxu0 %v7174_v37  ;;  %5981 = vmatprep.subr.bf16.mxu1 %v9954_v20 }
 0x43b   :  { %1135 = vmatpush1.bf16.msra.mxu0 %v7192_v42  ;;  %5982 = vmatpush3.bf16.msra.mxu1 %v7250_v54 }
 0x43c   :  { %1136 = vmatprep.subr.bf16.mxu0 %v7199_v44  ;;  %5983 = vmatprep.subr.bf16.mxu1 %v9954_v20 }
 0x43f   :  { %1137 = vmatpush1.bf16.msra.mxu0 %v7212_v46  ;;  %5984 = vmatpush3.bf16.msra.mxu1 %v7271_v57 }
 0x440   :  { %1138 = vmatprep.subr.bf16.mxu0 %v7224_v49  ;;  %5985 = vmatprep.subr.bf16.mxu1 %v9954_v20 }
 0x443   :  { %1139 = vmatpush1.bf16.msra.mxu0 %v7237_v52  ;;  %5986 = vmatpush3.bf16.msra.mxu1 %v7286_v59 }
 0x444   :  { %1140 = vmatprep.subr.bf16.mxu0 %v7244_v53  ;;  %5987 = vmatprep.subr.bf16.mxu1 %v9954_v20 }
 0x447   :  { %1141 = vmatpush1.bf16.msra.mxu0 %v7259_v55  ;;  %5988 = vmatpush3.bf16.msra.mxu1 %v7295_v60 }
 0x448   :  { %1142 = vmatprep.subr.bf16.mxu0 %v7265_v56  ;;  %5989 = vmatprep.subr.bf16.mxu1 %v9954_v20 }
 0x44b   :  { %1143 = vmatpush1.bf16.msra.mxu0 %v7278_v58  ;;  %5990 = vmatpush3.bf16.msra.mxu1 %v7306_v61 }
 0x44c   :  { %1240 = vmatprep.subr.bf16.mxu0 %v7126_v26  ;;  %5995 = vmatprep.subr.bf16.mxu1 %v9954_v20 }
 0x4ee   :  { %v1050_v24 = vpop.f32.mrf.mxu0  ;;  %v1091_v38 = vpop.f32.mrf.mxu1 }
 0x4ef   :  { %v1097_v4 = vadd.f32 %v1050_v24, %v7386_v31  ;;  %v1111_v39 = vadd.f32 %v1091_v38, %v7419_v41 }
 0x4f0   :  { %v1052_v10 = vpop.f32.mrf.mxu0  ;;  %v5973_v32 = vpop.f32.mrf.mxu1 }
 0x4f1   :  { %v5454_v33 = vmul.f32 -1.442695, %v1097_v4  ;;  %v1104_v23 = vadd.f32 %v1052_v10, %v7389_v35 }
 0x4f2   :  { %v1054_v1 = vpop.f32.mrf.mxu0  ;;  %v1094_v63 = vpop.f32.mrf.mxu1 }
 0x4f3   :  { %6566 = vpow2.f32 %v5454_v33  ;;  %v5455_v27 = vmul.f32 -1.442695, %v1104_v23  ;;  %v6882_v23 = vld [vmem:[%s9856_s2 + $0x90] ss:$12 sps:$4 sm:$0xff]  }
 0x4f4   :  { %v1055_v14 = vpop.f32.mrf.mxu0  ;;  %v5974_v8 = vpop.f32.mrf.mxu1 }
 0x4f5   :  { %6568 = vpow2.f32 %v5455_v27  ;;  %v6881_v8 = vld [vmem:[%s9856_s2 + $0x94] ss:$12 sps:$4 sm:$0xff]   ;;  %v6883_v27 = vld [vmem:[%s9856_s2 + $0x98] ss:$12 sps:$4 sm:$0xff]  }
 0x500   :  { %v6567_v3 = vpop.eup %6566 }
 0x501   :  { %v1101_v26 = vadd.f32 1.0, %v6567_v3  ;;  %v6884_v3 = vld [vmem:[%s9856_s2 + $0x7c] ss:$12 sps:$4 sm:$0xff]  }
 0x502   :  { %v6569_v21 = vpop.eup %6568 }
 0x503   :  { %6570 = vrcp.f32 %v1101_v26  ;;  %v1108_v25 = vadd.f32 1.0, %v6569_v21  ;;  %v6885_v26 = vld [vmem:[%s9856_s2 + $0x78] ss:$12 sps:$4 sm:$0xff]   ;;  %v6886_v21 = vld [vmem:[%s9856_s2 + $0x80] ss:$12 sps:$4 sm:$0xff]  }
 0x505   :  { %6572 = vrcp.f32 %v1108_v25  ;;  %v6887_v25 = vld [vmem:[%s9856_s2 + $0x64] ss:$12 sps:$4 sm:$0xff]  }
 0x510   :  { %v6571_v31 = vpop.eup %6570 }
 0x511   :  { %v1112_v17 = vmul.f32 %v6571_v31, %v1111_v39  ;;  %v6888_v39 = vld [vmem:[%s9856_s2 + $0x60] ss:$12 sps:$4 sm:$0xff]   ;;  %v6889_v31 = vld [vmem:[%s9856_s2 + $0x68] ss:$12 sps:$4 sm:$0xff]  }
 0x512   :  { %v6573_v43 = vpop.eup %6572 }
 0x513   :  { %v1113_v22 = vadd.f32 %v1112_v17, %v7397_v48  ;;  %v1115_v18 = vsub.f32 1.0, %v6573_v43  ;;  %v1117_v35 = vmul.f32 %v6573_v43, %v7558_v19  ;;  %v367_v48 = vadd.f32 %v7414_v6, %v7364_v11  ;;  %v6879_v6 = vld [vmem:[%s9856_s2 + $0xa8] ss:$12 sps:$4 sm:$0xff]   ;;  %v6880_v11 = vld [vmem:[%s9856_s2 + $0xb0] ss:$12 sps:$4 sm:$0xff]  }
 0x514   :  { %v6890_v17 = vld [vmem:[%s9856_s2 + $0x4c] ss:$12 sps:$4 sm:$0xff]   ;;  %v6892_v43 = vld [vmem:[%s9856_s2 + $0x34] ss:$12 sps:$4 sm:$0xff]  }
 0x515   :  { %6574 = vtanh.f32 %v1113_v22  ;;  %v6891_v22 = vld [vmem:[%s9856_s2 + $0x48] ss:$12 sps:$4 sm:$0xff]  }
 0x522   :  { %v6575_v7 = vpop.eup %6574 }
 0x523   :  { %v1116_v9 = vmul.f32 %v6575_v7, %v1115_v18  ;;  %v6893_v18 = vld [vmem:[%s9856_s2 + $0x30] ss:$12 sps:$4 sm:$0xff]  }
 0x524   :  { %v6894_v7 = vld [vmem:[%s9856_s2 + $0x1c] ss:$12 sps:$4 sm:$0xff]  }
 0x525   :  { %v7602_v5 = vadd.f32 %v1117_v35, %v1116_v9  ;;  %v6896_v9 = vld [vmem:[%s9856_s2 + $0x4] ss:$12 sps:$4 sm:$0xff]   ;;  %v6312_v35 = vld [vmem:[%s9859_s5 + $0x154] ss:$24 sps:$4 sm:$0xff]  }
 0x527   :  { %v1127_v24 = vpack.c.bf16 %v7602_v5, %v7602_v5 }
 0x529   :  { %1161 = vmatmul.mubr.bf16.vlgmr.msra.gmra.mxu0 %v1127_v24  ;;  %5992 = vmatmul.mubr.bf16.vlgmr.msra.gmra.mxu1 %v1127_v24 }
 0x52a   :  { %1241 = vmatpush1.bf16.msra.mxu0 %v7134_v28  ;;  %5996 = vmatpush3.bf16.msra.mxu1 %v7185_v40  ;;  %v6878_v28 = vld [vmem:[%s9856_s2 + $0xac] ss:$12 sps:$4 sm:$0xff]  }
 0x52b   :  { %1242 = vmatprep.subr.bf16.mxu0 %v7140_v29  ;;  %5997 = vmatprep.subr.bf16.mxu1 %v9954_v20 }
 0x52c   :  { %1272 = vmatprep.mubr.bf16.mxu0 %v9955_v15  ;;  %6011 = vmatprep.mubr.msk.bf16.mxu1 %vm6969_vm0, %v9954_v20 }
 0x52e   :  { %1243 = vmatpush1.bf16.msra.mxu0 %v7145_v30  ;;  %5998 = vmatpush3.bf16.msra.mxu1 %v7205_v45  ;;  %v301_v45 = vadd.f32 %v7399_v51, %v7367_v13 }
 0x52f   :  { %1244 = vmatprep.subr.bf16.mxu0 %v7162_v34  ;;  %5999 = vmatprep.subr.bf16.mxu1 %v9954_v20 }
 0x532   :  { %1245 = vmatpush1.bf16.msra.mxu0 %v7168_v36  ;;  %6000 = vmatpush3.bf16.msra.mxu1 %v7230_v50 }
 0x533   :  { %1246 = vmatprep.subr.bf16.mxu0 %v7174_v37  ;;  %6001 = vmatprep.subr.bf16.mxu1 %v9954_v20 }
 0x536   :  { %1247 = vmatpush1.bf16.msra.mxu0 %v7192_v42  ;;  %6002 = vmatpush3.bf16.msra.mxu1 %v7250_v54 }
 0x537   :  { %1248 = vmatprep.subr.bf16.mxu0 %v7199_v44  ;;  %6003 = vmatprep.subr.bf16.mxu1 %v9954_v20 }
 0x53a   :  { %1249 = vmatpush1.bf16.msra.mxu0 %v7212_v46  ;;  %6004 = vmatpush3.bf16.msra.mxu1 %v7271_v57 }
 0x53b   :  { %1250 = vmatprep.subr.bf16.mxu0 %v7224_v49  ;;  %6005 = vmatprep.subr.bf16.mxu1 %v9954_v20 }
 0x53e   :  { %1251 = vmatpush1.bf16.msra.mxu0 %v7237_v52  ;;  %6006 = vmatpush3.bf16.msra.mxu1 %v7286_v59 }
 0x53f   :  { %1252 = vmatprep.subr.bf16.mxu0 %v7244_v53  ;;  %6007 = vmatprep.subr.bf16.mxu1 %v9954_v20 }
 0x542   :  { %1253 = vmatpush1.bf16.msra.mxu0 %v7259_v55  ;;  %6008 = vmatpush3.bf16.msra.mxu1 %v7295_v60 }
 0x543   :  { %1254 = vmatprep.subr.bf16.mxu0 %v7265_v56  ;;  %6009 = vmatprep.subr.bf16.mxu1 %v9954_v20 }
 0x546   :  { %1255 = vmatpush1.bf16.msra.mxu0 %v7278_v58  ;;  %6010 = vmatpush3.bf16.msra.mxu1 %v7306_v61 }
 0x547   :  { %1352 = vmatprep.subr.bf16.mxu0 %v6878_v28  ;;  %6015 = vmatprep.subr.bf16.mxu1 %v9954_v20 }
 0x5e9   :  { %v1162_v29 = vpop.f32.mrf.mxu0  ;;  %v1203_v30 = vpop.f32.mrf.mxu1 }
 0x5ea   :  { %v1209_v34 = vadd.f32 %v1162_v29, %v7394_v47  ;;  %v1223_v58 = vadd.f32 %v1203_v30, %v7419_v41 }
 0x5eb   :  { %v1164_v36 = vpop.f32.mrf.mxu0  ;;  %v5993_v37 = vpop.f32.mrf.mxu1 }
 0x5ec   :  { %v5456_v40 = vmul.f32 -1.442695, %v1209_v34  ;;  %v1216_v50 = vadd.f32 %v1164_v36, %v301_v45 }
 0x5ed   :  { %v1166_v42 = vpop.f32.mrf.mxu0  ;;  %v1206_v44 = vpop.f32.mrf.mxu1 }
 0x5ee   :  { %6576 = vpow2.f32 %v5456_v40  ;;  %v5457_v52 = vmul.f32 -1.442695, %v1216_v50 }
 0x5ef   :  { %v1167_v46 = vpop.f32.mrf.mxu0  ;;  %v5994_v49 = vpop.f32.mrf.mxu1 }
 0x5f0   :  { %6578 = vpow2.f32 %v5457_v52 }
 0x5fb   :  { %v6577_v53 = vpop.eup %6576 }
 0x5fc   :  { %v1213_v54 = vadd.f32 1.0, %v6577_v53 }
 0x5fd   :  { %v6579_v55 = vpop.eup %6578 }
 0x5fe   :  { %6580 = vrcp.f32 %v1213_v54  ;;  %v1220_v56 = vadd.f32 1.0, %v6579_v55  ;;  %v9956_v55 = vld [vmem:[#allocation10_spill] sm:$0xff] }
 0x600   :  { %6582 = vrcp.f32 %v1220_v56 }
 0x60b   :  { %v6581_v47 = vpop.eup %6580 }
 0x60c   :  { %v1224_v38 = vmul.f32 %v6581_v47, %v1223_v58 }
 0x60d   :  { %v6583_v4 = vpop.eup %6582 }
 0x60e   :  { %v1225_v51 = vadd.f32 %v1224_v38, %v367_v48  ;;  %v1227_v10 = vsub.f32 1.0, %v6583_v4  ;;  %v1229_v1 = vmul.f32 %v6583_v4, %v7602_v5  ;;  %v6310_v4 = vld [vmem:[%s9859_s5 + $0x150] ss:$24 sps:$4 sm:$0xff]  }
 0x610   :  { %6584 = vtanh.f32 %v1225_v51 }
 0x61d   :  { %v6585_v32 = vpop.eup %6584 }
 0x61e   :  { %v1228_v33 = vmul.f32 %v6585_v32, %v1227_v10  ;;  %v6318_v32 = vld [vmem:[%s9859_s5 + $0x124] ss:$24 sps:$4 sm:$0xff]  }
 0x620   :  { %v7650_v63 = vadd.f32 %v1229_v1, %v1228_v33  ;;  %v6321_v33 = vld [vmem:[%s9859_s5 + $0x12c] ss:$24 sps:$4 sm:$0xff]   ;;  %v6316_v1 = vld [vmem:[%s9859_s5 + $0x120] ss:$24 sps:$4 sm:$0xff]  }
 0x622   :  { %v1239_v14 = vpack.c.bf16 %v7650_v63, %v7650_v63 }
 0x624   :  { %1273 = vmatmul.mubr.bf16.vlgmr.msra.gmra.mxu0 %v1239_v14  ;;  %6012 = vmatmul.mubr.bf16.vlgmr.msra.gmra.mxu1 %v1239_v14  ;;  %v6319_v14 = vld [vmem:[%s9859_s5 + $0x128] ss:$24 sps:$4 sm:$0xff]  }
 0x625   :  { %1353 = vmatpush1.bf16.msra.mxu0 %v6879_v6  ;;  %6016 = vmatpush3.bf16.msra.mxu1 %v6880_v11  ;;  %v6324_v6 = vld [vmem:[%s9859_s5 + $0xf4] ss:$24 sps:$4 sm:$0xff]  }
 0x626   :  { %1354 = vmatprep.subr.bf16.mxu0 %v6881_v8  ;;  %6017 = vmatprep.subr.bf16.mxu1 %v9954_v20  ;;  %v6327_v11 = vld [vmem:[%s9859_s5 + $0xfc] ss:$24 sps:$4 sm:$0xff]   ;;  %v6322_v8 = vld [vmem:[%s9859_s5 + $0xf0] ss:$24 sps:$4 sm:$0xff]  }
 0x627   :  { %1384 = vmatprep.mubr.bf16.mxu0 %v9955_v15  ;;  %6031 = vmatprep.mubr.msk.bf16.mxu1 %vm6969_vm0, %v9954_v20 }
 0x629   :  { %1355 = vmatpush1.bf16.msra.mxu0 %v6882_v23  ;;  %6018 = vmatpush3.bf16.msra.mxu1 %v6883_v27  ;;  %v6325_v23 = vld [vmem:[%s9859_s5 + $0xf8] ss:$24 sps:$4 sm:$0xff]   ;;  %v6330_v27 = vld [vmem:[%s9859_s5 + $0xc4] ss:$24 sps:$4 sm:$0xff]  }
 0x62a   :  { %1356 = vmatprep.subr.bf16.mxu0 %v6884_v3  ;;  %6019 = vmatprep.subr.bf16.mxu1 %v9954_v20  ;;  %v6333_v3 = vld [vmem:[%s9859_s5 + $0xcc] ss:$24 sps:$4 sm:$0xff]  }
 0x62d   :  { %1357 = vmatpush1.bf16.msra.mxu0 %v6885_v26  ;;  %6020 = vmatpush3.bf16.msra.mxu1 %v6886_v21  ;;  %v6328_v26 = vld [vmem:[%s9859_s5 + $0xc0] ss:$24 sps:$4 sm:$0xff]  }
 0x62e   :  { %1358 = vmatprep.subr.bf16.mxu0 %v6887_v25  ;;  %6021 = vmatprep.subr.bf16.mxu1 %v9954_v20  ;;  %v6331_v21 = vld [vmem:[%s9859_s5 + $0xc8] ss:$24 sps:$4 sm:$0xff]   ;;  %v6336_v25 = vld [vmem:[%s9859_s5 + $0x94] ss:$24 sps:$4 sm:$0xff]  }
 0x631   :  { %1359 = vmatpush1.bf16.msra.mxu0 %v6888_v39  ;;  %6022 = vmatpush3.bf16.msra.mxu1 %v6889_v31  ;;  %v6339_v39 = vld [vmem:[%s9859_s5 + $0x9c] ss:$24 sps:$4 sm:$0xff]   ;;  %v6334_v31 = vld [vmem:[%s9859_s5 + $0x90] ss:$24 sps:$4 sm:$0xff]  }
 0x632   :  { %1360 = vmatprep.subr.bf16.mxu0 %v6890_v17  ;;  %6023 = vmatprep.subr.bf16.mxu1 %v9954_v20  ;;  %v6337_v17 = vld [vmem:[%s9859_s5 + $0x98] ss:$24 sps:$4 sm:$0xff]  }
 0x635   :  { %1361 = vmatpush1.bf16.msra.mxu0 %v6891_v22  ;;  %6024 = vmatpush3.bf16.msra.mxu1 %v7271_v57  ;;  %v6895_v57 = vld [vmem:[%s9856_s2 + $0x18] ss:$12 sps:$4 sm:$0xff]  }
 0x636   :  { %1362 = vmatprep.subr.bf16.mxu0 %v6892_v43  ;;  %6025 = vmatprep.subr.bf16.mxu1 %v9954_v20  ;;  %v6342_v22 = vld [vmem:[%s9859_s5 + $0x64] ss:$24 sps:$4 sm:$0xff]  }
 0x637   :  { %v6345_v43 = vld [vmem:[%s9859_s5 + $0x6c] ss:$24 sps:$4 sm:$0xff]  }
 0x639   :  { %1363 = vmatpush1.bf16.msra.mxu0 %v6893_v18  ;;  %6026 = vmatpush3.bf16.msra.mxu1 %v7286_v59  ;;  %v6897_v59 = vld [vmem:[%s9856_s2] ss:$12 sps:$4 sm:$0xff]  }
 0x63a   :  { %1364 = vmatprep.subr.bf16.mxu0 %v6894_v7  ;;  %6027 = vmatprep.subr.bf16.mxu1 %v9954_v20  ;;  %v6340_v18 = vld [vmem:[%s9859_s5 + $0x60] ss:$24 sps:$4 sm:$0xff]  }
 0x63b   :  { %v6343_v7 = vld [vmem:[%s9859_s5 + $0x68] ss:$24 sps:$4 sm:$0xff]  }
 0x63d   :  { %1365 = vmatpush1.bf16.msra.mxu0 %v6895_v57  ;;  %6028 = vmatpush3.bf16.msra.mxu1 %v7295_v60  ;;  %v6315_v60 = vld [vmem:[%s9859_s5 + $0x15c] ss:$24 sps:$4 sm:$0xff]  }
 0x63e   :  { %1366 = vmatprep.subr.bf16.mxu0 %v6896_v9  ;;  %6029 = vmatprep.subr.bf16.mxu1 %v9954_v20  ;;  %v6348_v57 = vld [vmem:[%s9859_s5 + $0x34] ss:$24 sps:$4 sm:$0xff]  }
 0x63f   :  { %v6351_v9 = vld [vmem:[%s9859_s5 + $0x3c] ss:$24 sps:$4 sm:$0xff]  }
 0x641   :  { %1367 = vmatpush1.bf16.msra.mxu0 %v6897_v59  ;;  %6030 = vmatpush3.bf16.msra.mxu1 %v7306_v61  ;;  %v6346_v59 = vld [vmem:[%s9859_s5 + $0x30] ss:$24 sps:$4 sm:$0xff]  }
 0x642   :  { %1789 = vmatprep.subr.bf16.mxu0 %v6312_v35  ;;  %1862 = vmatprep.subr.bf16.mxu1 %v6315_v60  ;;  %v6349_v35 = vld [vmem:[%s9859_s5 + $0x38] ss:$24 sps:$4 sm:$0xff]   ;;  %v6354_v60 = vld [vmem:[%s9859_s5 + $0x4] ss:$24 sps:$4 sm:$0xff]  }
 0x6e4   :  { %v1274_v24 = vpop.f32.mrf.mxu0  ;;  %v1315_v28 = vpop.f32.mrf.mxu1 }
 0x6e5   :  { %v1321_v29 = vadd.f32 %v1274_v24, %v7404_v12  ;;  %v1335_v53 = vadd.f32 %v1315_v28, %v7419_v41  ;;  %v6313_v41 = vld [vmem:[%s9859_s5 + $0x158] ss:$24 sps:$4 sm:$0xff]   ;;  %v6357_v24 = vld [vmem:[%s9859_s5 + $0xc] ss:$24 sps:$4 sm:$0xff]  }
 0x6e6   :  { %v1276_v30 = vpop.f32.mrf.mxu0  ;;  %v6013_v34 = vpop.f32.mrf.mxu1  ;;  %v6352_v28 = vld [vmem:[%s9859_s5] ss:$24 sps:$4 sm:$0xff]  }
 0x6e7   :  { %v5458_v36 = vmul.f32 -1.442695, %v1321_v29  ;;  %v1328_v44 = vadd.f32 %v1276_v30, %v7407_v16  ;;  %v6355_v29 = vld [vmem:[%s9859_s5 + $0x8] ss:$24 sps:$4 sm:$0xff]   ;;  %v7834_v30 = vpack.c.bf16 %v7469_v0, %v7423_v62  ;;  %v7842_v34 = vpack.c.bf16 %v7558_v19, %v7513_v2  ;;  %v7859_v0 = vld [vmem:[%s9860_s6 + $0x154] ss:$24 sps:$4 sm:$0xff]  }
 0x6e8   :  { %v1278_v37 = vpop.f32.mrf.mxu0  ;;  %v1318_v40 = vpop.f32.mrf.mxu1  ;;  %v7850_v62 = vpack.c.bf16 %v7650_v63, %v7602_v5  ;;  %9957 = vst [vmem:[#allocation10_spill] sm:$0xff] %v7859_v0  ;;  %v6362_v2 = vld [vmem:[%s9859_s5 + $0x164] ss:$24 sps:$4 sm:$0xff]   ;;  %v7867_v19 = vld [vmem:[%s9860_s6 + $0x150] ss:$24 sps:$4 sm:$0xff]  }
 0x6e9   :  { %6586 = vpow2.f32 %v5458_v36  ;;  %v5459_v45 = vmul.f32 -1.442695, %v1328_v44  ;;  %v6360_v5 = vld [vmem:[%s9859_s5 + $0x160] ss:$24 sps:$4 sm:$0xff]   ;;  %v6368_v36 = vld [vmem:[%s9859_s5 + $0x134] ss:$24 sps:$4 sm:$0xff]  }
 0x6ea   :  { %v1279_v61 = vpop.f32.mrf.mxu0  ;;  %v6014_v42 = vpop.f32.mrf.mxu1  ;;  %v7885_v37 = vld [vmem:[%s9860_s6 + $0x120] ss:$24 sps:$4 sm:$0xff]   ;;  %v6366_v40 = vld [vmem:[%s9859_s5 + $0x130] ss:$24 sps:$4 sm:$0xff]  }
 0x6eb   :  { %6588 = vpow2.f32 %v5459_v45  ;;  %v7895_v61 = vld [vmem:[%s9860_s6 + $0xf4] ss:$24 sps:$4 sm:$0xff]   ;;  %v6374_v42 = vld [vmem:[%s9859_s5 + $0x104] ss:$24 sps:$4 sm:$0xff]   ;;  %v7903_v44 = vld [vmem:[%s9860_s6 + $0xf0] ss:$24 sps:$4 sm:$0xff]  }
 0x6ec   :  { %v6372_v45 = vld [vmem:[%s9859_s5 + $0x100] ss:$24 sps:$4 sm:$0xff]  }
 0x6f6   :  { %v6587_v46 = vpop.eup %6586 }
 0x6f7   :  { %v1325_v49 = vadd.f32 1.0, %v6587_v46  ;;  %v7913_v46 = vld [vmem:[%s9860_s6 + $0xc4] ss:$24 sps:$4 sm:$0xff]  }
 0x6f8   :  { %v6589_v50 = vpop.eup %6588 }
 0x6f9   :  { %6590 = vrcp.f32 %v1325_v49  ;;  %v1332_v52 = vadd.f32 1.0, %v6589_v50  ;;  %v6380_v49 = vld [vmem:[%s9859_s5 + $0xd4] ss:$24 sps:$4 sm:$0xff]   ;;  %v7921_v50 = vld [vmem:[%s9860_s6 + $0xc0] ss:$24 sps:$4 sm:$0xff]  }
 0x6fb   :  { %6592 = vrcp.f32 %v1332_v52  ;;  %v6378_v52 = vld [vmem:[%s9859_s5 + $0xd0] ss:$24 sps:$4 sm:$0xff]  }
 0x706   :  { %v6591_v12 = vpop.eup %6590 }
 0x707   :  { %v1336_v54 = vmul.f32 %v6591_v12, %v1335_v53  ;;  %v7931_v53 = vld [vmem:[%s9860_s6 + $0x94] ss:$24 sps:$4 sm:$0xff]   ;;  %v6386_v12 = vld [vmem:[%s9859_s5 + $0xa4] ss:$24 sps:$4 sm:$0xff]  }
 0x708   :  { %v6593_v58 = vpop.eup %6592 }
 0x709   :  { %v1337_v56 = vadd.f32 %v1336_v54, %v9956_v55  ;;  %v1339_v47 = vsub.f32 1.0, %v6593_v58  ;;  %v1341_v16 = vmul.f32 %v6593_v58, %v7650_v63  ;;  %v7877_v63 = vld [vmem:[%s9860_s6 + $0x124] ss:$24 sps:$4 sm:$0xff]   ;;  %v7939_v54 = vld [vmem:[%s9860_s6 + $0x90] ss:$24 sps:$4 sm:$0xff]  }
 0x70a   :  { %v6384_v55 = vld [vmem:[%s9859_s5 + $0xa0] ss:$24 sps:$4 sm:$0xff]   ;;  %v6392_v58 = vld [vmem:[%s9859_s5 + $0x74] ss:$24 sps:$4 sm:$0xff]  }
 0x70b   :  { %6594 = vtanh.f32 %v1337_v56  ;;  %v7949_v56 = vld [vmem:[%s9860_s6 + $0x64] ss:$24 sps:$4 sm:$0xff]  }
 0x718   :  { %v6595_v48 = vpop.eup %6594 }
 0x719   :  { %v1340_v38 = vmul.f32 %v6595_v48, %v1339_v47  ;;  %v7957_v47 = vld [vmem:[%s9860_s6 + $0x60] ss:$24 sps:$4 sm:$0xff]   ;;  %v6390_v48 = vld [vmem:[%s9859_s5 + $0x70] ss:$24 sps:$4 sm:$0xff]  }
 0x71b   :  { %v7736_v51 = vadd.f32 %v1341_v16, %v1340_v38  ;;  %v7966_v38 = vld [vmem:[%s9860_s6 + $0x34] ss:$24 sps:$4 sm:$0xff]   ;;  %v6398_v16 = vld [vmem:[%s9859_s5 + $0x44] ss:$24 sps:$4 sm:$0xff]  }
 0x71d   :  { %v1351_v10 = vpack.c.bf16 %v7736_v51, %v7736_v51 }
 0x71f   :  { %1385 = vmatmul.mubr.bf16.vlgmr.msra.gmra.mxu0 %v1351_v10  ;;  %6032 = vmatmul.mubr.bf16.vlgmr.msra.gmra.mxu1 %v1351_v10  ;;  %v7984_v10 = vld [vmem:[%s9860_s6 + $0x4] ss:$24 sps:$4 sm:$0xff]  }
 0x720   :  { %1790 = vmatpush1.bf16.msra.mxu0 %v6310_v4  ;;  %1863 = vmatpush1.bf16.msra.mxu1 %v6313_v41  ;;  %v7976_v4 = vld [vmem:[%s9860_s6 + $0x30] ss:$24 sps:$4 sm:$0xff]   ;;  %v6396_v41 = vld [vmem:[%s9859_s5 + $0x40] ss:$24 sps:$4 sm:$0xff]  }
 0x721   :  { %1791 = vmatprep.subr.bf16.mxu0 %v6318_v32  ;;  %1864 = vmatprep.subr.bf16.mxu1 %v6321_v33  ;;  %v6404_v32 = vld [vmem:[%s9859_s5 + $0x14] ss:$24 sps:$4 sm:$0xff]   ;;  %v7993_v33 = vld [vmem:[%s9860_s6] ss:$24 sps:$4 sm:$0xff]  }
 0x722   :  { %1821 = vmatprep.mubr.bf16.mxu0 %v9955_v15  ;;  %1894 = vmatprep.mubr.bf16.mxu1 %v9955_v15 }
 0x724   :  { %1792 = vmatpush1.bf16.msra.mxu0 %v6316_v1  ;;  %1865 = vmatpush1.bf16.msra.mxu1 %v6319_v14  ;;  %v6402_v1 = vld [vmem:[%s9859_s5 + $0x10] ss:$24 sps:$4 sm:$0xff]   ;;  %v8002_v14 = vld [vmem:[%s9860_s6 + $0x164] ss:$24 sps:$4 sm:$0xff]  }
 0x725   :  { %1793 = vmatprep.subr.bf16.mxu0 %v6324_v6  ;;  %1866 = vmatprep.subr.bf16.mxu1 %v6327_v11  ;;  %v8009_v6 = vld [vmem:[%s9860_s6 + $0x15c] ss:$24 sps:$4 sm:$0xff]  }
 0x728   :  { %1794 = vmatpush1.bf16.msra.mxu0 %v6322_v8  ;;  %1867 = vmatpush1.bf16.msra.mxu1 %v6325_v23  ;;  %v9958_v23 = vld [vmem:[#allocation12_spill] sm:$0xff] }
 0x729   :  { %1795 = vmatprep.subr.bf16.mxu0 %v6330_v27  ;;  %1868 = vmatprep.subr.bf16.mxu1 %v6333_v3 }
 0x72c   :  { %1796 = vmatpush1.bf16.msra.mxu0 %v6328_v26  ;;  %1869 = vmatpush1.bf16.msra.mxu1 %v6331_v21 }
 0x72d   :  { %1797 = vmatprep.subr.bf16.mxu0 %v6336_v25  ;;  %1870 = vmatprep.subr.bf16.mxu1 %v6339_v39 }
 0x730   :  { %1798 = vmatpush1.bf16.msra.mxu0 %v6334_v31  ;;  %1871 = vmatpush1.bf16.msra.mxu1 %v6337_v17  ;;  %v9959_v31 = vld [vmem:[#allocation13_spill] sm:$0xff] }
 0x731   :  { %1799 = vmatprep.subr.bf16.mxu0 %v6342_v22  ;;  %1872 = vmatprep.subr.bf16.mxu1 %v6345_v43  ;;  %v311_v17 = vadd.f32 %v9959_v31, %v7367_v13  ;;  %v9960_v13 = vld [vmem:[#allocation11_spill] sm:$0xff] }
 0x732   :  { %v8155_v31 = vld [vmem:[%s9860_s6 + $0x70] ss:$24 sps:$4 sm:$0xff]  }
 0x734   :  { %1800 = vmatpush1.bf16.msra.mxu0 %v6340_v18  ;;  %1873 = vmatpush1.bf16.msra.mxu1 %v6343_v7 }
 0x735   :  { %1801 = vmatprep.subr.bf16.mxu0 %v6348_v57  ;;  %1874 = vmatprep.subr.bf16.mxu1 %v6351_v9 }
 0x738   :  { %1802 = vmatpush1.bf16.msra.mxu0 %v6346_v59  ;;  %1875 = vmatpush1.bf16.msra.mxu1 %v6349_v35 }
 0x739   :  { %1803 = vmatprep.subr.bf16.mxu0 %v6354_v60  ;;  %1876 = vmatprep.subr.bf16.mxu1 %v6357_v24  ;;  %v6898_v60 = vld [vmem:[%s9858_s4] sm:$0xff] }
 0x73c   :  { %1804 = vmatpush1.bf16.msra.mxu0 %v6352_v28  ;;  %1877 = vmatpush1.bf16.msra.mxu1 %v6355_v29 }
 0x73d   :  { %2352 = vmatprep.subr.bf16.mxu1 %v7859_v0  ;;  %1935 = vmatprep.subr.bf16.mxu0 %v6362_v2 }
 0x73f   :  { %1822 = vmatmul.mubr.bf16.vlgmr.msra.gmra.mxu0 %v7834_v30  ;;  %1895 = vmatmul.mubr.bf16.vlgmr.msra.gmra.mxu1 %v7834_v30 }
 0x740   :  { %1831 = vmatprep.mubr.bf16.mxu0 %v9955_v15  ;;  %1904 = vmatprep.mubr.bf16.mxu1 %v9955_v15 }
 0x741   :  { %2353 = vmatpush1.bf16.msra.mxu1 %v7867_v19  ;;  %1936 = vmatpush1.bf16.msra.mxu0 %v6360_v5 }
 0x742   :  { %2354 = vmatprep.subr.bf16.mxu1 %v7877_v63  ;;  %1937 = vmatprep.subr.bf16.mxu0 %v6368_v36 }
 0x745   :  { %2355 = vmatpush1.bf16.msra.mxu1 %v7885_v37  ;;  %1938 = vmatpush1.bf16.msra.mxu0 %v6366_v40 }
 0x746   :  { %2356 = vmatprep.subr.bf16.mxu1 %v7895_v61  ;;  %1939 = vmatprep.subr.bf16.mxu0 %v6374_v42 }
 0x747   :  { %1832 = vmatmul.mubr.bf16.gmra.mxu0 %v7842_v34  ;;  %1905 = vmatmul.mubr.bf16.gmra.mxu1 %v7842_v34 }
 0x748   :  { %1841 = vmatprep.mubr.bf16.mxu0 %v9955_v15  ;;  %1914 = vmatprep.mubr.bf16.mxu1 %v9955_v15 }
 0x749   :  { %2357 = vmatpush1.bf16.msra.mxu1 %v7903_v44  ;;  %1940 = vmatpush1.bf16.msra.mxu0 %v6372_v45 }
 0x74a   :  { %2358 = vmatprep.subr.bf16.mxu1 %v7913_v46  ;;  %1941 = vmatprep.subr.bf16.mxu0 %v6380_v49 }
 0x74d   :  { %2359 = vmatpush1.bf16.msra.mxu1 %v7921_v50  ;;  %1942 = vmatpush1.bf16.msra.mxu0 %v6378_v52 }
 0x74e   :  { %2360 = vmatprep.subr.bf16.mxu1 %v7931_v53  ;;  %1943 = vmatprep.subr.bf16.mxu0 %v6386_v12  ;;  %v8030_v12 = vld [vmem:[%s9860_s6 + $0x160] ss:$24 sps:$4 sm:$0xff]  }
 0x74f   :  { %1842 = vmatmul.mubr.bf16.gmra.mxu0 %v7850_v62  ;;  %1915 = vmatmul.mubr.bf16.gmra.mxu1 %v7850_v62 }
 0x750   :  { %1851 = vmatprep.mubr.bf16.mxu0 %v9955_v15  ;;  %1924 = vmatprep.mubr.bf16.mxu1 %v9955_v15 }
 0x751   :  { %2361 = vmatpush1.bf16.msra.mxu1 %v7939_v54  ;;  %1944 = vmatpush1.bf16.msra.mxu0 %v6384_v55  ;;  %v8035_v55 = vld [vmem:[%s9860_s6 + $0x158] ss:$24 sps:$4 sm:$0xff]  }
 0x752   :  { %2362 = vmatprep.subr.bf16.mxu1 %v7949_v56  ;;  %1945 = vmatprep.subr.bf16.mxu0 %v6392_v58  ;;  %v8045_v58 = vld [vmem:[%s9860_s6 + $0x12c] ss:$24 sps:$4 sm:$0xff]  }
 0x755   :  { %2363 = vmatpush1.bf16.msra.mxu1 %v7957_v47  ;;  %1946 = vmatpush1.bf16.msra.mxu0 %v6390_v48  ;;  %v8054_v48 = vld [vmem:[%s9860_s6 + $0x130] ss:$24 sps:$4 sm:$0xff]  }
 0x756   :  { %2364 = vmatprep.subr.bf16.mxu1 %v7966_v38  ;;  %1947 = vmatprep.subr.bf16.mxu0 %v6398_v16  ;;  %v8059_v16 = vld [vmem:[%s9860_s6 + $0x128] ss:$24 sps:$4 sm:$0xff]  }
 0x759   :  { %2365 = vmatpush1.bf16.msra.mxu1 %v7976_v4  ;;  %1948 = vmatpush1.bf16.msra.mxu0 %v6396_v41  ;;  %v8071_v41 = vld [vmem:[%s9860_s6 + $0xfc] ss:$24 sps:$4 sm:$0xff]  }
 0x75a   :  { %2366 = vmatprep.subr.bf16.mxu1 %v7984_v10  ;;  %1949 = vmatprep.subr.bf16.mxu0 %v6404_v32  ;;  %v8080_v32 = vld [vmem:[%s9860_s6 + $0x100] ss:$24 sps:$4 sm:$0xff]  }
 0x75d   :  { %2367 = vmatpush1.bf16.msra.mxu1 %v7993_v33  ;;  %1950 = vmatpush1.bf16.msra.mxu0 %v6402_v1  ;;  %v8085_v1 = vld [vmem:[%s9860_s6 + $0xf8] ss:$24 sps:$4 sm:$0xff]  }
 0x75e   :  { %2434 = vmatprep.subr.bf16.mxu1 %v8002_v14  ;;  %2393 = vmatprep.subr.bf16.mxu0 %v8009_v6 }
 0x7df   :  { %v1386_v11 = vpop.f32.mrf.mxu0  ;;  %v1427_v8 = vpop.f32.mrf.mxu1 }
 0x7e0   :  { %v1433_v27 = vadd.f32 %v1386_v11, %v9958_v23  ;;  %v1447_v24 = vadd.f32 %v6898_v60, %v1427_v8  ;;  %v8092_v11 = vld [vmem:[%s9860_s6 + $0xd4] ss:$24 sps:$4 sm:$0xff]   ;;  %v8105_v23 = vld [vmem:[%s9860_s6 + $0xd0] ss:$24 sps:$4 sm:$0xff]  }
 0x7e1   :  { %v1388_v3 = vpop.f32.mrf.mxu0  ;;  %v6033_v26 = vpop.f32.mrf.mxu1  ;;  %v8097_v8 = vld [vmem:[%s9860_s6 + $0xcc] ss:$24 sps:$4 sm:$0xff]  }
 0x7e2   :  { %v5460_v21 = vmul.f32 -1.442695, %v1433_v27  ;;  %v1440_v18 = vadd.f32 %v1388_v3, %v311_v17  ;;  %v8110_v27 = vld [vmem:[%s9860_s6 + $0xc8] ss:$24 sps:$4 sm:$0xff]   ;;  %v8122_v3 = vld [vmem:[%s9860_s6 + $0x9c] ss:$24 sps:$4 sm:$0xff]  }
 0x7e3   :  { %v1390_v25 = vpop.f32.mrf.mxu0  ;;  %v1430_v39 = vpop.f32.mrf.mxu1  ;;  %9961 = vst [vmem:[#allocation12_spill] sm:$0xff] %v8122_v3  ;;  %v8130_v26 = vld [vmem:[%s9860_s6 + $0xa0] ss:$24 sps:$4 sm:$0xff]  }
 0x7e4   :  { %6596 = vpow2.f32 %v5460_v21  ;;  %v5461_v7 = vmul.f32 -1.442695, %v1440_v18  ;;  %v8135_v21 = vld [vmem:[%s9860_s6 + $0x98] ss:$24 sps:$4 sm:$0xff]   ;;  %v8142_v25 = vld [vmem:[%s9860_s6 + $0x74] ss:$24 sps:$4 sm:$0xff]  }
 0x7e5   :  { %v1391_v22 = vpop.f32.mrf.mxu0  ;;  %v6034_v43 = vpop.f32.mrf.mxu1  ;;  %9962 = vst [vmem:[#allocation13_spill] sm:$0xff] %v8135_v21  ;;  %v8147_v39 = vld [vmem:[%s9860_s6 + $0x6c] ss:$24 sps:$4 sm:$0xff]   ;;  %v8160_v17 = vld [vmem:[%s9860_s6 + $0x68] ss:$24 sps:$4 sm:$0xff]  }
 0x7e6   :  { %6598 = vpow2.f32 %v5461_v7  ;;  %9963 = vst [vmem:[#allocation11_spill] sm:$0xff] %v8147_v39  ;;  %9964 = vst [vmem:[#allocation14_spill] sm:$0xff] %v8160_v17  ;;  %v8172_v22 = vld [vmem:[%s9860_s6 + $0x3c] ss:$24 sps:$4 sm:$0xff]   ;;  %v8180_v43 = vld [vmem:[%s9860_s6 + $0x40] ss:$24 sps:$4 sm:$0xff]  }
 0x7e7   :  { %9965 = vst [vmem:[#allocation15_spill] sm:$0xff] %v8172_v22  ;;  %v8185_v18 = vld [vmem:[%s9860_s6 + $0x38] ss:$24 sps:$4 sm:$0xff]   ;;  %v8192_v7 = vld [vmem:[%s9860_s6 + $0x14] ss:$24 sps:$4 sm:$0xff]  }
 0x7e8   :  { %9966 = vst [vmem:[#allocation16_spill] sm:$0xff] %v8185_v18 }
 0x7f1   :  { %v6597_v57 = vpop.eup %6596 }
 0x7f2   :  { %v1437_v9 = vadd.f32 1.0, %v6597_v57  ;;  %v8197_v57 = vld [vmem:[%s9860_s6 + $0xc] ss:$24 sps:$4 sm:$0xff]  }
 0x7f3   :  { %v6599_v59 = vpop.eup %6598  ;;  %9967 = vst [vmem:[#allocation17_spill] sm:$0xff] %v8197_v57 }
 0x7f4   :  { %6600 = vrcp.f32 %v1437_v9  ;;  %v1444_v35 = vadd.f32 1.0, %v6599_v59  ;;  %v8205_v9 = vld [vmem:[%s9860_s6 + $0x10] ss:$24 sps:$4 sm:$0xff]  }
 0x7f5   :  { %v8210_v59 = vld [vmem:[%s9860_s6 + $0x8] ss:$24 sps:$4 sm:$0xff]  }
 0x7f6   :  { %6602 = vrcp.f32 %v1444_v35  ;;  %9968 = vst [vmem:[#allocation18_spill] sm:$0xff] %v8210_v59 }
 0x7ff   :  { %v1823_v35 = vpop.f32.mrf.mxu0  ;;  %v8255_v60 = vpop.f32.mrf.mxu1 }
 0x801   :  { %v6601_v28 = vpop.eup %6600 }
 0x802   :  { %v1448_v29 = vmul.f32 %v6601_v28, %v1447_v24  ;;  %v1825_v24 = vpop.f32.mrf.mxu0  ;;  %v8257_v28 = vpop.f32.mrf.mxu1 }
 0x803   :  { %v6603_v5 = vpop.eup %6602  ;;  %9969 = vst [vmem:[#allocation19_spill] sm:$0xff] %v8257_v28 }
 0x804   :  { %v1449_v2 = vadd.f32 %v1448_v29, %v9960_v13  ;;  %v1451_v36 = vsub.f32 1.0, %v6603_v5  ;;  %v1453_v45 = vmul.f32 %v6603_v5, %v7736_v51  ;;  %v8259_v29 = vpop.f32.mrf.mxu0  ;;  %v8261_v13 = vpop.f32.mrf.mxu1 }
 0x805   :  { %9970 = vst [vmem:[#allocation20_spill] sm:$0xff] %v8259_v29  ;;  %9971 = vst [vmem:[#allocation21_spill] sm:$0xff] %v8261_v13 }
 0x806   :  { %6604 = vtanh.f32 %v1449_v2  ;;  %v8263_v2 = vpop.f32.mrf.mxu0  ;;  %v8265_v5 = vpop.f32.mrf.mxu1 }
 0x807   :  { %9972 = vst [vmem:[#allocation22_spill] sm:$0xff] %v8263_v2  ;;  %9973 = vst [vmem:[#allocation23_spill] sm:$0xff] %v8265_v5 }
 0x813   :  { %v6605_v40 = vpop.eup %6604 }
 0x814   :  { %v1452_v42 = vmul.f32 %v6605_v40, %v1451_v36  ;;  %v8267_v36 = vpop.f32.mrf.mxu0  ;;  %v8269_v40 = vpop.f32.mrf.mxu1 }
 0x815   :  { %9974 = vst [vmem:[#allocation24_spill] sm:$0xff] %v8267_v36  ;;  %9975 = vst [vmem:[#allocation25_spill] sm:$0xff] %v8269_v40 }
 0x816   :  { %v1454_v49 = vadd.f32 %v1453_v45, %v1452_v42  ;;  %v8271_v42 = vpop.f32.mrf.mxu0  ;;  %v8273_v45 = vpop.f32.mrf.mxu1 }
 0x817   :  { %9976 = vst [vmem:[#allocation26_spill] sm:$0xff] %v8271_v42  ;;  %9977 = vst [vmem:[#allocation27_spill] sm:$0xff] %v8273_v45 }
 0x818   :  { %v8021_v52 = vpack.c.bf16 %v1454_v49, %v7736_v51  ;;  %v8040_v51 = vld [vmem:[%s9860_s6 + $0x134] ss:$24 sps:$4 sm:$0xff]   ;;  %v8275_v49 = vpop.f32.mrf.mxu0 }
 0x819   :  { %9978 = vst [vmem:[#allocation28_spill] sm:$0xff] %v8275_v49 }
 0x81a   :  { %1852 = vmatmul.mubr.bf16.gmra.mxu0 %v8021_v52  ;;  %1925 = vmatmul.mubr.bf16.gmra.mxu1 %v8021_v52  ;;  %v8279_v28 = vpop.f32.mrf.mxu0 }
 0x81b   :  { %1967 = vmatprep.mubr.bf16.mxu0 %v9955_v15  ;;  %2384 = vmatprep.mubr.bf16.mxu1 %v9955_v15  ;;  %9980 = vst [vmem:[#allocation30_spill] sm:$0xff] %v8279_v28 }
 0x81c   :  { %v8283_v13 = vpop.f32.mrf.mxu0 }
 0x81d   :  { %9982 = vst [vmem:[#allocation32_spill] sm:$0xff] %v8283_v13 }
 0x81e   :  { %v8287_v5 = vpop.f32.mrf.mxu0 }
 0x81f   :  { %9984 = vst [vmem:[#allocation34_spill] sm:$0xff] %v8287_v5  ;;  %v9992_v5 = vld [vmem:[#allocation6_spill] sm:$0xff] }
 0x820   :  { %v8291_v40 = vpop.f32.mrf.mxu0 }
 0x821   :  { %9986 = vst [vmem:[#allocation36_spill] sm:$0xff] %v8291_v40 }
 0x822   :  { %1968 = vmatmul.mubr.bf16.vlgmr.msra.gmra.mxu0 %v7834_v30  ;;  %2385 = vmatmul.mubr.bf16.vlgmr.msra.gmra.mxu1 %v9955_v15  ;;  %v8066_v30 = vld [vmem:[%s9860_s6 + $0x104] ss:$24 sps:$4 sm:$0xff]   ;;  %v8295_v45 = vpop.f32.mrf.mxu0 }
 0x823   :  { %2435 = vmatpush1.bf16.msra.mxu1 %v8030_v12  ;;  %2394 = vmatpush1.bf16.msra.mxu0 %v8035_v55  ;;  %9988 = vst [vmem:[#allocation38_spill] sm:$0xff] %v8295_v45 }
 0x824   :  { %2436 = vmatprep.subr.bf16.mxu1 %v8040_v51  ;;  %2395 = vmatprep.subr.bf16.mxu0 %v8045_v58 }
 0x825   :  { %1977 = vmatprep.mubr.bf16.mxu0 %v9955_v15  ;;  %2466 = vmatprep.mubr.bf16.mxu1 %v9955_v15 }
 0x827   :  { %2437 = vmatpush1.bf16.msra.mxu1 %v8054_v48  ;;  %2396 = vmatpush1.bf16.msra.mxu0 %v8059_v16 }
 0x828   :  { %2438 = vmatprep.subr.bf16.mxu1 %v8066_v30  ;;  %2397 = vmatprep.subr.bf16.mxu0 %v8071_v41 }
 0x82a   :  { %1978 = vmatmul.mubr.bf16.gmra.mxu0 %v7842_v34  ;;  %v8117_v34 = vld [vmem:[%s9860_s6 + $0xa4] ss:$24 sps:$4 sm:$0xff]  }
 0x82b   :  { %2439 = vmatpush1.bf16.msra.mxu1 %v8080_v32  ;;  %2398 = vmatpush1.bf16.msra.mxu0 %v8085_v1 }
 0x82c   :  { %2440 = vmatprep.subr.bf16.mxu1 %v8092_v11  ;;  %2399 = vmatprep.subr.bf16.mxu0 %v8097_v8 }
 0x82d   :  { %1987 = vmatprep.mubr.bf16.mxu0 %v9955_v15 }
 0x82f   :  { %2441 = vmatpush1.bf16.msra.mxu1 %v8105_v23  ;;  %2400 = vmatpush1.bf16.msra.mxu0 %v8110_v27 }
 0x830   :  { %2442 = vmatprep.subr.bf16.mxu1 %v8117_v34  ;;  %2401 = vmatprep.subr.bf16.mxu0 %v8122_v3 }
 0x832   :  { %1988 = vmatmul.mubr.bf16.gmra.mxu0 %v7850_v62  ;;  %v8167_v62 = vld [vmem:[%s9860_s6 + $0x44] ss:$24 sps:$4 sm:$0xff]  }
 0x833   :  { %2443 = vmatpush1.bf16.msra.mxu1 %v8130_v26  ;;  %2402 = vmatpush1.bf16.msra.mxu0 %v8135_v21 }
 0x834   :  { %2444 = vmatprep.subr.bf16.mxu1 %v8142_v25  ;;  %2403 = vmatprep.subr.bf16.mxu0 %v8147_v39 }
 0x835   :  { %1997 = vmatprep.mubr.bf16.mxu0 %v9955_v15 }
 0x837   :  { %2445 = vmatpush1.bf16.msra.mxu1 %v8155_v31  ;;  %2404 = vmatpush1.bf16.msra.mxu0 %v8160_v17 }
 0x838   :  { %2446 = vmatprep.subr.bf16.mxu1 %v8167_v62  ;;  %2405 = vmatprep.subr.bf16.mxu0 %v8172_v22 }
 0x83a   :  { %1998 = vmatmul.mubr.bf16.gmra.mxu0 %v8021_v52  ;;  %v8277_v52 = vpop.f32.mrf.mxu1 }
 0x83b   :  { %2447 = vmatpush1.bf16.msra.mxu1 %v8180_v43  ;;  %2406 = vmatpush1.bf16.msra.mxu0 %v8185_v18  ;;  %9979 = vst [vmem:[#allocation29_spill] sm:$0xff] %v8277_v52  ;;  %v1537_v52 = vsub.s32 4, %v9992_v5 }
 0x83c   :  { %2448 = vmatprep.subr.bf16.mxu1 %v8192_v7  ;;  %2407 = vmatprep.subr.bf16.mxu0 %v8197_v57  ;;  %v8281_v20 = vpop.f32.mrf.mxu1 }
 0x83d   :  { %2425 = vmatprep.mubr.bf16.mxu0 %v9955_v15  ;;  %9981 = vst [vmem:[#allocation31_spill] sm:$0xff] %v8281_v20  ;;  %v8302_v20 = vld [vmem:[%s9861_s7] sm:$0x3f] }
 0x83e   :  { %v8285_v2 = vpop.f32.mrf.mxu1 }
 0x83f   :  { %2449 = vmatpush1.bf16.msra.mxu1 %v8205_v9  ;;  %2408 = vmatpush1.bf16.msra.mxu0 %v8210_v59  ;;  %9983 = vst [vmem:[#allocation33_spill] sm:$0xff] %v8285_v2 }
 0x840   :  { %2529 = vmatprep.subr.bf16.mxu0 %v7859_v0  ;;  %2570 = vmatprep.subr.bf16.mxu1 %v8009_v6  ;;  %v8289_v36 = vpop.f32.mrf.mxu1 }
 0x841   :  { %9985 = vst [vmem:[#allocation35_spill] sm:$0xff] %v8289_v36  ;;  %v1541_v36 = vsub.s32 5, %v9992_v5 }
 0x842   :  { %2467 = vmatmul.mubr.bf16.vlgmr.msra.gmra.mxu1 %v9955_v15  ;;  %2426 = vmatmul.mubr.bf16.vlgmr.msra.gmra.mxu0 %v9955_v15  ;;  %v8293_v42 = vpop.f32.mrf.mxu1 }
 0x843   :  { %2530 = vmatpush1.bf16.msra.mxu0 %v7867_v19  ;;  %2571 = vmatpush1.bf16.msra.mxu1 %v8035_v55  ;;  %9987 = vst [vmem:[#allocation37_spill] sm:$0xff] %v8293_v42  ;;  %v9995_v42 = vld [vmem:[#allocation7_spill] sm:$0xff] }
 0x844   :  { %2531 = vmatprep.subr.bf16.mxu0 %v7877_v63  ;;  %2572 = vmatprep.subr.bf16.mxu1 %v8045_v58  ;;  %v8297_v49 = vpop.f32.mrf.mxu1  ;;  %v8315_v45 = vrot.slane %v8302_v20, %v9995_v42 }
 0x845   :  { %2561 = vmatprep.mubr.bf16.mxu0 %v9955_v15  ;;  %2602 = vmatprep.mubr.bf16.mxu1 %v9955_v15  ;;  %9989 = vst [vmem:[#allocation39_spill] sm:$0xff] %v8297_v49 }
 0x846   :  { %9996 = vst [vmem:[#allocation43_spill] sm:$0xff] %v8315_v45 }
 0x847   :  { %2532 = vmatpush1.bf16.msra.mxu0 %v7885_v37  ;;  %2573 = vmatpush1.bf16.msra.mxu1 %v8059_v16 }
 0x848   :  { %2533 = vmatprep.subr.bf16.mxu0 %v7895_v61  ;;  %2574 = vmatprep.subr.bf16.mxu1 %v8071_v41 }
 0x84b   :  { %2534 = vmatpush1.bf16.msra.mxu0 %v7903_v44  ;;  %2575 = vmatpush1.bf16.msra.mxu1 %v8085_v1 }
 0x84c   :  { %2535 = vmatprep.subr.bf16.mxu0 %v7913_v46  ;;  %2576 = vmatprep.subr.bf16.mxu1 %v8097_v8 }
 0x84f   :  { %2536 = vmatpush1.bf16.msra.mxu0 %v7921_v50  ;;  %2577 = vmatpush1.bf16.msra.mxu1 %v8110_v27 }
 0x850   :  { %2537 = vmatprep.subr.bf16.mxu0 %v7931_v53  ;;  %2578 = vmatprep.subr.bf16.mxu1 %v8122_v3 }
 0x853   :  { %2538 = vmatpush1.bf16.msra.mxu0 %v7939_v54  ;;  %2579 = vmatpush1.bf16.msra.mxu1 %v8135_v21 }
 0x854   :  { %2539 = vmatprep.subr.bf16.mxu0 %v7949_v56  ;;  %2580 = vmatprep.subr.bf16.mxu1 %v8147_v39 }
 0x857   :  { %2540 = vmatpush1.bf16.msra.mxu0 %v7957_v47  ;;  %2581 = vmatpush1.bf16.msra.mxu1 %v8160_v17 }
 0x858   :  { %2541 = vmatprep.subr.bf16.mxu0 %v7966_v38  ;;  %2582 = vmatprep.subr.bf16.mxu1 %v8172_v22 }
 0x85b   :  { %2542 = vmatpush1.bf16.msra.mxu0 %v7976_v4  ;;  %2583 = vmatpush1.bf16.msra.mxu1 %v8185_v18 }
 0x85c   :  { %2543 = vmatprep.subr.bf16.mxu0 %v7984_v10  ;;  %2584 = vmatprep.subr.bf16.mxu1 %v8197_v57  ;;  %v10000_v57 = vld [vmem:[#allocation9_spill] sm:$0xff] }
 0x85d   :  { %v8335_v18 = vrot.slane %v8302_v20, %v10000_v57 }
 0x85f   :  { %2544 = vmatpush1.bf16.msra.mxu0 %v7993_v33  ;;  %2585 = vmatpush1.bf16.msra.mxu1 %v8210_v59  ;;  %10001 = vst [vmem:[#allocation47_spill] sm:$0xff] %v8335_v18 }
 0x860   :  { %2611 = vmatprep.subr.bf16.mxu0 %v8002_v14  ;;  %2707 = vmatprep.subr.bf16.mxu1 %v7859_v0 }
 0x8da   :  { %v8304_v13 = vpop.f32.mrf.mxu0  ;;  %v8306_v2 = vpop.f32.mrf.mxu1 }
 0x8db   :  { %9990 = vst [vmem:[#allocation40_spill] sm:$0xff] %v8304_v13  ;;  %9991 = vst [vmem:[#allocation41_spill] sm:$0xff] %v8306_v2  ;;  %v8323_v13 = vrot.slane %v8302_v20, %v1537_v52 }
 0x8dc   :  { %v8309_v28 = vpop.f32.mrf.mxu0  ;;  %v8311_v40 = vpop.f32.mrf.mxu1 }
 0x8dd   :  { %9993 = vst [vmem:[#allocation6_spill] sm:$0xff] %v8309_v28  ;;  %9994 = vst [vmem:[#allocation42_spill] sm:$0xff] %v8311_v40  ;;  %v1824_v28 = vadd.f32 %v1823_v35, %v8315_v45  ;;  %v8331_v40 = vrot.slane %v8302_v20, %v1541_v36  ;;  %v1826_v36 = vadd.f32 %v1825_v24, %v8335_v18 }
 0x8de   :  { %v8318_v49 = vpop.f32.mrf.mxu0  ;;  %v8320_v29 = vpop.f32.mrf.mxu1 }
 0x8df   :  { %9997 = vst [vmem:[#allocation44_spill] sm:$0xff] %v8318_v49  ;;  %9998 = vst [vmem:[#allocation45_spill] sm:$0xff] %v8320_v29 }
 0x8e0   :  { %v8325_v2 = vpop.f32.mrf.mxu0  ;;  %v8327_v0 = vpop.f32.mrf.mxu1 }
 0x8e1   :  { %9999 = vst [vmem:[#allocation46_spill] sm:$0xff] %v8325_v2 }
 0x8e2   :  { %v1969_v42 = vpop.f32.mrf.mxu0  ;;  %v2386_v59 = vpop.f32.mrf.mxu1 }
 0x8e3   :  { %v8338_v29 = vadd.f32 %v1969_v42, %v8323_v13  ;;  %v2475_v52 = vadd.f32 %v2386_v59, %v1824_v28 }
 0x8e4   :  { %v1971_v49 = vpop.f32.mrf.mxu0  ;;  %v2388_v22 = vpop.f32.mrf.mxu1 }
 0x8e5   :  { %10002 = vst [vmem:[#allocation48_spill] sm:$0xff] %v8338_v29  ;;  %v5558_v2 = vmul.f32 -1.442695, %v2475_v52  ;;  %v8341_v17 = vadd.f32 %v1971_v49, %v8331_v40  ;;  %v2489_v3 = vadd.f32 %v2388_v22, %v1826_v36 }
 0x8e6   :  { %v1973_v35 = vpop.f32.mrf.mxu0  ;;  %v2390_v45 = vpop.f32.mrf.mxu1 }
 0x8e7   :  { %10003 = vst [vmem:[#allocation49_spill] sm:$0xff] %v8341_v17  ;;  %6606 = vpow2.f32 %v5558_v2  ;;  %v8345_v39 = vadd.f32 %v1973_v35, %v8323_v13  ;;  %v5560_v52 = vmul.f32 -1.442695, %v2489_v3 }
 0x8e8   :  { %v1975_v57 = vpop.f32.mrf.mxu0  ;;  %v2391_v21 = vpop.f32.mrf.mxu1 }
 0x8e9   :  { %10004 = vst [vmem:[#allocation50_spill] sm:$0xff] %v8345_v39  ;;  %v8348_v42 = vadd.f32 %v1975_v57, %v8331_v40  ;;  %6608 = vpow2.f32 %v5560_v52 }
 0x8ea   :  { %v1979_v59 = vpop.f32.mrf.mxu0 }
 0x8eb   :  { %10005 = vst [vmem:[#allocation51_spill] sm:$0xff] %v8348_v42  ;;  %v8351_v28 = vadd.f32 %v1979_v59, %v8323_v13 }
 0x8ec   :  { %v1981_v49 = vpop.f32.mrf.mxu0 }
 0x8ed   :  { %10006 = vst [vmem:[#allocation52_spill] sm:$0xff] %v8351_v28  ;;  %v8354_v45 = vadd.f32 %v1981_v49, %v8331_v40  ;;  %v1533_v28 = vsub.s32 3, %v9992_v5 }
 0x8ee   :  { %v1983_v24 = vpop.f32.mrf.mxu0 }
 0x8ef   :  { %10007 = vst [vmem:[#allocation53_spill] sm:$0xff] %v8354_v45  ;;  %v8357_v2 = vadd.f32 %v1983_v24, %v8323_v13 }
 0x8f0   :  { %v1985_v35 = vpop.f32.mrf.mxu0 }
 0x8f1   :  { %10008 = vst [vmem:[#allocation54_spill] sm:$0xff] %v8357_v2  ;;  %v8360_v21 = vadd.f32 %v1985_v35, %v8331_v40 }
 0x8f2   :  { %v1989_v22 = vpop.f32.mrf.mxu0 }
 0x8f3   :  { %10009 = vst [vmem:[#allocation55_spill] sm:$0xff] %v8360_v21  ;;  %v8363_v57 = vadd.f32 %v1989_v22, %v8323_v13 }
 0x8f4   :  { %v6607_v36 = vpop.eup %6606  ;;  %v1991_v59 = vpop.f32.mrf.mxu0 }
 0x8f5   :  { %10010 = vst [vmem:[#allocation56_spill] sm:$0xff] %v8363_v57  ;;  %v2483_v17 = vadd.f32 1.0, %v6607_v36  ;;  %v8366_v3 = vadd.f32 %v1991_v59, %v8331_v40 }
 0x8f6   :  { %v1993_v49 = vpop.f32.mrf.mxu0  ;;  %v6609_v36 = vpop.eup %6608 }
 0x8f7   :  { %10011 = vst [vmem:[#allocation57_spill] sm:$0xff] %v8366_v3  ;;  %6610 = vrcp.f32 %v2483_v17  ;;  %v8369_v24 = vadd.f32 %v1993_v49, %v8323_v13  ;;  %v8383_v17 = vld [vmem:[%s9862_s8] sm:$0xff]  ;;  %v10017_v49 = vld [vmem:[#allocation8_spill] sm:$0xff] }
 0x8f8   :  { %v1995_v29 = vpop.f32.mrf.mxu0  ;;  %10016 = vst [vmem:[#allocation62_spill] sm:$0xff] %v8383_v17 }
 0x8f9   :  { %10012 = vst [vmem:[#allocation58_spill] sm:$0xff] %v8369_v24  ;;  %v8372_v52 = vadd.f32 %v1995_v29, %v8331_v40  ;;  %v8387_v29 = vrot.slane %v8302_v20, %v10017_v49 }
 0x8fa   :  { %v1999_v35 = vpop.f32.mrf.mxu0 }
 0x8fb   :  { %10013 = vst [vmem:[#allocation59_spill] sm:$0xff] %v8372_v52  ;;  %v8375_v42 = vadd.f32 %v1999_v35, %v8323_v13  ;;  %10018 = vst [vmem:[#allocation63_spill] sm:$0xff] %v8387_v29  ;;  %v2497_v35 = vadd.f32 1.0, %v6609_v36  ;;  %v1897_v24 = vadd.f32 %v8255_v60, %v8387_v29 }
 0x8fc   :  { %v2001_v22 = vpop.f32.mrf.mxu0 }
 0x8fd   :  { %10014 = vst [vmem:[#allocation60_spill] sm:$0xff] %v8375_v42  ;;  %v8378_v39 = vadd.f32 %v2001_v22, %v8331_v40  ;;  %6612 = vrcp.f32 %v2497_v35 }
 0x8fe   :  { %v2003_v59 = vpop.f32.mrf.mxu0 }
 0x8ff   :  { %10015 = vst [vmem:[#allocation61_spill] sm:$0xff] %v8378_v39  ;;  %v8394_v39 = vrot.slane %v8302_v20, %v1533_v28 }
 0x900   :  { %v2005_v45 = vpop.f32.mrf.mxu0 }
 0x901   :  { %10019 = vst [vmem:[#allocation64_spill] sm:$0xff] %v8394_v39  ;;  %v1933_v5 = vadd.f32 %v8327_v0, %v8394_v39 }
 0x902   :  { %v2468_v21 = vpop.f32.mrf.mxu1  ;;  %v2427_v2 = vpop.f32.mrf.mxu0 }
 0x903   :  { %v2503_v22 = vadd.f32 %v2427_v2, %v8383_v17 }
 0x904   :  { %v6611_v3 = vpop.eup %6610  ;;  %v2469_v57 = vpop.f32.mrf.mxu1 }
 0x905   :  { %v2429_v52 = vpop.f32.mrf.mxu0  ;;  %v2505_v42 = vmul.f32 %v6611_v3, %v2503_v22  ;;  %v2004_v57 = vadd.f32 %v2003_v59, %v8323_v13 }
 0x906   :  { %v2470_v17 = vpop.f32.mrf.mxu1 }
 0x907   :  { %v2430_v49 = vpop.f32.mrf.mxu0  ;;  %v2507_v36 = vadd.f32 %v2505_v42, %v1897_v24  ;;  %v2490_v52 = vadd.f32 %v2470_v17, %v2004_v57 }
 0x908   :  { %v2472_v13 = vpop.f32.mrf.mxu1 }
 0x909   :  { %v2431_v21 = vpop.f32.mrf.mxu0  ;;  %6614 = vtanh.f32 %v2507_v36  ;;  %v5561_v29 = vmul.f32 -1.442695, %v2490_v52 }
 0x90a   :  { %v2476_v18 = vadd.f32 %v2431_v21, %v1933_v5  ;;  %v6613_v60 = vpop.eup %6612 }
 0x90b   :  { %v2511_v20 = vsub.f32 1.0, %v6613_v60  ;;  %v2515_v49 = vmul.f32 0.0, %v6613_v60 }
 0x90c   :  { %v5559_v2 = vmul.f32 -1.442695, %v2476_v18  ;;  %v8404_v18 = vld [vmem:[%s9862_s8 + $0x8] sm:$0xff] }
 0x90d   :  { %v2504_v17 = vadd.f32 %v2472_v13, %v8404_v18  ;;  %v10030_v13 = vld [vmem:[#allocation10_spill] sm:$0xff] }
 0x90e   :  { %6616 = vpow2.f32 %v5559_v2 }
 0x90f   :  { %6618 = vpow2.f32 %v5561_v29  ;;  %v2006_v29 = vadd.f32 %v2005_v45, %v8331_v40  ;;  %v10023_v40 = vld [vmem:[#allocation13_spill] sm:$0xff]  ;;  %v10024_v45 = vld [vmem:[#allocation11_spill] sm:$0xff] }
 0x916   :  { %v6615_v28 = vpop.eup %6614 }
 0x917   :  { %v2513_v3 = vmul.f32 %v6615_v28, %v2511_v20 }
 0x919   :  { %v8399_v35 = vadd.f32 %v2515_v49, %v2513_v3  ;;  %v10025_v3 = vld [vmem:[#allocation14_spill] sm:$0xff]  ;;  %v10026_v49 = vld [vmem:[#allocation15_spill] sm:$0xff] }
 0x91b   :  { %10020 = vst [vmem:[#allocation65_spill] sm:$0xff] %v8399_v35  ;;  %v6617_v0 = vpop.eup %6616 }
 0x91c   :  { %v2484_v42 = vadd.f32 1.0, %v6617_v0  ;;  %v6619_v24 = vpop.eup %6618  ;;  %v10027_v0 = vld [vmem:[#allocation16_spill] sm:$0xff] }
 0x91d   :  { %v2498_v59 = vadd.f32 1.0, %v6619_v24  ;;  %v10029_v24 = vld [vmem:[#allocation18_spill] sm:$0xff] }
 0x91e   :  { %6620 = vrcp.f32 %v2484_v42  ;;  %v10028_v42 = vld [vmem:[#allocation17_spill] sm:$0xff] }
 0x91f   :  { %6622 = vrcp.f32 %v2498_v59  ;;  %v10031_v59 = vld [vmem:[#allocation43_spill] sm:$0xff] }
 0x92b   :  { %v6621_v22 = vpop.eup %6620 }
 0x92c   :  { %v2506_v5 = vmul.f32 %v6621_v22, %v2504_v17  ;;  %v6623_v21 = vpop.eup %6622  ;;  %v10032_v17 = vld [vmem:[#allocation20_spill] sm:$0xff] }
 0x92d   :  { %v2512_v2 = vsub.f32 1.0, %v6623_v21  ;;  %v2516_v60 = vmul.f32 0.0, %v6623_v21  ;;  %v1828_v22 = vadd.f32 %v10032_v17, %v10031_v59  ;;  %v10034_v17 = vld [vmem:[#allocation47_spill] sm:$0xff]  ;;  %v10035_v59 = vld [vmem:[#allocation22_spill] sm:$0xff] }
 0x92e   :  { %v2508_v36 = vadd.f32 %v2506_v5, %v2006_v29 }
 0x930   :  { %6624 = vtanh.f32 %v2508_v36 }
 0x93d   :  { %v6625_v57 = vpop.eup %6624 }
 0x93e   :  { %v2514_v52 = vmul.f32 %v6625_v57, %v2512_v2 }
 0x940   :  { %v8408_v20 = vadd.f32 %v2516_v60, %v2514_v52 }
 0x942   :  { %10021 = vst [vmem:[#allocation66_spill] sm:$0xff] %v8408_v20  ;;  %v2528_v28 = vpack.c.bf16 %v8408_v20, %v8399_v35 }
 0x944   :  { %2562 = vmatmul.mubr.bf16.vlgmr.msra.gmra.mxu0 %v2528_v28  ;;  %2603 = vmatmul.mubr.bf16.vlgmr.msra.gmra.mxu1 %v2528_v28 }
 0x945   :  { %2612 = vmatpush1.bf16.msra.mxu0 %v8030_v12  ;;  %2643 = vmatprep.mubr.bf16.mxu0 %v9955_v15 }
 0x946   :  { %2613 = vmatprep.subr.bf16.mxu0 %v8040_v51  ;;  %2708 = vmatpush1.bf16.msra.mxu1 %v7867_v19  ;;  %v10022_v19 = vld [vmem:[#allocation12_spill] sm:$0xff] }
 0x947   :  { %2709 = vmatprep.subr.bf16.mxu1 %v7877_v63  ;;  %2739 = vmatprep.mubr.bf16.mxu1 %v9955_v15 }
 0x949   :  { %2614 = vmatpush1.bf16.msra.mxu0 %v8054_v48 }
 0x94a   :  { %2615 = vmatprep.subr.bf16.mxu0 %v8066_v30  ;;  %2710 = vmatpush1.bf16.msra.mxu1 %v7885_v37 }
 0x94b   :  { %2711 = vmatprep.subr.bf16.mxu1 %v7895_v61 }
 0x94d   :  { %2616 = vmatpush1.bf16.msra.mxu0 %v8080_v32 }
 0x94e   :  { %2617 = vmatprep.subr.bf16.mxu0 %v8092_v11  ;;  %2712 = vmatpush1.bf16.msra.mxu1 %v7903_v44 }
 0x94f   :  { %2713 = vmatprep.subr.bf16.mxu1 %v7913_v46 }
 0x951   :  { %2618 = vmatpush1.bf16.msra.mxu0 %v8105_v23 }
 0x952   :  { %2619 = vmatprep.subr.bf16.mxu0 %v8117_v34  ;;  %2714 = vmatpush1.bf16.msra.mxu1 %v7921_v50 }
 0x953   :  { %2715 = vmatprep.subr.bf16.mxu1 %v7931_v53 }
 0x955   :  { %2620 = vmatpush1.bf16.msra.mxu0 %v8130_v26 }
 0x956   :  { %2621 = vmatprep.subr.bf16.mxu0 %v8142_v25  ;;  %2716 = vmatpush1.bf16.msra.mxu1 %v7939_v54 }
 0x957   :  { %2717 = vmatprep.subr.bf16.mxu1 %v7949_v56 }
 0x959   :  { %2622 = vmatpush1.bf16.msra.mxu0 %v8155_v31 }
 0x95a   :  { %2623 = vmatprep.subr.bf16.mxu0 %v8167_v62  ;;  %2718 = vmatpush1.bf16.msra.mxu1 %v7957_v47 }
 0x95b   :  { %2719 = vmatprep.subr.bf16.mxu1 %v7966_v38 }
 0x95d   :  { %2624 = vmatpush1.bf16.msra.mxu0 %v8180_v43 }
 0x95e   :  { %2625 = vmatprep.subr.bf16.mxu0 %v8192_v7  ;;  %2720 = vmatpush1.bf16.msra.mxu1 %v7976_v4 }
 0x95f   :  { %2721 = vmatprep.subr.bf16.mxu1 %v7984_v10 }
 0x961   :  { %2626 = vmatpush1.bf16.msra.mxu0 %v8205_v9 }
 0x962   :  { %2748 = vmatprep.subr.bf16.mxu0 %v8009_v6  ;;  %2722 = vmatpush1.bf16.msra.mxu1 %v7993_v33 }
 0x963   :  { %2789 = vmatprep.subr.bf16.mxu1 %v8002_v14 }
 0x964   :  { %2644 = vmatmul.mubr.bf16.vlgmr.msra.gmra.mxu0 %v2528_v28  ;;  %v10033_v28 = vld [vmem:[#allocation42_spill] sm:$0xff] }
 0x965   :  { %2749 = vmatpush1.bf16.msra.mxu0 %v8035_v55  ;;  %2780 = vmatprep.mubr.bf16.mxu0 %v9955_v15 }
 0x966   :  { %2750 = vmatprep.subr.bf16.mxu0 %v8045_v58 }
 0x969   :  { %2751 = vmatpush1.bf16.msra.mxu0 %v8059_v16 }
 0x96a   :  { %2752 = vmatprep.subr.bf16.mxu0 %v8071_v41 }
 0x96d   :  { %2753 = vmatpush1.bf16.msra.mxu0 %v8085_v1 }
 0x96e   :  { %2754 = vmatprep.subr.bf16.mxu0 %v8097_v8 }
 0x971   :  { %2755 = vmatpush1.bf16.msra.mxu0 %v8110_v27 }
 0x972   :  { %2756 = vmatprep.subr.bf16.mxu0 %v10022_v19 }
 0x975   :  { %2757 = vmatpush1.bf16.msra.mxu0 %v10023_v40  ;;  %v10036_v40 = vld [vmem:[#allocation62_spill] sm:$0xff] }
 0x976   :  { %2758 = vmatprep.subr.bf16.mxu0 %v10024_v45 }
 0x979   :  { %2759 = vmatpush1.bf16.msra.mxu0 %v10025_v3 }
 0x97a   :  { %2760 = vmatprep.subr.bf16.mxu0 %v10026_v49 }
 0x97d   :  { %2761 = vmatpush1.bf16.msra.mxu0 %v10027_v0  ;;  %v1929_v0 = vadd.f32 %v10033_v28, %v8394_v39  ;;  %v10039_v39 = vld [vmem:[#allocation60_spill] sm:$0xff] }
 0x97e   :  { %2762 = vmatprep.subr.bf16.mxu0 %v10028_v42 }
 0x981   :  { %2763 = vmatpush1.bf16.msra.mxu0 %v10029_v24 }
 0x982   :  { %2885 = vmatprep.subr.bf16.mxu0 %v10030_v13 }
 0xa04   :  { %v2563_v29 = vpop.f32.mrf.mxu0  ;;  %v2604_v5 = vpop.f32.mrf.mxu1 }
 0xa05   :  { %v2652_v36 = vadd.f32 %v2563_v29, %v1828_v22  ;;  %v1830_v22 = vadd.f32 %v10035_v59, %v10034_v17  ;;  %v2680_v28 = vadd.f32 %v2604_v5, %v10036_v40 }
 0xa06   :  { %v2565_v21 = vpop.f32.mrf.mxu0  ;;  %v2606_v2 = vpop.f32.mrf.mxu1 }
 0xa07   :  { %v5562_v57 = vmul.f32 -1.442695, %v2652_v36  ;;  %v2666_v2 = vadd.f32 %v2565_v21, %v1830_v22 }
 0xa08   :  { %v2567_v52 = vpop.f32.mrf.mxu0  ;;  %v2607_v60 = vpop.f32.mrf.mxu1 }
 0xa09   :  { %6626 = vpow2.f32 %v5562_v57  ;;  %v5564_v52 = vmul.f32 -1.442695, %v2666_v2  ;;  %v10040_v2 = vld [vmem:[#allocation61_spill] sm:$0xff] }
 0xa0a   :  { %v2568_v42 = vpop.f32.mrf.mxu0  ;;  %v2608_v49 = vpop.f32.mrf.mxu1 }
 0xa0b   :  { %v2653_v24 = vadd.f32 %v2608_v49, %v1929_v0  ;;  %v10037_v49 = vld [vmem:[#allocation63_spill] sm:$0xff]  ;;  %v10038_v0 = vld [vmem:[#allocation21_spill] sm:$0xff] }
 0xa0d   :  { %v5563_v3 = vmul.f32 -1.442695, %v2653_v24 }
 0xa0f   :  { %6628 = vpow2.f32 %v5563_v3  ;;  %v1901_v3 = vadd.f32 %v10038_v0, %v10037_v49 }
 0xa16   :  { %v6627_v13 = vpop.eup %6626 }
 0xa17   :  { %v2660_v45 = vadd.f32 1.0, %v6627_v13 }
 0xa19   :  { %6630 = vrcp.f32 %v2660_v45 }
 0xa1c   :  { %v6629_v29 = vpop.eup %6628 }
 0xa1d   :  { %v2661_v36 = vadd.f32 1.0, %v6629_v29 }
 0xa1f   :  { %6632 = vrcp.f32 %v2661_v36 }
 0xa20   :  { %6634 = vpow2.f32 %v5564_v52 }
 0xa24   :  { %v2645_v60 = vpop.f32.mrf.mxu0 }
 0xa26   :  { %v6631_v42 = vpop.eup %6630  ;;  %v2646_v57 = vpop.f32.mrf.mxu0 }
 0xa27   :  { %v2682_v24 = vmul.f32 %v6631_v42, %v2680_v28 }
 0xa28   :  { %v2647_v13 = vpop.f32.mrf.mxu0 }
 0xa29   :  { %v2684_v45 = vadd.f32 %v2682_v24, %v1901_v3  ;;  %v2667_v19 = vadd.f32 %v2647_v13, %v10039_v39 }
 0xa2a   :  { %v2649_v59 = vpop.f32.mrf.mxu0 }
 0xa2b   :  { %v5565_v17 = vmul.f32 -1.442695, %v2667_v19  ;;  %v2681_v21 = vadd.f32 %v2649_v59, %v8404_v18 }
 0xa2c   :  { %v6633_v22 = vpop.eup %6632 }
 0xa2d   :  { %6636 = vpow2.f32 %v5565_v17  ;;  %v2683_v29 = vmul.f32 %v6633_v22, %v2681_v21  ;;  %v6635_v36 = vpop.eup %6634 }
 0xa2e   :  { %v2674_v52 = vadd.f32 1.0, %v6635_v36 }
 0xa2f   :  { %v2685_v5 = vadd.f32 %v2683_v29, %v10040_v2  ;;  %v8489_v29 = vld [vmem:[%s9860_s6 + $0x150] ss:$24 sps:$4 sm:$0xff]   ;;  %v10055_v2 = vld [vmem:[#allocation26_spill] sm:$0xff] }
 0xa30   :  { %6638 = vrcp.f32 %v2674_v52 }
 0xa31   :  { %6640 = vtanh.f32 %v2684_v45 }
 0xa3a   :  { %v6637_v60 = vpop.eup %6636 }
 0xa3b   :  { %v2675_v57 = vadd.f32 1.0, %v6637_v60  ;;  %v10056_v60 = vld [vmem:[#allocation64_spill] sm:$0xff] }
 0xa3d   :  { %6642 = vrcp.f32 %v2675_v57  ;;  %v6639_v28 = vpop.eup %6638  ;;  %v10057_v57 = vld [vmem:[#allocation39_spill] sm:$0xff] }
 0xa3e   :  { %6644 = vtanh.f32 %v2685_v5  ;;  %v6641_v42 = vpop.eup %6640  ;;  %v2688_v39 = vsub.f32 1.0, %v6639_v28  ;;  %v2692_v17 = vmul.f32 %v6639_v28, %v8399_v35  ;;  %v1923_v28 = vadd.f32 %v10057_v57, %v10056_v60  ;;  %v10059_v57 = vld [vmem:[#allocation58_spill] sm:$0xff] }
 0xa40   :  { %v2690_v3 = vmul.f32 %v6641_v42, %v2688_v39 }
 0xa42   :  { %v8477_v21 = vadd.f32 %v2692_v17, %v2690_v3 }
 0xa44   :  { %10041 = vst [vmem:[#allocation10_spill] sm:$0xff] %v8477_v21 }
 0xa4a   :  { %v6643_v0 = vpop.eup %6642 }
 0xa4b   :  { %v2689_v19 = vsub.f32 1.0, %v6643_v0  ;;  %v6645_v24 = vpop.eup %6644  ;;  %v2693_v59 = vmul.f32 %v6643_v0, %v8408_v20 }
 0xa4d   :  { %v2691_v13 = vmul.f32 %v6645_v24, %v2689_v19 }
 0xa4f   :  { %v8479_v22 = vadd.f32 %v2693_v59, %v2691_v13 }
 0xa51   :  { %10042 = vst [vmem:[#allocation20_spill] sm:$0xff] %v8479_v22  ;;  %v2706_v45 = vpack.c.bf16 %v8479_v22, %v8477_v21 }
 0xa53   :  { %2740 = vmatmul.mubr.bf16.vlgmr.msra.gmra.mxu1 %v2706_v45  ;;  %2781 = vmatmul.mubr.bf16.vlgmr.msra.gmra.mxu0 %v2706_v45 }
 0xa54   :  { %2790 = vmatpush1.bf16.msra.mxu1 %v8030_v12  ;;  %2821 = vmatprep.mubr.bf16.mxu1 %v9955_v15 }
 0xa55   :  { %2791 = vmatprep.subr.bf16.mxu1 %v8040_v51  ;;  %2886 = vmatpush1.bf16.msra.mxu0 %v8489_v29 }
 0xa56   :  { %2887 = vmatprep.subr.bf16.mxu0 %v7877_v63  ;;  %2917 = vmatprep.mubr.bf16.mxu0 %v9955_v15  ;;  %v10043_v63 = vld [vmem:[#allocation12_spill] sm:$0xff] }
 0xa58   :  { %2792 = vmatpush1.bf16.msra.mxu1 %v8054_v48 }
 0xa59   :  { %2793 = vmatprep.subr.bf16.mxu1 %v8066_v30  ;;  %2888 = vmatpush1.bf16.msra.mxu0 %v7885_v37  ;;  %v10044_v37 = vld [vmem:[#allocation13_spill] sm:$0xff] }
 0xa5a   :  { %2889 = vmatprep.subr.bf16.mxu0 %v7895_v61  ;;  %v10045_v61 = vld [vmem:[#allocation11_spill] sm:$0xff] }
 0xa5c   :  { %2794 = vmatpush1.bf16.msra.mxu1 %v8080_v32 }
 0xa5d   :  { %2795 = vmatprep.subr.bf16.mxu1 %v8092_v11  ;;  %2890 = vmatpush1.bf16.msra.mxu0 %v7903_v44  ;;  %v10046_v44 = vld [vmem:[#allocation14_spill] sm:$0xff] }
 0xa5e   :  { %2891 = vmatprep.subr.bf16.mxu0 %v7913_v46  ;;  %v10047_v46 = vld [vmem:[#allocation15_spill] sm:$0xff] }
 0xa60   :  { %2796 = vmatpush1.bf16.msra.mxu1 %v8105_v23 }
 0xa61   :  { %2797 = vmatprep.subr.bf16.mxu1 %v8117_v34  ;;  %2892 = vmatpush1.bf16.msra.mxu0 %v7921_v50  ;;  %v10048_v50 = vld [vmem:[#allocation16_spill] sm:$0xff] }
 0xa62   :  { %2893 = vmatprep.subr.bf16.mxu0 %v7931_v53  ;;  %v10049_v53 = vld [vmem:[#allocation17_spill] sm:$0xff] }
 0xa64   :  { %2798 = vmatpush1.bf16.msra.mxu1 %v8130_v26 }
 0xa65   :  { %2799 = vmatprep.subr.bf16.mxu1 %v8142_v25  ;;  %2894 = vmatpush1.bf16.msra.mxu0 %v7939_v54  ;;  %v10050_v54 = vld [vmem:[#allocation18_spill] sm:$0xff] }
 0xa66   :  { %2895 = vmatprep.subr.bf16.mxu0 %v7949_v56  ;;  %v8541_v56 = vld [vmem:[%s9860_s6 + $0x154] ss:$24 sps:$4 sm:$0xff]  }
 0xa67   :  { %10051 = vst [vmem:[#allocation42_spill] sm:$0xff] %v8541_v56 }
 0xa68   :  { %2800 = vmatpush1.bf16.msra.mxu1 %v8155_v31 }
 0xa69   :  { %2801 = vmatprep.subr.bf16.mxu1 %v8167_v62  ;;  %2896 = vmatpush1.bf16.msra.mxu0 %v7957_v47  ;;  %v10052_v47 = vld [vmem:[#allocation43_spill] sm:$0xff] }
 0xa6a   :  { %2897 = vmatprep.subr.bf16.mxu0 %v7966_v38  ;;  %v10053_v38 = vld [vmem:[#allocation24_spill] sm:$0xff] }
 0xa6c   :  { %2802 = vmatpush1.bf16.msra.mxu1 %v8180_v43 }
 0xa6d   :  { %2803 = vmatprep.subr.bf16.mxu1 %v8192_v7  ;;  %2898 = vmatpush1.bf16.msra.mxu0 %v7976_v4  ;;  %v1834_v4 = vadd.f32 %v10053_v38, %v10052_v47 }
 0xa6e   :  { %2899 = vmatprep.subr.bf16.mxu0 %v7984_v10 }
 0xa70   :  { %2804 = vmatpush1.bf16.msra.mxu1 %v8205_v9 }
 0xa71   :  { %2926 = vmatprep.subr.bf16.mxu1 %v8009_v6  ;;  %2900 = vmatpush1.bf16.msra.mxu0 %v7993_v33 }
 0xa72   :  { %2967 = vmatprep.subr.bf16.mxu0 %v8002_v14 }
 0xa73   :  { %2822 = vmatmul.mubr.bf16.vlgmr.msra.gmra.mxu1 %v2706_v45 }
 0xa74   :  { %2927 = vmatpush1.bf16.msra.mxu1 %v8035_v55  ;;  %2958 = vmatprep.mubr.bf16.mxu1 %v9955_v15 }
 0xa75   :  { %2928 = vmatprep.subr.bf16.mxu1 %v8045_v58 }
 0xa78   :  { %2929 = vmatpush1.bf16.msra.mxu1 %v8059_v16  ;;  %v10054_v16 = vld [vmem:[#allocation47_spill] sm:$0xff] }
 0xa79   :  { %2930 = vmatprep.subr.bf16.mxu1 %v8071_v41  ;;  %v1836_v5 = vadd.f32 %v10055_v2, %v10054_v16 }
 0xa7c   :  { %2931 = vmatpush1.bf16.msra.mxu1 %v8085_v1 }
 0xa7d   :  { %2932 = vmatprep.subr.bf16.mxu1 %v8097_v8 }
 0xa80   :  { %2933 = vmatpush1.bf16.msra.mxu1 %v8110_v27 }
 0xa81   :  { %2934 = vmatprep.subr.bf16.mxu1 %v10043_v63 }
 0xa84   :  { %2935 = vmatpush1.bf16.msra.mxu1 %v10044_v37 }
 0xa85   :  { %2936 = vmatprep.subr.bf16.mxu1 %v10045_v61 }
 0xa88   :  { %2937 = vmatpush1.bf16.msra.mxu1 %v10046_v44 }
 0xa89   :  { %2938 = vmatprep.subr.bf16.mxu1 %v10047_v46 }
 0xa8c   :  { %2939 = vmatpush1.bf16.msra.mxu1 %v10048_v50 }
 0xa8d   :  { %2940 = vmatprep.subr.bf16.mxu1 %v10049_v53 }
 0xa90   :  { %2941 = vmatpush1.bf16.msra.mxu1 %v10050_v54 }
 0xa91   :  { %3063 = vmatprep.subr.bf16.mxu1 %v8541_v56 }
 0xb13   :  { %v2741_v10 = vpop.f32.mrf.mxu1  ;;  %v2782_v33 = vpop.f32.mrf.mxu0 }
 0xb14   :  { %v2830_v14 = vadd.f32 %v2741_v10, %v1834_v4 }
 0xb15   :  { %v2743_v6 = vpop.f32.mrf.mxu1  ;;  %v2784_v55 = vpop.f32.mrf.mxu0 }
 0xb16   :  { %v5566_v58 = vmul.f32 -1.442695, %v2830_v14  ;;  %v2844_v42 = vadd.f32 %v2743_v6, %v1836_v5  ;;  %v2858_v14 = vadd.f32 %v2782_v33, %v10036_v40 }
 0xb17   :  { %v2745_v36 = vpop.f32.mrf.mxu1  ;;  %v2785_v52 = vpop.f32.mrf.mxu0 }
 0xb18   :  { %6646 = vpow2.f32 %v5566_v58  ;;  %v5568_v3 = vmul.f32 -1.442695, %v2844_v42  ;;  %v10058_v58 = vld [vmem:[#allocation25_spill] sm:$0xff] }
 0xb19   :  { %v2746_v39 = vpop.f32.mrf.mxu1  ;;  %v2786_v0 = vpop.f32.mrf.mxu0  ;;  %v1907_v2 = vadd.f32 %v10058_v58, %v10037_v49 }
 0xb1a   :  { %v2831_v19 = vadd.f32 %v2786_v0, %v1923_v28  ;;  %6648 = vpow2.f32 %v5568_v3 }
 0xb1c   :  { %v5567_v24 = vmul.f32 -1.442695, %v2831_v19 }
 0xb1e   :  { %6650 = vpow2.f32 %v5567_v24 }
 0xb25   :  { %v6647_v13 = vpop.eup %6646 }
 0xb26   :  { %v2838_v17 = vadd.f32 1.0, %v6647_v13 }
 0xb27   :  { %v6649_v59 = vpop.eup %6648 }
 0xb28   :  { %6652 = vrcp.f32 %v2838_v17  ;;  %v2852_v38 = vadd.f32 1.0, %v6649_v59 }
 0xb2a   :  { %6654 = vrcp.f32 %v2852_v38 }
 0xb2b   :  { %v6651_v45 = vpop.eup %6650 }
 0xb2c   :  { %v2839_v4 = vadd.f32 1.0, %v6651_v45 }
 0xb2e   :  { %6656 = vrcp.f32 %v2839_v4  ;;  %v10060_v4 = vld [vmem:[#allocation59_spill] sm:$0xff] }
 0xb33   :  { %v2823_v10 = vpop.f32.mrf.mxu1 }
 0xb35   :  { %v6653_v55 = vpop.eup %6652  ;;  %v2824_v6 = vpop.f32.mrf.mxu1 }
 0xb36   :  { %v2860_v5 = vmul.f32 %v6653_v55, %v2858_v14 }
 0xb37   :  { %v2825_v36 = vpop.f32.mrf.mxu1  ;;  %v6655_v0 = vpop.eup %6654 }
 0xb38   :  { %v2862_v52 = vadd.f32 %v2860_v5, %v1907_v2  ;;  %v2845_v28 = vadd.f32 %v2825_v36, %v10059_v57  ;;  %v2866_v24 = vsub.f32 1.0, %v6655_v0  ;;  %v2870_v59 = vmul.f32 %v6655_v0, %v8477_v21  ;;  %v8571_v57 = vld [vmem:[%s9860_s6 + $0x124] ss:$24 sps:$4 sm:$0xff]  }
 0xb39   :  { %v2827_v39 = vpop.f32.mrf.mxu1 }
 0xb3a   :  { %6658 = vtanh.f32 %v2862_v52  ;;  %v5569_v42 = vmul.f32 -1.442695, %v2845_v28  ;;  %v2859_v19 = vadd.f32 %v2827_v39, %v8404_v18  ;;  %v8675_v28 = vld [vmem:[%s9860_s6 + $0x164] ss:$24 sps:$4 sm:$0xff]   ;;  %v8694_v39 = vld [vmem:[%s9860_s6 + $0x128] ss:$24 sps:$4 sm:$0xff]  }
 0xb3b   :  { %v6657_v33 = vpop.eup %6656 }
 0xb3c   :  { %6660 = vpow2.f32 %v5569_v42  ;;  %v2861_v3 = vmul.f32 %v6657_v33, %v2859_v19  ;;  %v8688_v42 = vld [vmem:[%s9860_s6 + $0x12c] ss:$24 sps:$4 sm:$0xff]  }
 0xb3e   :  { %v2863_v10 = vadd.f32 %v2861_v3, %v10060_v4 }
 0xb47   :  { %v6659_v13 = vpop.eup %6658 }
 0xb48   :  { %v2868_v17 = vmul.f32 %v6659_v13, %v2866_v24 }
 0xb49   :  { %v6661_v45 = vpop.eup %6660 }
 0xb4a   :  { %v2853_v38 = vadd.f32 1.0, %v6661_v45  ;;  %v8557_v14 = vadd.f32 %v2870_v59, %v2868_v17  ;;  %v10065_v17 = vld [vmem:[#allocation30_spill] sm:$0xff] }
 0xb4b   :  { %v1840_v59 = vadd.f32 %v10065_v17, %v10054_v16 }
 0xb4c   :  { %10061 = vst [vmem:[#allocation22_spill] sm:$0xff] %v8557_v14  ;;  %6662 = vrcp.f32 %v2853_v38 }
 0xb4d   :  { %6664 = vtanh.f32 %v2863_v10 }
 0xb59   :  { %v6663_v55 = vpop.eup %6662 }
 0xb5a   :  { %v2867_v6 = vsub.f32 1.0, %v6663_v55  ;;  %v6665_v58 = vpop.eup %6664  ;;  %v2871_v5 = vmul.f32 %v6663_v55, %v8479_v22 }
 0xb5c   :  { %v2869_v2 = vmul.f32 %v6665_v58, %v2867_v6 }
 0xb5e   :  { %v8560_v36 = vadd.f32 %v2871_v5, %v2869_v2  ;;  %v10066_v5 = vld [vmem:[#allocation29_spill] sm:$0xff] }
 0xb60   :  { %10062 = vst [vmem:[#allocation62_spill] sm:$0xff] %v8560_v36  ;;  %v2884_v52 = vpack.c.bf16 %v8560_v36, %v8557_v14 }
 0xb62   :  { %2918 = vmatmul.mubr.bf16.vlgmr.msra.gmra.mxu0 %v2884_v52  ;;  %2959 = vmatmul.mubr.bf16.vlgmr.msra.gmra.mxu1 %v2884_v52 }
 0xb63   :  { %2968 = vmatpush1.bf16.msra.mxu0 %v8030_v12  ;;  %2999 = vmatprep.mubr.bf16.mxu0 %v9955_v15  ;;  %v8580_v12 = vld [vmem:[%s9860_s6 + $0x120] ss:$24 sps:$4 sm:$0xff]  }
 0xb64   :  { %2969 = vmatprep.subr.bf16.mxu0 %v8040_v51  ;;  %3064 = vmatpush1.bf16.msra.mxu1 %v8489_v29  ;;  %v8586_v51 = vld [vmem:[%s9860_s6 + $0xf4] ss:$24 sps:$4 sm:$0xff]  }
 0xb65   :  { %3065 = vmatprep.subr.bf16.mxu1 %v8571_v57  ;;  %3095 = vmatprep.mubr.bf16.mxu1 %v9955_v15 }
 0xb67   :  { %2970 = vmatpush1.bf16.msra.mxu0 %v8054_v48  ;;  %v8594_v48 = vld [vmem:[%s9860_s6 + $0xf0] ss:$24 sps:$4 sm:$0xff]  }
 0xb68   :  { %2971 = vmatprep.subr.bf16.mxu0 %v8066_v30  ;;  %3066 = vmatpush1.bf16.msra.mxu1 %v8580_v12  ;;  %v8600_v30 = vld [vmem:[%s9860_s6 + $0xc4] ss:$24 sps:$4 sm:$0xff]  }
 0xb69   :  { %3067 = vmatprep.subr.bf16.mxu1 %v8586_v51 }
 0xb6b   :  { %2972 = vmatpush1.bf16.msra.mxu0 %v8080_v32  ;;  %v8608_v32 = vld [vmem:[%s9860_s6 + $0xc0] ss:$24 sps:$4 sm:$0xff]  }
 0xb6c   :  { %2973 = vmatprep.subr.bf16.mxu0 %v8092_v11  ;;  %3068 = vmatpush1.bf16.msra.mxu1 %v8594_v48  ;;  %v8614_v11 = vld [vmem:[%s9860_s6 + $0x94] ss:$24 sps:$4 sm:$0xff]  }
 0xb6d   :  { %3069 = vmatprep.subr.bf16.mxu1 %v8600_v30 }
 0xb6f   :  { %2974 = vmatpush1.bf16.msra.mxu0 %v8105_v23  ;;  %v8622_v23 = vld [vmem:[%s9860_s6 + $0x90] ss:$24 sps:$4 sm:$0xff]  }
 0xb70   :  { %2975 = vmatprep.subr.bf16.mxu0 %v8117_v34  ;;  %3070 = vmatpush1.bf16.msra.mxu1 %v8608_v32  ;;  %v8628_v34 = vld [vmem:[%s9860_s6 + $0x64] ss:$24 sps:$4 sm:$0xff]  }
 0xb71   :  { %3071 = vmatprep.subr.bf16.mxu1 %v8614_v11 }
 0xb73   :  { %2976 = vmatpush1.bf16.msra.mxu0 %v8130_v26  ;;  %v8636_v26 = vld [vmem:[%s9860_s6 + $0x60] ss:$24 sps:$4 sm:$0xff]  }
 0xb74   :  { %2977 = vmatprep.subr.bf16.mxu0 %v8142_v25  ;;  %3072 = vmatpush1.bf16.msra.mxu1 %v8622_v23  ;;  %v8642_v25 = vld [vmem:[%s9860_s6 + $0x34] ss:$24 sps:$4 sm:$0xff]  }
 0xb75   :  { %3073 = vmatprep.subr.bf16.mxu1 %v8628_v34 }
 0xb77   :  { %2978 = vmatpush1.bf16.msra.mxu0 %v8155_v31  ;;  %v8650_v31 = vld [vmem:[%s9860_s6 + $0x30] ss:$24 sps:$4 sm:$0xff]  }
 0xb78   :  { %2979 = vmatprep.subr.bf16.mxu0 %v8167_v62  ;;  %3074 = vmatpush1.bf16.msra.mxu1 %v8636_v26  ;;  %v8656_v62 = vld [vmem:[%s9860_s6 + $0x4] ss:$24 sps:$4 sm:$0xff]  }
 0xb79   :  { %3075 = vmatprep.subr.bf16.mxu1 %v8642_v25 }
 0xb7b   :  { %2980 = vmatpush1.bf16.msra.mxu0 %v8180_v43  ;;  %v8663_v43 = vld [vmem:[%s9860_s6 + $0x15c] ss:$24 sps:$4 sm:$0xff]  }
 0xb7c   :  { %2981 = vmatprep.subr.bf16.mxu0 %v8192_v7  ;;  %3076 = vmatpush1.bf16.msra.mxu1 %v8650_v31  ;;  %v8669_v7 = vld [vmem:[%s9860_s6] ss:$24 sps:$4 sm:$0xff]  }
 0xb7d   :  { %3077 = vmatprep.subr.bf16.mxu1 %v8656_v62 }
 0xb7f   :  { %2982 = vmatpush1.bf16.msra.mxu0 %v8205_v9  ;;  %v8681_v9 = vld [vmem:[%s9860_s6 + $0x158] ss:$24 sps:$4 sm:$0xff]  }
 0xb80   :  { %3104 = vmatprep.subr.bf16.mxu0 %v8663_v43  ;;  %3078 = vmatpush1.bf16.msra.mxu1 %v8669_v7 }
 0xb81   :  { %3145 = vmatprep.subr.bf16.mxu1 %v8675_v28 }
 0xb82   :  { %3000 = vmatmul.mubr.bf16.vlgmr.msra.gmra.mxu0 %v2884_v52  ;;  %v1911_v52 = vadd.f32 %v10066_v5, %v10037_v49 }
 0xb83   :  { %3105 = vmatpush1.bf16.msra.mxu0 %v8681_v9  ;;  %3136 = vmatprep.mubr.bf16.mxu0 %v9955_v15 }
 0xb84   :  { %3106 = vmatprep.subr.bf16.mxu0 %v8688_v42 }
 0xb87   :  { %3107 = vmatpush1.bf16.msra.mxu0 %v8694_v39 }
 0xb88   :  { %3108 = vmatprep.subr.bf16.mxu0 %v8071_v41  ;;  %v10063_v41 = vld [vmem:[#allocation28_spill] sm:$0xff] }
 0xb8b   :  { %3109 = vmatpush1.bf16.msra.mxu0 %v8085_v1  ;;  %v1838_v1 = vadd.f32 %v10063_v41, %v10052_v47 }
 0xb8c   :  { %3110 = vmatprep.subr.bf16.mxu0 %v8097_v8 }
 0xb8f   :  { %3111 = vmatpush1.bf16.msra.mxu0 %v8110_v27 }
 0xb90   :  { %3112 = vmatprep.subr.bf16.mxu0 %v10043_v63 }
 0xb93   :  { %3113 = vmatpush1.bf16.msra.mxu0 %v10044_v37 }
 0xb94   :  { %3114 = vmatprep.subr.bf16.mxu0 %v10045_v61 }
 0xb97   :  { %3115 = vmatpush1.bf16.msra.mxu0 %v10046_v44 }
 0xb98   :  { %3116 = vmatprep.subr.bf16.mxu0 %v10047_v46  ;;  %v10064_v46 = vld [vmem:[#allocation35_spill] sm:$0xff] }
 0xb9b   :  { %3117 = vmatpush1.bf16.msra.mxu0 %v10048_v50  ;;  %v1919_v50 = vadd.f32 %v10064_v46, %v10056_v60 }
 0xb9c   :  { %3118 = vmatprep.subr.bf16.mxu0 %v10049_v53 }
 0xb9f   :  { %3119 = vmatpush1.bf16.msra.mxu0 %v10050_v54 }
 0xba0   :  { %3241 = vmatprep.subr.bf16.mxu0 %v8541_v56 }
 0xc22   :  { %v2919_v8 = vpop.f32.mrf.mxu0  ;;  %v2960_v27 = vpop.f32.mrf.mxu1 }
 0xc23   :  { %v3008_v63 = vadd.f32 %v2919_v8, %v1838_v1  ;;  %v3036_v6 = vadd.f32 %v2960_v27, %v10036_v40 }
 0xc24   :  { %v2921_v37 = vpop.f32.mrf.mxu0  ;;  %v2962_v61 = vpop.f32.mrf.mxu1 }
 0xc25   :  { %v5570_v0 = vmul.f32 -1.442695, %v3008_v63  ;;  %v3022_v38 = vadd.f32 %v2921_v37, %v1840_v59  ;;  %v10067_v63 = vld [vmem:[#allocation56_spill] sm:$0xff] }
 0xc26   :  { %v2923_v44 = vpop.f32.mrf.mxu0  ;;  %v2963_v19 = vpop.f32.mrf.mxu1 }
 0xc27   :  { %6666 = vpow2.f32 %v5570_v0  ;;  %v5572_v10 = vmul.f32 -1.442695, %v3022_v38 }
 0xc28   :  { %v2924_v53 = vpop.f32.mrf.mxu0  ;;  %v2964_v33 = vpop.f32.mrf.mxu1 }
 0xc29   :  { %v3009_v54 = vadd.f32 %v2964_v33, %v1919_v50  ;;  %v10068_v50 = vld [vmem:[#allocation57_spill] sm:$0xff] }
 0xc2b   :  { %v5571_v3 = vmul.f32 -1.442695, %v3009_v54 }
 0xc2d   :  { %6668 = vpow2.f32 %v5571_v3 }
 0xc34   :  { %v6667_v24 = vpop.eup %6666 }
 0xc35   :  { %v3016_v13 = vadd.f32 1.0, %v6667_v24 }
 0xc37   :  { %6670 = vrcp.f32 %v3016_v13 }
 0xc3a   :  { %v6669_v45 = vpop.eup %6668 }
 0xc3b   :  { %v3017_v4 = vadd.f32 1.0, %v6669_v45 }
 0xc3d   :  { %6672 = vrcp.f32 %v3017_v4 }
 0xc3e   :  { %6674 = vpow2.f32 %v5572_v10 }
 0xc42   :  { %v3001_v55 = vpop.f32.mrf.mxu0 }
 0xc44   :  { %v6671_v58 = vpop.eup %6670  ;;  %v3002_v2 = vpop.f32.mrf.mxu0 }
 0xc45   :  { %v3038_v41 = vmul.f32 %v6671_v58, %v3036_v6 }
 0xc46   :  { %v3003_v1 = vpop.f32.mrf.mxu0 }
 0xc47   :  { %v3040_v8 = vadd.f32 %v3038_v41, %v1911_v52  ;;  %v3023_v61 = vadd.f32 %v3003_v1, %v10067_v63  ;;  %v8733_v52 = vld [vmem:[%s9860_s6 + $0x160] ss:$24 sps:$4 sm:$0xff]   ;;  %v8740_v41 = vld [vmem:[%s9860_s6 + $0x134] ss:$24 sps:$4 sm:$0xff]   ;;  %v8749_v1 = vld [vmem:[%s9860_s6 + $0x130] ss:$24 sps:$4 sm:$0xff]  }
 0xc48   :  { %v3005_v0 = vpop.f32.mrf.mxu0  ;;  %v8763_v63 = vld [vmem:[%s9860_s6 + $0x100] ss:$24 sps:$4 sm:$0xff]  }
 0xc49   :  { %v5573_v44 = vmul.f32 -1.442695, %v3023_v61  ;;  %v3037_v37 = vadd.f32 %v3005_v0, %v8404_v18  ;;  %v8769_v61 = vld [vmem:[%s9860_s6 + $0xd4] ss:$24 sps:$4 sm:$0xff]   ;;  %v8777_v0 = vld [vmem:[%s9860_s6 + $0xd0] ss:$24 sps:$4 sm:$0xff]  }
 0xc4a   :  { %v6673_v19 = vpop.eup %6672 }
 0xc4b   :  { %6676 = vpow2.f32 %v5573_v44  ;;  %v3039_v46 = vmul.f32 %v6673_v19, %v3037_v37  ;;  %v6675_v53 = vpop.eup %6674  ;;  %v8783_v44 = vld [vmem:[%s9860_s6 + $0xa4] ss:$24 sps:$4 sm:$0xff]   ;;  %v8791_v37 = vld [vmem:[%s9860_s6 + $0xa0] ss:$24 sps:$4 sm:$0xff]   ;;  %v8797_v19 = vld [vmem:[%s9860_s6 + $0x74] ss:$24 sps:$4 sm:$0xff]  }
 0xc4c   :  { %v3030_v33 = vadd.f32 1.0, %v6675_v53  ;;  %v8825_v53 = vld [vmem:[%s9860_s6 + $0x14] ss:$24 sps:$4 sm:$0xff]  }
 0xc4d   :  { %v3041_v27 = vadd.f32 %v3039_v46, %v10068_v50  ;;  %v8805_v46 = vld [vmem:[%s9860_s6 + $0x70] ss:$24 sps:$4 sm:$0xff]   ;;  %v8811_v50 = vld [vmem:[%s9860_s6 + $0x44] ss:$24 sps:$4 sm:$0xff]  }
 0xc4e   :  { %6678 = vrcp.f32 %v3030_v33  ;;  %v8833_v33 = vld [vmem:[%s9860_s6 + $0x10] ss:$24 sps:$4 sm:$0xff]  }
 0xc4f   :  { %6680 = vtanh.f32 %v3040_v8  ;;  %v8755_v8 = vld [vmem:[%s9860_s6 + $0x104] ss:$24 sps:$4 sm:$0xff]  }
 0xc58   :  { %v6677_v54 = vpop.eup %6676 }
 0xc59   :  { %v3031_v3 = vadd.f32 1.0, %v6677_v54  ;;  %v8846_v54 = vld [vmem:[%s9860_s6 + $0xfc] ss:$24 sps:$4 sm:$0xff]  }
 0xc5b   :  { %6682 = vrcp.f32 %v3031_v3  ;;  %v6679_v24 = vpop.eup %6678  ;;  %v8852_v3 = vld [vmem:[%s9860_s6 + $0xf8] ss:$24 sps:$4 sm:$0xff]  }
 0xc5c   :  { %6684 = vtanh.f32 %v3041_v27  ;;  %v6681_v13 = vpop.eup %6680  ;;  %v3044_v17 = vsub.f32 1.0, %v6679_v24  ;;  %v3048_v55 = vmul.f32 %v6679_v24, %v8557_v14  ;;  %v8819_v27 = vld [vmem:[%s9860_s6 + $0x40] ss:$24 sps:$4 sm:$0xff]   ;;  %v8858_v24 = vld [vmem:[%s9860_s6 + $0xcc] ss:$24 sps:$4 sm:$0xff]  }
 0xc5d   :  { %10071 = vst [vmem:[#allocation61_spill] sm:$0xff] %v8858_v24 }
 0xc5e   :  { %v3046_v38 = vmul.f32 %v6681_v13, %v3044_v17  ;;  %v8864_v13 = vld [vmem:[%s9860_s6 + $0xc8] ss:$24 sps:$4 sm:$0xff]   ;;  %v8870_v17 = vld [vmem:[%s9860_s6 + $0x9c] ss:$24 sps:$4 sm:$0xff]  }
 0xc5f   :  { %10072 = vst [vmem:[#allocation12_spill] sm:$0xff] %v8864_v13  ;;  %10073 = vst [vmem:[#allocation13_spill] sm:$0xff] %v8870_v17 }
 0xc60   :  { %v8724_v58 = vadd.f32 %v3048_v55, %v3046_v38  ;;  %v8888_v38 = vld [vmem:[%s9860_s6 + $0x68] ss:$24 sps:$4 sm:$0xff]   ;;  %v8906_v55 = vld [vmem:[%s9860_s6 + $0xc] ss:$24 sps:$4 sm:$0xff]  }
 0xc61   :  { %10076 = vst [vmem:[#allocation15_spill] sm:$0xff] %v8888_v38  ;;  %10079 = vst [vmem:[#allocation18_spill] sm:$0xff] %v8906_v55 }
 0xc62   :  { %10069 = vst [vmem:[#allocation21_spill] sm:$0xff] %v8724_v58 }
 0xc68   :  { %v6683_v59 = vpop.eup %6682 }
 0xc69   :  { %v3045_v45 = vsub.f32 1.0, %v6683_v59  ;;  %v6685_v4 = vpop.eup %6684  ;;  %v3049_v6 = vmul.f32 %v6683_v59, %v8560_v36  ;;  %v8876_v59 = vld [vmem:[%s9860_s6 + $0x98] ss:$24 sps:$4 sm:$0xff]  }
 0xc6a   :  { %10074 = vst [vmem:[#allocation11_spill] sm:$0xff] %v8876_v59 }
 0xc6b   :  { %v3047_v10 = vmul.f32 %v6685_v4, %v3045_v45  ;;  %v8882_v45 = vld [vmem:[%s9860_s6 + $0x6c] ss:$24 sps:$4 sm:$0xff]   ;;  %v8894_v4 = vld [vmem:[%s9860_s6 + $0x3c] ss:$24 sps:$4 sm:$0xff]  }
 0xc6c   :  { %10075 = vst [vmem:[#allocation14_spill] sm:$0xff] %v8882_v45  ;;  %10077 = vst [vmem:[#allocation16_spill] sm:$0xff] %v8894_v4 }
 0xc6d   :  { %v8726_v2 = vadd.f32 %v3049_v6, %v3047_v10  ;;  %v8900_v10 = vld [vmem:[%s9860_s6 + $0x38] ss:$24 sps:$4 sm:$0xff]   ;;  %v8912_v6 = vld [vmem:[%s9860_s6 + $0x8] ss:$24 sps:$4 sm:$0xff]  }
 0xc6e   :  { %10078 = vst [vmem:[#allocation17_spill] sm:$0xff] %v8900_v10  ;;  %10080 = vst [vmem:[#allocation24_spill] sm:$0xff] %v8912_v6 }
 0xc6f   :  { %10070 = vst [vmem:[#allocation60_spill] sm:$0xff] %v8726_v2  ;;  %v3062_v5 = vpack.c.bf16 %v8726_v2, %v8724_v58 }
 0xc71   :  { %3096 = vmatmul.mubr.bf16.vlgmr.msra.gmra.mxu1 %v3062_v5  ;;  %3137 = vmatmul.mubr.bf16.vlgmr.msra.gmra.mxu0 %v3062_v5 }
 0xc72   :  { %3146 = vmatpush1.bf16.msra.mxu1 %v8733_v52  ;;  %3177 = vmatprep.mubr.bf16.mxu1 %v9955_v15 }
 0xc73   :  { %3147 = vmatprep.subr.bf16.mxu1 %v8740_v41  ;;  %3242 = vmatpush1.bf16.msra.mxu0 %v8489_v29 }
 0xc74   :  { %3243 = vmatprep.subr.bf16.mxu0 %v8571_v57  ;;  %3273 = vmatprep.mubr.bf16.mxu0 %v9955_v15 }
 0xc76   :  { %3148 = vmatpush1.bf16.msra.mxu1 %v8749_v1 }
 0xc77   :  { %3149 = vmatprep.subr.bf16.mxu1 %v8755_v8  ;;  %3244 = vmatpush1.bf16.msra.mxu0 %v8580_v12 }
 0xc78   :  { %3245 = vmatprep.subr.bf16.mxu0 %v8586_v51 }
 0xc7a   :  { %3150 = vmatpush1.bf16.msra.mxu1 %v8763_v63 }
 0xc7b   :  { %3151 = vmatprep.subr.bf16.mxu1 %v8769_v61  ;;  %3246 = vmatpush1.bf16.msra.mxu0 %v8594_v48 }
 0xc7c   :  { %3247 = vmatprep.subr.bf16.mxu0 %v8600_v30 }
 0xc7e   :  { %3152 = vmatpush1.bf16.msra.mxu1 %v8777_v0 }
 0xc7f   :  { %3153 = vmatprep.subr.bf16.mxu1 %v8783_v44  ;;  %3248 = vmatpush1.bf16.msra.mxu0 %v8608_v32 }
 0xc80   :  { %3249 = vmatprep.subr.bf16.mxu0 %v8614_v11 }
 0xc82   :  { %3154 = vmatpush1.bf16.msra.mxu1 %v8791_v37 }
 0xc83   :  { %3155 = vmatprep.subr.bf16.mxu1 %v8797_v19  ;;  %3250 = vmatpush1.bf16.msra.mxu0 %v8622_v23 }
 0xc84   :  { %3251 = vmatprep.subr.bf16.mxu0 %v8628_v34 }
 0xc86   :  { %3156 = vmatpush1.bf16.msra.mxu1 %v8805_v46 }
 0xc87   :  { %3157 = vmatprep.subr.bf16.mxu1 %v8811_v50  ;;  %3252 = vmatpush1.bf16.msra.mxu0 %v8636_v26 }
 0xc88   :  { %3253 = vmatprep.subr.bf16.mxu0 %v8642_v25 }
 0xc8a   :  { %3158 = vmatpush1.bf16.msra.mxu1 %v8819_v27 }
 0xc8b   :  { %3159 = vmatprep.subr.bf16.mxu1 %v8825_v53  ;;  %3254 = vmatpush1.bf16.msra.mxu0 %v8650_v31 }
 0xc8c   :  { %3255 = vmatprep.subr.bf16.mxu0 %v8656_v62 }
 0xc8e   :  { %3160 = vmatpush1.bf16.msra.mxu1 %v8833_v33 }
 0xc8f   :  { %3282 = vmatprep.subr.bf16.mxu1 %v8663_v43  ;;  %3256 = vmatpush1.bf16.msra.mxu0 %v8669_v7 }
 0xc90   :  { %3323 = vmatprep.subr.bf16.mxu0 %v8675_v28 }
 0xc91   :  { %3178 = vmatmul.mubr.bf16.vlgmr.msra.gmra.mxu1 %v3062_v5  ;;  %v10081_v5 = vld [vmem:[#allocation32_spill] sm:$0xff] }
 0xc92   :  { %3283 = vmatpush1.bf16.msra.mxu1 %v8681_v9  ;;  %3314 = vmatprep.mubr.bf16.mxu1 %v9955_v15  ;;  %v1844_v22 = vadd.f32 %v10081_v5, %v10052_v47 }
 0xc93   :  { %3284 = vmatprep.subr.bf16.mxu1 %v8688_v42 }
 0xc96   :  { %3285 = vmatpush1.bf16.msra.mxu1 %v8694_v39 }
 0xc97   :  { %3286 = vmatprep.subr.bf16.mxu1 %v8846_v54 }
 0xc9a   :  { %3287 = vmatpush1.bf16.msra.mxu1 %v8852_v3 }
 0xc9b   :  { %3288 = vmatprep.subr.bf16.mxu1 %v8858_v24 }
 0xc9e   :  { %3289 = vmatpush1.bf16.msra.mxu1 %v8864_v13 }
 0xc9f   :  { %3290 = vmatprep.subr.bf16.mxu1 %v8870_v17 }
 0xca2   :  { %3291 = vmatpush1.bf16.msra.mxu1 %v8876_v59  ;;  %v10083_v59 = vld [vmem:[#allocation31_spill] sm:$0xff] }
 0xca3   :  { %3292 = vmatprep.subr.bf16.mxu1 %v8882_v45  ;;  %v1913_v17 = vadd.f32 %v10083_v59, %v10056_v60 }
 0xca6   :  { %3293 = vmatpush1.bf16.msra.mxu1 %v8888_v38 }
 0xca7   :  { %3294 = vmatprep.subr.bf16.mxu1 %v8894_v4 }
 0xcaa   :  { %3295 = vmatpush1.bf16.msra.mxu1 %v8900_v10 }
 0xcab   :  { %3296 = vmatprep.subr.bf16.mxu1 %v8906_v55  ;;  %v10082_v55 = vld [vmem:[#allocation34_spill] sm:$0xff] }
 0xcac   :  { %v1846_v4 = vadd.f32 %v10082_v55, %v10054_v16 }
 0xcae   :  { %3297 = vmatpush1.bf16.msra.mxu1 %v8912_v6 }
 0xcaf   :  { %3419 = vmatprep.subr.bf16.mxu1 %v8541_v56 }
 0xd31   :  { %v3097_v20 = vpop.f32.mrf.mxu1  ;;  %v3138_v35 = vpop.f32.mrf.mxu0 }
 0xd32   :  { %v3186_v36 = vadd.f32 %v3097_v20, %v1844_v22  ;;  %v3214_v16 = vadd.f32 %v3138_v35, %v10036_v40 }
 0xd33   :  { %v3099_v21 = vpop.f32.mrf.mxu1  ;;  %v3140_v14 = vpop.f32.mrf.mxu0 }
 0xd34   :  { %v5574_v10 = vmul.f32 -1.442695, %v3186_v36  ;;  %v3200_v6 = vadd.f32 %v3099_v21, %v1846_v4  ;;  %v10085_v4 = vld [vmem:[#allocation54_spill] sm:$0xff] }
 0xd35   :  { %v3101_v38 = vpop.f32.mrf.mxu1  ;;  %v3141_v45 = vpop.f32.mrf.mxu0 }
 0xd36   :  { %6686 = vpow2.f32 %v5574_v10  ;;  %v5576_v5 = vmul.f32 -1.442695, %v3200_v6 }
 0xd37   :  { %v3102_v56 = vpop.f32.mrf.mxu1  ;;  %v3142_v13 = vpop.f32.mrf.mxu0 }
 0xd38   :  { %v3187_v24 = vadd.f32 %v3142_v13, %v1913_v17  ;;  %6688 = vpow2.f32 %v5576_v5  ;;  %v10084_v56 = vld [vmem:[#allocation33_spill] sm:$0xff] }
 0xd39   :  { %v1917_v13 = vadd.f32 %v10084_v56, %v10037_v49 }
 0xd3a   :  { %v5575_v47 = vmul.f32 -1.442695, %v3187_v24 }
 0xd3c   :  { %6690 = vpow2.f32 %v5575_v47 }
 0xd43   :  { %v6687_v20 = vpop.eup %6686 }
 0xd44   :  { %v3194_v22 = vadd.f32 1.0, %v6687_v20 }
 0xd45   :  { %v6689_v14 = vpop.eup %6688 }
 0xd46   :  { %6692 = vrcp.f32 %v3194_v22  ;;  %v3208_v55 = vadd.f32 1.0, %v6689_v14 }
 0xd48   :  { %6694 = vrcp.f32 %v3208_v55 }
 0xd49   :  { %v6691_v36 = vpop.eup %6690 }
 0xd4a   :  { %v3195_v38 = vadd.f32 1.0, %v6691_v36 }
 0xd4c   :  { %6696 = vrcp.f32 %v3195_v38 }
 0xd51   :  { %v3179_v45 = vpop.f32.mrf.mxu1 }
 0xd53   :  { %v6693_v59 = vpop.eup %6692  ;;  %v3180_v21 = vpop.f32.mrf.mxu1 }
 0xd54   :  { %v3216_v17 = vmul.f32 %v6693_v59, %v3214_v16  ;;  %v10086_v59 = vld [vmem:[#allocation55_spill] sm:$0xff] }
 0xd55   :  { %v3181_v24 = vpop.f32.mrf.mxu1  ;;  %v6695_v20 = vpop.eup %6694 }
 0xd56   :  { %v3218_v47 = vadd.f32 %v3216_v17, %v1917_v13  ;;  %v3201_v10 = vadd.f32 %v3181_v24, %v10085_v4  ;;  %v3222_v14 = vsub.f32 1.0, %v6695_v20  ;;  %v3226_v45 = vmul.f32 %v6695_v20, %v8724_v58  ;;  %v10089_v20 = vld [vmem:[#allocation13_spill] sm:$0xff] }
 0xd57   :  { %v3183_v5 = vpop.f32.mrf.mxu1 }
 0xd58   :  { %6698 = vtanh.f32 %v3218_v47  ;;  %v5577_v6 = vmul.f32 -1.442695, %v3201_v10  ;;  %v3215_v22 = vadd.f32 %v3183_v5, %v8404_v18  ;;  %v10088_v5 = vld [vmem:[#allocation12_spill] sm:$0xff] }
 0xd59   :  { %v6697_v35 = vpop.eup %6696 }
 0xd5a   :  { %6700 = vpow2.f32 %v5577_v6  ;;  %v3217_v40 = vmul.f32 %v6697_v35, %v3215_v22  ;;  %v10087_v6 = vld [vmem:[#allocation61_spill] sm:$0xff]  ;;  %v10090_v22 = vld [vmem:[#allocation11_spill] sm:$0xff]  ;;  %v10091_v35 = vld [vmem:[#allocation14_spill] sm:$0xff] }
 0xd5c   :  { %v3219_v21 = vadd.f32 %v3217_v40, %v10086_v59  ;;  %v10092_v40 = vld [vmem:[#allocation15_spill] sm:$0xff]  ;;  %v10099_v59 = vld [vmem:[#allocation36_spill] sm:$0xff] }
 0xd65   :  { %v6699_v36 = vpop.eup %6698 }
 0xd66   :  { %v3224_v55 = vmul.f32 %v6699_v36, %v3222_v14  ;;  %v10093_v14 = vld [vmem:[#allocation16_spill] sm:$0xff]  ;;  %v10094_v36 = vld [vmem:[#allocation17_spill] sm:$0xff] }
 0xd67   :  { %v6701_v16 = vpop.eup %6700 }
 0xd68   :  { %v3209_v38 = vadd.f32 1.0, %v6701_v16  ;;  %v8929_v56 = vadd.f32 %v3226_v45, %v3224_v55  ;;  %v10095_v55 = vld [vmem:[#allocation18_spill] sm:$0xff]  ;;  %v10096_v45 = vld [vmem:[#allocation24_spill] sm:$0xff] }
 0xd69   :  { %v10097_v16 = vld [vmem:[#allocation42_spill] sm:$0xff] }
 0xd6a   :  { %6702 = vrcp.f32 %v3209_v38  ;;  %v10098_v38 = vld [vmem:[#allocation43_spill] sm:$0xff] }
 0xd6b   :  { %6704 = vtanh.f32 %v3219_v21  ;;  %v1848_v21 = vadd.f32 %v10099_v59, %v10098_v38  ;;  %v10101_v59 = vld [vmem:[#allocation47_spill] sm:$0xff]  ;;  %v10102_v38 = vld [vmem:[#allocation38_spill] sm:$0xff] }
 0xd77   :  { %v6703_v13 = vpop.eup %6702 }
 0xd78   :  { %v3223_v17 = vsub.f32 1.0, %v6703_v13  ;;  %v6705_v24 = vpop.eup %6704  ;;  %v3227_v18 = vmul.f32 %v6703_v13, %v8726_v2 }
 0xd7a   :  { %v3225_v47 = vmul.f32 %v6705_v24, %v3223_v17 }
 0xd7c   :  { %v8932_v4 = vadd.f32 %v3227_v18, %v3225_v47 }
 0xd7e   :  { %v3240_v10 = vpack.c.bf16 %v8932_v4, %v8929_v56 }
 0xd80   :  { %3274 = vmatmul.mubr.bf16.vlgmr.msra.gmra.mxu0 %v3240_v10  ;;  %3315 = vmatmul.mubr.bf16.vlgmr.msra.gmra.mxu1 %v3240_v10 }
 0xd81   :  { %3324 = vmatpush1.bf16.msra.mxu0 %v8733_v52  ;;  %3355 = vmatprep.mubr.bf16.mxu0 %v9955_v15 }
 0xd82   :  { %3325 = vmatprep.subr.bf16.mxu0 %v8740_v41  ;;  %3420 = vmatpush1.bf16.msra.mxu1 %v8489_v29 }
 0xd83   :  { %3421 = vmatprep.subr.bf16.mxu1 %v8571_v57  ;;  %3451 = vmatprep.mubr.bf16.mxu1 %v9955_v15 }
 0xd85   :  { %3326 = vmatpush1.bf16.msra.mxu0 %v8749_v1 }
 0xd86   :  { %3327 = vmatprep.subr.bf16.mxu0 %v8755_v8  ;;  %3422 = vmatpush1.bf16.msra.mxu1 %v8580_v12 }
 0xd87   :  { %3423 = vmatprep.subr.bf16.mxu1 %v8586_v51 }
 0xd89   :  { %3328 = vmatpush1.bf16.msra.mxu0 %v8763_v63 }
 0xd8a   :  { %3329 = vmatprep.subr.bf16.mxu0 %v8769_v61  ;;  %3424 = vmatpush1.bf16.msra.mxu1 %v8594_v48 }
 0xd8b   :  { %3425 = vmatprep.subr.bf16.mxu1 %v8600_v30 }
 0xd8d   :  { %3330 = vmatpush1.bf16.msra.mxu0 %v8777_v0 }
 0xd8e   :  { %3331 = vmatprep.subr.bf16.mxu0 %v8783_v44  ;;  %3426 = vmatpush1.bf16.msra.mxu1 %v8608_v32 }
 0xd8f   :  { %3427 = vmatprep.subr.bf16.mxu1 %v8614_v11 }
 0xd91   :  { %3332 = vmatpush1.bf16.msra.mxu0 %v8791_v37 }
 0xd92   :  { %3333 = vmatprep.subr.bf16.mxu0 %v8797_v19  ;;  %3428 = vmatpush1.bf16.msra.mxu1 %v8622_v23 }
 0xd93   :  { %3429 = vmatprep.subr.bf16.mxu1 %v8628_v34 }
 0xd95   :  { %3334 = vmatpush1.bf16.msra.mxu0 %v8805_v46 }
 0xd96   :  { %3335 = vmatprep.subr.bf16.mxu0 %v8811_v50  ;;  %3430 = vmatpush1.bf16.msra.mxu1 %v8636_v26 }
 0xd97   :  { %3431 = vmatprep.subr.bf16.mxu1 %v8642_v25 }
 0xd99   :  { %3336 = vmatpush1.bf16.msra.mxu0 %v8819_v27 }
 0xd9a   :  { %3337 = vmatprep.subr.bf16.mxu0 %v8825_v53  ;;  %3432 = vmatpush1.bf16.msra.mxu1 %v8650_v31 }
 0xd9b   :  { %3433 = vmatprep.subr.bf16.mxu1 %v8656_v62 }
 0xd9d   :  { %3338 = vmatpush1.bf16.msra.mxu0 %v8833_v33 }
 0xd9e   :  { %3460 = vmatprep.subr.bf16.mxu0 %v8663_v43  ;;  %3434 = vmatpush1.bf16.msra.mxu1 %v8669_v7 }
 0xd9f   :  { %3501 = vmatprep.subr.bf16.mxu1 %v8675_v28 }
 0xda0   :  { %3356 = vmatmul.mubr.bf16.vlgmr.msra.gmra.mxu0 %v3240_v10 }
 0xda1   :  { %3461 = vmatpush1.bf16.msra.mxu0 %v8681_v9  ;;  %3492 = vmatprep.mubr.bf16.mxu0 %v9955_v15 }
 0xda2   :  { %3462 = vmatprep.subr.bf16.mxu0 %v8688_v42 }
 0xda5   :  { %3463 = vmatpush1.bf16.msra.mxu0 %v8694_v39 }
 0xda6   :  { %3464 = vmatprep.subr.bf16.mxu0 %v8846_v54 }
 0xda9   :  { %3465 = vmatpush1.bf16.msra.mxu0 %v8852_v3 }
 0xdaa   :  { %3466 = vmatprep.subr.bf16.mxu0 %v10087_v6 }
 0xdad   :  { %3467 = vmatpush1.bf16.msra.mxu0 %v10088_v5 }
 0xdae   :  { %3468 = vmatprep.subr.bf16.mxu0 %v10089_v20 }
 0xdb1   :  { %3469 = vmatpush1.bf16.msra.mxu0 %v10090_v22 }
 0xdb2   :  { %3470 = vmatprep.subr.bf16.mxu0 %v10091_v35 }
 0xdb5   :  { %3471 = vmatpush1.bf16.msra.mxu0 %v10092_v40 }
 0xdb6   :  { %3472 = vmatprep.subr.bf16.mxu0 %v10093_v14  ;;  %v10100_v14 = vld [vmem:[#allocation27_spill] sm:$0xff] }
 0xdb9   :  { %3473 = vmatpush1.bf16.msra.mxu0 %v10094_v36  ;;  %v1909_v36 = vadd.f32 %v10100_v14, %v10056_v60  ;;  %v8996_v14 = vld [vmem:[%s9862_s8] sm:$0xff] }
 0xdba   :  { %3474 = vmatprep.subr.bf16.mxu0 %v10095_v55  ;;  %10103 = vst [vmem:[#allocation26_spill] sm:$0xff] %v8996_v14 }
 0xdbd   :  { %3475 = vmatpush1.bf16.msra.mxu0 %v10096_v45 }
 0xdbe   :  { %3597 = vmatprep.subr.bf16.mxu0 %v10097_v16 }
 0xe40   :  { %v3275_v13 = vpop.f32.mrf.mxu0  ;;  %v3316_v17 = vpop.f32.mrf.mxu1 }
 0xe41   :  { %v3364_v24 = vadd.f32 %v3275_v13, %v1848_v21  ;;  %v1850_v21 = vadd.f32 %v10102_v38, %v10101_v59 }
 0xe42   :  { %v3277_v47 = vpop.f32.mrf.mxu0  ;;  %v3318_v18 = vpop.f32.mrf.mxu1 }
 0xe43   :  { %v5578_v10 = vmul.f32 -1.442695, %v3364_v24  ;;  %v3378_v18 = vadd.f32 %v3277_v47, %v1850_v21 }
 0xe44   :  { %v3279_v2 = vpop.f32.mrf.mxu0  ;;  %v3319_v58 = vpop.f32.mrf.mxu1 }
 0xe45   :  { %6706 = vpow2.f32 %v5578_v10  ;;  %v5580_v58 = vmul.f32 -1.442695, %v3378_v18  ;;  %v10105_v10 = vld [vmem:[#allocation52_spill] sm:$0xff]  ;;  %v9005_v18 = vld [vmem:[%s9862_s8 + $0x8] sm:$0xff] }
 0xe46   :  { %v3280_v55 = vpop.f32.mrf.mxu0  ;;  %v3320_v40 = vpop.f32.mrf.mxu1  ;;  %10106 = vst [vmem:[#allocation64_spill] sm:$0xff] %v9005_v18 }
 0xe47   :  { %v3365_v45 = vadd.f32 %v3320_v40, %v1909_v36  ;;  %v3392_v40 = vadd.f32 %v8996_v14, %v3316_v17 }
 0xe49   :  { %v5579_v35 = vmul.f32 -1.442695, %v3365_v45 }
 0xe4b   :  { %6708 = vpow2.f32 %v5579_v35 }
 0xe52   :  { %v6707_v16 = vpop.eup %6706 }
 0xe53   :  { %v3372_v22 = vadd.f32 1.0, %v6707_v16 }
 0xe55   :  { %6710 = vrcp.f32 %v3372_v22  ;;  %v10104_v22 = vld [vmem:[#allocation37_spill] sm:$0xff] }
 0xe56   :  { %v1921_v55 = vadd.f32 %v10104_v22, %v10037_v49 }
 0xe58   :  { %v6709_v13 = vpop.eup %6708 }
 0xe59   :  { %v3373_v24 = vadd.f32 1.0, %v6709_v13 }
 0xe5b   :  { %6712 = vrcp.f32 %v3373_v24 }
 0xe5c   :  { %6714 = vpow2.f32 %v5580_v58 }
 0xe60   :  { %v3357_v2 = vpop.f32.mrf.mxu0 }
 0xe61   :  { %v10107_v2 = vld [vmem:[#allocation53_spill] sm:$0xff] }
 0xe62   :  { %v6711_v35 = vpop.eup %6710  ;;  %v3358_v36 = vpop.f32.mrf.mxu0 }
 0xe63   :  { %v3394_v45 = vmul.f32 %v6711_v35, %v3392_v40 }
 0xe64   :  { %v3359_v38 = vpop.f32.mrf.mxu0 }
 0xe65   :  { %v3396_v47 = vadd.f32 %v3394_v45, %v1921_v55  ;;  %v3379_v16 = vadd.f32 %v3359_v38, %v10105_v10 }
 0xe66   :  { %v3361_v21 = vpop.f32.mrf.mxu0 }
 0xe67   :  { %v5581_v13 = vmul.f32 -1.442695, %v3379_v16  ;;  %v3393_v17 = vadd.f32 %v9005_v18, %v3361_v21 }
 0xe68   :  { %v6713_v24 = vpop.eup %6712 }
 0xe69   :  { %6716 = vpow2.f32 %v5581_v13  ;;  %v3395_v58 = vmul.f32 %v6713_v24, %v3393_v17  ;;  %v6715_v22 = vpop.eup %6714 }
 0xe6a   :  { %v3386_v40 = vadd.f32 1.0, %v6715_v22 }
 0xe6b   :  { %v3397_v36 = vadd.f32 %v3395_v58, %v10107_v2 }
 0xe6c   :  { %6718 = vrcp.f32 %v3386_v40 }
 0xe6d   :  { %6720 = vtanh.f32 %v3396_v47 }
 0xe76   :  { %v6717_v35 = vpop.eup %6716 }
 0xe77   :  { %v3387_v55 = vadd.f32 1.0, %v6717_v35 }
 0xe79   :  { %6722 = vrcp.f32 %v3387_v55  ;;  %v6719_v45 = vpop.eup %6718 }
 0xe7a   :  { %6724 = vtanh.f32 %v3397_v36  ;;  %v6721_v38 = vpop.eup %6720  ;;  %v3400_v10 = vsub.f32 1.0, %v6719_v45  ;;  %v3404_v13 = vmul.f32 %v6719_v45, %v8929_v56 }
 0xe7c   :  { %v3402_v14 = vmul.f32 %v6721_v38, %v3400_v10  ;;  %v10119_v38 = vld [vmem:[#allocation26_spill] sm:$0xff] }
 0xe7e   :  { %v9011_v24 = vadd.f32 %v3404_v13, %v3402_v14  ;;  %v10120_v13 = vld [vmem:[#allocation63_spill] sm:$0xff] }
 0xe86   :  { %v6723_v16 = vpop.eup %6722 }
 0xe87   :  { %v3401_v49 = vsub.f32 1.0, %v6723_v16  ;;  %v6725_v21 = vpop.eup %6724  ;;  %v3405_v17 = vmul.f32 %v6723_v16, %v8932_v4 }
 0xe89   :  { %v3403_v18 = vmul.f32 %v6725_v21, %v3401_v49  ;;  %v10108_v49 = vld [vmem:[#allocation11_spill] sm:$0xff] }
 0xe8b   :  { %v9013_v58 = vadd.f32 %v3405_v17, %v3403_v18  ;;  %v10121_v17 = vld [vmem:[#allocation41_spill] sm:$0xff] }
 0xe8d   :  { %v3418_v47 = vpack.c.bf16 %v9013_v58, %v9011_v24 }
 0xe8f   :  { %3452 = vmatmul.mubr.bf16.vlgmr.msra.gmra.mxu1 %v3418_v47  ;;  %3493 = vmatmul.mubr.bf16.vlgmr.msra.gmra.mxu0 %v3418_v47 }
 0xe90   :  { %3502 = vmatpush1.bf16.msra.mxu1 %v8733_v52  ;;  %3533 = vmatprep.mubr.bf16.mxu1 %v9955_v15 }
 0xe91   :  { %3503 = vmatprep.subr.bf16.mxu1 %v8740_v41  ;;  %3598 = vmatpush1.bf16.msra.mxu0 %v8489_v29  ;;  %v10109_v29 = vld [vmem:[#allocation14_spill] sm:$0xff] }
 0xe92   :  { %3599 = vmatprep.subr.bf16.mxu0 %v8571_v57  ;;  %3629 = vmatprep.mubr.bf16.mxu0 %v9955_v15  ;;  %v10110_v57 = vld [vmem:[#allocation15_spill] sm:$0xff] }
 0xe94   :  { %3504 = vmatpush1.bf16.msra.mxu1 %v8749_v1 }
 0xe95   :  { %3505 = vmatprep.subr.bf16.mxu1 %v8755_v8  ;;  %3600 = vmatpush1.bf16.msra.mxu0 %v8580_v12  ;;  %v10111_v12 = vld [vmem:[#allocation16_spill] sm:$0xff] }
 0xe96   :  { %3601 = vmatprep.subr.bf16.mxu0 %v8586_v51  ;;  %v10112_v51 = vld [vmem:[#allocation17_spill] sm:$0xff] }
 0xe98   :  { %3506 = vmatpush1.bf16.msra.mxu1 %v8763_v63 }
 0xe99   :  { %3507 = vmatprep.subr.bf16.mxu1 %v8769_v61  ;;  %3602 = vmatpush1.bf16.msra.mxu0 %v8594_v48  ;;  %v10113_v48 = vld [vmem:[#allocation18_spill] sm:$0xff] }
 0xe9a   :  { %3603 = vmatprep.subr.bf16.mxu0 %v8600_v30  ;;  %v10114_v30 = vld [vmem:[#allocation24_spill] sm:$0xff] }
 0xe9c   :  { %3508 = vmatpush1.bf16.msra.mxu1 %v8777_v0 }
 0xe9d   :  { %3509 = vmatprep.subr.bf16.mxu1 %v8783_v44  ;;  %3604 = vmatpush1.bf16.msra.mxu0 %v8608_v32  ;;  %v10115_v32 = vld [vmem:[#allocation43_spill] sm:$0xff] }
 0xe9e   :  { %3605 = vmatprep.subr.bf16.mxu0 %v8614_v11  ;;  %v10116_v11 = vld [vmem:[#allocation40_spill] sm:$0xff] }
 0xea0   :  { %3510 = vmatpush1.bf16.msra.mxu1 %v8791_v37 }
 0xea1   :  { %3511 = vmatprep.subr.bf16.mxu1 %v8797_v19  ;;  %3606 = vmatpush1.bf16.msra.mxu0 %v8622_v23  ;;  %v1854_v23 = vadd.f32 %v10116_v11, %v10115_v32 }
 0xea2   :  { %3607 = vmatprep.subr.bf16.mxu0 %v8628_v34 }
 0xea4   :  { %3512 = vmatpush1.bf16.msra.mxu1 %v8805_v46 }
 0xea5   :  { %3513 = vmatprep.subr.bf16.mxu1 %v8811_v50  ;;  %3608 = vmatpush1.bf16.msra.mxu0 %v8636_v26 }
 0xea6   :  { %3609 = vmatprep.subr.bf16.mxu0 %v8642_v25 }
 0xea8   :  { %3514 = vmatpush1.bf16.msra.mxu1 %v8819_v27 }
 0xea9   :  { %3515 = vmatprep.subr.bf16.mxu1 %v8825_v53  ;;  %3610 = vmatpush1.bf16.msra.mxu0 %v8650_v31 }
 0xeaa   :  { %3611 = vmatprep.subr.bf16.mxu0 %v8656_v62 }
 0xeac   :  { %3516 = vmatpush1.bf16.msra.mxu1 %v8833_v33 }
 0xead   :  { %3638 = vmatprep.subr.bf16.mxu1 %v8663_v43  ;;  %3612 = vmatpush1.bf16.msra.mxu0 %v8669_v7  ;;  %v10117_v7 = vld [vmem:[#allocation6_spill] sm:$0xff] }
 0xeae   :  { %3679 = vmatprep.subr.bf16.mxu0 %v8675_v28  ;;  %v1856_v28 = vadd.f32 %v10117_v7, %v10101_v59 }
 0xeaf   :  { %3534 = vmatmul.mubr.bf16.vlgmr.msra.gmra.mxu1 %v3418_v47  ;;  %v1927_v47 = vadd.f32 %v10121_v17, %v10120_v13  ;;  %v9179_v17 = vld [vmem:[%s9864_s10 + $0xac] ss:$12 sps:$4 sm:$0xff]  }
 0xeb0   :  { %3639 = vmatpush1.bf16.msra.mxu1 %v8681_v9  ;;  %3670 = vmatprep.mubr.bf16.mxu1 %v9955_v15 }
 0xeb1   :  { %3640 = vmatprep.subr.bf16.mxu1 %v8688_v42 }
 0xeb4   :  { %3641 = vmatpush1.bf16.msra.mxu1 %v8694_v39  ;;  %v10118_v39 = vld [vmem:[#allocation23_spill] sm:$0xff] }
 0xeb5   :  { %3642 = vmatprep.subr.bf16.mxu1 %v8846_v54  ;;  %v1903_v54 = vadd.f32 %v10118_v39, %v10056_v60 }
 0xeb8   :  { %3643 = vmatpush1.bf16.msra.mxu1 %v8852_v3 }
 0xeb9   :  { %3644 = vmatprep.subr.bf16.mxu1 %v10087_v6 }
 0xebc   :  { %3645 = vmatpush1.bf16.msra.mxu1 %v10088_v5 }
 0xebd   :  { %3646 = vmatprep.subr.bf16.mxu1 %v10089_v20 }
 0xec0   :  { %3647 = vmatpush1.bf16.msra.mxu1 %v10108_v49 }
 0xec1   :  { %3648 = vmatprep.subr.bf16.mxu1 %v10109_v29 }
 0xec4   :  { %3649 = vmatpush1.bf16.msra.mxu1 %v10110_v57 }
 0xec5   :  { %3650 = vmatprep.subr.bf16.mxu1 %v10111_v12  ;;  %v10122_v12 = vld [vmem:[#allocation50_spill] sm:$0xff] }
 0xec8   :  { %3651 = vmatpush1.bf16.msra.mxu1 %v10112_v51 }
 0xec9   :  { %3652 = vmatprep.subr.bf16.mxu1 %v10113_v48 }
 0xecc   :  { %3653 = vmatpush1.bf16.msra.mxu1 %v10114_v30 }
 0xf4f   :  { %v3453_v34 = vpop.f32.mrf.mxu1  ;;  %v3494_v26 = vpop.f32.mrf.mxu0 }
 0xf50   :  { %v3542_v25 = vadd.f32 %v3453_v34, %v1854_v23  ;;  %v3570_v10 = vadd.f32 %v10119_v38, %v3494_v26  ;;  %v10123_v23 = vld [vmem:[#allocation64_spill] sm:$0xff] }
 0xf51   :  { %v3455_v31 = vpop.f32.mrf.mxu1  ;;  %v3496_v62 = vpop.f32.mrf.mxu0 }
 0xf52   :  { %v5582_v43 = vmul.f32 -1.442695, %v3542_v25  ;;  %v3556_v3 = vadd.f32 %v3455_v31, %v1856_v28 }
 0xf53   :  { %v3457_v9 = vpop.f32.mrf.mxu1  ;;  %v3497_v42 = vpop.f32.mrf.mxu0 }
 0xf54   :  { %6726 = vpow2.f32 %v5582_v43  ;;  %v5584_v14 = vmul.f32 -1.442695, %v3556_v3  ;;  %v10124_v42 = vld [vmem:[#allocation51_spill] sm:$0xff] }
 0xf55   :  { %v3458_v6 = vpop.f32.mrf.mxu1  ;;  %v3498_v5 = vpop.f32.mrf.mxu0 }
 0xf56   :  { %v3543_v20 = vadd.f32 %v3498_v5, %v1903_v54  ;;  %6728 = vpow2.f32 %v5584_v14 }
 0xf58   :  { %v5583_v18 = vmul.f32 -1.442695, %v3543_v20 }
 0xf5a   :  { %6730 = vpow2.f32 %v5583_v18 }
 0xf61   :  { %v6727_v2 = vpop.eup %6726 }
 0xf62   :  { %v3550_v36 = vadd.f32 1.0, %v6727_v2 }
 0xf63   :  { %v6729_v22 = vpop.eup %6728 }
 0xf64   :  { %6732 = vrcp.f32 %v3550_v36  ;;  %v3564_v35 = vadd.f32 1.0, %v6729_v22  ;;  %v6476_v36 = vld [vmem:[%s9863_s9 + $0x34] ss:$12 sps:$4 sm:$0xff]   ;;  %v6477_v22 = vld [vmem:[%s9863_s9 + $0x38] ss:$12 sps:$4 sm:$0xff]  }
 0xf66   :  { %6734 = vrcp.f32 %v3564_v35  ;;  %v6480_v35 = vld [vmem:[%s9863_s9 + $0x1c] ss:$12 sps:$4 sm:$0xff]  }
 0xf67   :  { %v6731_v40 = vpop.eup %6730 }
 0xf68   :  { %v3551_v55 = vadd.f32 1.0, %v6731_v40  ;;  %v6474_v40 = vld [vmem:[%s9863_s9 + $0x30] ss:$12 sps:$4 sm:$0xff]  }
 0xf6a   :  { %6736 = vrcp.f32 %v3551_v55  ;;  %v6481_v55 = vld [vmem:[%s9863_s9 + $0x20] ss:$12 sps:$4 sm:$0xff]  }
 0xf6f   :  { %v3535_v45 = vpop.f32.mrf.mxu1 }
 0xf70   :  { %v6478_v45 = vld [vmem:[%s9863_s9 + $0x18] ss:$12 sps:$4 sm:$0xff]  }
 0xf71   :  { %v6733_v16 = vpop.eup %6732  ;;  %v3536_v21 = vpop.f32.mrf.mxu1 }
 0xf72   :  { %v3572_v49 = vmul.f32 %v6733_v16, %v3570_v10  ;;  %v6484_v10 = vld [vmem:[%s9863_s9 + $0x4] ss:$12 sps:$4 sm:$0xff]   ;;  %v6485_v16 = vld [vmem:[%s9863_s9 + $0x8] ss:$12 sps:$4 sm:$0xff]   ;;  %v6482_v21 = vld [vmem:[%s9863_s9] ss:$12 sps:$4 sm:$0xff]  }
 0xf73   :  { %v3537_v29 = vpop.f32.mrf.mxu1  ;;  %v6735_v11 = vpop.eup %6734 }
 0xf74   :  { %v3574_v57 = vadd.f32 %v3572_v49, %v1927_v47  ;;  %v3557_v51 = vadd.f32 %v3537_v29, %v10122_v12  ;;  %v3578_v25 = vsub.f32 1.0, %v6735_v11  ;;  %v3582_v7 = vmul.f32 %v6735_v11, %v9011_v24  ;;  %v10126_v49 = vld [vmem:[#allocation44_spill] sm:$0xff] }
 0xf75   :  { %v3539_v30 = vpop.f32.mrf.mxu1  ;;  %v10125_v47 = vmov 0.0   ;;  %v1858_v29 = vadd.f32 %v10126_v49, %v10115_v32 }
 0xf76   :  { %6738 = vtanh.f32 %v3574_v57  ;;  %v5585_v48 = vmul.f32 -1.442695, %v3557_v51  ;;  %v3571_v34 = vadd.f32 %v10123_v23, %v3539_v30 }
 0xf77   :  { %v6737_v26 = vpop.eup %6736 }
 0xf78   :  { %6740 = vpow2.f32 %v5585_v48  ;;  %v3573_v31 = vmul.f32 %v6737_v26, %v3571_v34 }
 0xf7a   :  { %v3575_v39 = vadd.f32 %v3573_v31, %v10124_v42 }
 0xf83   :  { %v6739_v62 = vpop.eup %6738 }
 0xf84   :  { %v3580_v43 = vmul.f32 %v6739_v62, %v3578_v25  ;;  %v10127_v25 = vld [vmem:[#allocation19_spill] sm:$0xff]  ;;  %v10128_v62 = vld [vmem:[#allocation46_spill] sm:$0xff] }
 0xf85   :  { %v6741_v28 = vpop.eup %6740  ;;  %v1899_v31 = vadd.f32 %v10127_v25, %v10056_v60 }
 0xf86   :  { %v3565_v9 = vadd.f32 1.0, %v6741_v28  ;;  %v9080_v54 = vadd.f32 %v3582_v7, %v3580_v43  ;;  %v1860_v43 = vadd.f32 %v10128_v62, %v10101_v59 }
 0xf88   :  { %6742 = vrcp.f32 %v3565_v9 }
 0xf89   :  { %6744 = vtanh.f32 %v3575_v39 }
 0xf95   :  { %v6743_v3 = vpop.eup %6742 }
 0xf96   :  { %v3579_v6 = vsub.f32 1.0, %v6743_v3  ;;  %v6745_v5 = vpop.eup %6744  ;;  %v3583_v14 = vmul.f32 %v6743_v3, %v9013_v58 }
 0xf98   :  { %v3581_v20 = vmul.f32 %v6745_v5, %v3579_v6 }
 0xf9a   :  { %v9083_v18 = vadd.f32 %v3583_v14, %v3581_v20 }
 0xf9c   :  { %v3596_v2 = vpack.c.bf16 %v9083_v18, %v9080_v54 }
 0xf9e   :  { %3630 = vmatmul.mubr.bf16.vlgmr.msra.gmra.mxu0 %v3596_v2  ;;  %3671 = vmatmul.mubr.bf16.vlgmr.msra.gmra.mxu1 %v3596_v2 }
 0xf9f   :  { %3680 = vmatpush1.bf16.msra.mxu0 %v8733_v52  ;;  %3711 = vmatprep.mubr.bf16.mxu0 %v9955_v15  ;;  %v6456_v52 = vld [vmem:[%s9863_s9 + $0xac] ss:$12 sps:$4 sm:$0xff]  }
 0xfa0   :  { %3681 = vmatprep.subr.bf16.mxu0 %v8740_v41  ;;  %4028 = vmatprep.mubr.bf16.mxu1 %v9955_v15  ;;  %v6454_v41 = vld [vmem:[%s9863_s9 + $0xa8] ss:$12 sps:$4 sm:$0xff]  }
 0xfa1   :  { %3996 = vmatprep.subr.bf16.mxu1 %v6456_v52 }
 0xfa2   :  { %3997 = vmatpush1.bf16.msra.mxu1 %v6454_v41 }
 0xfa3   :  { %3682 = vmatpush1.bf16.msra.mxu0 %v8749_v1  ;;  %v6457_v1 = vld [vmem:[%s9863_s9 + $0xb0] ss:$12 sps:$4 sm:$0xff]  }
 0xfa4   :  { %3683 = vmatprep.subr.bf16.mxu0 %v8755_v8  ;;  %v6460_v8 = vld [vmem:[%s9863_s9 + $0x94] ss:$12 sps:$4 sm:$0xff]  }
 0xfa5   :  { %3998 = vmatprep.subr.bf16.mxu1 %v6460_v8 }
 0xfa7   :  { %3684 = vmatpush1.bf16.msra.mxu0 %v8763_v63  ;;  %v6458_v63 = vld [vmem:[%s9863_s9 + $0x90] ss:$12 sps:$4 sm:$0xff]  }
 0xfa8   :  { %3685 = vmatprep.subr.bf16.mxu0 %v8769_v61  ;;  %v6461_v61 = vld [vmem:[%s9863_s9 + $0x98] ss:$12 sps:$4 sm:$0xff]   ;;  %3999 = vmatpush1.bf16.msra.mxu1 %v6458_v63 }
 0xfab   :  { %3686 = vmatpush1.bf16.msra.mxu0 %v8777_v0  ;;  %v6462_v0 = vld [vmem:[%s9863_s9 + $0x78] ss:$12 sps:$4 sm:$0xff]  }
 0xfac   :  { %3687 = vmatprep.subr.bf16.mxu0 %v8783_v44  ;;  %v6464_v44 = vld [vmem:[%s9863_s9 + $0x7c] ss:$12 sps:$4 sm:$0xff]  }
 0xfad   :  { %4000 = vmatprep.subr.bf16.mxu1 %v6464_v44  ;;  %v10130_v44 = vld [vmem:[#allocation48_spill] sm:$0xff] }
 0xfae   :  { %4001 = vmatpush1.bf16.msra.mxu1 %v6462_v0 }
 0xfaf   :  { %3688 = vmatpush1.bf16.msra.mxu0 %v8791_v37  ;;  %v6465_v37 = vld [vmem:[%s9863_s9 + $0x80] ss:$12 sps:$4 sm:$0xff]  }
 0xfb0   :  { %3689 = vmatprep.subr.bf16.mxu0 %v8797_v19  ;;  %v6468_v19 = vld [vmem:[%s9863_s9 + $0x64] ss:$12 sps:$4 sm:$0xff]  }
 0xfb1   :  { %4002 = vmatprep.subr.bf16.mxu1 %v6468_v19 }
 0xfb3   :  { %3690 = vmatpush1.bf16.msra.mxu0 %v8805_v46  ;;  %v6469_v46 = vld [vmem:[%s9863_s9 + $0x68] ss:$12 sps:$4 sm:$0xff]  }
 0xfb4   :  { %3691 = vmatprep.subr.bf16.mxu0 %v8811_v50  ;;  %v6466_v50 = vld [vmem:[%s9863_s9 + $0x60] ss:$12 sps:$4 sm:$0xff]  }
 0xfb5   :  { %4003 = vmatpush1.bf16.msra.mxu1 %v6466_v50 }
 0xfb7   :  { %3692 = vmatpush1.bf16.msra.mxu0 %v8819_v27  ;;  %v6472_v27 = vld [vmem:[%s9863_s9 + $0x4c] ss:$12 sps:$4 sm:$0xff]  }
 0xfb8   :  { %3693 = vmatprep.subr.bf16.mxu0 %v8825_v53  ;;  %v6473_v53 = vld [vmem:[%s9863_s9 + $0x50] ss:$12 sps:$4 sm:$0xff]   ;;  %4004 = vmatprep.subr.bf16.mxu1 %v6472_v27 }
 0xfbb   :  { %3694 = vmatpush1.bf16.msra.mxu0 %v8833_v33  ;;  %v6470_v33 = vld [vmem:[%s9863_s9 + $0x48] ss:$12 sps:$4 sm:$0xff]  }
 0xfbc   :  { %6035 = vmatprep.subr.bf16.mxu0 %v6457_v1  ;;  %4005 = vmatpush1.bf16.msra.mxu1 %v6470_v33 }
 0xfbd   :  { %4006 = vmatprep.subr.bf16.mxu1 %v6476_v36 }
 0xfbe   :  { %3712 = vmatmul.mubr.bf16.vlgmr.msra.gmra.mxu0 %v3596_v2 }
 0xfbf   :  { %6036 = vmatpush3.bf16.msra.mxu0 %v6457_v1  ;;  %v10129_v1 = vld [vmem:[#allocation45_spill] sm:$0xff] }
 0xfc0   :  { %6037 = vmatprep.subr.bf16.mxu0 %v6461_v61  ;;  %4007 = vmatpush1.bf16.msra.mxu1 %v6474_v40  ;;  %v1931_v8 = vadd.f32 %v10129_v1, %v10120_v13  ;;  %v9250_v1 = vld [vmem:[%s9864_s10 + $0x78] ss:$12 sps:$4 sm:$0xff]  }
 0xfc1   :  { %4008 = vmatprep.subr.bf16.mxu1 %v6480_v35 }
 0xfc3   :  { %6038 = vmatpush3.bf16.msra.mxu0 %v6461_v61 }
 0xfc4   :  { %6039 = vmatprep.subr.bf16.mxu0 %v6465_v37  ;;  %4009 = vmatpush1.bf16.msra.mxu1 %v6478_v45 }
 0xfc5   :  { %4010 = vmatprep.subr.bf16.mxu1 %v6484_v10 }
 0xfc7   :  { %6040 = vmatpush3.bf16.msra.mxu0 %v6465_v37 }
 0xfc8   :  { %6041 = vmatprep.subr.bf16.mxu0 %v6469_v46  ;;  %4011 = vmatpush1.bf16.msra.mxu1 %v6482_v21 }
 0xfc9   :  { %4322 = vmatprep.subr.bf16.mxu1 %v9179_v17 }
 0xfcb   :  { %6042 = vmatpush3.bf16.msra.mxu0 %v6469_v46 }
 0xfcc   :  { %6043 = vmatprep.subr.bf16.mxu0 %v6473_v53 }
 0xfcf   :  { %6044 = vmatpush3.bf16.msra.mxu0 %v6473_v53 }
 0xfd0   :  { %6045 = vmatprep.subr.bf16.mxu0 %v6477_v22 }
 0xfd3   :  { %6046 = vmatpush3.bf16.msra.mxu0 %v6477_v22 }
 0xfd4   :  { %6047 = vmatprep.subr.bf16.mxu0 %v6481_v55 }
 0xfd7   :  { %6048 = vmatpush3.bf16.msra.mxu0 %v6481_v55 }
 0xfd8   :  { %6049 = vmatprep.subr.bf16.mxu0 %v6485_v16 }
 0xfdb   :  { %6050 = vmatpush3.bf16.msra.mxu0 %v6485_v16 }
 0xfdc   :  { %6059 = vmatprep.subr.bf16.mxu0 %v10125_v47 }
0x105e   :  { %v3631_v57 = vpop.f32.mrf.mxu0  ;;  %v3672_v12 = vpop.f32.mrf.mxu1 }
0x105f   :  { %v3720_v51 = vadd.f32 %v3631_v57, %v1858_v29  ;;  %v3748_v59 = vadd.f32 %v10119_v38, %v3672_v12  ;;  %v10131_v38 = vld [vmem:[#allocation49_spill] sm:$0xff]  ;;  %v10132_v57 = vld [vmem:[#allocation22_spill] sm:$0xff] }
0x1060   :  { %v3633_v48 = vpop.f32.mrf.mxu0  ;;  %v3674_v30 = vpop.f32.mrf.mxu1  ;;  %v3785_v12 = vadd.f32 %v9013_v58, %v10132_v57 }
0x1061   :  { %v5586_v11 = vmul.f32 -1.442695, %v3720_v51  ;;  %v3734_v9 = vadd.f32 %v3633_v48, %v1860_v43  ;;  %v10133_v48 = vld [vmem:[#allocation10_spill] sm:$0xff]  ;;  %v10137_v43 = vld [vmem:[#allocation60_spill] sm:$0xff] }
0x1062   :  { %v3635_v34 = vpop.f32.mrf.mxu0  ;;  %v3675_v26 = vpop.f32.mrf.mxu1  ;;  %v3784_v30 = vadd.f32 %v9083_v18, %v10133_v48 }
0x1063   :  { %6746 = vpow2.f32 %v5586_v11  ;;  %v5588_v39 = vmul.f32 -1.442695, %v3734_v9  ;;  %v10134_v11 = vld [vmem:[#allocation62_spill] sm:$0xff]  ;;  %v10135_v26 = vld [vmem:[#allocation21_spill] sm:$0xff] }
0x1064   :  { %v3636_v7 = vpop.f32.mrf.mxu0  ;;  %v3676_v28 = vpop.f32.mrf.mxu1  ;;  %v3788_v34 = vadd.f32 %v9011_v24, %v10134_v11  ;;  %v3786_v25 = vadd.f32 %v8932_v4, %v10135_v26  ;;  %v9216_v4 = vld [vmem:[%s9864_s10 + $0x94] ss:$12 sps:$4 sm:$0xff]  }
0x1065   :  { %v3721_v42 = vadd.f32 %v3676_v28, %v1899_v31  ;;  %v10136_v31 = vld [vmem:[#allocation65_spill] sm:$0xff]  ;;  %v3787_v7 = vadd.f32 %v8929_v56, %v10137_v43  ;;  %v3793_v28 = vmul.f32 0.5, %v3785_v12 }
0x1066   :  { %v3794_v58 = vmul.f32 0.5, %v3786_v25 }
0x1067   :  { %v5587_v32 = vmul.f32 -1.442695, %v3721_v42  ;;  %v3792_v42 = vmul.f32 0.5, %v3784_v30  ;;  %v3795_v24 = vmul.f32 0.5, %v3787_v7 }
0x1069   :  { %6748 = vpow2.f32 %v5587_v32  ;;  %v3796_v32 = vmul.f32 0.5, %v3788_v34 }
0x106a   :  { %6750 = vpow2.f32 %v5588_v39 }
0x1070   :  { %v6747_v3 = vpop.eup %6746 }
0x1071   :  { %v3728_v6 = vadd.f32 1.0, %v6747_v3  ;;  %v3816_v3 = vpack.c.bf16 %v3794_v58, %v3793_v28 }
0x1073   :  { %6752 = vrcp.f32 %v3728_v6  ;;  %v10138_v6 = vld [vmem:[#allocation66_spill] sm:$0xff] }
0x1076   :  { %v6749_v5 = vpop.eup %6748 }
0x1077   :  { %v3729_v20 = vadd.f32 1.0, %v6749_v5  ;;  %v6751_v14 = vpop.eup %6750  ;;  %v9222_v5 = vld [vmem:[%s9864_s10 + $0xb0] ss:$12 sps:$4 sm:$0xff]  }
0x1078   :  { %v3742_v60 = vadd.f32 1.0, %v6751_v14  ;;  %v9228_v14 = vld [vmem:[%s9864_s10 + $0x90] ss:$12 sps:$4 sm:$0xff]  }
0x1079   :  { %6754 = vrcp.f32 %v3729_v20  ;;  %v3817_v20 = vpack.c.bf16 %v3796_v32, %v3795_v24 }
0x107a   :  { %6756 = vrcp.f32 %v3742_v60  ;;  %v10139_v60 = vld [vmem:[#allocation20_spill] sm:$0xff] }
0x107e   :  { %v3713_v2 = vpop.f32.mrf.mxu0 }
0x107f   :  { %v3789_v2 = vadd.f32 %v9080_v54, %v10139_v60 }
0x1080   :  { %v6753_v52 = vpop.eup %6752  ;;  %v3714_v41 = vpop.f32.mrf.mxu0 }
0x1081   :  { %v3750_v63 = vmul.f32 %v6753_v52, %v3748_v59  ;;  %v9236_v59 = vld [vmem:[%s9864_s10 + $0x7c] ss:$12 sps:$4 sm:$0xff]   ;;  %v9243_v41 = vld [vmem:[%s9864_s10 + $0x98] ss:$12 sps:$4 sm:$0xff]  }
0x1082   :  { %v3715_v61 = vpop.f32.mrf.mxu0 }
0x1083   :  { %v3752_v0 = vadd.f32 %v3750_v63, %v1931_v8  ;;  %v3735_v37 = vadd.f32 %v3715_v61, %v10130_v44  ;;  %v9256_v8 = vld [vmem:[%s9864_s10 + $0x64] ss:$12 sps:$4 sm:$0xff]   ;;  %v9262_v61 = vld [vmem:[%s9864_s10 + $0x80] ss:$12 sps:$4 sm:$0xff]  }
0x1084   :  { %v3717_v19 = vpop.f32.mrf.mxu0  ;;  %v9276_v44 = vld [vmem:[%s9864_s10 + $0x4c] ss:$12 sps:$4 sm:$0xff]  }
0x1085   :  { %6758 = vtanh.f32 %v3752_v0  ;;  %v5589_v46 = vmul.f32 -1.442695, %v3735_v37  ;;  %v3749_v50 = vadd.f32 %v10123_v23, %v3717_v19  ;;  %v9269_v0 = vld [vmem:[%s9864_s10 + $0x60] ss:$12 sps:$4 sm:$0xff]   ;;  %v9282_v37 = vld [vmem:[%s9864_s10 + $0x68] ss:$12 sps:$4 sm:$0xff]  }
0x1086   :  { %v6755_v27 = vpop.eup %6754  ;;  %v9291_v19 = vld [vmem:[%s9864_s10 + $0x48] ss:$12 sps:$4 sm:$0xff]  }
0x1087   :  { %6760 = vpow2.f32 %v5589_v46  ;;  %v3751_v53 = vmul.f32 %v6755_v27, %v3749_v50  ;;  %v6757_v36 = vpop.eup %6756  ;;  %v9297_v46 = vld [vmem:[%s9864_s10 + $0x34] ss:$12 sps:$4 sm:$0xff]   ;;  %v9303_v50 = vld [vmem:[%s9864_s10 + $0x50] ss:$12 sps:$4 sm:$0xff]  }
0x1088   :  { %v3756_v22 = vsub.f32 1.0, %v6757_v36  ;;  %v3760_v35 = vmul.f32 %v6757_v36, %v9080_v54  ;;  %v3797_v54 = vmul.f32 0.5, %v3789_v2  ;;  %v9310_v27 = vld [vmem:[%s9864_s10 + $0x30] ss:$12 sps:$4 sm:$0xff]  }
0x1089   :  { %v3753_v33 = vadd.f32 %v3751_v53, %v10131_v38  ;;  %v9317_v53 = vld [vmem:[%s9864_s10 + $0x1c] ss:$12 sps:$4 sm:$0xff]   ;;  %v9323_v38 = vld [vmem:[%s9864_s10 + $0x38] ss:$12 sps:$4 sm:$0xff]  }
0x108a   :  { %v9336_v36 = vld [vmem:[%s9864_s10 + $0x4] ss:$12 sps:$4 sm:$0xff]  }
0x1092   :  { %v6759_v40 = vpop.eup %6758 }
0x1093   :  { %v3758_v13 = vmul.f32 %v6759_v40, %v3756_v22  ;;  %v9342_v22 = vld [vmem:[%s9864_s10 + $0x20] ss:$12 sps:$4 sm:$0xff]  }
0x1094   :  { %v6761_v55 = vpop.eup %6760  ;;  %v9349_v40 = vld [vmem:[%s9864_s10] ss:$12 sps:$4 sm:$0xff]  }
0x1095   :  { %v3743_v45 = vadd.f32 1.0, %v6761_v55  ;;  %v3762_v10 = vadd.f32 %v3760_v35, %v3758_v13  ;;  %v9357_v13 = vld [vmem:[%s9864_s10 + $0x8] ss:$12 sps:$4 sm:$0xff]   ;;  %v3851_v35 = vld [vmem:[%s9865_s11] sm:$0x7] }
0x1096   :  { %v10140_v55 = vld [vmem:[#allocation8_spill] sm:$0xff] }
0x1097   :  { %6762 = vrcp.f32 %v3743_v45  ;;  %v3790_v56 = vadd.f32 %v3762_v10, %v10138_v6  ;;  %v9405_v45 = vrot.slane %v3851_v35, %v10140_v55 }
0x1098   :  { %6764 = vtanh.f32 %v3753_v33  ;;  %v9330_v33 = vld [vmem:[%s9864_s10 + $0x18] ss:$12 sps:$4 sm:$0xff]  }
0x1099   :  { %v3798_v52 = vmul.f32 0.5, %v3790_v56 }
0x109b   :  { %v3818_v63 = vpack.c.bf16 %v3798_v52, %v3797_v54 }
0x10a4   :  { %v6763_v16 = vpop.eup %6762 }
0x10a5   :  { %v3757_v21 = vsub.f32 1.0, %v6763_v16  ;;  %v6765_v49 = vpop.eup %6764  ;;  %v3761_v29 = vmul.f32 %v6763_v16, %v9083_v18  ;;  %v9211_v18 = vld [vmem:[%s9864_s10 + $0xa8] ss:$12 sps:$4 sm:$0xff]  }
0x10a7   :  { %v3759_v23 = vmul.f32 %v6765_v49, %v3757_v21 }
0x10a9   :  { %v3763_v51 = vadd.f32 %v3761_v29, %v3759_v23  ;;  %v10141_v23 = vld [vmem:[#allocation7_spill] sm:$0xff] }
0x10aa   :  { %v3856_v29 = vrot.slane %v3851_v35, %v10141_v23 }
0x10ab   :  { %v3783_v62 = vadd.f32 %v3763_v51, %v10136_v31  ;;  %v10142_v51 = vld [vmem:[#allocation9_spill] sm:$0xff] }
0x10ac   :  { %v3860_v48 = vrot.slane %v3851_v35, %v10142_v51 }
0x10ad   :  { %v3791_v9 = vmul.f32 0.5, %v3783_v62 }
0x10af   :  { %v3815_v39 = vpack.c.bf16 %v3792_v42, %v3791_v9 }
0x10b1   :  { %4029 = vmatmul.mubr.bf16.vlgmr.msra.gmra.mxu1 %v3815_v39  ;;  %6051 = vmatprep.mubr.bf16.mxu0 %v3815_v39 }
0x10b2   :  { %6052 = vmatmul.mubr.bf16.vlgmr.msra.gmra.mxu0 %v3816_v3  ;;  %4323 = vmatpush1.bf16.msra.mxu1 %v9211_v18 }
0x10b3   :  { %6055 = vmatprep.mubr.bf16.mxu0 %v3817_v20  ;;  %4324 = vmatprep.subr.bf16.mxu1 %v9216_v4 }
0x10b4   :  { %4038 = vmatprep.mubr.bf16.mxu1 %v9955_v15  ;;  %6060 = vmatpush3.bf16.msra.mxu0 %v9222_v5 }
0x10b5   :  { %6061 = vmatprep.subr.bf16.mxu0 %v10125_v47 }
0x10b6   :  { %4325 = vmatpush1.bf16.msra.mxu1 %v9228_v14 }
0x10b7   :  { %4326 = vmatprep.subr.bf16.mxu1 %v9236_v59 }
0x10b8   :  { %6062 = vmatpush3.bf16.msra.mxu0 %v9243_v41 }
0x10b9   :  { %4039 = vmatmul.mubr.bf16.gmra.mxu1 %v3816_v3  ;;  %6063 = vmatprep.subr.bf16.mxu0 %v10125_v47 }
0x10ba   :  { %6056 = vmatmul.mubr.bf16.gmra.mxu0 %v3818_v63  ;;  %4327 = vmatpush1.bf16.msra.mxu1 %v9250_v1 }
0x10bb   :  { %4328 = vmatprep.subr.bf16.mxu1 %v9256_v8  ;;  %4048 = vmatprep.mubr.bf16.mxu1 %v9955_v15 }
0x10bc   :  { %6064 = vmatpush3.bf16.msra.mxu0 %v9262_v61  ;;  %6075 = vmatprep.mubr.msk.bf16.mxu0 %vm6969_vm0, %v10125_v47 }
0x10bd   :  { %6065 = vmatprep.subr.bf16.mxu0 %v10125_v47 }
0x10be   :  { %4329 = vmatpush1.bf16.msra.mxu1 %v9269_v0 }
0x10bf   :  { %4330 = vmatprep.subr.bf16.mxu1 %v9276_v44 }
0x10c0   :  { %6066 = vmatpush3.bf16.msra.mxu0 %v9282_v37 }
0x10c1   :  { %4049 = vmatmul.mubr.bf16.gmra.mxu1 %v3817_v20  ;;  %6067 = vmatprep.subr.bf16.mxu0 %v10125_v47 }
0x10c2   :  { %4331 = vmatpush1.bf16.msra.mxu1 %v9291_v19  ;;  %4058 = vmatprep.mubr.bf16.mxu1 %v9955_v15 }
0x10c3   :  { %4332 = vmatprep.subr.bf16.mxu1 %v9297_v46 }
0x10c4   :  { %6068 = vmatpush3.bf16.msra.mxu0 %v9303_v50 }
0x10c5   :  { %6069 = vmatprep.subr.bf16.mxu0 %v10125_v47 }
0x10c6   :  { %4333 = vmatpush1.bf16.msra.mxu1 %v9310_v27 }
0x10c7   :  { %4334 = vmatprep.subr.bf16.mxu1 %v9317_v53 }
0x10c8   :  { %6070 = vmatpush3.bf16.msra.mxu0 %v9323_v38 }
0x10c9   :  { %4059 = vmatmul.mubr.bf16.gmra.mxu1 %v3818_v63  ;;  %6071 = vmatprep.subr.bf16.mxu0 %v10125_v47 }
0x10ca   :  { %4335 = vmatpush1.bf16.msra.mxu1 %v9330_v33  ;;  %4354 = vmatprep.mubr.bf16.mxu1 %v9955_v15 }
0x10cb   :  { %4336 = vmatprep.subr.bf16.mxu1 %v9336_v36 }
0x10cc   :  { %6072 = vmatpush3.bf16.msra.mxu0 %v9342_v22 }
0x10cd   :  { %6073 = vmatprep.subr.bf16.mxu0 %v10125_v47 }
0x10ce   :  { %4337 = vmatpush1.bf16.msra.mxu1 %v9349_v40 }
0x10cf   :  { %4430 = vmatprep.subr.bf16.mxu1 %v9179_v17 }
0x10d0   :  { %6074 = vmatpush3.bf16.msra.mxu0 %v9357_v13 }
0x10d1   :  { %4355 = vmatmul.mubr.bf16.vlgmr.msra.gmra.mxu1 %v9955_v15  ;;  %6079 = vmatprep.subr.bf16.mxu0 %v10125_v47 }
0x10d2   :  { %4431 = vmatpush1.bf16.msra.mxu1 %v9211_v18  ;;  %4462 = vmatprep.mubr.bf16.mxu1 %v9955_v15 }
0x10d3   :  { %6076 = vmatmul.mubr.bf16.vlgmr.msra.gmra.mxu0 %v9955_v15  ;;  %4432 = vmatprep.subr.bf16.mxu1 %v9216_v4 }
0x10d4   :  { %6080 = vmatpush3.bf16.msra.mxu0 %v9222_v5  ;;  %6095 = vmatprep.mubr.msk.bf16.mxu0 %vm6969_vm0, %v10125_v47 }
0x10d5   :  { %6081 = vmatprep.subr.bf16.mxu0 %v10125_v47 }
0x10d6   :  { %4433 = vmatpush1.bf16.msra.mxu1 %v9228_v14 }
0x10d7   :  { %4434 = vmatprep.subr.bf16.mxu1 %v9236_v59 }
0x10d8   :  { %6082 = vmatpush3.bf16.msra.mxu0 %v9243_v41 }
0x10d9   :  { %6083 = vmatprep.subr.bf16.mxu0 %v10125_v47 }
0x10da   :  { %4435 = vmatpush1.bf16.msra.mxu1 %v9250_v1 }
0x10db   :  { %4436 = vmatprep.subr.bf16.mxu1 %v9256_v8 }
0x10dc   :  { %6084 = vmatpush3.bf16.msra.mxu0 %v9262_v61 }
0x10dd   :  { %6085 = vmatprep.subr.bf16.mxu0 %v10125_v47 }
0x10de   :  { %4437 = vmatpush1.bf16.msra.mxu1 %v9269_v0 }
0x10df   :  { %4438 = vmatprep.subr.bf16.mxu1 %v9276_v44 }
0x10e0   :  { %6086 = vmatpush3.bf16.msra.mxu0 %v9282_v37 }
0x10e1   :  { %6087 = vmatprep.subr.bf16.mxu0 %v10125_v47 }
0x10e2   :  { %4439 = vmatpush1.bf16.msra.mxu1 %v9291_v19 }
0x10e3   :  { %4440 = vmatprep.subr.bf16.mxu1 %v9297_v46 }
0x10e4   :  { %6088 = vmatpush3.bf16.msra.mxu0 %v9303_v50 }
0x10e5   :  { %6089 = vmatprep.subr.bf16.mxu0 %v10125_v47 }
0x10e6   :  { %4441 = vmatpush1.bf16.msra.mxu1 %v9310_v27 }
0x10e7   :  { %4442 = vmatprep.subr.bf16.mxu1 %v9317_v53 }
0x10e8   :  { %6090 = vmatpush3.bf16.msra.mxu0 %v9323_v38 }
0x10e9   :  { %6091 = vmatprep.subr.bf16.mxu0 %v10125_v47 }
0x10ea   :  { %4443 = vmatpush1.bf16.msra.mxu1 %v9330_v33 }
0x10eb   :  { %4444 = vmatprep.subr.bf16.mxu1 %v9336_v36 }
0x10ec   :  { %6092 = vmatpush3.bf16.msra.mxu0 %v9342_v22 }
0x10ed   :  { %6093 = vmatprep.subr.bf16.mxu0 %v10125_v47 }
0x10ee   :  { %4445 = vmatpush1.bf16.msra.mxu1 %v9349_v40 }
0x10ef   :  { %4538 = vmatprep.subr.bf16.mxu1 %v9179_v17 }
0x10f0   :  { %6094 = vmatpush3.bf16.msra.mxu0 %v9357_v13 }
0x10f1   :  { %6099 = vmatprep.subr.bf16.mxu0 %v10125_v47 }
0x1171   :  { %v4030_v10 = vpop.f32.mrf.mxu1 }
0x1172   :  { %v6053_v16 = vpop.f32.mrf.mxu0 }
0x1173   :  { %v9408_v21 = vadd.f32 %v6053_v16, %v9405_v45  ;;  %v4032_v49 = vpop.f32.mrf.mxu1 }
0x1174   :  { %v9411_v57 = vpop.f32.mrf.mxu0 }
0x1175   :  { %v4034_v12 = vpop.f32.mrf.mxu1 }
0x1176   :  { %v9414_v30 = vadd.f32 %v4034_v12, %v3856_v29  ;;  %v6054_v11 = vpop.f32.mrf.mxu0 }
0x1177   :  { %v9417_v34 = vadd.f32 %v6054_v11, %v9405_v45  ;;  %v4036_v26 = vpop.f32.mrf.mxu1 }
0x1178   :  { %v9419_v25 = vadd.f32 %v4036_v26, %v3860_v48  ;;  %v4106_v31 = vpop.f32.mrf.mxu0 }
0x1179   :  { %v9422_v62 = vadd.f32 %v4106_v31, %v9405_v45  ;;  %v4040_v43 = vpop.f32.mrf.mxu1 }
0x117a   :  { %v9424_v7 = vadd.f32 %v4040_v43, %v3856_v29  ;;  %v6057_v28 = vpop.f32.mrf.mxu0 }
0x117b   :  { %v9427_v9 = vadd.f32 %v6057_v28, %v9405_v45  ;;  %v4042_v42 = vpop.f32.mrf.mxu1 }
0x117c   :  { %v9429_v32 = vadd.f32 %v4042_v42, %v3860_v48  ;;  %v4119_v58 = vpop.f32.mrf.mxu0 }
0x117d   :  { %10143 = vst [vmem:[#allocation39_spill] sm:$0xff] %v9427_v9  ;;  %v9432_v39 = vadd.f32 %v4119_v58, %v9405_v45  ;;  %v4044_v24 = vpop.f32.mrf.mxu1  ;;  %v4033_v9 = vadd.f32 %v4032_v49, %v3860_v48 }
0x117e   :  { %v9434_v3 = vadd.f32 %v4044_v24, %v3856_v29  ;;  %v6058_v6 = vpop.f32.mrf.mxu0  ;;  %v4031_v24 = vadd.f32 %v4030_v10, %v3856_v29 }
0x117f   :  { %v9437_v56 = vadd.f32 %v6058_v6, %v9405_v45  ;;  %v4046_v20 = vpop.f32.mrf.mxu1 }
0x1180   :  { %v9439_v60 = vadd.f32 %v4046_v20, %v3860_v48  ;;  %v4122_v2 = vpop.f32.mrf.mxu0 }
0x1181   :  { %10144 = vst [vmem:[#allocation25_spill] sm:$0xff] %v9437_v56  ;;  %v9442_v52 = vadd.f32 %v4122_v2, %v9405_v45  ;;  %v4050_v54 = vpop.f32.mrf.mxu1 }
0x1182   :  { %v9444_v63 = vadd.f32 %v4050_v54, %v3856_v29 }
0x1183   :  { %10145 = vst [vmem:[#allocation58_spill] sm:$0xff] %v9442_v52  ;;  %v4052_v35 = vpop.f32.mrf.mxu1 }
0x1184   :  { %v9446_v55 = vadd.f32 %v4052_v35, %v3860_v48 }
0x1185   :  { %v4054_v16 = vpop.f32.mrf.mxu1 }
0x1186   :  { %v9448_v23 = vadd.f32 %v4054_v16, %v3856_v29 }
0x1187   :  { %v4056_v12 = vpop.f32.mrf.mxu1 }
0x1188   :  { %v9450_v51 = vadd.f32 %v4056_v12, %v3860_v48 }
0x1189   :  { %v4060_v11 = vpop.f32.mrf.mxu1 }
0x118a   :  { %v9452_v26 = vadd.f32 %v4060_v11, %v3856_v29 }
0x118b   :  { %v4062_v31 = vpop.f32.mrf.mxu1 }
0x118c   :  { %10146 = vst [vmem:[#allocation59_spill] sm:$0xff] %v9452_v26  ;;  %v9454_v43 = vadd.f32 %v4062_v31, %v3860_v48 }
0x118d   :  { %v4064_v28 = vpop.f32.mrf.mxu1 }
0x118e   :  { %10147 = vst [vmem:[#allocation28_spill] sm:$0xff] %v9454_v43  ;;  %v9456_v42 = vadd.f32 %v4064_v28, %v3856_v29  ;;  %v9463_v29 = vld [vmem:[%s9866_s12] sm:$0xff] }
0x118f   :  { %v4066_v58 = vpop.f32.mrf.mxu1 }
0x1190   :  { %10148 = vst [vmem:[#allocation35_spill] sm:$0xff] %v9456_v42  ;;  %v9458_v6 = vadd.f32 %v4066_v58, %v3860_v48  ;;  %v4104_v48 = vadd.f32 %v9411_v57, %v9405_v45 }
0x1191   :  { %v4356_v20 = vpop.f32.mrf.mxu1 }
0x1192   :  { %v4403_v2 = vadd.f32 %v4356_v20, %v4031_v24 }
0x1193   :  { %v4358_v54 = vpop.f32.mrf.mxu1  ;;  %v4397_v35 = vpop.f32.mrf.mxu0 }
0x1194   :  { %v5638_v16 = vmul.f32 -1.442695, %v4403_v2  ;;  %v4410_v31 = vadd.f32 %v4358_v54, %v4033_v9 }
0x1195   :  { %v4360_v12 = vpop.f32.mrf.mxu1  ;;  %v6077_v56 = vpop.f32.mrf.mxu0 }
0x1196   :  { %6766 = vpow2.f32 %v5638_v16  ;;  %v5639_v52 = vmul.f32 -1.442695, %v4410_v31  ;;  %v4417_v56 = vadd.f32 %v4397_v35, %v9463_v29 }
0x1197   :  { %v4361_v11 = vpop.f32.mrf.mxu1  ;;  %v4400_v26 = vpop.f32.mrf.mxu0 }
0x1198   :  { %6768 = vpow2.f32 %v5639_v52 }
0x1199   :  { %v6078_v43 = vpop.f32.mrf.mxu0 }
0x11a3   :  { %v6767_v28 = vpop.eup %6766 }
0x11a4   :  { %v4407_v42 = vadd.f32 1.0, %v6767_v28 }
0x11a5   :  { %v6769_v10 = vpop.eup %6768 }
0x11a6   :  { %6770 = vrcp.f32 %v4407_v42  ;;  %v4414_v58 = vadd.f32 1.0, %v6769_v10 }
0x11a8   :  { %6772 = vrcp.f32 %v4414_v58 }
0x11b3   :  { %v6771_v49 = vpop.eup %6770 }
0x11b4   :  { %v4418_v9 = vmul.f32 %v6771_v49, %v4417_v56 }
0x11b5   :  { %v6773_v52 = vpop.eup %6772 }
0x11b6   :  { %v4419_v26 = vadd.f32 %v4418_v9, %v4104_v48  ;;  %v4421_v43 = vsub.f32 1.0, %v6773_v52  ;;  %v4423_v20 = vmul.f32 0.0, %v6773_v52 }
0x11b8   :  { %6774 = vtanh.f32 %v4419_v26 }
0x11c5   :  { %v6775_v42 = vpop.eup %6774 }
0x11c6   :  { %v4422_v24 = vmul.f32 %v6775_v42, %v4421_v43 }
0x11c8   :  { %v9468_v2 = vadd.f32 %v4423_v20, %v4422_v24 }
0x11ca   :  { %v4429_v54 = vpack.c.bf16 %v9468_v2, %v9468_v2 }
0x11cc   :  { %4463 = vmatmul.mubr.bf16.vlgmr.msra.gmra.mxu1 %v4429_v54  ;;  %6096 = vmatmul.mubr.bf16.vlgmr.msra.gmra.mxu0 %v4429_v54 }
0x11cd   :  { %4539 = vmatpush1.bf16.msra.mxu1 %v9211_v18  ;;  %6100 = vmatpush3.bf16.msra.mxu0 %v9222_v5 }
0x11ce   :  { %4540 = vmatprep.subr.bf16.mxu1 %v9216_v4  ;;  %6101 = vmatprep.subr.bf16.mxu0 %v10125_v47 }
0x11cf   :  { %4570 = vmatprep.mubr.bf16.mxu1 %v9955_v15  ;;  %6115 = vmatprep.mubr.msk.bf16.mxu0 %vm6969_vm0, %v10125_v47 }
0x11d1   :  { %4541 = vmatpush1.bf16.msra.mxu1 %v9228_v14  ;;  %6102 = vmatpush3.bf16.msra.mxu0 %v9243_v41 }
0x11d2   :  { %4542 = vmatprep.subr.bf16.mxu1 %v9236_v59  ;;  %6103 = vmatprep.subr.bf16.mxu0 %v10125_v47 }
0x11d5   :  { %4543 = vmatpush1.bf16.msra.mxu1 %v9250_v1  ;;  %6104 = vmatpush3.bf16.msra.mxu0 %v9262_v61 }
0x11d6   :  { %4544 = vmatprep.subr.bf16.mxu1 %v9256_v8  ;;  %6105 = vmatprep.subr.bf16.mxu0 %v10125_v47 }
0x11d9   :  { %4545 = vmatpush1.bf16.msra.mxu1 %v9269_v0  ;;  %6106 = vmatpush3.bf16.msra.mxu0 %v9282_v37 }
0x11da   :  { %4546 = vmatprep.subr.bf16.mxu1 %v9276_v44  ;;  %6107 = vmatprep.subr.bf16.mxu0 %v10125_v47 }
0x11dd   :  { %4547 = vmatpush1.bf16.msra.mxu1 %v9291_v19  ;;  %6108 = vmatpush3.bf16.msra.mxu0 %v9303_v50 }
0x11de   :  { %4548 = vmatprep.subr.bf16.mxu1 %v9297_v46  ;;  %6109 = vmatprep.subr.bf16.mxu0 %v10125_v47 }
0x11e1   :  { %4549 = vmatpush1.bf16.msra.mxu1 %v9310_v27  ;;  %6110 = vmatpush3.bf16.msra.mxu0 %v9323_v38 }
0x11e2   :  { %4550 = vmatprep.subr.bf16.mxu1 %v9317_v53  ;;  %6111 = vmatprep.subr.bf16.mxu0 %v10125_v47 }
0x11e5   :  { %4551 = vmatpush1.bf16.msra.mxu1 %v9330_v33  ;;  %6112 = vmatpush3.bf16.msra.mxu0 %v9342_v22 }
0x11e6   :  { %4552 = vmatprep.subr.bf16.mxu1 %v9336_v36  ;;  %6113 = vmatprep.subr.bf16.mxu0 %v10125_v47 }
0x11e9   :  { %4553 = vmatpush1.bf16.msra.mxu1 %v9349_v40  ;;  %6114 = vmatpush3.bf16.msra.mxu0 %v9357_v13 }
0x11ea   :  { %4646 = vmatprep.subr.bf16.mxu1 %v9179_v17  ;;  %6119 = vmatprep.subr.bf16.mxu0 %v10125_v47 }
0x128c   :  { %v4464_v45 = vpop.f32.mrf.mxu1  ;;  %v4505_v57 = vpop.f32.mrf.mxu0 }
0x128d   :  { %v4511_v35 = vadd.f32 %v4464_v45, %v9414_v30  ;;  %v4525_v43 = vadd.f32 %v4505_v57, %v9463_v29 }
0x128e   :  { %v4466_v16 = vpop.f32.mrf.mxu1  ;;  %v6097_v12 = vpop.f32.mrf.mxu0 }
0x128f   :  { %v5640_v11 = vmul.f32 -1.442695, %v4511_v35  ;;  %v4518_v56 = vadd.f32 %v4466_v16, %v9419_v25 }
0x1290   :  { %v4468_v31 = vpop.f32.mrf.mxu1  ;;  %v4508_v28 = vpop.f32.mrf.mxu0 }
0x1291   :  { %6776 = vpow2.f32 %v5640_v11  ;;  %v5641_v49 = vmul.f32 -1.442695, %v4518_v56 }
0x1292   :  { %v4469_v10 = vpop.f32.mrf.mxu1  ;;  %v6098_v58 = vpop.f32.mrf.mxu0 }
0x1293   :  { %6778 = vpow2.f32 %v5641_v49 }
0x129e   :  { %v6777_v48 = vpop.eup %6776 }
0x129f   :  { %v4515_v9 = vadd.f32 1.0, %v6777_v48 }
0x12a0   :  { %v6779_v26 = vpop.eup %6778 }
0x12a1   :  { %6780 = vrcp.f32 %v4515_v9  ;;  %v4522_v52 = vadd.f32 1.0, %v6779_v26 }
0x12a3   :  { %6782 = vrcp.f32 %v4522_v52 }
0x12ae   :  { %v6781_v30 = vpop.eup %6780 }
0x12af   :  { %v4526_v42 = vmul.f32 %v6781_v30, %v4525_v43 }
0x12b0   :  { %v6783_v20 = vpop.eup %6782 }
0x12b1   :  { %v4527_v24 = vadd.f32 %v4526_v42, %v9422_v62  ;;  %v4529_v54 = vsub.f32 1.0, %v6783_v20  ;;  %v4531_v25 = vmul.f32 %v6783_v20, %v9468_v2 }
0x12b3   :  { %6784 = vtanh.f32 %v4527_v24 }
0x12c0   :  { %v6785_v45 = vpop.eup %6784 }
0x12c1   :  { %v4530_v35 = vmul.f32 %v6785_v45, %v4529_v54 }
0x12c3   :  { %v9512_v16 = vadd.f32 %v4531_v25, %v4530_v35 }
0x12c5   :  { %v4537_v12 = vpack.c.bf16 %v9512_v16, %v9512_v16 }
0x12c7   :  { %4571 = vmatmul.mubr.bf16.vlgmr.msra.gmra.mxu1 %v4537_v12  ;;  %6116 = vmatmul.mubr.bf16.vlgmr.msra.gmra.mxu0 %v4537_v12 }
0x12c8   :  { %4647 = vmatpush1.bf16.msra.mxu1 %v9211_v18  ;;  %6120 = vmatpush3.bf16.msra.mxu0 %v9222_v5 }
0x12c9   :  { %4648 = vmatprep.subr.bf16.mxu1 %v9216_v4  ;;  %6121 = vmatprep.subr.bf16.mxu0 %v10125_v47 }
0x12ca   :  { %4678 = vmatprep.mubr.bf16.mxu1 %v9955_v15  ;;  %6135 = vmatprep.mubr.msk.bf16.mxu0 %vm6969_vm0, %v10125_v47 }
0x12cc   :  { %4649 = vmatpush1.bf16.msra.mxu1 %v9228_v14  ;;  %6122 = vmatpush3.bf16.msra.mxu0 %v9243_v41 }
0x12cd   :  { %4650 = vmatprep.subr.bf16.mxu1 %v9236_v59  ;;  %6123 = vmatprep.subr.bf16.mxu0 %v10125_v47 }
0x12d0   :  { %4651 = vmatpush1.bf16.msra.mxu1 %v9250_v1  ;;  %6124 = vmatpush3.bf16.msra.mxu0 %v9262_v61 }
0x12d1   :  { %4652 = vmatprep.subr.bf16.mxu1 %v9256_v8  ;;  %6125 = vmatprep.subr.bf16.mxu0 %v10125_v47 }
0x12d4   :  { %4653 = vmatpush1.bf16.msra.mxu1 %v9269_v0  ;;  %6126 = vmatpush3.bf16.msra.mxu0 %v9282_v37 }
0x12d5   :  { %4654 = vmatprep.subr.bf16.mxu1 %v9276_v44  ;;  %6127 = vmatprep.subr.bf16.mxu0 %v10125_v47 }
0x12d8   :  { %4655 = vmatpush1.bf16.msra.mxu1 %v9291_v19  ;;  %6128 = vmatpush3.bf16.msra.mxu0 %v9303_v50 }
0x12d9   :  { %4656 = vmatprep.subr.bf16.mxu1 %v9297_v46  ;;  %6129 = vmatprep.subr.bf16.mxu0 %v10125_v47 }
0x12dc   :  { %4657 = vmatpush1.bf16.msra.mxu1 %v9310_v27  ;;  %6130 = vmatpush3.bf16.msra.mxu0 %v9323_v38 }
0x12dd   :  { %4658 = vmatprep.subr.bf16.mxu1 %v9317_v53  ;;  %6131 = vmatprep.subr.bf16.mxu0 %v10125_v47 }
0x12e0   :  { %4659 = vmatpush1.bf16.msra.mxu1 %v9330_v33  ;;  %6132 = vmatpush3.bf16.msra.mxu0 %v9342_v22 }
0x12e1   :  { %4660 = vmatprep.subr.bf16.mxu1 %v9336_v36  ;;  %6133 = vmatprep.subr.bf16.mxu0 %v10125_v47 }
0x12e4   :  { %4661 = vmatpush1.bf16.msra.mxu1 %v9349_v40  ;;  %6134 = vmatpush3.bf16.msra.mxu0 %v9357_v13 }
0x12e5   :  { %4754 = vmatprep.subr.bf16.mxu1 %v9179_v17  ;;  %6139 = vmatprep.subr.bf16.mxu0 %v10125_v47 }
0x1387   :  { %v4572_v62 = vpop.f32.mrf.mxu1  ;;  %v4613_v57 = vpop.f32.mrf.mxu0 }
0x1388   :  { %v4619_v11 = vadd.f32 %v4572_v62, %v9424_v7  ;;  %v4633_v24 = vadd.f32 %v4613_v57, %v9463_v29 }
0x1389   :  { %v4574_v31 = vpop.f32.mrf.mxu1  ;;  %v6117_v28 = vpop.f32.mrf.mxu0 }
0x138a   :  { %v5642_v10 = vmul.f32 -1.442695, %v4619_v11  ;;  %v4626_v9 = vadd.f32 %v4574_v31, %v9429_v32 }
0x138b   :  { %v4576_v58 = vpop.f32.mrf.mxu1  ;;  %v4616_v56 = vpop.f32.mrf.mxu0 }
0x138c   :  { %6786 = vpow2.f32 %v5642_v10  ;;  %v5643_v26 = vmul.f32 -1.442695, %v4626_v9 }
0x138d   :  { %v4577_v49 = vpop.f32.mrf.mxu1  ;;  %v6118_v48 = vpop.f32.mrf.mxu0 }
0x138e   :  { %6788 = vpow2.f32 %v5643_v26 }
0x1399   :  { %v6787_v52 = vpop.eup %6786 }
0x139a   :  { %v4623_v43 = vadd.f32 1.0, %v6787_v52 }
0x139b   :  { %v6789_v30 = vpop.eup %6788 }
0x139c   :  { %6790 = vrcp.f32 %v4623_v43  ;;  %v4630_v42 = vadd.f32 1.0, %v6789_v30 }
0x139e   :  { %6792 = vrcp.f32 %v4630_v42 }
0x13a9   :  { %v6791_v7 = vpop.eup %6790 }
0x13aa   :  { %v4634_v20 = vmul.f32 %v6791_v7, %v4633_v24 }
0x13ab   :  { %v6793_v45 = vpop.eup %6792 }
0x13ac   :  { %v4635_v54 = vadd.f32 %v4634_v20, %v9408_v21  ;;  %v4637_v35 = vsub.f32 1.0, %v6793_v45  ;;  %v4639_v32 = vmul.f32 %v6793_v45, %v9512_v16 }
0x13ae   :  { %6794 = vtanh.f32 %v4635_v54 }
0x13bb   :  { %v6795_v25 = vpop.eup %6794 }
0x13bc   :  { %v4638_v12 = vmul.f32 %v6795_v25, %v4637_v35 }
0x13be   :  { %v9556_v62 = vadd.f32 %v4639_v32, %v4638_v12 }
0x13c0   :  { %v4645_v11 = vpack.c.bf16 %v9556_v62, %v9556_v62 }
0x13c2   :  { %4679 = vmatmul.mubr.bf16.vlgmr.msra.gmra.mxu1 %v4645_v11  ;;  %6136 = vmatmul.mubr.bf16.vlgmr.msra.gmra.mxu0 %v4645_v11 }
0x13c3   :  { %4755 = vmatpush1.bf16.msra.mxu1 %v9211_v18  ;;  %6140 = vmatpush3.bf16.msra.mxu0 %v9222_v5 }
0x13c4   :  { %4756 = vmatprep.subr.bf16.mxu1 %v9216_v4  ;;  %6141 = vmatprep.subr.bf16.mxu0 %v10125_v47 }
0x13c5   :  { %4786 = vmatprep.mubr.bf16.mxu1 %v9955_v15  ;;  %6155 = vmatprep.mubr.msk.bf16.mxu0 %vm6969_vm0, %v10125_v47 }
0x13c7   :  { %4757 = vmatpush1.bf16.msra.mxu1 %v9228_v14  ;;  %6142 = vmatpush3.bf16.msra.mxu0 %v9243_v41 }
0x13c8   :  { %4758 = vmatprep.subr.bf16.mxu1 %v9236_v59  ;;  %6143 = vmatprep.subr.bf16.mxu0 %v10125_v47 }
0x13cb   :  { %4759 = vmatpush1.bf16.msra.mxu1 %v9250_v1  ;;  %6144 = vmatpush3.bf16.msra.mxu0 %v9262_v61 }
0x13cc   :  { %4760 = vmatprep.subr.bf16.mxu1 %v9256_v8  ;;  %6145 = vmatprep.subr.bf16.mxu0 %v10125_v47 }
0x13cf   :  { %4761 = vmatpush1.bf16.msra.mxu1 %v9269_v0  ;;  %6146 = vmatpush3.bf16.msra.mxu0 %v9282_v37 }
0x13d0   :  { %4762 = vmatprep.subr.bf16.mxu1 %v9276_v44  ;;  %6147 = vmatprep.subr.bf16.mxu0 %v10125_v47 }
0x13d3   :  { %4763 = vmatpush1.bf16.msra.mxu1 %v9291_v19  ;;  %6148 = vmatpush3.bf16.msra.mxu0 %v9303_v50 }
0x13d4   :  { %4764 = vmatprep.subr.bf16.mxu1 %v9297_v46  ;;  %6149 = vmatprep.subr.bf16.mxu0 %v10125_v47 }
0x13d7   :  { %4765 = vmatpush1.bf16.msra.mxu1 %v9310_v27  ;;  %6150 = vmatpush3.bf16.msra.mxu0 %v9323_v38 }
0x13d8   :  { %4766 = vmatprep.subr.bf16.mxu1 %v9317_v53  ;;  %6151 = vmatprep.subr.bf16.mxu0 %v10125_v47 }
0x13db   :  { %4767 = vmatpush1.bf16.msra.mxu1 %v9330_v33  ;;  %6152 = vmatpush3.bf16.msra.mxu0 %v9342_v22 }
0x13dc   :  { %4768 = vmatprep.subr.bf16.mxu1 %v9336_v36  ;;  %6153 = vmatprep.subr.bf16.mxu0 %v10125_v47 }
0x13df   :  { %4769 = vmatpush1.bf16.msra.mxu1 %v9349_v40  ;;  %6154 = vmatpush3.bf16.msra.mxu0 %v9357_v13 }
0x13e0   :  { %4862 = vmatprep.subr.bf16.mxu1 %v9179_v17  ;;  %6159 = vmatprep.subr.bf16.mxu0 %v10125_v47 }
0x1482   :  { %v4680_v21 = vpop.f32.mrf.mxu1  ;;  %v4721_v57 = vpop.f32.mrf.mxu0 }
0x1483   :  { %v4727_v31 = vadd.f32 %v4680_v21, %v9434_v3  ;;  %v4741_v24 = vadd.f32 %v4721_v57, %v9463_v29 }
0x1484   :  { %v4682_v28 = vpop.f32.mrf.mxu1  ;;  %v6137_v10 = vpop.f32.mrf.mxu0 }
0x1485   :  { %v5644_v58 = vmul.f32 -1.442695, %v4727_v31  ;;  %v4734_v26 = vadd.f32 %v4682_v28, %v9439_v60 }
0x1486   :  { %v4684_v56 = vpop.f32.mrf.mxu1  ;;  %v4724_v49 = vpop.f32.mrf.mxu0 }
0x1487   :  { %6796 = vpow2.f32 %v5644_v58  ;;  %v5645_v52 = vmul.f32 -1.442695, %v4734_v26 }
0x1488   :  { %v4685_v48 = vpop.f32.mrf.mxu1  ;;  %v6138_v9 = vpop.f32.mrf.mxu0 }
0x1489   :  { %6798 = vpow2.f32 %v5645_v52 }
0x1494   :  { %v6797_v43 = vpop.eup %6796 }
0x1495   :  { %v4731_v17 = vadd.f32 1.0, %v6797_v43 }
0x1496   :  { %v6799_v30 = vpop.eup %6798 }
0x1497   :  { %6800 = vrcp.f32 %v4731_v17  ;;  %v4738_v42 = vadd.f32 1.0, %v6799_v30 }
0x1499   :  { %6802 = vrcp.f32 %v4738_v42 }
0x14a4   :  { %v6801_v3 = vpop.eup %6800 }
0x14a5   :  { %v4742_v7 = vmul.f32 %v6801_v3, %v4741_v24 }
0x14a6   :  { %v6803_v54 = vpop.eup %6802 }
0x14a7   :  { %v4743_v20 = vadd.f32 %v4742_v7, %v9417_v34  ;;  %v4745_v45 = vsub.f32 1.0, %v6803_v54  ;;  %v4747_v60 = vmul.f32 %v6803_v54, %v9556_v62  ;;  %v9640_v34 = vld [vmem:[%s9864_s10 + $0xac] ss:$12 sps:$4 sm:$0xff]  }
0x14a9   :  { %6804 = vtanh.f32 %v4743_v20 }
0x14b6   :  { %v6805_v35 = vpop.eup %6804 }
0x14b7   :  { %v4746_v25 = vmul.f32 %v6805_v35, %v4745_v45 }
0x14b9   :  { %v9600_v12 = vadd.f32 %v4747_v60, %v4746_v25  ;;  %v10149_v60 = vld [vmem:[#allocation58_spill] sm:$0xff] }
0x14bb   :  { %v4753_v32 = vpack.c.bf16 %v9600_v12, %v9600_v12 }
0x14bd   :  { %4787 = vmatmul.mubr.bf16.vlgmr.msra.gmra.mxu1 %v4753_v32  ;;  %6156 = vmatmul.mubr.bf16.vlgmr.msra.gmra.mxu0 %v4753_v32 }
0x14be   :  { %4863 = vmatpush1.bf16.msra.mxu1 %v9211_v18  ;;  %6160 = vmatpush3.bf16.msra.mxu0 %v9222_v5 }
0x14bf   :  { %4864 = vmatprep.subr.bf16.mxu1 %v9216_v4  ;;  %6161 = vmatprep.subr.bf16.mxu0 %v10125_v47 }
0x14c0   :  { %4894 = vmatprep.mubr.bf16.mxu1 %v9955_v15  ;;  %6175 = vmatprep.mubr.msk.bf16.mxu0 %vm6969_vm0, %v10125_v47 }
0x14c2   :  { %4865 = vmatpush1.bf16.msra.mxu1 %v9228_v14  ;;  %6162 = vmatpush3.bf16.msra.mxu0 %v9243_v41 }
0x14c3   :  { %4866 = vmatprep.subr.bf16.mxu1 %v9236_v59  ;;  %6163 = vmatprep.subr.bf16.mxu0 %v10125_v47 }
0x14c6   :  { %4867 = vmatpush1.bf16.msra.mxu1 %v9250_v1  ;;  %6164 = vmatpush3.bf16.msra.mxu0 %v9262_v61 }
0x14c7   :  { %4868 = vmatprep.subr.bf16.mxu1 %v9256_v8  ;;  %6165 = vmatprep.subr.bf16.mxu0 %v10125_v47 }
0x14ca   :  { %4869 = vmatpush1.bf16.msra.mxu1 %v9269_v0  ;;  %6166 = vmatpush3.bf16.msra.mxu0 %v9282_v37 }
0x14cb   :  { %4870 = vmatprep.subr.bf16.mxu1 %v9276_v44  ;;  %6167 = vmatprep.subr.bf16.mxu0 %v10125_v47 }
0x14ce   :  { %4871 = vmatpush1.bf16.msra.mxu1 %v9291_v19  ;;  %6168 = vmatpush3.bf16.msra.mxu0 %v9303_v50 }
0x14cf   :  { %4872 = vmatprep.subr.bf16.mxu1 %v9297_v46  ;;  %6169 = vmatprep.subr.bf16.mxu0 %v10125_v47 }
0x14d2   :  { %4873 = vmatpush1.bf16.msra.mxu1 %v9310_v27  ;;  %6170 = vmatpush3.bf16.msra.mxu0 %v9323_v38 }
0x14d3   :  { %4874 = vmatprep.subr.bf16.mxu1 %v9317_v53  ;;  %6171 = vmatprep.subr.bf16.mxu0 %v10125_v47 }
0x14d6   :  { %4875 = vmatpush1.bf16.msra.mxu1 %v9330_v33  ;;  %6172 = vmatpush3.bf16.msra.mxu0 %v9342_v22 }
0x14d7   :  { %4876 = vmatprep.subr.bf16.mxu1 %v9336_v36  ;;  %6173 = vmatprep.subr.bf16.mxu0 %v10125_v47 }
0x14da   :  { %4877 = vmatpush1.bf16.msra.mxu1 %v9349_v40  ;;  %6174 = vmatpush3.bf16.msra.mxu0 %v9357_v13 }
0x14db   :  { %4970 = vmatprep.subr.bf16.mxu1 %v9640_v34  ;;  %6179 = vmatprep.subr.bf16.mxu0 %v10125_v47 }
0x157d   :  { %v4788_v11 = vpop.f32.mrf.mxu1  ;;  %v4829_v21 = vpop.f32.mrf.mxu0 }
0x157e   :  { %v4835_v57 = vadd.f32 %v4788_v11, %v9444_v63  ;;  %v4849_v42 = vadd.f32 %v4829_v21, %v9463_v29 }
0x157f   :  { %v4790_v31 = vpop.f32.mrf.mxu1  ;;  %v6157_v28 = vpop.f32.mrf.mxu0 }
0x1580   :  { %v5646_v10 = vmul.f32 -1.442695, %v4835_v57  ;;  %v4842_v9 = vadd.f32 %v4790_v31, %v9446_v55 }
0x1581   :  { %v4792_v58 = vpop.f32.mrf.mxu1  ;;  %v4832_v56 = vpop.f32.mrf.mxu0 }
0x1582   :  { %6806 = vpow2.f32 %v5646_v10  ;;  %v5647_v26 = vmul.f32 -1.442695, %v4842_v9  ;;  %v6950_v10 = vld [vmem:[%s9864_s10 + $0xa8] ss:$12 sps:$4 sm:$0xff]   ;;  %v6951_v58 = vld [vmem:[%s9864_s10 + $0xb0] ss:$12 sps:$4 sm:$0xff]  }
0x1583   :  { %v4793_v49 = vpop.f32.mrf.mxu1  ;;  %v6158_v48 = vpop.f32.mrf.mxu0  ;;  %v6952_v56 = vld [vmem:[%s9864_s10 + $0x94] ss:$12 sps:$4 sm:$0xff]   ;;  %v6955_v9 = vld [vmem:[%s9864_s10 + $0x7c] ss:$12 sps:$4 sm:$0xff]  }
0x1584   :  { %6808 = vpow2.f32 %v5647_v26  ;;  %v6953_v49 = vld [vmem:[%s9864_s10 + $0x90] ss:$12 sps:$4 sm:$0xff]   ;;  %v6954_v48 = vld [vmem:[%s9864_s10 + $0x98] ss:$12 sps:$4 sm:$0xff]   ;;  %v6957_v26 = vld [vmem:[%s9864_s10 + $0x80] ss:$12 sps:$4 sm:$0xff]  }
0x158f   :  { %v6807_v52 = vpop.eup %6806 }
0x1590   :  { %v4839_v43 = vadd.f32 1.0, %v6807_v52  ;;  %v6958_v52 = vld [vmem:[%s9864_s10 + $0x64] ss:$12 sps:$4 sm:$0xff]  }
0x1591   :  { %v6809_v17 = vpop.eup %6808 }
0x1592   :  { %6810 = vrcp.f32 %v4839_v43  ;;  %v4846_v30 = vadd.f32 1.0, %v6809_v17  ;;  %v6959_v43 = vld [vmem:[%s9864_s10 + $0x60] ss:$12 sps:$4 sm:$0xff]   ;;  %v6960_v17 = vld [vmem:[%s9864_s10 + $0x68] ss:$12 sps:$4 sm:$0xff]  }
0x1594   :  { %6812 = vrcp.f32 %v4846_v30  ;;  %v6961_v30 = vld [vmem:[%s9864_s10 + $0x4c] ss:$12 sps:$4 sm:$0xff]  }
0x159f   :  { %v6811_v63 = vpop.eup %6810 }
0x15a0   :  { %v4850_v24 = vmul.f32 %v6811_v63, %v4849_v42  ;;  %v6962_v42 = vld [vmem:[%s9864_s10 + $0x48] ss:$12 sps:$4 sm:$0xff]   ;;  %v6963_v63 = vld [vmem:[%s9864_s10 + $0x50] ss:$12 sps:$4 sm:$0xff]  }
0x15a1   :  { %v6813_v7 = vpop.eup %6812 }
0x15a2   :  { %v4851_v3 = vadd.f32 %v4850_v24, %v9432_v39  ;;  %v4853_v20 = vsub.f32 1.0, %v6813_v7  ;;  %v4855_v55 = vmul.f32 %v6813_v7, %v9600_v12  ;;  %v6964_v24 = vld [vmem:[%s9864_s10 + $0x34] ss:$12 sps:$4 sm:$0xff]   ;;  %v6966_v7 = vld [vmem:[%s9864_s10 + $0x1c] ss:$12 sps:$4 sm:$0xff]  }
0x15a4   :  { %6814 = vtanh.f32 %v4851_v3  ;;  %v6965_v3 = vld [vmem:[%s9864_s10 + $0x30] ss:$12 sps:$4 sm:$0xff]  }
0x15b1   :  { %v6815_v54 = vpop.eup %6814 }
0x15b2   :  { %v4854_v45 = vmul.f32 %v6815_v54, %v4853_v20 }
0x15b4   :  { %v9649_v35 = vadd.f32 %v4855_v55, %v4854_v45  ;;  %v10150_v45 = vld [vmem:[#allocation59_spill] sm:$0xff] }
0x15b6   :  { %v4861_v25 = vpack.c.bf16 %v9649_v35, %v9649_v35 }
0x15b8   :  { %4895 = vmatmul.mubr.bf16.vlgmr.msra.gmra.mxu1 %v4861_v25  ;;  %6176 = vmatmul.mubr.bf16.vlgmr.msra.gmra.mxu0 %v4861_v25 }
0x15b9   :  { %4971 = vmatpush1.bf16.msra.mxu1 %v9211_v18  ;;  %6180 = vmatpush3.bf16.msra.mxu0 %v9222_v5 }
0x15ba   :  { %4972 = vmatprep.subr.bf16.mxu1 %v9216_v4  ;;  %6181 = vmatprep.subr.bf16.mxu0 %v10125_v47 }
0x15bb   :  { %5002 = vmatprep.mubr.bf16.mxu1 %v9955_v15  ;;  %6195 = vmatprep.mubr.msk.bf16.mxu0 %vm6969_vm0, %v10125_v47 }
0x15bd   :  { %4973 = vmatpush1.bf16.msra.mxu1 %v9228_v14  ;;  %6182 = vmatpush3.bf16.msra.mxu0 %v9243_v41 }
0x15be   :  { %4974 = vmatprep.subr.bf16.mxu1 %v9236_v59  ;;  %6183 = vmatprep.subr.bf16.mxu0 %v10125_v47 }
0x15c1   :  { %4975 = vmatpush1.bf16.msra.mxu1 %v9250_v1  ;;  %6184 = vmatpush3.bf16.msra.mxu0 %v9262_v61 }
0x15c2   :  { %4976 = vmatprep.subr.bf16.mxu1 %v9256_v8  ;;  %6185 = vmatprep.subr.bf16.mxu0 %v10125_v47 }
0x15c5   :  { %4977 = vmatpush1.bf16.msra.mxu1 %v9269_v0  ;;  %6186 = vmatpush3.bf16.msra.mxu0 %v9282_v37 }
0x15c6   :  { %4978 = vmatprep.subr.bf16.mxu1 %v9276_v44  ;;  %6187 = vmatprep.subr.bf16.mxu0 %v10125_v47 }
0x15c9   :  { %4979 = vmatpush1.bf16.msra.mxu1 %v9291_v19  ;;  %6188 = vmatpush3.bf16.msra.mxu0 %v9303_v50 }
0x15ca   :  { %4980 = vmatprep.subr.bf16.mxu1 %v9297_v46  ;;  %6189 = vmatprep.subr.bf16.mxu0 %v10125_v47 }
0x15cd   :  { %4981 = vmatpush1.bf16.msra.mxu1 %v9310_v27  ;;  %6190 = vmatpush3.bf16.msra.mxu0 %v9323_v38 }
0x15ce   :  { %4982 = vmatprep.subr.bf16.mxu1 %v9317_v53  ;;  %6191 = vmatprep.subr.bf16.mxu0 %v10125_v47 }
0x15d1   :  { %4983 = vmatpush1.bf16.msra.mxu1 %v9330_v33  ;;  %6192 = vmatpush3.bf16.msra.mxu0 %v9342_v22 }
0x15d2   :  { %4984 = vmatprep.subr.bf16.mxu1 %v9336_v36  ;;  %6193 = vmatprep.subr.bf16.mxu0 %v10125_v47 }
0x15d5   :  { %4985 = vmatpush1.bf16.msra.mxu1 %v9349_v40  ;;  %6194 = vmatpush3.bf16.msra.mxu0 %v9357_v13 }
0x15d6   :  { %5078 = vmatprep.subr.bf16.mxu1 %v9640_v34  ;;  %6199 = vmatprep.subr.bf16.mxu0 %v10125_v47 }
0x1678   :  { %v4896_v18 = vpop.f32.mrf.mxu1  ;;  %v4937_v4 = vpop.f32.mrf.mxu0 }
0x1679   :  { %v4943_v5 = vadd.f32 %v4896_v18, %v9448_v23  ;;  %v4957_v53 = vadd.f32 %v4937_v4, %v9463_v29 }
0x167a   :  { %v4898_v14 = vpop.f32.mrf.mxu1  ;;  %v6177_v59 = vpop.f32.mrf.mxu0 }
0x167b   :  { %v5648_v41 = vmul.f32 -1.442695, %v4943_v5  ;;  %v4950_v44 = vadd.f32 %v4898_v14, %v9450_v51 }
0x167c   :  { %v4900_v1 = vpop.f32.mrf.mxu1  ;;  %v4940_v8 = vpop.f32.mrf.mxu0 }
0x167d   :  { %6816 = vpow2.f32 %v5648_v41  ;;  %v5649_v37 = vmul.f32 -1.442695, %v4950_v44  ;;  %v10152_v44 = vld [vmem:[#allocation39_spill] sm:$0xff] }
0x167e   :  { %v4901_v61 = vpop.f32.mrf.mxu1  ;;  %v6178_v0 = vpop.f32.mrf.mxu0 }
0x167f   :  { %6818 = vpow2.f32 %v5649_v37 }
0x168a   :  { %v6817_v19 = vpop.eup %6816 }
0x168b   :  { %v4947_v46 = vadd.f32 1.0, %v6817_v19 }
0x168c   :  { %v6819_v50 = vpop.eup %6818 }
0x168d   :  { %6820 = vrcp.f32 %v4947_v46  ;;  %v4954_v27 = vadd.f32 1.0, %v6819_v50 }
0x168f   :  { %6822 = vrcp.f32 %v4954_v27 }
0x169a   :  { %v6821_v39 = vpop.eup %6820 }
0x169b   :  { %v4958_v23 = vmul.f32 %v6821_v39, %v4957_v53 }
0x169c   :  { %v6823_v34 = vpop.eup %6822 }
0x169d   :  { %v4959_v32 = vadd.f32 %v4958_v23, %v10149_v60  ;;  %v4961_v11 = vsub.f32 1.0, %v6823_v34  ;;  %v4963_v51 = vmul.f32 %v6823_v34, %v9649_v35  ;;  %v6519_v60 = vld [vmem:[%s9867_s13 + $0x30] sm:$0xff]   ;;  %v6520_v34 = vld [vmem:[%s9867_s13 + $0x28] sm:$0xff]  }
0x169f   :  { %6824 = vtanh.f32 %v4959_v32  ;;  %v5190_v32 = vpack.c.bf16 %v9512_v16, %v9468_v2  ;;  %v6522_v2 = vld [vmem:[%s9867_s13 + $0x18] sm:$0xff]   ;;  %v6523_v16 = vld [vmem:[%s9867_s13 + $0x10] sm:$0xff]  }
0x16ac   :  { %v6825_v21 = vpop.eup %6824 }
0x16ad   :  { %v4962_v57 = vmul.f32 %v6825_v21, %v4961_v11  ;;  %v6521_v11 = vld [vmem:[%s9867_s13 + $0x20] sm:$0xff]   ;;  %v6524_v21 = vld [vmem:[%s9867_s13 + $0x8] sm:$0xff]  }
0x16af   :  { %v9693_v31 = vadd.f32 %v4963_v51, %v4962_v57  ;;  %v6525_v57 = vld [vmem:[%s9867_s13] sm:$0xff]   ;;  %v5191_v51 = vpack.c.bf16 %v9600_v12, %v9556_v62 }
0x16b1   :  { %v4969_v28 = vpack.c.bf16 %v9693_v31, %v9693_v31 }
0x16b3   :  { %5003 = vmatmul.mubr.bf16.vlgmr.msra.gmra.mxu1 %v4969_v28  ;;  %6196 = vmatmul.mubr.bf16.vlgmr.msra.gmra.mxu0 %v4969_v28  ;;  %v5192_v28 = vpack.c.bf16 %v9693_v31, %v9649_v35 }
0x16b4   :  { %5079 = vmatpush1.bf16.msra.mxu1 %v6950_v10  ;;  %6200 = vmatpush3.bf16.msra.mxu0 %v6951_v58 }
0x16b5   :  { %5080 = vmatprep.subr.bf16.mxu1 %v6952_v56  ;;  %6201 = vmatprep.subr.bf16.mxu0 %v10125_v47  ;;  %v10153_v56 = vld [vmem:[#allocation35_spill] sm:$0xff] }
0x16b6   :  { %5110 = vmatprep.mubr.bf16.mxu1 %v9955_v15  ;;  %6215 = vmatprep.mubr.msk.bf16.mxu0 %vm6969_vm0, %v10125_v47  ;;  %v6956_v15 = vld [vmem:[%s9864_s10 + $0x78] ss:$12 sps:$4 sm:$0xff]  }
0x16b8   :  { %5081 = vmatpush1.bf16.msra.mxu1 %v6953_v49  ;;  %6202 = vmatpush3.bf16.msra.mxu0 %v6954_v48 }
0x16b9   :  { %5082 = vmatprep.subr.bf16.mxu1 %v6955_v9  ;;  %6203 = vmatprep.subr.bf16.mxu0 %v10125_v47 }
0x16bc   :  { %5083 = vmatpush1.bf16.msra.mxu1 %v6956_v15  ;;  %6204 = vmatpush3.bf16.msra.mxu0 %v6957_v26 }
0x16bd   :  { %5084 = vmatprep.subr.bf16.mxu1 %v6958_v52  ;;  %6205 = vmatprep.subr.bf16.mxu0 %v10125_v47 }
0x16c0   :  { %5085 = vmatpush1.bf16.msra.mxu1 %v6959_v43  ;;  %6206 = vmatpush3.bf16.msra.mxu0 %v6960_v17 }
0x16c1   :  { %5086 = vmatprep.subr.bf16.mxu1 %v6961_v30  ;;  %6207 = vmatprep.subr.bf16.mxu0 %v10125_v47 }
0x16c4   :  { %5087 = vmatpush1.bf16.msra.mxu1 %v6962_v42  ;;  %6208 = vmatpush3.bf16.msra.mxu0 %v6963_v63  ;;  %v9808_v42 = vld [vmem:[%s9868_s14] ss:$0 sm:$0xff] }
0x16c5   :  { %5088 = vmatprep.subr.bf16.mxu1 %v6964_v24  ;;  %6209 = vmatprep.subr.bf16.mxu0 %v10125_v47 }
0x16c8   :  { %5089 = vmatpush1.bf16.msra.mxu1 %v6965_v3  ;;  %6210 = vmatpush3.bf16.msra.mxu0 %v9323_v38  ;;  %v6518_v38 = vld [vmem:[%s9867_s13 + $0x38] sm:$0xff]  }
0x16c9   :  { %5090 = vmatprep.subr.bf16.mxu1 %v6966_v7  ;;  %6211 = vmatprep.subr.bf16.mxu0 %v10125_v47 }
0x16cc   :  { %5091 = vmatpush1.bf16.msra.mxu1 %v9330_v33  ;;  %6212 = vmatpush3.bf16.msra.mxu0 %v9342_v22 }
0x16cd   :  { %5092 = vmatprep.subr.bf16.mxu1 %v9336_v36  ;;  %6213 = vmatprep.subr.bf16.mxu0 %v10125_v47 }
0x16d0   :  { %5093 = vmatpush1.bf16.msra.mxu1 %v9349_v40  ;;  %6214 = vmatpush3.bf16.msra.mxu0 %v9357_v13  ;;  %v10151_v40 = vld [vmem:[#allocation28_spill] sm:$0xff] }
0x16d1   :  { %6219 = vmatprep.subr.bf16.mxu1 %v6518_v38 }
0x1773   :  { %v5004_v20 = vpop.f32.mrf.mxu1  ;;  %v5045_v54 = vpop.f32.mrf.mxu0 }
0x1774   :  { %v5051_v55 = vadd.f32 %v5004_v20, %v10150_v45  ;;  %v5065_v8 = vadd.f32 %v5045_v54, %v9463_v29 }
0x1775   :  { %v5006_v33 = vpop.f32.mrf.mxu1  ;;  %v6197_v25 = vpop.f32.mrf.mxu0 }
0x1776   :  { %v5650_v22 = vmul.f32 -1.442695, %v5051_v55  ;;  %v5058_v5 = vadd.f32 %v5006_v33, %v10151_v40  ;;  %v10154_v33 = vld [vmem:[#allocation25_spill] sm:$0xff] }
0x1777   :  { %v5008_v18 = vpop.f32.mrf.mxu1  ;;  %v5048_v36 = vpop.f32.mrf.mxu0 }
0x1778   :  { %6826 = vpow2.f32 %v5650_v22  ;;  %v5651_v13 = vmul.f32 -1.442695, %v5058_v5 }
0x1779   :  { %v5009_v47 = vpop.f32.mrf.mxu1  ;;  %v6198_v4 = vpop.f32.mrf.mxu0 }
0x177a   :  { %6828 = vpow2.f32 %v5651_v13 }
0x1785   :  { %v6827_v14 = vpop.eup %6826 }
0x1786   :  { %v5055_v59 = vadd.f32 1.0, %v6827_v14 }
0x1787   :  { %v6829_v41 = vpop.eup %6828 }
0x1788   :  { %6830 = vrcp.f32 %v5055_v59  ;;  %v5062_v1 = vadd.f32 1.0, %v6829_v41 }
0x178a   :  { %6832 = vrcp.f32 %v5062_v1 }
0x1795   :  { %v6831_v61 = vpop.eup %6830 }
0x1796   :  { %v5066_v0 = vmul.f32 %v6831_v61, %v5065_v8 }
0x1797   :  { %v6833_v19 = vpop.eup %6832 }
0x1798   :  { %v5067_v37 = vadd.f32 %v5066_v0, %v10152_v44  ;;  %v5069_v46 = vsub.f32 1.0, %v6833_v19  ;;  %v5071_v53 = vmul.f32 %v6833_v19, %v9693_v31 }
0x179a   :  { %6834 = vtanh.f32 %v5067_v37 }
0x17a7   :  { %v6835_v50 = vpop.eup %6834 }
0x17a8   :  { %v5070_v27 = vmul.f32 %v6835_v50, %v5069_v46 }
0x17aa   :  { %v9772_v39 = vadd.f32 %v5071_v53, %v5070_v27 }
0x17ac   :  { %v5077_v23 = vpack.c.bf16 %v9772_v39, %v9772_v39 }
0x17ae   :  { %5111 = vmatmul.mubr.bf16.vlgmr.msra.gmra.mxu1 %v5077_v23  ;;  %6216 = vmatmul.mubr.bf16.vlgmr.msra.gmra.mxu0 %v5077_v23 }
0x17af   :  { %6220 = vmatpush3.bf16.msra.mxu1 %v6518_v38  ;;  %6235 = vmatprep.mubr.bf16.mxu1 %v5190_v32 }
0x17b0   :  { %6221 = vmatprep.subr.bf16.mxu1 %v6519_v60 }
0x17b3   :  { %6222 = vmatpush3.bf16.msra.mxu1 %v6519_v60 }
0x17b4   :  { %6223 = vmatprep.subr.bf16.mxu1 %v6520_v34 }
0x17b7   :  { %6224 = vmatpush3.bf16.msra.mxu1 %v6520_v34 }
0x17b8   :  { %6225 = vmatprep.subr.bf16.mxu1 %v6521_v11 }
0x17bb   :  { %6226 = vmatpush3.bf16.msra.mxu1 %v6521_v11 }
0x17bc   :  { %6227 = vmatprep.subr.bf16.mxu1 %v6522_v2 }
0x17bf   :  { %6228 = vmatpush3.bf16.msra.mxu1 %v6522_v2 }
0x17c0   :  { %6229 = vmatprep.subr.bf16.mxu1 %v6523_v16 }
0x17c3   :  { %6230 = vmatpush3.bf16.msra.mxu1 %v6523_v16 }
0x17c4   :  { %6231 = vmatprep.subr.bf16.mxu1 %v6524_v21 }
0x17c7   :  { %6232 = vmatpush3.bf16.msra.mxu1 %v6524_v21 }
0x17c8   :  { %6233 = vmatprep.subr.bf16.mxu1 %v6525_v57 }
0x17cb   :  { %6234 = vmatpush3.bf16.msra.mxu1 %v6525_v57 }
0x17ce   :  { %6236 = vmatmul.mubr.bf16.vlgmr.msra.gmra.mxu1 %v5191_v51 }
0x17cf   :  { %6239 = vmatprep.mubr.bf16.mxu1 %v5192_v28 }
0x186e   :  { %v5112_v10 = vpop.f32.mrf.mxu1  ;;  %v5153_v58 = vpop.f32.mrf.mxu0 }
0x186f   :  { %v5159_v49 = vadd.f32 %v5112_v10, %v10153_v56  ;;  %v5173_v3 = vadd.f32 %v5153_v58, %v9463_v29 }
0x1870   :  { %v5114_v48 = vpop.f32.mrf.mxu1  ;;  %v6217_v9 = vpop.f32.mrf.mxu0 }
0x1871   :  { %v5652_v15 = vmul.f32 -1.442695, %v5159_v49  ;;  %v5166_v30 = vadd.f32 %v5114_v48, %v9458_v6 }
0x1872   :  { %v5116_v26 = vpop.f32.mrf.mxu1  ;;  %v5156_v52 = vpop.f32.mrf.mxu0 }
0x1873   :  { %6836 = vpow2.f32 %v5652_v15  ;;  %v5653_v62 = vmul.f32 -1.442695, %v5166_v30 }
0x1874   :  { %v5117_v43 = vpop.f32.mrf.mxu1  ;;  %v6218_v17 = vpop.f32.mrf.mxu0 }
0x1875   :  { %6838 = vpow2.f32 %v5653_v62 }
0x1880   :  { %v6837_v12 = vpop.eup %6836 }
0x1881   :  { %v5163_v35 = vadd.f32 1.0, %v6837_v12 }
0x1882   :  { %v6839_v31 = vpop.eup %6838 }
0x1883   :  { %6840 = vrcp.f32 %v5163_v35  ;;  %v5170_v63 = vadd.f32 1.0, %v6839_v31 }
0x1885   :  { %6842 = vrcp.f32 %v5170_v63 }
0x188e   :  { %v6237_v24 = vpop.f32.mrf.mxu1 }
0x188f   :  { %v5308_v7 = vadd.f32 %v6237_v24, %v9808_v42 }
0x1890   :  { %v6841_v38 = vpop.eup %6840  ;;  %v5299_v20 = vpop.f32.mrf.mxu1 }
0x1891   :  { %v5174_v6 = vmul.f32 %v6841_v38, %v5173_v3  ;;  %v5665_v54 = vmul.f32 -1.442695, %v5308_v7  ;;  %v5300_v45 = vadd.f32 %v9808_v42, %v5299_v20 }
0x1892   :  { %v6238_v55 = vpop.f32.mrf.mxu1  ;;  %v6843_v40 = vpop.eup %6842 }
0x1893   :  { %v5175_v25 = vadd.f32 %v5174_v6, %v10154_v33  ;;  %6844 = vpow2.f32 %v5665_v54  ;;  %v5663_v22 = vmul.f32 -1.442695, %v5300_v45  ;;  %v5311_v18 = vadd.f32 %v6238_v55, %v9808_v42 }
0x1894   :  { %v5302_v36 = vpop.f32.mrf.mxu1  ;;  %v5177_v14 = vsub.f32 1.0, %v6843_v40  ;;  %v5179_v8 = vmul.f32 %v6843_v40, %v9772_v39 }
0x1895   :  { %6846 = vtanh.f32 %v5175_v25  ;;  %v5666_v47 = vmul.f32 -1.442695, %v5311_v18  ;;  %v5303_v29 = vadd.f32 %v9808_v42, %v5302_v36 }
0x1896   :  { %6848 = vpow2.f32 %v5663_v22 }
0x1897   :  { %6850 = vpow2.f32 %v5666_v47  ;;  %v5664_v4 = vmul.f32 -1.442695, %v5303_v29 }
0x1899   :  { %6852 = vpow2.f32 %v5664_v4 }
0x18a0   :  { %v6845_v5 = vpop.eup %6844 }
0x18a1   :  { %v5356_v13 = vadd.f32 1.0, %v6845_v5 }
0x18a2   :  { %v6847_v59 = vpop.eup %6846 }
0x18a3   :  { %v6849_v41 = vpop.eup %6848  ;;  %6854 = vrcp.f32 %v5356_v13  ;;  %v5178_v1 = vmul.f32 %v6847_v59, %v5177_v14 }
0x18a4   :  { %v6851_v61 = vpop.eup %6850  ;;  %v5354_v0 = vadd.f32 1.0, %v6849_v41 }
0x18a5   :  { %v5357_v44 = vadd.f32 1.0, %v6851_v61  ;;  %v5180_v37 = vadd.f32 %v5179_v8, %v5178_v1 }
0x18a6   :  { %v6853_v19 = vpop.eup %6852  ;;  %6856 = vrcp.f32 %v5354_v0 }
0x18a7   :  { %6858 = vrcp.f32 %v5357_v44  ;;  %v5355_v46 = vadd.f32 1.0, %v6853_v19  ;;  %v5193_v50 = vpack.c.bf16 %v5180_v37, %v9772_v39 }
0x18a9   :  { %6860 = vrcp.f32 %v5355_v46  ;;  %6240 = vmatmul.mubr.bf16.gmra.mxu1 %v5193_v50 }
0x18b0   :  { %v6855_v27 = vpop.eup %6854 }
0x18b1   :  { %5381 = vst.msk [vmem:[%s9869_s15 + $0x10] sm:$0xff] %vm5378_vm1, %v6855_v27 }
0x18b3   :  { %v6857_v53 = vpop.eup %6856 }
0x18b4   :  { %v6859_v23 = vpop.eup %6858  ;;  %5379 = vst.msk [vmem:[%s9869_s15] sm:$0xff] %vm5378_vm1, %v6857_v53 }
0x18b5   :  { %5382 = vst.msk [vmem:[%s9869_s15 + $0x18] sm:$0xff] %vm5378_vm1, %v6859_v23 }
0x18b6   :  { %v6861_v39 = vpop.eup %6860 }
0x18b7   :  { %5380 = vst.msk [vmem:[%s9869_s15 + $0x8] sm:$0xff] %vm5378_vm1, %v6861_v39 }
0x1969   :  { %v6241_v60 = vpop.f32.mrf.mxu1 }
0x196a   :  { %v5324_v32 = vadd.f32 %v6241_v60, %v9808_v42 }
0x196b   :  { %v5315_v34 = vpop.f32.mrf.mxu1 }
0x196c   :  { %v5669_v11 = vmul.f32 -1.442695, %v5324_v32  ;;  %v5316_v2 = vadd.f32 %v9808_v42, %v5315_v34 }
0x196d   :  { %v6242_v16 = vpop.f32.mrf.mxu1 }
0x196e   :  { %6862 = vpow2.f32 %v5669_v11  ;;  %v5667_v21 = vmul.f32 -1.442695, %v5316_v2  ;;  %v5327_v57 = vadd.f32 %v6242_v16, %v9808_v42 }
0x196f   :  { %v5318_v51 = vpop.f32.mrf.mxu1 }
0x1970   :  { %6864 = vpow2.f32 %v5667_v21  ;;  %v5670_v28 = vmul.f32 -1.442695, %v5327_v57  ;;  %v5319_v10 = vadd.f32 %v9808_v42, %v5318_v51 }
0x1972   :  { %6866 = vpow2.f32 %v5670_v28  ;;  %v5668_v58 = vmul.f32 -1.442695, %v5319_v10 }
0x1974   :  { %6868 = vpow2.f32 %v5668_v58 }
0x197b   :  { %v6863_v56 = vpop.eup %6862 }
0x197c   :  { %v5360_v49 = vadd.f32 1.0, %v6863_v56 }
0x197d   :  { %v6865_v48 = vpop.eup %6864 }
0x197e   :  { %6870 = vrcp.f32 %v5360_v49  ;;  %v5358_v9 = vadd.f32 1.0, %v6865_v48 }
0x197f   :  { %v6867_v15 = vpop.eup %6866 }
0x1980   :  { %6872 = vrcp.f32 %v5358_v9  ;;  %v5361_v26 = vadd.f32 1.0, %v6867_v15 }
0x1981   :  { %v6869_v52 = vpop.eup %6868 }
0x1982   :  { %6874 = vrcp.f32 %v5361_v26  ;;  %v5359_v43 = vadd.f32 1.0, %v6869_v52 }
0x1984   :  { %6876 = vrcp.f32 %v5359_v43 }
0x198b   :  { %v6871_v17 = vpop.eup %6870 }
0x198c   :  { %5385 = vst.msk [vmem:[%s9869_s15 + $0x30] sm:$0xff] %vm5378_vm1, %v6871_v17 }
0x198d   :  { %v6873_v30 = vpop.eup %6872 }
0x198e   :  { %5383 = vst.msk [vmem:[%s9869_s15 + $0x20] sm:$0xff] %vm5378_vm1, %v6873_v30 }
0x198f   :  { %v6875_v62 = vpop.eup %6874 }
0x1990   :  { %5386 = vst.msk [vmem:[%s9869_s15 + $0x38] sm:$0xff] %vm5378_vm1, %v6875_v62 }
0x1991   :  { %v6877_v12 = vpop.eup %6876 }
0x1992   :  { %5384 = vst.msk [vmem:[%s9869_s15 + $0x28] sm:$0xff] %vm5378_vm1, %v6877_v12 }

</bundles_post_ra>
